<compile_context>
chip_gen: v7x
topology: tpu7x:2x2x1
jax: 0.10.0
libtpu: 0.0.40
codegen_flags: <defaults>
</compile_context>

<pallas_src>
import functools

import jax
import jax.numpy as jnp
from jax.experimental import pallas as pl
from jax.experimental.pallas import tpu as pltpu

BN_EPS = 1e-5          # torch.nn.BatchNorm default
NORM_EPS = 1e-12       # torch.nn.functional.normalize default
EMBEDDING_SIZE = 512
NUM_FEATURES = 512     # resnet18 fc.in_features


def _default_vmem_limit():
    try:
        kind = jax.devices()[0].device_kind.lower()
    except Exception:
        kind = ""
    if "v5" in kind or "v6" in kind:
        return 96 * 1024 * 1024   # 128 MiB physical -> allow fat tiles
    return 48 * 1024 * 1024       # v7x (64 MiB physical) and unknown: stay safe


_VMEM_LIMIT = _default_vmem_limit()
_WHOLE = pl.BlockSpec(memory_space=pltpu.MemorySpace.VMEM)


def _round_up(x, m):
    return ((x + m - 1) // m) * m


def _pick_tiles(m, n, k):
    tm = min(512, _round_up(m, 8))
    tn = min(512, _round_up(n, 128))
    tk = min(512, _round_up(k, 128))
    return tm, tn, tk


def _pad2(x, rows, cols):
    r, c = x.shape
    if r == rows and c == cols:
        return x
    return jnp.pad(x, ((0, rows - r), (0, cols - c)))


# --------------------------- Pallas kernels --------------------------------

def _mm_bias_kernel(a_ref, b_ref, bias_ref, o_ref, acc_ref, *, relu):
    @pl.when(pl.program_id(2) == 0)
    def _():
        acc_ref[...] = jnp.zeros_like(acc_ref)

    acc_ref[...] += jnp.dot(a_ref[...], b_ref[...],
                            preferred_element_type=jnp.float32)

    @pl.when(pl.program_id(2) == pl.num_programs(2) - 1)
    def _():
        y = acc_ref[...] + bias_ref[...]
        if relu:
            y = jnp.maximum(y, 0.0)
        o_ref[...] = y.astype(o_ref.dtype)


def _mm_bias_res_kernel(a_ref, b_ref, bias_ref, res_ref, o_ref, acc_ref, *,
                        relu):
    @pl.when(pl.program_id(2) == 0)
    def _():
        acc_ref[...] = jnp.zeros_like(acc_ref)

    acc_ref[...] += jnp.dot(a_ref[...], b_ref[...],
                            preferred_element_type=jnp.float32)

    @pl.when(pl.program_id(2) == pl.num_programs(2) - 1)
    def _():
        y = acc_ref[...] + bias_ref[...] + res_ref[...].astype(jnp.float32)
        if relu:
            y = jnp.maximum(y, 0.0)
        o_ref[...] = y.astype(o_ref.dtype)


def fused_matmul(a, b, bias, res=None, relu=True, out_dtype=jnp.bfloat16):
    """(M,K)@(K,N) + bias(1,N) [+ res(M,N)] [ReLU], tiled with K accumulator."""
    m, k = a.shape
    k2, n = b.shape
    assert k == k2
    tm, tn, tk = _pick_tiles(m, n, k)
    mp, np_, kp = _round_up(m, tm), _round_up(n, tn), _round_up(k, tk)

    a_p = _pad2(a, mp, kp).astype(jnp.bfloat16)
    b_p = _pad2(b, kp, np_).astype(jnp.bfloat16)
    bias_p = _pad2(bias.astype(jnp.float32), 1, np_)

    in_specs = [
        pl.BlockSpec((tm, tk), lambda i, j, kk: (i, kk)),
        pl.BlockSpec((tk, tn), lambda i, j, kk: (kk, j)),
        pl.BlockSpec((1, tn), lambda i, j, kk: (0, j)),
    ]
    args = [a_p, b_p, bias_p]
    if res is not None:
        res_p = _pad2(res, mp, np_)
        in_specs.append(pl.BlockSpec((tm, tn), lambda i, j, kk: (i, j)))
        args.append(res_p)
        kern = functools.partial(_mm_bias_res_kernel, relu=relu)
    else:
        kern = functools.partial(_mm_bias_kernel, relu=relu)

    out = pl.pallas_call(
        kern,
        out_shape=jax.ShapeDtypeStruct((mp, np_), out_dtype),
        grid_spec=pltpu.PrefetchScalarGridSpec(
            num_scalar_prefetch=0,
            grid=(mp // tm, np_ // tn, kp // tk),
            in_specs=in_specs,
            out_specs=pl.BlockSpec((tm, tn), lambda i, j, kk: (i, j)),
            scratch_shapes=[pltpu.VMEM((tm, tn), jnp.float32)]),
        compiler_params=pltpu.CompilerParams(
            dimension_semantics=("parallel", "parallel", "arbitrary"),
            vmem_limit_bytes=_VMEM_LIMIT),
        cost_estimate=pl.CostEstimate(
            flops=2 * mp * np_ * kp,
            transcendentals=0,
            bytes_accessed=mp * kp * 2 + kp * np_ * 2 + mp * np_ * 4),
    )(*args)
    return out[:m, :n]


def _embed_kernel(f_ref, w_ref, b_ref, emb_ref, nrm_ref):
    # embedding_head: Linear (BN1d folded in) -> ReLU; Dropout is identity in
    # eval-mode forward.
    z = jnp.dot(f_ref[...], w_ref[...],
                preferred_element_type=jnp.float32) + b_ref[...]
    emb = jnp.maximum(z, 0.0)
    emb_ref[...] = emb.astype(emb_ref.dtype)
    # F.normalize(embedding, p=2, dim=1)
    norm = jnp.sqrt(jnp.sum(emb * emb, axis=1, keepdims=True))
    inv = pl.reciprocal(jnp.maximum(norm, NORM_EPS), approx=True)
    nrm_ref[...] = (emb * inv).astype(nrm_ref.dtype)


def pallas_head(features, head):
    b = features.shape[0]
    emb_dim = head["w1"].shape[1]
    f = features.astype(jnp.float32)
    emb, emb_norm = pl.pallas_call(
        _embed_kernel,
        out_shape=(jax.ShapeDtypeStruct((b, emb_dim), jnp.float32),
                   jax.ShapeDtypeStruct((b, emb_dim), jnp.float32)),
        in_specs=[_WHOLE] * 3,
        out_specs=(_WHOLE, _WHOLE),
        compiler_params=pltpu.CompilerParams(vmem_limit_bytes=_VMEM_LIMIT),
    )(f, head["w1"], head["b1"])
    # classifier: Linear(embedding_size, num_classes) on the UN-normalized
    # embedding (matches the PyTorch reference) via the tiled MXU matmul.
    logits = fused_matmul(emb, head["wc"], head["bc"], relu=False,
                          out_dtype=jnp.float32)
    return logits, emb_norm


# --------------------------- conv / resnet glue -----------------------------

def conv_bn_relu(x_nhwc, layer, stride, pad, relu=True, res_nhwc=None):
    """Conv2d(bias=False)+BN(+residual)(+ReLU) via im2col + fused Pallas matmul."""
    kh, kw = layer["khw"]
    cout = layer["w"].shape[1]
    patches = jax.lax.conv_general_dilated_patches(
        x_nhwc, filter_shape=(kh, kw), window_strides=(stride, stride),
        padding=[(pad, pad), (pad, pad)],
        dimension_numbers=("NHWC", "HWIO", "NHWC"))
    n, ho, wo, k = patches.shape     # feature dim ordered (Cin, kh, kw)
    a = patches.reshape(n * ho * wo, k)
    res_flat = None if res_nhwc is None else res_nhwc.reshape(n * ho * wo, cout)
    y = fused_matmul(a, layer["w"], layer["bias"], res=res_flat, relu=relu,
                     out_dtype=jnp.bfloat16)
    return y.reshape(n, ho, wo, cout)


def basic_block(x_nhwc, blk):
    s = blk["stride"]
    out = conv_bn_relu(x_nhwc, blk["conv1"], s, 1, relu=True)
    if "down" in blk:
        identity = conv_bn_relu(x_nhwc, blk["down"], s, 0, relu=False)
    else:
        identity = x_nhwc
    # residual add + final ReLU fused into conv2's matmul epilogue
    return conv_bn_relu(out, blk["conv2"], 1, 1, relu=True, res_nhwc=identity)


def resnet18_features(x_nchw, params):
    x = jnp.transpose(x_nchw, (0, 2, 3, 1)).astype(jnp.bfloat16)   # NHWC, once
    y = conv_bn_relu(x, params["stem"], 2, 3, relu=True)
    # MaxPool2d(3, stride=2, padding=1) -- plain-JAX reduce_window glue
    # (post-ReLU so the pad value does not change the result).
    y = jax.lax.reduce_window(y, jnp.array(-jnp.inf, y.dtype), jax.lax.max,
                              (1, 3, 3, 1), (1, 2, 2, 1),
                              [(0, 0), (1, 1), (1, 1), (0, 0)])
    for blk in params["blocks"]:
        y = basic_block(y, blk)
    # AdaptiveAvgPool2d((1,1)) + flatten -- plain-JAX glue
    return jnp.mean(y.astype(jnp.float32), axis=(1, 2))   # (N, 512)


def model_forward(x_nchw, params):
    features = resnet18_features(x_nchw, params)
    logits, emb_norm = pallas_head(features, params["head"])
    return logits, emb_norm


# --------------------------- params ----------------------------------------
# TODO(synk): torchvision pretrained=True weights cannot be loaded here; the
# backbone uses the identical ResNet-18 architecture with deterministic
# random initialization instead.

def init_params(key, num_classes):
    keys = iter(jax.random.split(key, 200))

    def conv_w(cout, cin, kh, kw):
        fan_in = cin * kh * kw
        return ((2.0 / fan_in) ** 0.5 *
                jax.random.normal(next(keys), (cout, cin, kh, kw), jnp.float32))

    def bn_p(c):
        return dict(
            gamma=1.0 + 0.1 * jax.random.normal(next(keys), (1, c), jnp.float32),
            beta=0.1 * jax.random.normal(next(keys), (1, c), jnp.float32),
            mean=0.1 * jax.random.normal(next(keys), (1, c), jnp.float32),
            var=1.0 + 0.5 * jax.random.uniform(next(keys), (1, c), jnp.float32),
        )

    raw = dict(conv1=conv_w(64, 3, 7, 7), bn1=bn_p(64), layers=[])
    in_c = 64
    for out_c, stride in [(64, 1), (128, 2), (256, 2), (512, 2)]:
        blocks = []
        for bi in range(2):
            s = stride if bi == 0 else 1
            blk = dict(stride=s,
                       conv1=conv_w(out_c, in_c, 3, 3), bn1=bn_p(out_c),
                       conv2=conv_w(out_c, out_c, 3, 3), bn2=bn_p(out_c))
            if s != 1 or in_c != out_c:
                blk["down_conv"] = conv_w(out_c, in_c, 1, 1)
                blk["down_bn"] = bn_p(out_c)
            blocks.append(blk)
            in_c = out_c
        raw["layers"].append(blocks)

    raw["head"] = dict(
        w1=(1.0 / NUM_FEATURES ** 0.5) *
           jax.random.normal(next(keys), (NUM_FEATURES, EMBEDDING_SIZE), jnp.float32),
        b1=0.01 * jax.random.normal(next(keys), (1, EMBEDDING_SIZE), jnp.float32),
        bn=bn_p(EMBEDDING_SIZE),
        wc=(1.0 / EMBEDDING_SIZE ** 0.5) *
           jax.random.normal(next(keys), (EMBEDDING_SIZE, num_classes), jnp.float32),
        bc=0.01 * jax.random.normal(next(keys), (1, num_classes), jnp.float32),
    )
    return raw


def _fold_conv_bn(w_oihw, bn):
    """Fold eval-mode BN into the (K, Cout) matmul weight + a bias row."""
    cout = w_oihw.shape[0]
    scale = bn["gamma"] * jax.lax.rsqrt(bn["var"] + BN_EPS)   # (1, Cout)
    bias = bn["beta"] - bn["mean"] * scale                    # (1, Cout)
    wkc = w_oihw.reshape(cout, -1).T * scale                  # (Cin*kh*kw, Cout)
    return dict(w=wkc.astype(jnp.bfloat16),
                bias=bias.astype(jnp.float32),
                khw=(int(w_oihw.shape[2]), int(w_oihw.shape[3])))


def prepare_params(raw):
    """One-time weight prep: fold BN, reshape to (K, Cout), cast to bf16."""
    prepared = dict(stem=_fold_conv_bn(raw["conv1"], raw["bn1"]), blocks=[])
    for blocks in raw["layers"]:
        for blk in blocks:
            pb = dict(stride=blk["stride"],
                      conv1=_fold_conv_bn(blk["conv1"], blk["bn1"]),
                      conv2=_fold_conv_bn(blk["conv2"], blk["bn2"]))
            if "down_conv" in blk:
                pb["down"] = _fold_conv_bn(blk["down_conv"], blk["down_bn"])
            prepared["blocks"].append(pb)
    h = raw["head"]
    scale = h["bn"]["gamma"] * jax.lax.rsqrt(h["bn"]["var"] + BN_EPS)
    prepared["head"] = dict(
        w1=(h["w1"] * scale).astype(jnp.float32),
        b1=((h["b1"] - h["bn"]["mean"]) * scale + h["bn"]["beta"]).astype(jnp.float32),
        wc=h["wc"].astype(jnp.float32),
        bc=h["bc"].astype(jnp.float32),
    )
    return prepared


if __name__ == "__main__":
    key = jax.random.PRNGKey(0)
    pkey, xkey = jax.random.split(key)
    num_classes = 10
    raw_params = init_params(pkey, num_classes)
    params = prepare_params(raw_params)      # one-time fold, outside jit

    # Small NCHW input consistent with a ResNet-18 backbone (3 channels).
    x = jax.random.normal(xkey, (2, 3, 16, 16), jnp.float32)

    fwd = jax.jit(lambda inp: model_forward(inp, params))
    logits, emb_norm = fwd(x)
    jax.block_until_ready((logits, emb_norm))

    assert logits.shape == (2, num_classes)
    assert emb_norm.shape == (2, EMBEDDING_SIZE)
    assert bool(jnp.all(jnp.isfinite(logits))) and bool(jnp.all(jnp.isfinite(emb_norm)))
    print("KERNEL_OK")
</pallas_src>

<mosaic_0001>
module attributes {stable_mosaic.version = 11 : i64} {
  func.func @_mm_bias_kernel(%arg0: i32, %arg1: i32, %arg2: i32, %arg3: memref<128x256xbf16, #tpu.memory_space<vmem>>, %arg4: memref<256x128xbf16, #tpu.memory_space<vmem>>, %arg5: memref<1x128xf32, #tpu.memory_space<vmem>>, %arg6: memref<128x128xbf16, #tpu.memory_space<vmem>>, %arg7: memref<128x128xf32, #tpu.memory_space<vmem>>) attributes {dimension_semantics = [#tpu.dimension_semantics<parallel>, #tpu.dimension_semantics<parallel>, #tpu.dimension_semantics<arbitrary>], iteration_bounds = array<i64: 1, 1, 1>, scalar_prefetch = 0 : i64, scratch_operands = 1 : i64, tpu.core_type = #tpu.core_type<tc>, window_params = [{transform_indices = @transform_0, window_bounds = array<i64: 128, 256>}, {transform_indices = @transform_1, window_bounds = array<i64: 256, 128>}, {transform_indices = @transform_2, window_bounds = array<i64: 1, 128>}, {transform_indices = @transform_3, window_bounds = array<i64: 128, 128>}]} {
    %c0_i32 = arith.constant 0 : i32
    %0 = arith.cmpi eq, %arg2, %c0_i32 : i32
    %1 = arith.extui %0 : i1 to i32
    %c0_i32_0 = arith.constant 0 : i32
    %2 = arith.cmpi ne, %1, %c0_i32_0 : i32
    scf.if %2 {
      %cst_10 = arith.constant 0.000000e+00 : f32
      %12 = vector.broadcast %cst_10 : f32 to vector<128x128xf32>
      %c0_11 = arith.constant 0 : index
      %c0_12 = arith.constant 0 : index
      %13 = vector.load %arg7[%c0_11, %c0_12] : memref<128x128xf32, #tpu.memory_space<vmem>>, vector<128x128xf32>
      tpu.vector_store %arg7[%c0_11, %c0_12], %12 {strides = array<i32>} : memref<128x128xf32, #tpu.memory_space<vmem>>, vector<128x128xf32>,
    } else {
    }
    %c0 = arith.constant 0 : index
    %c0_1 = arith.constant 0 : index
    %3 = vector.load %arg7[%c0, %c0_1] : memref<128x128xf32, #tpu.memory_space<vmem>>, vector<128x128xf32>
    %c0_2 = arith.constant 0 : index
    %c0_3 = arith.constant 0 : index
    %4 = vector.load %arg3[%c0_2, %c0_3] : memref<128x256xbf16, #tpu.memory_space<vmem>>, vector<128x256xbf16>
    %c0_4 = arith.constant 0 : index
    %c0_5 = arith.constant 0 : index
    %5 = vector.load %arg4[%c0_4, %c0_5] : memref<256x128xbf16, #tpu.memory_space<vmem>>, vector<256x128xbf16>
    %cst = arith.constant dense<0.000000e+00> : vector<128x128xf32>
    %6 = tpu.matmul %4, %5, %cst {dimension_numbers = #tpu.dot_dimension_numbers<[1], [0], [0], [1], [0, 0, 1, 1], [], []>} : vector<128x256xbf16>, vector<256x128xbf16>, vector<128x128xf32> -> vector<128x128xf32>
    %7 = arith.addf %3, %6 : vector<128x128xf32>
    %c0_6 = arith.constant 0 : index
    %c0_7 = arith.constant 0 : index
    %8 = vector.load %arg7[%c0_6, %c0_7] : memref<128x128xf32, #tpu.memory_space<vmem>>, vector<128x128xf32>
    tpu.vector_store %arg7[%c0_6, %c0_7], %7 {strides = array<i32>} : memref<128x128xf32, #tpu.memory_space<vmem>>, vector<128x128xf32>,
    %c0_i32_8 = arith.constant 0 : i32
    %9 = arith.cmpi eq, %arg2, %c0_i32_8 : i32
    %10 = arith.extui %9 : i1 to i32
    %c0_i32_9 = arith.constant 0 : i32
    %11 = arith.cmpi ne, %10, %c0_i32_9 : i32
    scf.if %11 {
      %c0_10 = arith.constant 0 : index
      %c0_11 = arith.constant 0 : index
      %12 = vector.load %arg7[%c0_10, %c0_11] : memref<128x128xf32, #tpu.memory_space<vmem>>, vector<128x128xf32>
      %c0_12 = arith.constant 0 : index
      %c0_13 = arith.constant 0 : index
      %13 = vector.load %arg5[%c0_12, %c0_13] : memref<1x128xf32, #tpu.memory_space<vmem>>, vector<1x128xf32>
      %14 = vector.broadcast %13 : vector<1x128xf32> to vector<128x128xf32>
      %15 = arith.addf %12, %14 : vector<128x128xf32>
      %cst_14 = arith.constant 0.000000e+00 : f32
      %16 = vector.broadcast %cst_14 : f32 to vector<128x128xf32>
      %17 = arith.maximumf %15, %16 : vector<128x128xf32>
      %18 = arith.truncf %17 : vector<128x128xf32> to vector<128x128xbf16>
      %c0_15 = arith.constant 0 : index
      %c0_16 = arith.constant 0 : index
      %19 = vector.load %arg6[%c0_15, %c0_16] : memref<128x128xbf16, #tpu.memory_space<vmem>>, vector<128x128xbf16>
      tpu.vector_store %arg6[%c0_15, %c0_16], %18 {strides = array<i32>} : memref<128x128xbf16, #tpu.memory_space<vmem>>, vector<128x128xbf16>,
    } else {
    }
    return
  }
  func.func @transform_0(%arg0: i32, %arg1: i32, %arg2: i32) -> (i32, i32) {
    %c0_i32 = arith.constant 0 : i32
    return %arg0, %arg2 : i32, i32
  }
  func.func @transform_1(%arg0: i32, %arg1: i32, %arg2: i32) -> (i32, i32) {
    %c0_i32 = arith.constant 0 : i32
    return %arg2, %arg1 : i32, i32
  }
  func.func @transform_2(%arg0: i32, %arg1: i32, %arg2: i32) -> (i32, i32) {
    %c0_i32 = arith.constant 0 : i32
    %c0_i32_0 = arith.constant 0 : i32
    return %c0_i32, %arg1 : i32, i32
  }
  func.func @transform_3(%arg0: i32, %arg1: i32, %arg2: i32) -> (i32, i32) {
    %c0_i32 = arith.constant 0 : i32
    return %arg0, %arg1 : i32, i32
  }
}

module attributes {stable_mosaic.version = 11 : i64} {
  func.func @_mm_bias_kernel(%arg0: i32, %arg1: i32, %arg2: i32, %arg3: memref<32x512xbf16, #tpu.memory_space<vmem>>, %arg4: memref<512x128xbf16, #tpu.memory_space<vmem>>, %arg5: memref<1x128xf32, #tpu.memory_space<vmem>>, %arg6: memref<32x128xbf16, #tpu.memory_space<vmem>>, %arg7: memref<32x128xf32, #tpu.memory_space<vmem>>) attributes {dimension_semantics = [#tpu.dimension_semantics<parallel>, #tpu.dimension_semantics<parallel>, #tpu.dimension_semantics<arbitrary>], iteration_bounds = array<i64: 1, 1, 2>, scalar_prefetch = 0 : i64, scratch_operands = 1 : i64, tpu.core_type = #tpu.core_type<tc>, window_params = [{transform_indices = @transform_0, window_bounds = array<i64: 32, 512>}, {transform_indices = @transform_1, window_bounds = array<i64: 512, 128>}, {transform_indices = @transform_2, window_bounds = array<i64: 1, 128>}, {transform_indices = @transform_3, window_bounds = array<i64: 32, 128>}]} {
    %c0_i32 = arith.constant 0 : i32
    %0 = arith.cmpi eq, %arg2, %c0_i32 : i32
    %1 = arith.extui %0 : i1 to i32
    %c0_i32_0 = arith.constant 0 : i32
    %2 = arith.cmpi ne, %1, %c0_i32_0 : i32
    scf.if %2 {
      %cst_9 = arith.constant 0.000000e+00 : f32
      %12 = vector.broadcast %cst_9 : f32 to vector<32x128xf32>
      %c0_10 = arith.constant 0 : index
      %c0_11 = arith.constant 0 : index
      %13 = vector.load %arg7[%c0_10, %c0_11] : memref<32x128xf32, #tpu.memory_space<vmem>>, vector<32x128xf32>
      tpu.vector_store %arg7[%c0_10, %c0_11], %12 {strides = array<i32>} : memref<32x128xf32, #tpu.memory_space<vmem>>, vector<32x128xf32>,
    } else {
    }
    %c0 = arith.constant 0 : index
    %c0_1 = arith.constant 0 : index
    %3 = vector.load %arg7[%c0, %c0_1] : memref<32x128xf32, #tpu.memory_space<vmem>>, vector<32x128xf32>
    %c0_2 = arith.constant 0 : index
    %c0_3 = arith.constant 0 : index
    %4 = vector.load %arg3[%c0_2, %c0_3] : memref<32x512xbf16, #tpu.memory_space<vmem>>, vector<32x512xbf16>
    %c0_4 = arith.constant 0 : index
    %c0_5 = arith.constant 0 : index
    %5 = vector.load %arg4[%c0_4, %c0_5] : memref<512x128xbf16, #tpu.memory_space<vmem>>, vector<512x128xbf16>
    %cst = arith.constant dense<0.000000e+00> : vector<32x128xf32>
    %6 = tpu.matmul %4, %5, %cst {dimension_numbers = #tpu.dot_dimension_numbers<[1], [0], [0], [1], [0, 0, 1, 1], [], []>} : vector<32x512xbf16>, vector<512x128xbf16>, vector<32x128xf32> -> vector<32x128xf32>
    %7 = arith.addf %3, %6 : vector<32x128xf32>
    %c0_6 = arith.constant 0 : index
    %c0_7 = arith.constant 0 : index
    %8 = vector.load %arg7[%c0_6, %c0_7] : memref<32x128xf32, #tpu.memory_space<vmem>>, vector<32x128xf32>
    tpu.vector_store %arg7[%c0_6, %c0_7], %7 {strides = array<i32>} : memref<32x128xf32, #tpu.memory_space<vmem>>, vector<32x128xf32>,
    %c1_i32 = arith.constant 1 : i32
    %9 = arith.cmpi eq, %arg2, %c1_i32 : i32
    %10 = arith.extui %9 : i1 to i32
    %c0_i32_8 = arith.constant 0 : i32
    %11 = arith.cmpi ne, %10, %c0_i32_8 : i32
    scf.if %11 {
      %c0_9 = arith.constant 0 : index
      %c0_10 = arith.constant 0 : index
      %12 = vector.load %arg7[%c0_9, %c0_10] : memref<32x128xf32, #tpu.memory_space<vmem>>, vector<32x128xf32>
      %c0_11 = arith.constant 0 : index
      %c0_12 = arith.constant 0 : index
      %13 = vector.load %arg5[%c0_11, %c0_12] : memref<1x128xf32, #tpu.memory_space<vmem>>, vector<1x128xf32>
      %14 = vector.broadcast %13 : vector<1x128xf32> to vector<32x128xf32>
      %15 = arith.addf %12, %14 : vector<32x128xf32>
      %cst_13 = arith.constant 0.000000e+00 : f32
      %16 = vector.broadcast %cst_13 : f32 to vector<32x128xf32>
      %17 = arith.maximumf %15, %16 : vector<32x128xf32>
      %18 = arith.truncf %17 : vector<32x128xf32> to vector<32x128xbf16>
      %c0_14 = arith.constant 0 : index
      %c0_15 = arith.constant 0 : index
      %19 = vector.load %arg6[%c0_14, %c0_15] : memref<32x128xbf16, #tpu.memory_space<vmem>>, vector<32x128xbf16>
      tpu.vector_store %arg6[%c0_14, %c0_15], %18 {strides = array<i32>} : memref<32x128xbf16, #tpu.memory_space<vmem>>, vector<32x128xbf16>,
    } else {
    }
    return
  }
  func.func @transform_0(%arg0: i32, %arg1: i32, %arg2: i32) -> (i32, i32) {
    %c0_i32 = arith.constant 0 : i32
    return %arg0, %arg2 : i32, i32
  }
  func.func @transform_1(%arg0: i32, %arg1: i32, %arg2: i32) -> (i32, i32) {
    %c0_i32 = arith.constant 0 : i32
    return %arg2, %arg1 : i32, i32
  }
  func.func @transform_2(%arg0: i32, %arg1: i32, %arg2: i32) -> (i32, i32) {
    %c0_i32 = arith.constant 0 : i32
    %c0_i32_0 = arith.constant 0 : i32
    return %c0_i32, %arg1 : i32, i32
  }
  func.func @transform_3(%arg0: i32, %arg1: i32, %arg2: i32) -> (i32, i32) {
    %c0_i32 = arith.constant 0 : i32
    return %arg0, %arg1 : i32, i32
  }
}

module attributes {stable_mosaic.version = 11 : i64} {
  func.func @_mm_bias_res_kernel(%arg0: i32, %arg1: i32, %arg2: i32, %arg3: memref<32x512xbf16, #tpu.memory_space<vmem>>, %arg4: memref<512x128xbf16, #tpu.memory_space<vmem>>, %arg5: memref<1x128xf32, #tpu.memory_space<vmem>>, %arg6: memref<32x128xbf16, #tpu.memory_space<vmem>>, %arg7: memref<32x128xbf16, #tpu.memory_space<vmem>>, %arg8: memref<32x128xf32, #tpu.memory_space<vmem>>) attributes {dimension_semantics = [#tpu.dimension_semantics<parallel>, #tpu.dimension_semantics<parallel>, #tpu.dimension_semantics<arbitrary>], iteration_bounds = array<i64: 1, 1, 2>, scalar_prefetch = 0 : i64, scratch_operands = 1 : i64, tpu.core_type = #tpu.core_type<tc>, window_params = [{transform_indices = @transform_0, window_bounds = array<i64: 32, 512>}, {transform_indices = @transform_1, window_bounds = array<i64: 512, 128>}, {transform_indices = @transform_2, window_bounds = array<i64: 1, 128>}, {transform_indices = @transform_3, window_bounds = array<i64: 32, 128>}, {transform_indices = @transform_4, window_bounds = array<i64: 32, 128>}]} {
    %c0_i32 = arith.constant 0 : i32
    %0 = arith.cmpi eq, %arg2, %c0_i32 : i32
    %1 = arith.extui %0 : i1 to i32
    %c0_i32_0 = arith.constant 0 : i32
    %2 = arith.cmpi ne, %1, %c0_i32_0 : i32
    scf.if %2 {
      %cst_9 = arith.constant 0.000000e+00 : f32
      %12 = vector.broadcast %cst_9 : f32 to vector<32x128xf32>
      %c0_10 = arith.constant 0 : index
      %c0_11 = arith.constant 0 : index
      %13 = vector.load %arg8[%c0_10, %c0_11] : memref<32x128xf32, #tpu.memory_space<vmem>>, vector<32x128xf32>
      tpu.vector_store %arg8[%c0_10, %c0_11], %12 {strides = array<i32>} : memref<32x128xf32, #tpu.memory_space<vmem>>, vector<32x128xf32>,
    } else {
    }
    %c0 = arith.constant 0 : index
    %c0_1 = arith.constant 0 : index
    %3 = vector.load %arg8[%c0, %c0_1] : memref<32x128xf32, #tpu.memory_space<vmem>>, vector<32x128xf32>
    %c0_2 = arith.constant 0 : index
    %c0_3 = arith.constant 0 : index
    %4 = vector.load %arg3[%c0_2, %c0_3] : memref<32x512xbf16, #tpu.memory_space<vmem>>, vector<32x512xbf16>
    %c0_4 = arith.constant 0 : index
    %c0_5 = arith.constant 0 : index
    %5 = vector.load %arg4[%c0_4, %c0_5] : memref<512x128xbf16, #tpu.memory_space<vmem>>, vector<512x128xbf16>
    %cst = arith.constant dense<0.000000e+00> : vector<32x128xf32>
    %6 = tpu.matmul %4, %5, %cst {dimension_numbers = #tpu.dot_dimension_numbers<[1], [0], [0], [1], [0, 0, 1, 1], [], []>} : vector<32x512xbf16>, vector<512x128xbf16>, vector<32x128xf32> -> vector<32x128xf32>
    %7 = arith.addf %3, %6 : vector<32x128xf32>
    %c0_6 = arith.constant 0 : index
    %c0_7 = arith.constant 0 : index
    %8 = vector.load %arg8[%c0_6, %c0_7] : memref<32x128xf32, #tpu.memory_space<vmem>>, vector<32x128xf32>
    tpu.vector_store %arg8[%c0_6, %c0_7], %7 {strides = array<i32>} : memref<32x128xf32, #tpu.memory_space<vmem>>, vector<32x128xf32>,
    %c1_i32 = arith.constant 1 : i32
    %9 = arith.cmpi eq, %arg2, %c1_i32 : i32
    %10 = arith.extui %9 : i1 to i32
    %c0_i32_8 = arith.constant 0 : i32
    %11 = arith.cmpi ne, %10, %c0_i32_8 : i32
    scf.if %11 {
      %c0_9 = arith.constant 0 : index
      %c0_10 = arith.constant 0 : index
      %12 = vector.load %arg8[%c0_9, %c0_10] : memref<32x128xf32, #tpu.memory_space<vmem>>, vector<32x128xf32>
      %c0_11 = arith.constant 0 : index
      %c0_12 = arith.constant 0 : index
      %13 = vector.load %arg5[%c0_11, %c0_12] : memref<1x128xf32, #tpu.memory_space<vmem>>, vector<1x128xf32>
      %14 = vector.broadcast %13 : vector<1x128xf32> to vector<32x128xf32>
      %15 = arith.addf %12, %14 : vector<32x128xf32>
      %c0_13 = arith.constant 0 : index
      %c0_14 = arith.constant 0 : index
      %16 = vector.load %arg6[%c0_13, %c0_14] : memref<32x128xbf16, #tpu.memory_space<vmem>>, vector<32x128xbf16>
      %17 = arith.extf %16 : vector<32x128xbf16> to vector<32x128xf32>
      %18 = arith.addf %15, %17 : vector<32x128xf32>
      %cst_15 = arith.constant 0.000000e+00 : f32
      %19 = vector.broadcast %cst_15 : f32 to vector<32x128xf32>
      %20 = arith.maximumf %18, %19 : vector<32x128xf32>
      %21 = arith.truncf %20 : vector<32x128xf32> to vector<32x128xbf16>
      %c0_16 = arith.constant 0 : index
      %c0_17 = arith.constant 0 : index
      %22 = vector.load %arg7[%c0_16, %c0_17] : memref<32x128xbf16, #tpu.memory_space<vmem>>, vector<32x128xbf16>
      tpu.vector_store %arg7[%c0_16, %c0_17], %21 {strides = array<i32>} : memref<32x128xbf16, #tpu.memory_space<vmem>>, vector<32x128xbf16>,
    } else {
    }
    return
  }
  func.func @transform_0(%arg0: i32, %arg1: i32, %arg2: i32) -> (i32, i32) {
    %c0_i32 = arith.constant 0 : i32
    return %arg0, %arg2 : i32, i32
  }
  func.func @transform_1(%arg0: i32, %arg1: i32, %arg2: i32) -> (i32, i32) {
    %c0_i32 = arith.constant 0 : i32
    return %arg2, %arg1 : i32, i32
  }
  func.func @transform_2(%arg0: i32, %arg1: i32, %arg2: i32) -> (i32, i32) {
    %c0_i32 = arith.constant 0 : i32
    %c0_i32_0 = arith.constant 0 : i32
    return %c0_i32, %arg1 : i32, i32
  }
  func.func @transform_3(%arg0: i32, %arg1: i32, %arg2: i32) -> (i32, i32) {
    %c0_i32 = arith.constant 0 : i32
    return %arg0, %arg1 : i32, i32
  }
  func.func @transform_4(%arg0: i32, %arg1: i32, %arg2: i32) -> (i32, i32) {
    %c0_i32 = arith.constant 0 : i32
    return %arg0, %arg1 : i32, i32
  }
}

module attributes {stable_mosaic.version = 11 : i64} {
  func.func @_mm_bias_kernel(%arg0: i32, %arg1: i32, %arg2: i32, %arg3: memref<8x128xbf16, #tpu.memory_space<vmem>>, %arg4: memref<128x128xbf16, #tpu.memory_space<vmem>>, %arg5: memref<1x128xf32, #tpu.memory_space<vmem>>, %arg6: memref<8x128xbf16, #tpu.memory_space<vmem>>, %arg7: memref<8x128xf32, #tpu.memory_space<vmem>>) attributes {dimension_semantics = [#tpu.dimension_semantics<parallel>, #tpu.dimension_semantics<parallel>, #tpu.dimension_semantics<arbitrary>], iteration_bounds = array<i64: 1, 1, 1>, scalar_prefetch = 0 : i64, scratch_operands = 1 : i64, tpu.core_type = #tpu.core_type<tc>, window_params = [{transform_indices = @transform_0, window_bounds = array<i64: 8, 128>}, {transform_indices = @transform_1, window_bounds = array<i64: 128, 128>}, {transform_indices = @transform_2, window_bounds = array<i64: 1, 128>}, {transform_indices = @transform_3, window_bounds = array<i64: 8, 128>}]} {
    %c0_i32 = arith.constant 0 : i32
    %0 = arith.cmpi eq, %arg2, %c0_i32 : i32
    %1 = arith.extui %0 : i1 to i32
    %c0_i32_0 = arith.constant 0 : i32
    %2 = arith.cmpi ne, %1, %c0_i32_0 : i32
    scf.if %2 {
      %cst_10 = arith.constant 0.000000e+00 : f32
      %12 = vector.broadcast %cst_10 : f32 to vector<8x128xf32>
      %c0_11 = arith.constant 0 : index
      %c0_12 = arith.constant 0 : index
      %13 = vector.load %arg7[%c0_11, %c0_12] : memref<8x128xf32, #tpu.memory_space<vmem>>, vector<8x128xf32>
      tpu.vector_store %arg7[%c0_11, %c0_12], %12 {strides = array<i32>} : memref<8x128xf32, #tpu.memory_space<vmem>>, vector<8x128xf32>,
    } else {
    }
    %c0 = arith.constant 0 : index
    %c0_1 = arith.constant 0 : index
    %3 = vector.load %arg7[%c0, %c0_1] : memref<8x128xf32, #tpu.memory_space<vmem>>, vector<8x128xf32>
    %c0_2 = arith.constant 0 : index
    %c0_3 = arith.constant 0 : index
    %4 = vector.load %arg3[%c0_2, %c0_3] : memref<8x128xbf16, #tpu.memory_space<vmem>>, vector<8x128xbf16>
    %c0_4 = arith.constant 0 : index
    %c0_5 = arith.constant 0 : index
    %5 = vector.load %arg4[%c0_4, %c0_5] : memref<128x128xbf16, #tpu.memory_space<vmem>>, vector<128x128xbf16>
    %cst = arith.constant dense<0.000000e+00> : vector<8x128xf32>
    %6 = tpu.matmul %4, %5, %cst {dimension_numbers = #tpu.dot_dimension_numbers<[1], [0], [0], [1], [0, 0, 1, 1], [], []>} : vector<8x128xbf16>, vector<128x128xbf16>, vector<8x128xf32> -> vector<8x128xf32>
    %7 = arith.addf %3, %6 : vector<8x128xf32>
    %c0_6 = arith.constant 0 : index
    %c0_7 = arith.constant 0 : index
    %8 = vector.load %arg7[%c0_6, %c0_7] : memref<8x128xf32, #tpu.memory_space<vmem>>, vector<8x128xf32>
    tpu.vector_store %arg7[%c0_6, %c0_7], %7 {strides = array<i32>} : memref<8x128xf32, #tpu.memory_space<vmem>>, vector<8x128xf32>,
    %c0_i32_8 = arith.constant 0 : i32
    %9 = arith.cmpi eq, %arg2, %c0_i32_8 : i32
    %10 = arith.extui %9 : i1 to i32
    %c0_i32_9 = arith.constant 0 : i32
    %11 = arith.cmpi ne, %10, %c0_i32_9 : i32
    scf.if %11 {
      %c0_10 = arith.constant 0 : index
      %c0_11 = arith.constant 0 : index
      %12 = vector.load %arg7[%c0_10, %c0_11] : memref<8x128xf32, #tpu.memory_space<vmem>>, vector<8x128xf32>
      %c0_12 = arith.constant 0 : index
      %c0_13 = arith.constant 0 : index
      %13 = vector.load %arg5[%c0_12, %c0_13] : memref<1x128xf32, #tpu.memory_space<vmem>>, vector<1x128xf32>
      %14 = vector.broadcast %13 : vector<1x128xf32> to vector<8x128xf32>
      %15 = arith.addf %12, %14 : vector<8x128xf32>
      %16 = arith.truncf %15 : vector<8x128xf32> to vector<8x128xbf16>
      %c0_14 = arith.constant 0 : index
      %c0_15 = arith.constant 0 : index
      %17 = vector.load %arg6[%c0_14, %c0_15] : memref<8x128xbf16, #tpu.memory_space<vmem>>, vector<8x128xbf16>
      tpu.vector_store %arg6[%c0_14, %c0_15], %16 {strides = array<i32>} : memref<8x128xbf16, #tpu.memory_space<vmem>>, vector<8x128xbf16>,
    } else {
    }
    return
  }
  func.func @transform_0(%arg0: i32, %arg1: i32, %arg2: i32) -> (i32, i32) {
    %c0_i32 = arith.constant 0 : i32
    return %arg0, %arg2 : i32, i32
  }
  func.func @transform_1(%arg0: i32, %arg1: i32, %arg2: i32) -> (i32, i32) {
    %c0_i32 = arith.constant 0 : i32
    return %arg2, %arg1 : i32, i32
  }
  func.func @transform_2(%arg0: i32, %arg1: i32, %arg2: i32) -> (i32, i32) {
    %c0_i32 = arith.constant 0 : i32
    %c0_i32_0 = arith.constant 0 : i32
    return %c0_i32, %arg1 : i32, i32
  }
  func.func @transform_3(%arg0: i32, %arg1: i32, %arg2: i32) -> (i32, i32) {
    %c0_i32 = arith.constant 0 : i32
    return %arg0, %arg1 : i32, i32
  }
}

module attributes {stable_mosaic.version = 11 : i64} {
  func.func @_mm_bias_kernel(%arg0: i32, %arg1: i32, %arg2: i32, %arg3: memref<8x512xbf16, #tpu.memory_space<vmem>>, %arg4: memref<512x128xbf16, #tpu.memory_space<vmem>>, %arg5: memref<1x128xf32, #tpu.memory_space<vmem>>, %arg6: memref<8x128xbf16, #tpu.memory_space<vmem>>, %arg7: memref<8x128xf32, #tpu.memory_space<vmem>>) attributes {dimension_semantics = [#tpu.dimension_semantics<parallel>, #tpu.dimension_semantics<parallel>, #tpu.dimension_semantics<arbitrary>], iteration_bounds = array<i64: 1, 1, 2>, scalar_prefetch = 0 : i64, scratch_operands = 1 : i64, tpu.core_type = #tpu.core_type<tc>, window_params = [{transform_indices = @transform_0, window_bounds = array<i64: 8, 512>}, {transform_indices = @transform_1, window_bounds = array<i64: 512, 128>}, {transform_indices = @transform_2, window_bounds = array<i64: 1, 128>}, {transform_indices = @transform_3, window_bounds = array<i64: 8, 128>}]} {
    %c0_i32 = arith.constant 0 : i32
    %0 = arith.cmpi eq, %arg2, %c0_i32 : i32
    %1 = arith.extui %0 : i1 to i32
    %c0_i32_0 = arith.constant 0 : i32
    %2 = arith.cmpi ne, %1, %c0_i32_0 : i32
    scf.if %2 {
      %cst_9 = arith.constant 0.000000e+00 : f32
      %12 = vector.broadcast %cst_9 : f32 to vector<8x128xf32>
      %c0_10 = arith.constant 0 : index
      %c0_11 = arith.constant 0 : index
      %13 = vector.load %arg7[%c0_10, %c0_11] : memref<8x128xf32, #tpu.memory_space<vmem>>, vector<8x128xf32>
      tpu.vector_store %arg7[%c0_10, %c0_11], %12 {strides = array<i32>} : memref<8x128xf32, #tpu.memory_space<vmem>>, vector<8x128xf32>,
    } else {
    }
    %c0 = arith.constant 0 : index
    %c0_1 = arith.constant 0 : index
    %3 = vector.load %arg7[%c0, %c0_1] : memref<8x128xf32, #tpu.memory_space<vmem>>, vector<8x128xf32>
    %c0_2 = arith.constant 0 : index
    %c0_3 = arith.constant 0 : index
    %4 = vector.load %arg3[%c0_2, %c0_3] : memref<8x512xbf16, #tpu.memory_space<vmem>>, vector<8x512xbf16>
    %c0_4 = arith.constant 0 : index
    %c0_5 = arith.constant 0 : index
    %5 = vector.load %arg4[%c0_4, %c0_5] : memref<512x128xbf16, #tpu.memory_space<vmem>>, vector<512x128xbf16>
    %cst = arith.constant dense<0.000000e+00> : vector<8x128xf32>
    %6 = tpu.matmul %4, %5, %cst {dimension_numbers = #tpu.dot_dimension_numbers<[1], [0], [0], [1], [0, 0, 1, 1], [], []>} : vector<8x512xbf16>, vector<512x128xbf16>, vector<8x128xf32> -> vector<8x128xf32>
    %7 = arith.addf %3, %6 : vector<8x128xf32>
    %c0_6 = arith.constant 0 : index
    %c0_7 = arith.constant 0 : index
    %8 = vector.load %arg7[%c0_6, %c0_7] : memref<8x128xf32, #tpu.memory_space<vmem>>, vector<8x128xf32>
    tpu.vector_store %arg7[%c0_6, %c0_7], %7 {strides = array<i32>} : memref<8x128xf32, #tpu.memory_space<vmem>>, vector<8x128xf32>,
    %c1_i32 = arith.constant 1 : i32
    %9 = arith.cmpi eq, %arg2, %c1_i32 : i32
    %10 = arith.extui %9 : i1 to i32
    %c0_i32_8 = arith.constant 0 : i32
    %11 = arith.cmpi ne, %10, %c0_i32_8 : i32
    scf.if %11 {
      %c0_9 = arith.constant 0 : index
      %c0_10 = arith.constant 0 : index
      %12 = vector.load %arg7[%c0_9, %c0_10] : memref<8x128xf32, #tpu.memory_space<vmem>>, vector<8x128xf32>
      %c0_11 = arith.constant 0 : index
      %c0_12 = arith.constant 0 : index
      %13 = vector.load %arg5[%c0_11, %c0_12] : memref<1x128xf32, #tpu.memory_space<vmem>>, vector<1x128xf32>
      %14 = vector.broadcast %13 : vector<1x128xf32> to vector<8x128xf32>
      %15 = arith.addf %12, %14 : vector<8x128xf32>
      %cst_13 = arith.constant 0.000000e+00 : f32
      %16 = vector.broadcast %cst_13 : f32 to vector<8x128xf32>
      %17 = arith.maximumf %15, %16 : vector<8x128xf32>
      %18 = arith.truncf %17 : vector<8x128xf32> to vector<8x128xbf16>
      %c0_14 = arith.constant 0 : index
      %c0_15 = arith.constant 0 : index
      %19 = vector.load %arg6[%c0_14, %c0_15] : memref<8x128xbf16, #tpu.memory_space<vmem>>, vector<8x128xbf16>
      tpu.vector_store %arg6[%c0_14, %c0_15], %18 {strides = array<i32>} : memref<8x128xbf16, #tpu.memory_space<vmem>>, vector<8x128xbf16>,
    } else {
    }
    return
  }
  func.func @transform_0(%arg0: i32, %arg1: i32, %arg2: i32) -> (i32, i32) {
    %c0_i32 = arith.constant 0 : i32
    return %arg0, %arg2 : i32, i32
  }
  func.func @transform_1(%arg0: i32, %arg1: i32, %arg2: i32) -> (i32, i32) {
    %c0_i32 = arith.constant 0 : i32
    return %arg2, %arg1 : i32, i32
  }
  func.func @transform_2(%arg0: i32, %arg1: i32, %arg2: i32) -> (i32, i32) {
    %c0_i32 = arith.constant 0 : i32
    %c0_i32_0 = arith.constant 0 : i32
    return %c0_i32, %arg1 : i32, i32
  }
  func.func @transform_3(%arg0: i32, %arg1: i32, %arg2: i32) -> (i32, i32) {
    %c0_i32 = arith.constant 0 : i32
    return %arg0, %arg1 : i32, i32
  }
}

module attributes {stable_mosaic.version = 11 : i64} {
  func.func @_mm_bias_res_kernel(%arg0: i32, %arg1: i32, %arg2: i32, %arg3: memref<8x512xbf16, #tpu.memory_space<vmem>>, %arg4: memref<512x128xbf16, #tpu.memory_space<vmem>>, %arg5: memref<1x128xf32, #tpu.memory_space<vmem>>, %arg6: memref<8x128xbf16, #tpu.memory_space<vmem>>, %arg7: memref<8x128xbf16, #tpu.memory_space<vmem>>, %arg8: memref<8x128xf32, #tpu.memory_space<vmem>>) attributes {dimension_semantics = [#tpu.dimension_semantics<parallel>, #tpu.dimension_semantics<parallel>, #tpu.dimension_semantics<arbitrary>], iteration_bounds = array<i64: 1, 1, 3>, scalar_prefetch = 0 : i64, scratch_operands = 1 : i64, tpu.core_type = #tpu.core_type<tc>, window_params = [{transform_indices = @transform_0, window_bounds = array<i64: 8, 512>}, {transform_indices = @transform_1, window_bounds = array<i64: 512, 128>}, {transform_indices = @transform_2, window_bounds = array<i64: 1, 128>}, {transform_indices = @transform_3, window_bounds = array<i64: 8, 128>}, {transform_indices = @transform_4, window_bounds = array<i64: 8, 128>}]} {
    %c0_i32 = arith.constant 0 : i32
    %0 = arith.cmpi eq, %arg2, %c0_i32 : i32
    %1 = arith.extui %0 : i1 to i32
    %c0_i32_0 = arith.constant 0 : i32
    %2 = arith.cmpi ne, %1, %c0_i32_0 : i32
    scf.if %2 {
      %cst_9 = arith.constant 0.000000e+00 : f32
      %12 = vector.broadcast %cst_9 : f32 to vector<8x128xf32>
      %c0_10 = arith.constant 0 : index
      %c0_11 = arith.constant 0 : index
      %13 = vector.load %arg8[%c0_10, %c0_11] : memref<8x128xf32, #tpu.memory_space<vmem>>, vector<8x128xf32>
      tpu.vector_store %arg8[%c0_10, %c0_11], %12 {strides = array<i32>} : memref<8x128xf32, #tpu.memory_space<vmem>>, vector<8x128xf32>,
    } else {
    }
    %c0 = arith.constant 0 : index
    %c0_1 = arith.constant 0 : index
    %3 = vector.load %arg8[%c0, %c0_1] : memref<8x128xf32, #tpu.memory_space<vmem>>, vector<8x128xf32>
    %c0_2 = arith.constant 0 : index
    %c0_3 = arith.constant 0 : index
    %4 = vector.load %arg3[%c0_2, %c0_3] : memref<8x512xbf16, #tpu.memory_space<vmem>>, vector<8x512xbf16>
    %c0_4 = arith.constant 0 : index
    %c0_5 = arith.constant 0 : index
    %5 = vector.load %arg4[%c0_4, %c0_5] : memref<512x128xbf16, #tpu.memory_space<vmem>>, vector<512x128xbf16>
    %cst = arith.constant dense<0.000000e+00> : vector<8x128xf32>
    %6 = tpu.matmul %4, %5, %cst {dimension_numbers = #tpu.dot_dimension_numbers<[1], [0], [0], [1], [0, 0, 1, 1], [], []>} : vector<8x512xbf16>, vector<512x128xbf16>, vector<8x128xf32> -> vector<8x128xf32>
    %7 = arith.addf %3, %6 : vector<8x128xf32>
    %c0_6 = arith.constant 0 : index
    %c0_7 = arith.constant 0 : index
    %8 = vector.load %arg8[%c0_6, %c0_7] : memref<8x128xf32, #tpu.memory_space<vmem>>, vector<8x128xf32>
    tpu.vector_store %arg8[%c0_6, %c0_7], %7 {strides = array<i32>} : memref<8x128xf32, #tpu.memory_space<vmem>>, vector<8x128xf32>,
    %c2_i32 = arith.constant 2 : i32
    %9 = arith.cmpi eq, %arg2, %c2_i32 : i32
    %10 = arith.extui %9 : i1 to i32
    %c0_i32_8 = arith.constant 0 : i32
    %11 = arith.cmpi ne, %10, %c0_i32_8 : i32
    scf.if %11 {
      %c0_9 = arith.constant 0 : index
      %c0_10 = arith.constant 0 : index
      %12 = vector.load %arg8[%c0_9, %c0_10] : memref<8x128xf32, #tpu.memory_space<vmem>>, vector<8x128xf32>
      %c0_11 = arith.constant 0 : index
      %c0_12 = arith.constant 0 : index
      %13 = vector.load %arg5[%c0_11, %c0_12] : memref<1x128xf32, #tpu.memory_space<vmem>>, vector<1x128xf32>
      %14 = vector.broadcast %13 : vector<1x128xf32> to vector<8x128xf32>
      %15 = arith.addf %12, %14 : vector<8x128xf32>
      %c0_13 = arith.constant 0 : index
      %c0_14 = arith.constant 0 : index
      %16 = vector.load %arg6[%c0_13, %c0_14] : memref<8x128xbf16, #tpu.memory_space<vmem>>, vector<8x128xbf16>
      %17 = arith.extf %16 : vector<8x128xbf16> to vector<8x128xf32>
      %18 = arith.addf %15, %17 : vector<8x128xf32>
      %cst_15 = arith.constant 0.000000e+00 : f32
      %19 = vector.broadcast %cst_15 : f32 to vector<8x128xf32>
      %20 = arith.maximumf %18, %19 : vector<8x128xf32>
      %21 = arith.truncf %20 : vector<8x128xf32> to vector<8x128xbf16>
      %c0_16 = arith.constant 0 : index
      %c0_17 = arith.constant 0 : index
      %22 = vector.load %arg7[%c0_16, %c0_17] : memref<8x128xbf16, #tpu.memory_space<vmem>>, vector<8x128xbf16>
      tpu.vector_store %arg7[%c0_16, %c0_17], %21 {strides = array<i32>} : memref<8x128xbf16, #tpu.memory_space<vmem>>, vector<8x128xbf16>,
    } else {
    }
    return
  }
  func.func @transform_0(%arg0: i32, %arg1: i32, %arg2: i32) -> (i32, i32) {
    %c0_i32 = arith.constant 0 : i32
    return %arg0, %arg2 : i32, i32
  }
  func.func @transform_1(%arg0: i32, %arg1: i32, %arg2: i32) -> (i32, i32) {
    %c0_i32 = arith.constant 0 : i32
    return %arg2, %arg1 : i32, i32
  }
  func.func @transform_2(%arg0: i32, %arg1: i32, %arg2: i32) -> (i32, i32) {
    %c0_i32 = arith.constant 0 : i32
    %c0_i32_0 = arith.constant 0 : i32
    return %c0_i32, %arg1 : i32, i32
  }
  func.func @transform_3(%arg0: i32, %arg1: i32, %arg2: i32) -> (i32, i32) {
    %c0_i32 = arith.constant 0 : i32
    return %arg0, %arg1 : i32, i32
  }
  func.func @transform_4(%arg0: i32, %arg1: i32, %arg2: i32) -> (i32, i32) {
    %c0_i32 = arith.constant 0 : i32
    return %arg0, %arg1 : i32, i32
  }
}

module attributes {stable_mosaic.version = 11 : i64} {
  func.func @_mm_bias_kernel(%arg0: i32, %arg1: i32, %arg2: i32, %arg3: memref<8x512xbf16, #tpu.memory_space<vmem>>, %arg4: memref<512x128xbf16, #tpu.memory_space<vmem>>, %arg5: memref<1x128xf32, #tpu.memory_space<vmem>>, %arg6: memref<8x128xbf16, #tpu.memory_space<vmem>>, %arg7: memref<8x128xf32, #tpu.memory_space<vmem>>) attributes {dimension_semantics = [#tpu.dimension_semantics<parallel>, #tpu.dimension_semantics<parallel>, #tpu.dimension_semantics<arbitrary>], iteration_bounds = array<i64: 1, 1, 3>, scalar_prefetch = 0 : i64, scratch_operands = 1 : i64, tpu.core_type = #tpu.core_type<tc>, window_params = [{transform_indices = @transform_0, window_bounds = array<i64: 8, 512>}, {transform_indices = @transform_1, window_bounds = array<i64: 512, 128>}, {transform_indices = @transform_2, window_bounds = array<i64: 1, 128>}, {transform_indices = @transform_3, window_bounds = array<i64: 8, 128>}]} {
    %c0_i32 = arith.constant 0 : i32
    %0 = arith.cmpi eq, %arg2, %c0_i32 : i32
    %1 = arith.extui %0 : i1 to i32
    %c0_i32_0 = arith.constant 0 : i32
    %2 = arith.cmpi ne, %1, %c0_i32_0 : i32
    scf.if %2 {
      %cst_9 = arith.constant 0.000000e+00 : f32
      %12 = vector.broadcast %cst_9 : f32 to vector<8x128xf32>
      %c0_10 = arith.constant 0 : index
      %c0_11 = arith.constant 0 : index
      %13 = vector.load %arg7[%c0_10, %c0_11] : memref<8x128xf32, #tpu.memory_space<vmem>>, vector<8x128xf32>
      tpu.vector_store %arg7[%c0_10, %c0_11], %12 {strides = array<i32>} : memref<8x128xf32, #tpu.memory_space<vmem>>, vector<8x128xf32>,
    } else {
    }
    %c0 = arith.constant 0 : index
    %c0_1 = arith.constant 0 : index
    %3 = vector.load %arg7[%c0, %c0_1] : memref<8x128xf32, #tpu.memory_space<vmem>>, vector<8x128xf32>
    %c0_2 = arith.constant 0 : index
    %c0_3 = arith.constant 0 : index
    %4 = vector.load %arg3[%c0_2, %c0_3] : memref<8x512xbf16, #tpu.memory_space<vmem>>, vector<8x512xbf16>
    %c0_4 = arith.constant 0 : index
    %c0_5 = arith.constant 0 : index
    %5 = vector.load %arg4[%c0_4, %c0_5] : memref<512x128xbf16, #tpu.memory_space<vmem>>, vector<512x128xbf16>
    %cst = arith.constant dense<0.000000e+00> : vector<8x128xf32>
    %6 = tpu.matmul %4, %5, %cst {dimension_numbers = #tpu.dot_dimension_numbers<[1], [0], [0], [1], [0, 0, 1, 1], [], []>} : vector<8x512xbf16>, vector<512x128xbf16>, vector<8x128xf32> -> vector<8x128xf32>
    %7 = arith.addf %3, %6 : vector<8x128xf32>
    %c0_6 = arith.constant 0 : index
    %c0_7 = arith.constant 0 : index
    %8 = vector.load %arg7[%c0_6, %c0_7] : memref<8x128xf32, #tpu.memory_space<vmem>>, vector<8x128xf32>
    tpu.vector_store %arg7[%c0_6, %c0_7], %7 {strides = array<i32>} : memref<8x128xf32, #tpu.memory_space<vmem>>, vector<8x128xf32>,
    %c2_i32 = arith.constant 2 : i32
    %9 = arith.cmpi eq, %arg2, %c2_i32 : i32
    %10 = arith.extui %9 : i1 to i32
    %c0_i32_8 = arith.constant 0 : i32
    %11 = arith.cmpi ne, %10, %c0_i32_8 : i32
    scf.if %11 {
      %c0_9 = arith.constant 0 : index
      %c0_10 = arith.constant 0 : index
      %12 = vector.load %arg7[%c0_9, %c0_10] : memref<8x128xf32, #tpu.memory_space<vmem>>, vector<8x128xf32>
      %c0_11 = arith.constant 0 : index
      %c0_12 = arith.constant 0 : index
      %13 = vector.load %arg5[%c0_11, %c0_12] : memref<1x128xf32, #tpu.memory_space<vmem>>, vector<1x128xf32>
      %14 = vector.broadcast %13 : vector<1x128xf32> to vector<8x128xf32>
      %15 = arith.addf %12, %14 : vector<8x128xf32>
      %cst_13 = arith.constant 0.000000e+00 : f32
      %16 = vector.broadcast %cst_13 : f32 to vector<8x128xf32>
      %17 = arith.maximumf %15, %16 : vector<8x128xf32>
      %18 = arith.truncf %17 : vector<8x128xf32> to vector<8x128xbf16>
      %c0_14 = arith.constant 0 : index
      %c0_15 = arith.constant 0 : index
      %19 = vector.load %arg6[%c0_14, %c0_15] : memref<8x128xbf16, #tpu.memory_space<vmem>>, vector<8x128xbf16>
      tpu.vector_store %arg6[%c0_14, %c0_15], %18 {strides = array<i32>} : memref<8x128xbf16, #tpu.memory_space<vmem>>, vector<8x128xbf16>,
    } else {
    }
    return
  }
  func.func @transform_0(%arg0: i32, %arg1: i32, %arg2: i32) -> (i32, i32) {
    %c0_i32 = arith.constant 0 : i32
    return %arg0, %arg2 : i32, i32
  }
  func.func @transform_1(%arg0: i32, %arg1: i32, %arg2: i32) -> (i32, i32) {
    %c0_i32 = arith.constant 0 : i32
    return %arg2, %arg1 : i32, i32
  }
  func.func @transform_2(%arg0: i32, %arg1: i32, %arg2: i32) -> (i32, i32) {
    %c0_i32 = arith.constant 0 : i32
    %c0_i32_0 = arith.constant 0 : i32
    return %c0_i32, %arg1 : i32, i32
  }
  func.func @transform_3(%arg0: i32, %arg1: i32, %arg2: i32) -> (i32, i32) {
    %c0_i32 = arith.constant 0 : i32
    return %arg0, %arg1 : i32, i32
  }
}

module attributes {stable_mosaic.version = 11 : i64} {
  func.func @_mm_bias_kernel(%arg0: i32, %arg1: i32, %arg2: i32, %arg3: memref<8x128xbf16, #tpu.memory_space<vmem>>, %arg4: memref<128x256xbf16, #tpu.memory_space<vmem>>, %arg5: memref<1x256xf32, #tpu.memory_space<vmem>>, %arg6: memref<8x256xbf16, #tpu.memory_space<vmem>>, %arg7: memref<8x256xf32, #tpu.memory_space<vmem>>) attributes {dimension_semantics = [#tpu.dimension_semantics<parallel>, #tpu.dimension_semantics<parallel>, #tpu.dimension_semantics<arbitrary>], iteration_bounds = array<i64: 1, 1, 1>, scalar_prefetch = 0 : i64, scratch_operands = 1 : i64, tpu.core_type = #tpu.core_type<tc>, window_params = [{transform_indices = @transform_0, window_bounds = array<i64: 8, 128>}, {transform_indices = @transform_1, window_bounds = array<i64: 128, 256>}, {transform_indices = @transform_2, window_bounds = array<i64: 1, 256>}, {transform_indices = @transform_3, window_bounds = array<i64: 8, 256>}]} {
    %c0_i32 = arith.constant 0 : i32
    %0 = arith.cmpi eq, %arg2, %c0_i32 : i32
    %1 = arith.extui %0 : i1 to i32
    %c0_i32_0 = arith.constant 0 : i32
    %2 = arith.cmpi ne, %1, %c0_i32_0 : i32
    scf.if %2 {
      %cst_10 = arith.constant 0.000000e+00 : f32
      %12 = vector.broadcast %cst_10 : f32 to vector<8x256xf32>
      %c0_11 = arith.constant 0 : index
      %c0_12 = arith.constant 0 : index
      %13 = vector.load %arg7[%c0_11, %c0_12] : memref<8x256xf32, #tpu.memory_space<vmem>>, vector<8x256xf32>
      tpu.vector_store %arg7[%c0_11, %c0_12], %12 {strides = array<i32>} : memref<8x256xf32, #tpu.memory_space<vmem>>, vector<8x256xf32>,
    } else {
    }
    %c0 = arith.constant 0 : index
    %c0_1 = arith.constant 0 : index
    %3 = vector.load %arg7[%c0, %c0_1] : memref<8x256xf32, #tpu.memory_space<vmem>>, vector<8x256xf32>
    %c0_2 = arith.constant 0 : index
    %c0_3 = arith.constant 0 : index
    %4 = vector.load %arg3[%c0_2, %c0_3] : memref<8x128xbf16, #tpu.memory_space<vmem>>, vector<8x128xbf16>
    %c0_4 = arith.constant 0 : index
    %c0_5 = arith.constant 0 : index
    %5 = vector.load %arg4[%c0_4, %c0_5] : memref<128x256xbf16, #tpu.memory_space<vmem>>, vector<128x256xbf16>
    %cst = arith.constant dense<0.000000e+00> : vector<8x256xf32>
    %6 = tpu.matmul %4, %5, %cst {dimension_numbers = #tpu.dot_dimension_numbers<[1], [0], [0], [1], [0, 0, 1, 1], [], []>} : vector<8x128xbf16>, vector<128x256xbf16>, vector<8x256xf32> -> vector<8x256xf32>
    %7 = arith.addf %3, %6 : vector<8x256xf32>
    %c0_6 = arith.constant 0 : index
    %c0_7 = arith.constant 0 : index
    %8 = vector.load %arg7[%c0_6, %c0_7] : memref<8x256xf32, #tpu.memory_space<vmem>>, vector<8x256xf32>
    tpu.vector_store %arg7[%c0_6, %c0_7], %7 {strides = array<i32>} : memref<8x256xf32, #tpu.memory_space<vmem>>, vector<8x256xf32>,
    %c0_i32_8 = arith.constant 0 : i32
    %9 = arith.cmpi eq, %arg2, %c0_i32_8 : i32
    %10 = arith.extui %9 : i1 to i32
    %c0_i32_9 = arith.constant 0 : i32
    %11 = arith.cmpi ne, %10, %c0_i32_9 : i32
    scf.if %11 {
      %c0_10 = arith.constant 0 : index
      %c0_11 = arith.constant 0 : index
      %12 = vector.load %arg7[%c0_10, %c0_11] : memref<8x256xf32, #tpu.memory_space<vmem>>, vector<8x256xf32>
      %c0_12 = arith.constant 0 : index
      %c0_13 = arith.constant 0 : index
      %13 = vector.load %arg5[%c0_12, %c0_13] : memref<1x256xf32, #tpu.memory_space<vmem>>, vector<1x256xf32>
      %14 = vector.broadcast %13 : vector<1x256xf32> to vector<8x256xf32>
      %15 = arith.addf %12, %14 : vector<8x256xf32>
      %16 = arith.truncf %15 : vector<8x256xf32> to vector<8x256xbf16>
      %c0_14 = arith.constant 0 : index
      %c0_15 = arith.constant 0 : index
      %17 = vector.load %arg6[%c0_14, %c0_15] : memref<8x256xbf16, #tpu.memory_space<vmem>>, vector<8x256xbf16>
      tpu.vector_store %arg6[%c0_14, %c0_15], %16 {strides = array<i32>} : memref<8x256xbf16, #tpu.memory_space<vmem>>, vector<8x256xbf16>,
    } else {
    }
    return
  }
  func.func @transform_0(%arg0: i32, %arg1: i32, %arg2: i32) -> (i32, i32) {
    %c0_i32 = arith.constant 0 : i32
    return %arg0, %arg2 : i32, i32
  }
  func.func @transform_1(%arg0: i32, %arg1: i32, %arg2: i32) -> (i32, i32) {
    %c0_i32 = arith.constant 0 : i32
    return %arg2, %arg1 : i32, i32
  }
  func.func @transform_2(%arg0: i32, %arg1: i32, %arg2: i32) -> (i32, i32) {
    %c0_i32 = arith.constant 0 : i32
    %c0_i32_0 = arith.constant 0 : i32
    return %c0_i32, %arg1 : i32, i32
  }
  func.func @transform_3(%arg0: i32, %arg1: i32, %arg2: i32) -> (i32, i32) {
    %c0_i32 = arith.constant 0 : i32
    return %arg0, %arg1 : i32, i32
  }
}

module attributes {stable_mosaic.version = 11 : i64} {
  func.func @_mm_bias_kernel(%arg0: i32, %arg1: i32, %arg2: i32, %arg3: memref<8x512xbf16, #tpu.memory_space<vmem>>, %arg4: memref<512x256xbf16, #tpu.memory_space<vmem>>, %arg5: memref<1x256xf32, #tpu.memory_space<vmem>>, %arg6: memref<8x256xbf16, #tpu.memory_space<vmem>>, %arg7: memref<8x256xf32, #tpu.memory_space<vmem>>) attributes {dimension_semantics = [#tpu.dimension_semantics<parallel>, #tpu.dimension_semantics<parallel>, #tpu.dimension_semantics<arbitrary>], iteration_bounds = array<i64: 1, 1, 3>, scalar_prefetch = 0 : i64, scratch_operands = 1 : i64, tpu.core_type = #tpu.core_type<tc>, window_params = [{transform_indices = @transform_0, window_bounds = array<i64: 8, 512>}, {transform_indices = @transform_1, window_bounds = array<i64: 512, 256>}, {transform_indices = @transform_2, window_bounds = array<i64: 1, 256>}, {transform_indices = @transform_3, window_bounds = array<i64: 8, 256>}]} {
    %c0_i32 = arith.constant 0 : i32
    %0 = arith.cmpi eq, %arg2, %c0_i32 : i32
    %1 = arith.extui %0 : i1 to i32
    %c0_i32_0 = arith.constant 0 : i32
    %2 = arith.cmpi ne, %1, %c0_i32_0 : i32
    scf.if %2 {
      %cst_9 = arith.constant 0.000000e+00 : f32
      %12 = vector.broadcast %cst_9 : f32 to vector<8x256xf32>
      %c0_10 = arith.constant 0 : index
      %c0_11 = arith.constant 0 : index
      %13 = vector.load %arg7[%c0_10, %c0_11] : memref<8x256xf32, #tpu.memory_space<vmem>>, vector<8x256xf32>
      tpu.vector_store %arg7[%c0_10, %c0_11], %12 {strides = array<i32>} : memref<8x256xf32, #tpu.memory_space<vmem>>, vector<8x256xf32>,
    } else {
    }
    %c0 = arith.constant 0 : index
    %c0_1 = arith.constant 0 : index
    %3 = vector.load %arg7[%c0, %c0_1] : memref<8x256xf32, #tpu.memory_space<vmem>>, vector<8x256xf32>
    %c0_2 = arith.constant 0 : index
    %c0_3 = arith.constant 0 : index
    %4 = vector.load %arg3[%c0_2, %c0_3] : memref<8x512xbf16, #tpu.memory_space<vmem>>, vector<8x512xbf16>
    %c0_4 = arith.constant 0 : index
    %c0_5 = arith.constant 0 : index
    %5 = vector.load %arg4[%c0_4, %c0_5] : memref<512x256xbf16, #tpu.memory_space<vmem>>, vector<512x256xbf16>
    %cst = arith.constant dense<0.000000e+00> : vector<8x256xf32>
    %6 = tpu.matmul %4, %5, %cst {dimension_numbers = #tpu.dot_dimension_numbers<[1], [0], [0], [1], [0, 0, 1, 1], [], []>} : vector<8x512xbf16>, vector<512x256xbf16>, vector<8x256xf32> -> vector<8x256xf32>
    %7 = arith.addf %3, %6 : vector<8x256xf32>
    %c0_6 = arith.constant 0 : index
    %c0_7 = arith.constant 0 : index
    %8 = vector.load %arg7[%c0_6, %c0_7] : memref<8x256xf32, #tpu.memory_space<vmem>>, vector<8x256xf32>
    tpu.vector_store %arg7[%c0_6, %c0_7], %7 {strides = array<i32>} : memref<8x256xf32, #tpu.memory_space<vmem>>, vector<8x256xf32>,
    %c2_i32 = arith.constant 2 : i32
    %9 = arith.cmpi eq, %arg2, %c2_i32 : i32
    %10 = arith.extui %9 : i1 to i32
    %c0_i32_8 = arith.constant 0 : i32
    %11 = arith.cmpi ne, %10, %c0_i32_8 : i32
    scf.if %11 {
      %c0_9 = arith.constant 0 : index
      %c0_10 = arith.constant 0 : index
      %12 = vector.load %arg7[%c0_9, %c0_10] : memref<8x256xf32, #tpu.memory_space<vmem>>, vector<8x256xf32>
      %c0_11 = arith.constant 0 : index
      %c0_12 = arith.constant 0 : index
      %13 = vector.load %arg5[%c0_11, %c0_12] : memref<1x256xf32, #tpu.memory_space<vmem>>, vector<1x256xf32>
      %14 = vector.broadcast %13 : vector<1x256xf32> to vector<8x256xf32>
      %15 = arith.addf %12, %14 : vector<8x256xf32>
      %cst_13 = arith.constant 0.000000e+00 : f32
      %16 = vector.broadcast %cst_13 : f32 to vector<8x256xf32>
      %17 = arith.maximumf %15, %16 : vector<8x256xf32>
      %18 = arith.truncf %17 : vector<8x256xf32> to vector<8x256xbf16>
      %c0_14 = arith.constant 0 : index
      %c0_15 = arith.constant 0 : index
      %19 = vector.load %arg6[%c0_14, %c0_15] : memref<8x256xbf16, #tpu.memory_space<vmem>>, vector<8x256xbf16>
      tpu.vector_store %arg6[%c0_14, %c0_15], %18 {strides = array<i32>} : memref<8x256xbf16, #tpu.memory_space<vmem>>, vector<8x256xbf16>,
    } else {
    }
    return
  }
  func.func @transform_0(%arg0: i32, %arg1: i32, %arg2: i32) -> (i32, i32) {
    %c0_i32 = arith.constant 0 : i32
    return %arg0, %arg2 : i32, i32
  }
  func.func @transform_1(%arg0: i32, %arg1: i32, %arg2: i32) -> (i32, i32) {
    %c0_i32 = arith.constant 0 : i32
    return %arg2, %arg1 : i32, i32
  }
  func.func @transform_2(%arg0: i32, %arg1: i32, %arg2: i32) -> (i32, i32) {
    %c0_i32 = arith.constant 0 : i32
    %c0_i32_0 = arith.constant 0 : i32
    return %c0_i32, %arg1 : i32, i32
  }
  func.func @transform_3(%arg0: i32, %arg1: i32, %arg2: i32) -> (i32, i32) {
    %c0_i32 = arith.constant 0 : i32
    return %arg0, %arg1 : i32, i32
  }
}

module attributes {stable_mosaic.version = 11 : i64} {
  func.func @_mm_bias_res_kernel(%arg0: i32, %arg1: i32, %arg2: i32, %arg3: memref<8x512xbf16, #tpu.memory_space<vmem>>, %arg4: memref<512x256xbf16, #tpu.memory_space<vmem>>, %arg5: memref<1x256xf32, #tpu.memory_space<vmem>>, %arg6: memref<8x256xbf16, #tpu.memory_space<vmem>>, %arg7: memref<8x256xbf16, #tpu.memory_space<vmem>>, %arg8: memref<8x256xf32, #tpu.memory_space<vmem>>) attributes {dimension_semantics = [#tpu.dimension_semantics<parallel>, #tpu.dimension_semantics<parallel>, #tpu.dimension_semantics<arbitrary>], iteration_bounds = array<i64: 1, 1, 5>, scalar_prefetch = 0 : i64, scratch_operands = 1 : i64, tpu.core_type = #tpu.core_type<tc>, window_params = [{transform_indices = @transform_0, window_bounds = array<i64: 8, 512>}, {transform_indices = @transform_1, window_bounds = array<i64: 512, 256>}, {transform_indices = @transform_2, window_bounds = array<i64: 1, 256>}, {transform_indices = @transform_3, window_bounds = array<i64: 8, 256>}, {transform_indices = @transform_4, window_bounds = array<i64: 8, 256>}]} {
    %c0_i32 = arith.constant 0 : i32
    %0 = arith.cmpi eq, %arg2, %c0_i32 : i32
    %1 = arith.extui %0 : i1 to i32
    %c0_i32_0 = arith.constant 0 : i32
    %2 = arith.cmpi ne, %1, %c0_i32_0 : i32
    scf.if %2 {
      %cst_9 = arith.constant 0.000000e+00 : f32
      %12 = vector.broadcast %cst_9 : f32 to vector<8x256xf32>
      %c0_10 = arith.constant 0 : index
      %c0_11 = arith.constant 0 : index
      %13 = vector.load %arg8[%c0_10, %c0_11] : memref<8x256xf32, #tpu.memory_space<vmem>>, vector<8x256xf32>
      tpu.vector_store %arg8[%c0_10, %c0_11], %12 {strides = array<i32>} : memref<8x256xf32, #tpu.memory_space<vmem>>, vector<8x256xf32>,
    } else {
    }
    %c0 = arith.constant 0 : index
    %c0_1 = arith.constant 0 : index
    %3 = vector.load %arg8[%c0, %c0_1] : memref<8x256xf32, #tpu.memory_space<vmem>>, vector<8x256xf32>
    %c0_2 = arith.constant 0 : index
    %c0_3 = arith.constant 0 : index
    %4 = vector.load %arg3[%c0_2, %c0_3] : memref<8x512xbf16, #tpu.memory_space<vmem>>, vector<8x512xbf16>
    %c0_4 = arith.constant 0 : index
    %c0_5 = arith.constant 0 : index
    %5 = vector.load %arg4[%c0_4, %c0_5] : memref<512x256xbf16, #tpu.memory_space<vmem>>, vector<512x256xbf16>
    %cst = arith.constant dense<0.000000e+00> : vector<8x256xf32>
    %6 = tpu.matmul %4, %5, %cst {dimension_numbers = #tpu.dot_dimension_numbers<[1], [0], [0], [1], [0, 0, 1, 1], [], []>} : vector<8x512xbf16>, vector<512x256xbf16>, vector<8x256xf32> -> vector<8x256xf32>
    %7 = arith.addf %3, %6 : vector<8x256xf32>
    %c0_6 = arith.constant 0 : index
    %c0_7 = arith.constant 0 : index
    %8 = vector.load %arg8[%c0_6, %c0_7] : memref<8x256xf32, #tpu.memory_space<vmem>>, vector<8x256xf32>
    tpu.vector_store %arg8[%c0_6, %c0_7], %7 {strides = array<i32>} : memref<8x256xf32, #tpu.memory_space<vmem>>, vector<8x256xf32>,
    %c4_i32 = arith.constant 4 : i32
    %9 = arith.cmpi eq, %arg2, %c4_i32 : i32
    %10 = arith.extui %9 : i1 to i32
    %c0_i32_8 = arith.constant 0 : i32
    %11 = arith.cmpi ne, %10, %c0_i32_8 : i32
    scf.if %11 {
      %c0_9 = arith.constant 0 : index
      %c0_10 = arith.constant 0 : index
      %12 = vector.load %arg8[%c0_9, %c0_10] : memref<8x256xf32, #tpu.memory_space<vmem>>, vector<8x256xf32>
      %c0_11 = arith.constant 0 : index
      %c0_12 = arith.constant 0 : index
      %13 = vector.load %arg5[%c0_11, %c0_12] : memref<1x256xf32, #tpu.memory_space<vmem>>, vector<1x256xf32>
      %14 = vector.broadcast %13 : vector<1x256xf32> to vector<8x256xf32>
      %15 = arith.addf %12, %14 : vector<8x256xf32>
      %c0_13 = arith.constant 0 : index
      %c0_14 = arith.constant 0 : index
      %16 = vector.load %arg6[%c0_13, %c0_14] : memref<8x256xbf16, #tpu.memory_space<vmem>>, vector<8x256xbf16>
      %17 = arith.extf %16 : vector<8x256xbf16> to vector<8x256xf32>
      %18 = arith.addf %15, %17 : vector<8x256xf32>
      %cst_15 = arith.constant 0.000000e+00 : f32
      %19 = vector.broadcast %cst_15 : f32 to vector<8x256xf32>
      %20 = arith.maximumf %18, %19 : vector<8x256xf32>
      %21 = arith.truncf %20 : vector<8x256xf32> to vector<8x256xbf16>
      %c0_16 = arith.constant 0 : index
      %c0_17 = arith.constant 0 : index
      %22 = vector.load %arg7[%c0_16, %c0_17] : memref<8x256xbf16, #tpu.memory_space<vmem>>, vector<8x256xbf16>
      tpu.vector_store %arg7[%c0_16, %c0_17], %21 {strides = array<i32>} : memref<8x256xbf16, #tpu.memory_space<vmem>>, vector<8x256xbf16>,
    } else {
    }
    return
  }
  func.func @transform_0(%arg0: i32, %arg1: i32, %arg2: i32) -> (i32, i32) {
    %c0_i32 = arith.constant 0 : i32
    return %arg0, %arg2 : i32, i32
  }
  func.func @transform_1(%arg0: i32, %arg1: i32, %arg2: i32) -> (i32, i32) {
    %c0_i32 = arith.constant 0 : i32
    return %arg2, %arg1 : i32, i32
  }
  func.func @transform_2(%arg0: i32, %arg1: i32, %arg2: i32) -> (i32, i32) {
    %c0_i32 = arith.constant 0 : i32
    %c0_i32_0 = arith.constant 0 : i32
    return %c0_i32, %arg1 : i32, i32
  }
  func.func @transform_3(%arg0: i32, %arg1: i32, %arg2: i32) -> (i32, i32) {
    %c0_i32 = arith.constant 0 : i32
    return %arg0, %arg1 : i32, i32
  }
  func.func @transform_4(%arg0: i32, %arg1: i32, %arg2: i32) -> (i32, i32) {
    %c0_i32 = arith.constant 0 : i32
    return %arg0, %arg1 : i32, i32
  }
}

module attributes {stable_mosaic.version = 11 : i64} {
  func.func @_mm_bias_kernel(%arg0: i32, %arg1: i32, %arg2: i32, %arg3: memref<8x512xbf16, #tpu.memory_space<vmem>>, %arg4: memref<512x256xbf16, #tpu.memory_space<vmem>>, %arg5: memref<1x256xf32, #tpu.memory_space<vmem>>, %arg6: memref<8x256xbf16, #tpu.memory_space<vmem>>, %arg7: memref<8x256xf32, #tpu.memory_space<vmem>>) attributes {dimension_semantics = [#tpu.dimension_semantics<parallel>, #tpu.dimension_semantics<parallel>, #tpu.dimension_semantics<arbitrary>], iteration_bounds = array<i64: 1, 1, 5>, scalar_prefetch = 0 : i64, scratch_operands = 1 : i64, tpu.core_type = #tpu.core_type<tc>, window_params = [{transform_indices = @transform_0, window_bounds = array<i64: 8, 512>}, {transform_indices = @transform_1, window_bounds = array<i64: 512, 256>}, {transform_indices = @transform_2, window_bounds = array<i64: 1, 256>}, {transform_indices = @transform_3, window_bounds = array<i64: 8, 256>}]} {
    %c0_i32 = arith.constant 0 : i32
    %0 = arith.cmpi eq, %arg2, %c0_i32 : i32
    %1 = arith.extui %0 : i1 to i32
    %c0_i32_0 = arith.constant 0 : i32
    %2 = arith.cmpi ne, %1, %c0_i32_0 : i32
    scf.if %2 {
      %cst_9 = arith.constant 0.000000e+00 : f32
      %12 = vector.broadcast %cst_9 : f32 to vector<8x256xf32>
      %c0_10 = arith.constant 0 : index
      %c0_11 = arith.constant 0 : index
      %13 = vector.load %arg7[%c0_10, %c0_11] : memref<8x256xf32, #tpu.memory_space<vmem>>, vector<8x256xf32>
      tpu.vector_store %arg7[%c0_10, %c0_11], %12 {strides = array<i32>} : memref<8x256xf32, #tpu.memory_space<vmem>>, vector<8x256xf32>,
    } else {
    }
    %c0 = arith.constant 0 : index
    %c0_1 = arith.constant 0 : index
    %3 = vector.load %arg7[%c0, %c0_1] : memref<8x256xf32, #tpu.memory_space<vmem>>, vector<8x256xf32>
    %c0_2 = arith.constant 0 : index
    %c0_3 = arith.constant 0 : index
    %4 = vector.load %arg3[%c0_2, %c0_3] : memref<8x512xbf16, #tpu.memory_space<vmem>>, vector<8x512xbf16>
    %c0_4 = arith.constant 0 : index
    %c0_5 = arith.constant 0 : index
    %5 = vector.load %arg4[%c0_4, %c0_5] : memref<512x256xbf16, #tpu.memory_space<vmem>>, vector<512x256xbf16>
    %cst = arith.constant dense<0.000000e+00> : vector<8x256xf32>
    %6 = tpu.matmul %4, %5, %cst {dimension_numbers = #tpu.dot_dimension_numbers<[1], [0], [0], [1], [0, 0, 1, 1], [], []>} : vector<8x512xbf16>, vector<512x256xbf16>, vector<8x256xf32> -> vector<8x256xf32>
    %7 = arith.addf %3, %6 : vector<8x256xf32>
    %c0_6 = arith.constant 0 : index
    %c0_7 = arith.constant 0 : index
    %8 = vector.load %arg7[%c0_6, %c0_7] : memref<8x256xf32, #tpu.memory_space<vmem>>, vector<8x256xf32>
    tpu.vector_store %arg7[%c0_6, %c0_7], %7 {strides = array<i32>} : memref<8x256xf32, #tpu.memory_space<vmem>>, vector<8x256xf32>,
    %c4_i32 = arith.constant 4 : i32
    %9 = arith.cmpi eq, %arg2, %c4_i32 : i32
    %10 = arith.extui %9 : i1 to i32
    %c0_i32_8 = arith.constant 0 : i32
    %11 = arith.cmpi ne, %10, %c0_i32_8 : i32
    scf.if %11 {
      %c0_9 = arith.constant 0 : index
      %c0_10 = arith.constant 0 : index
      %12 = vector.load %arg7[%c0_9, %c0_10] : memref<8x256xf32, #tpu.memory_space<vmem>>, vector<8x256xf32>
      %c0_11 = arith.constant 0 : index
      %c0_12 = arith.constant 0 : index
      %13 = vector.load %arg5[%c0_11, %c0_12] : memref<1x256xf32, #tpu.memory_space<vmem>>, vector<1x256xf32>
      %14 = vector.broadcast %13 : vector<1x256xf32> to vector<8x256xf32>
      %15 = arith.addf %12, %14 : vector<8x256xf32>
      %cst_13 = arith.constant 0.000000e+00 : f32
      %16 = vector.broadcast %cst_13 : f32 to vector<8x256xf32>
      %17 = arith.maximumf %15, %16 : vector<8x256xf32>
      %18 = arith.truncf %17 : vector<8x256xf32> to vector<8x256xbf16>
      %c0_14 = arith.constant 0 : index
      %c0_15 = arith.constant 0 : index
      %19 = vector.load %arg6[%c0_14, %c0_15] : memref<8x256xbf16, #tpu.memory_space<vmem>>, vector<8x256xbf16>
      tpu.vector_store %arg6[%c0_14, %c0_15], %18 {strides = array<i32>} : memref<8x256xbf16, #tpu.memory_space<vmem>>, vector<8x256xbf16>,
    } else {
    }
    return
  }
  func.func @transform_0(%arg0: i32, %arg1: i32, %arg2: i32) -> (i32, i32) {
    %c0_i32 = arith.constant 0 : i32
    return %arg0, %arg2 : i32, i32
  }
  func.func @transform_1(%arg0: i32, %arg1: i32, %arg2: i32) -> (i32, i32) {
    %c0_i32 = arith.constant 0 : i32
    return %arg2, %arg1 : i32, i32
  }
  func.func @transform_2(%arg0: i32, %arg1: i32, %arg2: i32) -> (i32, i32) {
    %c0_i32 = arith.constant 0 : i32
    %c0_i32_0 = arith.constant 0 : i32
    return %c0_i32, %arg1 : i32, i32
  }
  func.func @transform_3(%arg0: i32, %arg1: i32, %arg2: i32) -> (i32, i32) {
    %c0_i32 = arith.constant 0 : i32
    return %arg0, %arg1 : i32, i32
  }
}

module attributes {stable_mosaic.version = 11 : i64} {
  func.func @_mm_bias_kernel(%arg0: i32, %arg1: i32, %arg2: i32, %arg3: memref<8x256xbf16, #tpu.memory_space<vmem>>, %arg4: memref<256x512xbf16, #tpu.memory_space<vmem>>, %arg5: memref<1x512xf32, #tpu.memory_space<vmem>>, %arg6: memref<8x512xbf16, #tpu.memory_space<vmem>>, %arg7: memref<8x512xf32, #tpu.memory_space<vmem>>) attributes {dimension_semantics = [#tpu.dimension_semantics<parallel>, #tpu.dimension_semantics<parallel>, #tpu.dimension_semantics<arbitrary>], iteration_bounds = array<i64: 1, 1, 1>, scalar_prefetch = 0 : i64, scratch_operands = 1 : i64, tpu.core_type = #tpu.core_type<tc>, window_params = [{transform_indices = @transform_0, window_bounds = array<i64: 8, 256>}, {transform_indices = @transform_1, window_bounds = array<i64: 256, 512>}, {transform_indices = @transform_2, window_bounds = array<i64: 1, 512>}, {transform_indices = @transform_3, window_bounds = array<i64: 8, 512>}]} {
    %c0_i32 = arith.constant 0 : i32
    %0 = arith.cmpi eq, %arg2, %c0_i32 : i32
    %1 = arith.extui %0 : i1 to i32
    %c0_i32_0 = arith.constant 0 : i32
    %2 = arith.cmpi ne, %1, %c0_i32_0 : i32
    scf.if %2 {
      %cst_10 = arith.constant 0.000000e+00 : f32
      %12 = vector.broadcast %cst_10 : f32 to vector<8x512xf32>
      %c0_11 = arith.constant 0 : index
      %c0_12 = arith.constant 0 : index
      %13 = vector.load %arg7[%c0_11, %c0_12] : memref<8x512xf32, #tpu.memory_space<vmem>>, vector<8x512xf32>
      tpu.vector_store %arg7[%c0_11, %c0_12], %12 {strides = array<i32>} : memref<8x512xf32, #tpu.memory_space<vmem>>, vector<8x512xf32>,
    } else {
    }
    %c0 = arith.constant 0 : index
    %c0_1 = arith.constant 0 : index
    %3 = vector.load %arg7[%c0, %c0_1] : memref<8x512xf32, #tpu.memory_space<vmem>>, vector<8x512xf32>
    %c0_2 = arith.constant 0 : index
    %c0_3 = arith.constant 0 : index
    %4 = vector.load %arg3[%c0_2, %c0_3] : memref<8x256xbf16, #tpu.memory_space<vmem>>, vector<8x256xbf16>
    %c0_4 = arith.constant 0 : index
    %c0_5 = arith.constant 0 : index
    %5 = vector.load %arg4[%c0_4, %c0_5] : memref<256x512xbf16, #tpu.memory_space<vmem>>, vector<256x512xbf16>
    %cst = arith.constant dense<0.000000e+00> : vector<8x512xf32>
    %6 = tpu.matmul %4, %5, %cst {dimension_numbers = #tpu.dot_dimension_numbers<[1], [0], [0], [1], [0, 0, 1, 1], [], []>} : vector<8x256xbf16>, vector<256x512xbf16>, vector<8x512xf32> -> vector<8x512xf32>
    %7 = arith.addf %3, %6 : vector<8x512xf32>
    %c0_6 = arith.constant 0 : index
    %c0_7 = arith.constant 0 : index
    %8 = vector.load %arg7[%c0_6, %c0_7] : memref<8x512xf32, #tpu.memory_space<vmem>>, vector<8x512xf32>
    tpu.vector_store %arg7[%c0_6, %c0_7], %7 {strides = array<i32>} : memref<8x512xf32, #tpu.memory_space<vmem>>, vector<8x512xf32>,
    %c0_i32_8 = arith.constant 0 : i32
    %9 = arith.cmpi eq, %arg2, %c0_i32_8 : i32
    %10 = arith.extui %9 : i1 to i32
    %c0_i32_9 = arith.constant 0 : i32
    %11 = arith.cmpi ne, %10, %c0_i32_9 : i32
    scf.if %11 {
      %c0_10 = arith.constant 0 : index
      %c0_11 = arith.constant 0 : index
      %12 = vector.load %arg7[%c0_10, %c0_11] : memref<8x512xf32, #tpu.memory_space<vmem>>, vector<8x512xf32>
      %c0_12 = arith.constant 0 : index
      %c0_13 = arith.constant 0 : index
      %13 = vector.load %arg5[%c0_12, %c0_13] : memref<1x512xf32, #tpu.memory_space<vmem>>, vector<1x512xf32>
      %14 = vector.broadcast %13 : vector<1x512xf32> to vector<8x512xf32>
      %15 = arith.addf %12, %14 : vector<8x512xf32>
      %16 = arith.truncf %15 : vector<8x512xf32> to vector<8x512xbf16>
      %c0_14 = arith.constant 0 : index
      %c0_15 = arith.constant 0 : index
      %17 = vector.load %arg6[%c0_14, %c0_15] : memref<8x512xbf16, #tpu.memory_space<vmem>>, vector<8x512xbf16>
      tpu.vector_store %arg6[%c0_14, %c0_15], %16 {strides = array<i32>} : memref<8x512xbf16, #tpu.memory_space<vmem>>, vector<8x512xbf16>,
    } else {
    }
    return
  }
  func.func @transform_0(%arg0: i32, %arg1: i32, %arg2: i32) -> (i32, i32) {
    %c0_i32 = arith.constant 0 : i32
    return %arg0, %arg2 : i32, i32
  }
  func.func @transform_1(%arg0: i32, %arg1: i32, %arg2: i32) -> (i32, i32) {
    %c0_i32 = arith.constant 0 : i32
    return %arg2, %arg1 : i32, i32
  }
  func.func @transform_2(%arg0: i32, %arg1: i32, %arg2: i32) -> (i32, i32) {
    %c0_i32 = arith.constant 0 : i32
    %c0_i32_0 = arith.constant 0 : i32
    return %c0_i32, %arg1 : i32, i32
  }
  func.func @transform_3(%arg0: i32, %arg1: i32, %arg2: i32) -> (i32, i32) {
    %c0_i32 = arith.constant 0 : i32
    return %arg0, %arg1 : i32, i32
  }
}

module attributes {stable_mosaic.version = 11 : i64} {
  func.func @_mm_bias_kernel(%arg0: i32, %arg1: i32, %arg2: i32, %arg3: memref<8x512xbf16, #tpu.memory_space<vmem>>, %arg4: memref<512x512xbf16, #tpu.memory_space<vmem>>, %arg5: memref<1x512xf32, #tpu.memory_space<vmem>>, %arg6: memref<8x512xbf16, #tpu.memory_space<vmem>>, %arg7: memref<8x512xf32, #tpu.memory_space<vmem>>) attributes {dimension_semantics = [#tpu.dimension_semantics<parallel>, #tpu.dimension_semantics<parallel>, #tpu.dimension_semantics<arbitrary>], iteration_bounds = array<i64: 1, 1, 5>, scalar_prefetch = 0 : i64, scratch_operands = 1 : i64, tpu.core_type = #tpu.core_type<tc>, window_params = [{transform_indices = @transform_0, window_bounds = array<i64: 8, 512>}, {transform_indices = @transform_1, window_bounds = array<i64: 512, 512>}, {transform_indices = @transform_2, window_bounds = array<i64: 1, 512>}, {transform_indices = @transform_3, window_bounds = array<i64: 8, 512>}]} {
    %c0_i32 = arith.constant 0 : i32
    %0 = arith.cmpi eq, %arg2, %c0_i32 : i32
    %1 = arith.extui %0 : i1 to i32
    %c0_i32_0 = arith.constant 0 : i32
    %2 = arith.cmpi ne, %1, %c0_i32_0 : i32
    scf.if %2 {
      %cst_9 = arith.constant 0.000000e+00 : f32
      %12 = vector.broadcast %cst_9 : f32 to vector<8x512xf32>
      %c0_10 = arith.constant 0 : index
      %c0_11 = arith.constant 0 : index
      %13 = vector.load %arg7[%c0_10, %c0_11] : memref<8x512xf32, #tpu.memory_space<vmem>>, vector<8x512xf32>
      tpu.vector_store %arg7[%c0_10, %c0_11], %12 {strides = array<i32>} : memref<8x512xf32, #tpu.memory_space<vmem>>, vector<8x512xf32>,
    } else {
    }
    %c0 = arith.constant 0 : index
    %c0_1 = arith.constant 0 : index
    %3 = vector.load %arg7[%c0, %c0_1] : memref<8x512xf32, #tpu.memory_space<vmem>>, vector<8x512xf32>
    %c0_2 = arith.constant 0 : index
    %c0_3 = arith.constant 0 : index
    %4 = vector.load %arg3[%c0_2, %c0_3] : memref<8x512xbf16, #tpu.memory_space<vmem>>, vector<8x512xbf16>
    %c0_4 = arith.constant 0 : index
    %c0_5 = arith.constant 0 : index
    %5 = vector.load %arg4[%c0_4, %c0_5] : memref<512x512xbf16, #tpu.memory_space<vmem>>, vector<512x512xbf16>
    %cst = arith.constant dense<0.000000e+00> : vector<8x512xf32>
    %6 = tpu.matmul %4, %5, %cst {dimension_numbers = #tpu.dot_dimension_numbers<[1], [0], [0], [1], [0, 0, 1, 1], [], []>} : vector<8x512xbf16>, vector<512x512xbf16>, vector<8x512xf32> -> vector<8x512xf32>
    %7 = arith.addf %3, %6 : vector<8x512xf32>
    %c0_6 = arith.constant 0 : index
    %c0_7 = arith.constant 0 : index
    %8 = vector.load %arg7[%c0_6, %c0_7] : memref<8x512xf32, #tpu.memory_space<vmem>>, vector<8x512xf32>
    tpu.vector_store %arg7[%c0_6, %c0_7], %7 {strides = array<i32>} : memref<8x512xf32, #tpu.memory_space<vmem>>, vector<8x512xf32>,
    %c4_i32 = arith.constant 4 : i32
    %9 = arith.cmpi eq, %arg2, %c4_i32 : i32
    %10 = arith.extui %9 : i1 to i32
    %c0_i32_8 = arith.constant 0 : i32
    %11 = arith.cmpi ne, %10, %c0_i32_8 : i32
    scf.if %11 {
      %c0_9 = arith.constant 0 : index
      %c0_10 = arith.constant 0 : index
      %12 = vector.load %arg7[%c0_9, %c0_10] : memref<8x512xf32, #tpu.memory_space<vmem>>, vector<8x512xf32>
      %c0_11 = arith.constant 0 : index
      %c0_12 = arith.constant 0 : index
      %13 = vector.load %arg5[%c0_11, %c0_12] : memref<1x512xf32, #tpu.memory_space<vmem>>, vector<1x512xf32>
      %14 = vector.broadcast %13 : vector<1x512xf32> to vector<8x512xf32>
      %15 = arith.addf %12, %14 : vector<8x512xf32>
      %cst_13 = arith.constant 0.000000e+00 : f32
      %16 = vector.broadcast %cst_13 : f32 to vector<8x512xf32>
      %17 = arith.maximumf %15, %16 : vector<8x512xf32>
      %18 = arith.truncf %17 : vector<8x512xf32> to vector<8x512xbf16>
      %c0_14 = arith.constant 0 : index
      %c0_15 = arith.constant 0 : index
      %19 = vector.load %arg6[%c0_14, %c0_15] : memref<8x512xbf16, #tpu.memory_space<vmem>>, vector<8x512xbf16>
      tpu.vector_store %arg6[%c0_14, %c0_15], %18 {strides = array<i32>} : memref<8x512xbf16, #tpu.memory_space<vmem>>, vector<8x512xbf16>,
    } else {
    }
    return
  }
  func.func @transform_0(%arg0: i32, %arg1: i32, %arg2: i32) -> (i32, i32) {
    %c0_i32 = arith.constant 0 : i32
    return %arg0, %arg2 : i32, i32
  }
  func.func @transform_1(%arg0: i32, %arg1: i32, %arg2: i32) -> (i32, i32) {
    %c0_i32 = arith.constant 0 : i32
    return %arg2, %arg1 : i32, i32
  }
  func.func @transform_2(%arg0: i32, %arg1: i32, %arg2: i32) -> (i32, i32) {
    %c0_i32 = arith.constant 0 : i32
    %c0_i32_0 = arith.constant 0 : i32
    return %c0_i32, %arg1 : i32, i32
  }
  func.func @transform_3(%arg0: i32, %arg1: i32, %arg2: i32) -> (i32, i32) {
    %c0_i32 = arith.constant 0 : i32
    return %arg0, %arg1 : i32, i32
  }
}

module attributes {stable_mosaic.version = 11 : i64} {
  func.func @_mm_bias_res_kernel(%arg0: i32, %arg1: i32, %arg2: i32, %arg3: memref<8x512xbf16, #tpu.memory_space<vmem>>, %arg4: memref<512x512xbf16, #tpu.memory_space<vmem>>, %arg5: memref<1x512xf32, #tpu.memory_space<vmem>>, %arg6: memref<8x512xbf16, #tpu.memory_space<vmem>>, %arg7: memref<8x512xbf16, #tpu.memory_space<vmem>>, %arg8: memref<8x512xf32, #tpu.memory_space<vmem>>) attributes {dimension_semantics = [#tpu.dimension_semantics<parallel>, #tpu.dimension_semantics<parallel>, #tpu.dimension_semantics<arbitrary>], iteration_bounds = array<i64: 1, 1, 9>, scalar_prefetch = 0 : i64, scratch_operands = 1 : i64, tpu.core_type = #tpu.core_type<tc>, window_params = [{transform_indices = @transform_0, window_bounds = array<i64: 8, 512>}, {transform_indices = @transform_1, window_bounds = array<i64: 512, 512>}, {transform_indices = @transform_2, window_bounds = array<i64: 1, 512>}, {transform_indices = @transform_3, window_bounds = array<i64: 8, 512>}, {transform_indices = @transform_4, window_bounds = array<i64: 8, 512>}]} {
    %c0_i32 = arith.constant 0 : i32
    %0 = arith.cmpi eq, %arg2, %c0_i32 : i32
    %1 = arith.extui %0 : i1 to i32
    %c0_i32_0 = arith.constant 0 : i32
    %2 = arith.cmpi ne, %1, %c0_i32_0 : i32
    scf.if %2 {
      %cst_9 = arith.constant 0.000000e+00 : f32
      %12 = vector.broadcast %cst_9 : f32 to vector<8x512xf32>
      %c0_10 = arith.constant 0 : index
      %c0_11 = arith.constant 0 : index
      %13 = vector.load %arg8[%c0_10, %c0_11] : memref<8x512xf32, #tpu.memory_space<vmem>>, vector<8x512xf32>
      tpu.vector_store %arg8[%c0_10, %c0_11], %12 {strides = array<i32>} : memref<8x512xf32, #tpu.memory_space<vmem>>, vector<8x512xf32>,
    } else {
    }
    %c0 = arith.constant 0 : index
    %c0_1 = arith.constant 0 : index
    %3 = vector.load %arg8[%c0, %c0_1] : memref<8x512xf32, #tpu.memory_space<vmem>>, vector<8x512xf32>
    %c0_2 = arith.constant 0 : index
    %c0_3 = arith.constant 0 : index
    %4 = vector.load %arg3[%c0_2, %c0_3] : memref<8x512xbf16, #tpu.memory_space<vmem>>, vector<8x512xbf16>
    %c0_4 = arith.constant 0 : index
    %c0_5 = arith.constant 0 : index
    %5 = vector.load %arg4[%c0_4, %c0_5] : memref<512x512xbf16, #tpu.memory_space<vmem>>, vector<512x512xbf16>
    %cst = arith.constant dense<0.000000e+00> : vector<8x512xf32>
    %6 = tpu.matmul %4, %5, %cst {dimension_numbers = #tpu.dot_dimension_numbers<[1], [0], [0], [1], [0, 0, 1, 1], [], []>} : vector<8x512xbf16>, vector<512x512xbf16>, vector<8x512xf32> -> vector<8x512xf32>
    %7 = arith.addf %3, %6 : vector<8x512xf32>
    %c0_6 = arith.constant 0 : index
    %c0_7 = arith.constant 0 : index
    %8 = vector.load %arg8[%c0_6, %c0_7] : memref<8x512xf32, #tpu.memory_space<vmem>>, vector<8x512xf32>
    tpu.vector_store %arg8[%c0_6, %c0_7], %7 {strides = array<i32>} : memref<8x512xf32, #tpu.memory_space<vmem>>, vector<8x512xf32>,
    %c8_i32 = arith.constant 8 : i32
    %9 = arith.cmpi eq, %arg2, %c8_i32 : i32
    %10 = arith.extui %9 : i1 to i32
    %c0_i32_8 = arith.constant 0 : i32
    %11 = arith.cmpi ne, %10, %c0_i32_8 : i32
    scf.if %11 {
      %c0_9 = arith.constant 0 : index
      %c0_10 = arith.constant 0 : index
      %12 = vector.load %arg8[%c0_9, %c0_10] : memref<8x512xf32, #tpu.memory_space<vmem>>, vector<8x512xf32>
      %c0_11 = arith.constant 0 : index
      %c0_12 = arith.constant 0 : index
      %13 = vector.load %arg5[%c0_11, %c0_12] : memref<1x512xf32, #tpu.memory_space<vmem>>, vector<1x512xf32>
      %14 = vector.broadcast %13 : vector<1x512xf32> to vector<8x512xf32>
      %15 = arith.addf %12, %14 : vector<8x512xf32>
      %c0_13 = arith.constant 0 : index
      %c0_14 = arith.constant 0 : index
      %16 = vector.load %arg6[%c0_13, %c0_14] : memref<8x512xbf16, #tpu.memory_space<vmem>>, vector<8x512xbf16>
      %17 = arith.extf %16 : vector<8x512xbf16> to vector<8x512xf32>
      %18 = arith.addf %15, %17 : vector<8x512xf32>
      %cst_15 = arith.constant 0.000000e+00 : f32
      %19 = vector.broadcast %cst_15 : f32 to vector<8x512xf32>
      %20 = arith.maximumf %18, %19 : vector<8x512xf32>
      %21 = arith.truncf %20 : vector<8x512xf32> to vector<8x512xbf16>
      %c0_16 = arith.constant 0 : index
      %c0_17 = arith.constant 0 : index
      %22 = vector.load %arg7[%c0_16, %c0_17] : memref<8x512xbf16, #tpu.memory_space<vmem>>, vector<8x512xbf16>
      tpu.vector_store %arg7[%c0_16, %c0_17], %21 {strides = array<i32>} : memref<8x512xbf16, #tpu.memory_space<vmem>>, vector<8x512xbf16>,
    } else {
    }
    return
  }
  func.func @transform_0(%arg0: i32, %arg1: i32, %arg2: i32) -> (i32, i32) {
    %c0_i32 = arith.constant 0 : i32
    return %arg0, %arg2 : i32, i32
  }
  func.func @transform_1(%arg0: i32, %arg1: i32, %arg2: i32) -> (i32, i32) {
    %c0_i32 = arith.constant 0 : i32
    return %arg2, %arg1 : i32, i32
  }
  func.func @transform_2(%arg0: i32, %arg1: i32, %arg2: i32) -> (i32, i32) {
    %c0_i32 = arith.constant 0 : i32
    %c0_i32_0 = arith.constant 0 : i32
    return %c0_i32, %arg1 : i32, i32
  }
  func.func @transform_3(%arg0: i32, %arg1: i32, %arg2: i32) -> (i32, i32) {
    %c0_i32 = arith.constant 0 : i32
    return %arg0, %arg1 : i32, i32
  }
  func.func @transform_4(%arg0: i32, %arg1: i32, %arg2: i32) -> (i32, i32) {
    %c0_i32 = arith.constant 0 : i32
    return %arg0, %arg1 : i32, i32
  }
}

module attributes {stable_mosaic.version = 11 : i64} {
  func.func @_mm_bias_kernel(%arg0: i32, %arg1: i32, %arg2: i32, %arg3: memref<8x512xbf16, #tpu.memory_space<vmem>>, %arg4: memref<512x512xbf16, #tpu.memory_space<vmem>>, %arg5: memref<1x512xf32, #tpu.memory_space<vmem>>, %arg6: memref<8x512xbf16, #tpu.memory_space<vmem>>, %arg7: memref<8x512xf32, #tpu.memory_space<vmem>>) attributes {dimension_semantics = [#tpu.dimension_semantics<parallel>, #tpu.dimension_semantics<parallel>, #tpu.dimension_semantics<arbitrary>], iteration_bounds = array<i64: 1, 1, 9>, scalar_prefetch = 0 : i64, scratch_operands = 1 : i64, tpu.core_type = #tpu.core_type<tc>, window_params = [{transform_indices = @transform_0, window_bounds = array<i64: 8, 512>}, {transform_indices = @transform_1, window_bounds = array<i64: 512, 512>}, {transform_indices = @transform_2, window_bounds = array<i64: 1, 512>}, {transform_indices = @transform_3, window_bounds = array<i64: 8, 512>}]} {
    %c0_i32 = arith.constant 0 : i32
    %0 = arith.cmpi eq, %arg2, %c0_i32 : i32
    %1 = arith.extui %0 : i1 to i32
    %c0_i32_0 = arith.constant 0 : i32
    %2 = arith.cmpi ne, %1, %c0_i32_0 : i32
    scf.if %2 {
      %cst_9 = arith.constant 0.000000e+00 : f32
      %12 = vector.broadcast %cst_9 : f32 to vector<8x512xf32>
      %c0_10 = arith.constant 0 : index
      %c0_11 = arith.constant 0 : index
      %13 = vector.load %arg7[%c0_10, %c0_11] : memref<8x512xf32, #tpu.memory_space<vmem>>, vector<8x512xf32>
      tpu.vector_store %arg7[%c0_10, %c0_11], %12 {strides = array<i32>} : memref<8x512xf32, #tpu.memory_space<vmem>>, vector<8x512xf32>,
    } else {
    }
    %c0 = arith.constant 0 : index
    %c0_1 = arith.constant 0 : index
    %3 = vector.load %arg7[%c0, %c0_1] : memref<8x512xf32, #tpu.memory_space<vmem>>, vector<8x512xf32>
    %c0_2 = arith.constant 0 : index
    %c0_3 = arith.constant 0 : index
    %4 = vector.load %arg3[%c0_2, %c0_3] : memref<8x512xbf16, #tpu.memory_space<vmem>>, vector<8x512xbf16>
    %c0_4 = arith.constant 0 : index
    %c0_5 = arith.constant 0 : index
    %5 = vector.load %arg4[%c0_4, %c0_5] : memref<512x512xbf16, #tpu.memory_space<vmem>>, vector<512x512xbf16>
    %cst = arith.constant dense<0.000000e+00> : vector<8x512xf32>
    %6 = tpu.matmul %4, %5, %cst {dimension_numbers = #tpu.dot_dimension_numbers<[1], [0], [0], [1], [0, 0, 1, 1], [], []>} : vector<8x512xbf16>, vector<512x512xbf16>, vector<8x512xf32> -> vector<8x512xf32>
    %7 = arith.addf %3, %6 : vector<8x512xf32>
    %c0_6 = arith.constant 0 : index
    %c0_7 = arith.constant 0 : index
    %8 = vector.load %arg7[%c0_6, %c0_7] : memref<8x512xf32, #tpu.memory_space<vmem>>, vector<8x512xf32>
    tpu.vector_store %arg7[%c0_6, %c0_7], %7 {strides = array<i32>} : memref<8x512xf32, #tpu.memory_space<vmem>>, vector<8x512xf32>,
    %c8_i32 = arith.constant 8 : i32
    %9 = arith.cmpi eq, %arg2, %c8_i32 : i32
    %10 = arith.extui %9 : i1 to i32
    %c0_i32_8 = arith.constant 0 : i32
    %11 = arith.cmpi ne, %10, %c0_i32_8 : i32
    scf.if %11 {
      %c0_9 = arith.constant 0 : index
      %c0_10 = arith.constant 0 : index
      %12 = vector.load %arg7[%c0_9, %c0_10] : memref<8x512xf32, #tpu.memory_space<vmem>>, vector<8x512xf32>
      %c0_11 = arith.constant 0 : index
      %c0_12 = arith.constant 0 : index
      %13 = vector.load %arg5[%c0_11, %c0_12] : memref<1x512xf32, #tpu.memory_space<vmem>>, vector<1x512xf32>
      %14 = vector.broadcast %13 : vector<1x512xf32> to vector<8x512xf32>
      %15 = arith.addf %12, %14 : vector<8x512xf32>
      %cst_13 = arith.constant 0.000000e+00 : f32
      %16 = vector.broadcast %cst_13 : f32 to vector<8x512xf32>
      %17 = arith.maximumf %15, %16 : vector<8x512xf32>
      %18 = arith.truncf %17 : vector<8x512xf32> to vector<8x512xbf16>
      %c0_14 = arith.constant 0 : index
      %c0_15 = arith.constant 0 : index
      %19 = vector.load %arg6[%c0_14, %c0_15] : memref<8x512xbf16, #tpu.memory_space<vmem>>, vector<8x512xbf16>
      tpu.vector_store %arg6[%c0_14, %c0_15], %18 {strides = array<i32>} : memref<8x512xbf16, #tpu.memory_space<vmem>>, vector<8x512xbf16>,
    } else {
    }
    return
  }
  func.func @transform_0(%arg0: i32, %arg1: i32, %arg2: i32) -> (i32, i32) {
    %c0_i32 = arith.constant 0 : i32
    return %arg0, %arg2 : i32, i32
  }
  func.func @transform_1(%arg0: i32, %arg1: i32, %arg2: i32) -> (i32, i32) {
    %c0_i32 = arith.constant 0 : i32
    return %arg2, %arg1 : i32, i32
  }
  func.func @transform_2(%arg0: i32, %arg1: i32, %arg2: i32) -> (i32, i32) {
    %c0_i32 = arith.constant 0 : i32
    %c0_i32_0 = arith.constant 0 : i32
    return %c0_i32, %arg1 : i32, i32
  }
  func.func @transform_3(%arg0: i32, %arg1: i32, %arg2: i32) -> (i32, i32) {
    %c0_i32 = arith.constant 0 : i32
    return %arg0, %arg1 : i32, i32
  }
}

module attributes {stable_mosaic.version = 11 : i64} {
  func.func @_embed_kernel(%arg0: memref<2x512xf32, #tpu.memory_space<vmem>>, %arg1: memref<512x512xf32, #tpu.memory_space<vmem>>, %arg2: memref<1x512xf32, #tpu.memory_space<vmem>>, %arg3: memref<2x512xf32, #tpu.memory_space<vmem>>, %arg4: memref<2x512xf32, #tpu.memory_space<vmem>>) attributes {dimension_semantics = [], scalar_prefetch = 0 : i64, scratch_operands = 0 : i64, tpu.core_type = #tpu.core_type<tc>} {
    %c0 = arith.constant 0 : index
    %c0_0 = arith.constant 0 : index
    %0 = vector.load %arg0[%c0, %c0_0] : memref<2x512xf32, #tpu.memory_space<vmem>>, vector<2x512xf32>
    %c0_1 = arith.constant 0 : index
    %c0_2 = arith.constant 0 : index
    %1 = vector.load %arg1[%c0_1, %c0_2] : memref<512x512xf32, #tpu.memory_space<vmem>>, vector<512x512xf32>
    %cst = arith.constant dense<0.000000e+00> : vector<2x512xf32>
    %2 = tpu.matmul %0, %1, %cst {dimension_numbers = #tpu.dot_dimension_numbers<[1], [0], [0], [1], [0, 0, 1, 1], [], []>} : vector<2x512xf32>, vector<512x512xf32>, vector<2x512xf32> -> vector<2x512xf32>
    %c0_3 = arith.constant 0 : index
    %c0_4 = arith.constant 0 : index
    %3 = vector.load %arg2[%c0_3, %c0_4] : memref<1x512xf32, #tpu.memory_space<vmem>>, vector<1x512xf32>
    %4 = vector.broadcast %3 : vector<1x512xf32> to vector<2x512xf32>
    %5 = arith.addf %2, %4 : vector<2x512xf32>
    %cst_5 = arith.constant 0.000000e+00 : f32
    %6 = vector.broadcast %cst_5 : f32 to vector<2x512xf32>
    %7 = arith.maximumf %5, %6 : vector<2x512xf32>
    %c0_6 = arith.constant 0 : index
    %c0_7 = arith.constant 0 : index
    %8 = vector.load %arg3[%c0_6, %c0_7] : memref<2x512xf32, #tpu.memory_space<vmem>>, vector<2x512xf32>
    tpu.vector_store %arg3[%c0_6, %c0_7], %7 {strides = array<i32>} : memref<2x512xf32, #tpu.memory_space<vmem>>, vector<2x512xf32>,
    %9 = arith.mulf %7, %7 : vector<2x512xf32>
    %cst_8 = arith.constant dense<0.000000e+00> : vector<2xf32>
    %10 = vector.multi_reduction <add>, %9, %cst_8 [1] : vector<2x512xf32> to vector<2xf32>
    %11 = vector.shape_cast %10 : vector<2xf32> to vector<2x1xf32>
    %12 = math.sqrt %11 : vector<2x1xf32>
    %cst_9 = arith.constant 9.99999996E-13 : f32
    %13 = vector.broadcast %cst_9 : f32 to vector<2x1xf32>
    %14 = arith.maximumf %12, %13 : vector<2x1xf32>
    %15 = tpu.reciprocal %14 {approx = true} : vector<2x1xf32> -> vector<2x1xf32>
    %16 = vector.broadcast %15 : vector<2x1xf32> to vector<2x512xf32>
    %17 = arith.mulf %7, %16 : vector<2x512xf32>
    %c0_10 = arith.constant 0 : index
    %c0_11 = arith.constant 0 : index
    %18 = vector.load %arg4[%c0_10, %c0_11] : memref<2x512xf32, #tpu.memory_space<vmem>>, vector<2x512xf32>
    tpu.vector_store %arg4[%c0_10, %c0_11], %17 {strides = array<i32>} : memref<2x512xf32, #tpu.memory_space<vmem>>, vector<2x512xf32>,
    return
  }
}

module attributes {stable_mosaic.version = 11 : i64} {
  func.func @_mm_bias_kernel(%arg0: i32, %arg1: i32, %arg2: i32, %arg3: memref<8x512xbf16, #tpu.memory_space<vmem>>, %arg4: memref<512x128xbf16, #tpu.memory_space<vmem>>, %arg5: memref<1x128xf32, #tpu.memory_space<vmem>>, %arg6: memref<8x128xf32, #tpu.memory_space<vmem>>, %arg7: memref<8x128xf32, #tpu.memory_space<vmem>>) attributes {dimension_semantics = [#tpu.dimension_semantics<parallel>, #tpu.dimension_semantics<parallel>, #tpu.dimension_semantics<arbitrary>], iteration_bounds = array<i64: 1, 1, 1>, scalar_prefetch = 0 : i64, scratch_operands = 1 : i64, tpu.core_type = #tpu.core_type<tc>, window_params = [{transform_indices = @transform_0, window_bounds = array<i64: 8, 512>}, {transform_indices = @transform_1, window_bounds = array<i64: 512, 128>}, {transform_indices = @transform_2, window_bounds = array<i64: 1, 128>}, {transform_indices = @transform_3, window_bounds = array<i64: 8, 128>}]} {
    %c0_i32 = arith.constant 0 : i32
    %0 = arith.cmpi eq, %arg2, %c0_i32 : i32
    %1 = arith.extui %0 : i1 to i32
    %c0_i32_0 = arith.constant 0 : i32
    %2 = arith.cmpi ne, %1, %c0_i32_0 : i32
    scf.if %2 {
      %cst_10 = arith.constant 0.000000e+00 : f32
      %12 = vector.broadcast %cst_10 : f32 to vector<8x128xf32>
      %c0_11 = arith.constant 0 : index
      %c0_12 = arith.constant 0 : index
      %13 = vector.load %arg7[%c0_11, %c0_12] : memref<8x128xf32, #tpu.memory_space<vmem>>, vector<8x128xf32>
      tpu.vector_store %arg7[%c0_11, %c0_12], %12 {strides = array<i32>} : memref<8x128xf32, #tpu.memory_space<vmem>>, vector<8x128xf32>,
    } else {
    }
    %c0 = arith.constant 0 : index
    %c0_1 = arith.constant 0 : index
    %3 = vector.load %arg7[%c0, %c0_1] : memref<8x128xf32, #tpu.memory_space<vmem>>, vector<8x128xf32>
    %c0_2 = arith.constant 0 : index
    %c0_3 = arith.constant 0 : index
    %4 = vector.load %arg3[%c0_2, %c0_3] : memref<8x512xbf16, #tpu.memory_space<vmem>>, vector<8x512xbf16>
    %c0_4 = arith.constant 0 : index
    %c0_5 = arith.constant 0 : index
    %5 = vector.load %arg4[%c0_4, %c0_5] : memref<512x128xbf16, #tpu.memory_space<vmem>>, vector<512x128xbf16>
    %cst = arith.constant dense<0.000000e+00> : vector<8x128xf32>
    %6 = tpu.matmul %4, %5, %cst {dimension_numbers = #tpu.dot_dimension_numbers<[1], [0], [0], [1], [0, 0, 1, 1], [], []>} : vector<8x512xbf16>, vector<512x128xbf16>, vector<8x128xf32> -> vector<8x128xf32>
    %7 = arith.addf %3, %6 : vector<8x128xf32>
    %c0_6 = arith.constant 0 : index
    %c0_7 = arith.constant 0 : index
    %8 = vector.load %arg7[%c0_6, %c0_7] : memref<8x128xf32, #tpu.memory_space<vmem>>, vector<8x128xf32>
    tpu.vector_store %arg7[%c0_6, %c0_7], %7 {strides = array<i32>} : memref<8x128xf32, #tpu.memory_space<vmem>>, vector<8x128xf32>,
    %c0_i32_8 = arith.constant 0 : i32
    %9 = arith.cmpi eq, %arg2, %c0_i32_8 : i32
    %10 = arith.extui %9 : i1 to i32
    %c0_i32_9 = arith.constant 0 : i32
    %11 = arith.cmpi ne, %10, %c0_i32_9 : i32
    scf.if %11 {
      %c0_10 = arith.constant 0 : index
      %c0_11 = arith.constant 0 : index
      %12 = vector.load %arg7[%c0_10, %c0_11] : memref<8x128xf32, #tpu.memory_space<vmem>>, vector<8x128xf32>
      %c0_12 = arith.constant 0 : index
      %c0_13 = arith.constant 0 : index
      %13 = vector.load %arg5[%c0_12, %c0_13] : memref<1x128xf32, #tpu.memory_space<vmem>>, vector<1x128xf32>
      %14 = vector.broadcast %13 : vector<1x128xf32> to vector<8x128xf32>
      %15 = arith.addf %12, %14 : vector<8x128xf32>
      %c0_14 = arith.constant 0 : index
      %c0_15 = arith.constant 0 : index
      %16 = vector.load %arg6[%c0_14, %c0_15] : memref<8x128xf32, #tpu.memory_space<vmem>>, vector<8x128xf32>
      tpu.vector_store %arg6[%c0_14, %c0_15], %15 {strides = array<i32>} : memref<8x128xf32, #tpu.memory_space<vmem>>, vector<8x128xf32>,
    } else {
    }
    return
  }
  func.func @transform_0(%arg0: i32, %arg1: i32, %arg2: i32) -> (i32, i32) {
    %c0_i32 = arith.constant 0 : i32
    return %arg0, %arg2 : i32, i32
  }
  func.func @transform_1(%arg0: i32, %arg1: i32, %arg2: i32) -> (i32, i32) {
    %c0_i32 = arith.constant 0 : i32
    return %arg2, %arg1 : i32, i32
  }
  func.func @transform_2(%arg0: i32, %arg1: i32, %arg2: i32) -> (i32, i32) {
    %c0_i32 = arith.constant 0 : i32
    %c0_i32_0 = arith.constant 0 : i32
    return %c0_i32, %arg1 : i32, i32
  }
  func.func @transform_3(%arg0: i32, %arg1: i32, %arg2: i32) -> (i32, i32) {
    %c0_i32 = arith.constant 0 : i32
    return %arg0, %arg1 : i32, i32
  }
}

</mosaic_0001>

<bundles_post_ra>
// kernel: _lambda_.22
= control target key start
LH: loop header
LB: loop body
LE: loop exit
PB: predicated region body
PF: predicated region fallthrough
CT: control target
= control target key end

     0   :  { %s939_s1 = inlined_call_operand.vmem [shape: bf16[256,128], index: 1, kind: input, shape index: {}]   ;;  %s940_s0 = inlined_call_operand.vmem [shape: bf16[128,256], index: 0, kind: input, shape index: {}]   ;;  %s941_s2 = inlined_call_operand.vmem [shape: f32[1,128], index: 2, kind: input, shape index: {}]   ;;  %s942_s3 = inlined_call_operand.vmem [shape: bf16[128,128], index: 3, kind: output, shape index: {}]  }
   0x1   :  { %v738_v0 = vld [vmem:[%s939_s1 + $0x40] sm:$0xff]   ;;  %v740_v2 = vld [vmem:[%s939_s1 + $0x48] sm:$0xff]   ;;  %v742_v4 = vld [vmem:[%s939_s1 + $0x50] sm:$0xff]  }
   0x2   :  { %v739_v1 = vld [vmem:[%s939_s1] sm:$0xff]   ;;  %658 = vmatprep.subr.bf16.mxu0 %v738_v0  ;;  %722 = vmatprep.subr.bf16.mxu1 %v738_v0  ;;  %v741_v3 = vld [vmem:[%s939_s1 + $0x8] sm:$0xff]   ;;  %v743_v5 = vld [vmem:[%s939_s1 + $0x10] sm:$0xff]  }
   0x3   :  { %659 = vmatpush3.bf16.msra.mxu0 %v739_v1  ;;  %730 = vmatpush3.bf16.msra.mxu1 %v739_v1  ;;  %v744_v6 = vld [vmem:[%s939_s1 + $0x58] sm:$0xff]   ;;  %v746_v8 = vld [vmem:[%s939_s1 + $0x60] sm:$0xff]   ;;  %v748_v10 = vld [vmem:[%s939_s1 + $0x68] sm:$0xff]  }
   0x4   :  { %660 = vmatprep.subr.bf16.mxu0 %v740_v2  ;;  %723 = vmatprep.subr.bf16.mxu1 %v740_v2  ;;  %v745_v7 = vld [vmem:[%s939_s1 + $0x18] sm:$0xff]   ;;  %v747_v9 = vld [vmem:[%s939_s1 + $0x20] sm:$0xff]   ;;  %v749_v13 = vld [vmem:[%s939_s1 + $0x28] sm:$0xff]  }
   0x5   :  { %v756_v11 = vld [vmem:[%s940_s0 + $0x4] ss:$8 sps:$4 sm:$0xff]   ;;  %v750_v14 = vld [vmem:[%s939_s1 + $0x70] sm:$0xff]   ;;  %v752_v16 = vld [vmem:[%s939_s1 + $0x78] sm:$0xff]  }
   0x6   :  { %v759_v12 = vld [vmem:[%s940_s0 + $0x44] ss:$8 sps:$4 sm:$0xff]   ;;  %307 = vmatprep.mubr.bf16.mxu0 %v756_v11  ;;  %v751_v15 = vld [vmem:[%s939_s1 + $0x30] sm:$0xff]   ;;  %v753_v17 = vld [vmem:[%s939_s1 + $0x38] sm:$0xff]  }
   0x7   :  { %661 = vmatpush3.bf16.msra.mxu0 %v741_v3  ;;  %731 = vmatpush3.bf16.msra.mxu1 %v741_v3  ;;  %v754_v18 = vld [vmem:[%s940_s0] ss:$8 sps:$4 sm:$0xff]   ;;  %v760_v20 = vld [vmem:[%s940_s0 + $0x14] ss:$8 sps:$4 sm:$0xff]   ;;  %v764_v22 = vld [vmem:[%s940_s0 + $0x10] ss:$8 sps:$4 sm:$0xff]  }
   0x8   :  { %662 = vmatprep.subr.bf16.mxu0 %v742_v4  ;;  %724 = vmatprep.subr.bf16.mxu1 %v742_v4  ;;  %v757_v19 = vld [vmem:[%s940_s0 + $0x40] ss:$8 sps:$4 sm:$0xff]   ;;  %v762_v21 = vld [vmem:[%s940_s0 + $0x54] ss:$8 sps:$4 sm:$0xff]   ;;  %v765_v23 = vld [vmem:[%s940_s0 + $0x50] ss:$8 sps:$4 sm:$0xff]  }
   0x9   :  { %339 = vmatprep.mubr.bf16.mxu1 %v759_v12  ;;  %v766_v24 = vld [vmem:[%s940_s0 + $0x24] ss:$8 sps:$4 sm:$0xff]   ;;  %v770_v26 = vld [vmem:[%s940_s0 + $0x20] ss:$8 sps:$4 sm:$0xff]   ;;  %v772_v28 = vld [vmem:[%s940_s0 + $0x34] ss:$8 sps:$4 sm:$0xff]  }
   0xa   :  { %v768_v25 = vld [vmem:[%s940_s0 + $0x64] ss:$8 sps:$4 sm:$0xff]   ;;  %v771_v27 = vld [vmem:[%s940_s0 + $0x60] ss:$8 sps:$4 sm:$0xff]   ;;  %v774_v29 = vld [vmem:[%s940_s0 + $0x74] ss:$8 sps:$4 sm:$0xff]  }
   0xb   :  { %663 = vmatpush3.bf16.msra.mxu0 %v743_v5  ;;  %732 = vmatpush3.bf16.msra.mxu1 %v743_v5  ;;  %v776_v30 = vld [vmem:[%s940_s0 + $0x30] ss:$8 sps:$4 sm:$0xff]   ;;  %v897_v35 = vld [vmem:[%s941_s2] ss:$0 sm:$0xff] }
   0xc   :  { %664 = vmatprep.subr.bf16.mxu0 %v744_v6  ;;  %725 = vmatprep.subr.bf16.mxu1 %v744_v6  ;;  %v777_v31 = vld [vmem:[%s940_s0 + $0x70] ss:$8 sps:$4 sm:$0xff]  }
   0xf   :  { %665 = vmatpush3.bf16.msra.mxu0 %v745_v7  ;;  %733 = vmatpush3.bf16.msra.mxu1 %v745_v7 }
  0x10   :  { %666 = vmatprep.subr.bf16.mxu0 %v746_v8  ;;  %726 = vmatprep.subr.bf16.mxu1 %v746_v8 }
  0x13   :  { %667 = vmatpush3.bf16.msra.mxu0 %v747_v9  ;;  %734 = vmatpush3.bf16.msra.mxu1 %v747_v9 }
  0x14   :  { %668 = vmatprep.subr.bf16.mxu0 %v748_v10  ;;  %727 = vmatprep.subr.bf16.mxu1 %v748_v10 }
  0x17   :  { %669 = vmatpush3.bf16.msra.mxu0 %v749_v13  ;;  %735 = vmatpush3.bf16.msra.mxu1 %v749_v13 }
  0x18   :  { %670 = vmatprep.subr.bf16.mxu0 %v750_v14  ;;  %728 = vmatprep.subr.bf16.mxu1 %v750_v14 }
  0x1b   :  { %671 = vmatpush3.bf16.msra.mxu0 %v751_v15  ;;  %736 = vmatpush3.bf16.msra.mxu1 %v751_v15 }
  0x1c   :  { %672 = vmatprep.subr.bf16.mxu0 %v752_v16  ;;  %729 = vmatprep.subr.bf16.mxu1 %v752_v16 }
  0x1f   :  { %673 = vmatpush3.bf16.msra.mxu0 %v753_v17  ;;  %737 = vmatpush3.bf16.msra.mxu1 %v753_v17 }
  0x22   :  { %308 = vmatmul.mubr.bf16.vlgmr.msra.gmra.mrb[0].mxu0 %v754_v18  ;;  %340 = vmatmul.mubr.bf16.vlgmr.msra.gmra.mrb[0].mxu1 %v757_v19 }
  0x23   :  { %315 = vmatprep.mubr.bf16.mxu0 %v760_v20  ;;  %347 = vmatprep.mubr.bf16.mxu1 %v762_v21 }
  0x2a   :  { %316 = vmatmul.mubr.bf16.gmra.mrb[4].mxu0 %v764_v22  ;;  %348 = vmatmul.mubr.bf16.gmra.mrb[4].mxu1 %v765_v23 }
  0x2b   :  { %323 = vmatprep.mubr.bf16.mxu0 %v766_v24  ;;  %355 = vmatprep.mubr.bf16.mxu1 %v768_v25 }
  0x32   :  { %324 = vmatmul.mubr.bf16.gmra.mrb[8].mxu0 %v770_v26  ;;  %356 = vmatmul.mubr.bf16.gmra.mrb[8].mxu1 %v771_v27 }
  0x33   :  { %331 = vmatprep.mubr.bf16.mxu0 %v772_v28  ;;  %363 = vmatprep.mubr.bf16.mxu1 %v774_v29 }
  0x3a   :  { %332 = vmatmul.mubr.bf16.gmra.mrb[12].mxu0 %v776_v30  ;;  %364 = vmatmul.mubr.bf16.gmra.mrb[12].mxu1 %v777_v31 }
  0xf5   :  { %v674_v32 = vpop.f32.mrb[0].mxu0  ;;  %v698_v33 = vpop.f32.mrb[0].mxu1 }
  0xf6   :  { %v675_v34 = vpop.f32.mrb[1].mxu0  ;;  %v699_v36 = vpop.f32.mrb[1].mxu1 }
  0xf7   :  { %v676_v37 = vadd.f32 %v675_v34, %v674_v32  ;;  %v700_v38 = vadd.f32 %v699_v36, %v698_v33  ;;  %v677_v39 = vpop.f32.mrb[2].mxu0  ;;  %v701_v40 = vpop.f32.mrb[2].mxu1 }
  0xf8   :  { %v678_v41 = vpop.f32.mrb[3].mxu0  ;;  %v702_v42 = vpop.f32.mrb[3].mxu1 }
  0xf9   :  { %v430_v43 = vadd.f32 %v676_v37, %v897_v35  ;;  %v438_v44 = vadd.f32 %v700_v38, %v897_v35  ;;  %v679_v45 = vadd.f32 %v678_v41, %v677_v39  ;;  %v703_v46 = vadd.f32 %v702_v42, %v701_v40 }
  0xfb   :  { %v431_v47 = vadd.f32 %v679_v45, %v897_v35  ;;  %v439_v48 = vadd.f32 %v703_v46, %v897_v35  ;;  %v446_v49 = vmax.f32 %v430_v43, 0.0  ;;  %v454_v50 = vmax.f32 %v438_v44, 0.0 }
  0xfd   :  { %v447_v51 = vmax.f32 %v431_v47, 0.0  ;;  %v455_v52 = vmax.f32 %v439_v48, 0.0  ;;  %v680_v53 = vpop.f32.mrb[4].mxu0  ;;  %v704_v54 = vpop.f32.mrb[4].mxu1 }
  0xfe   :  { %v681_v55 = vpop.f32.mrb[5].mxu0  ;;  %v705_v56 = vpop.f32.mrb[5].mxu1 }
  0xff   :  { %v614_v57 = vpack.c.bf16 %v447_v51, %v446_v49  ;;  %v634_v58 = vpack.c.bf16 %v455_v52, %v454_v50  ;;  %v682_v59 = vadd.f32 %v681_v55, %v680_v53  ;;  %v706_v60 = vadd.f32 %v705_v56, %v704_v54  ;;  %v683_v61 = vpop.f32.mrb[6].mxu0  ;;  %v707_v62 = vpop.f32.mrb[6].mxu1 }
 0x100   :  { %v684_v63 = vpop.f32.mrb[7].mxu0  ;;  %v708_v0 = vpop.f32.mrb[7].mxu1 }
 0x101   :  { %615 = vst [vmem:[%s942_s3] sm:$0xff] %v614_v57   ;;  %654 = vst [vmem:[%s942_s3 + $0x20] sm:$0xff] %v634_v58   ;;  %v432_v1 = vadd.f32 %v682_v59, %v897_v35  ;;  %v440_v2 = vadd.f32 %v706_v60, %v897_v35  ;;  %v685_v3 = vadd.f32 %v684_v63, %v683_v61 }
 0x102   :  { %v709_v4 = vadd.f32 %v708_v0, %v707_v62 }
 0x103   :  { %v433_v5 = vadd.f32 %v685_v3, %v897_v35  ;;  %v448_v7 = vmax.f32 %v432_v1, 0.0  ;;  %v456_v8 = vmax.f32 %v440_v2, 0.0 }
 0x104   :  { %v441_v6 = vadd.f32 %v709_v4, %v897_v35 }
 0x105   :  { %v449_v9 = vmax.f32 %v433_v5, 0.0  ;;  %v686_v11 = vpop.f32.mrb[8].mxu0  ;;  %v710_v12 = vpop.f32.mrb[8].mxu1 }
 0x106   :  { %v457_v10 = vmax.f32 %v441_v6, 0.0  ;;  %v687_v13 = vpop.f32.mrb[9].mxu0  ;;  %v711_v14 = vpop.f32.mrb[9].mxu1 }
 0x107   :  { %v619_v15 = vpack.c.bf16 %v449_v9, %v448_v7  ;;  %v688_v17 = vadd.f32 %v687_v13, %v686_v11  ;;  %v712_v18 = vadd.f32 %v711_v14, %v710_v12  ;;  %v689_v19 = vpop.f32.mrb[10].mxu0  ;;  %v713_v20 = vpop.f32.mrb[10].mxu1 }
 0x108   :  { %v639_v16 = vpack.c.bf16 %v457_v10, %v456_v8  ;;  %v690_v21 = vpop.f32.mrb[11].mxu0  ;;  %v714_v22 = vpop.f32.mrb[11].mxu1 }
 0x109   :  { %651 = vst [vmem:[%s942_s3 + $0x8] sm:$0xff] %v619_v15   ;;  %v434_v23 = vadd.f32 %v688_v17, %v897_v35  ;;  %v442_v24 = vadd.f32 %v712_v18, %v897_v35  ;;  %v691_v25 = vadd.f32 %v690_v21, %v689_v19  ;;  %v715_v26 = vadd.f32 %v714_v22, %v713_v20 }
 0x10a   :  { %655 = vst [vmem:[%s942_s3 + $0x28] sm:$0xff] %v639_v16  }
 0x10b   :  { %v435_v27 = vadd.f32 %v691_v25, %v897_v35  ;;  %v443_v28 = vadd.f32 %v715_v26, %v897_v35  ;;  %v450_v29 = vmax.f32 %v434_v23, 0.0  ;;  %v458_v30 = vmax.f32 %v442_v24, 0.0 }
 0x10d   :  { %v451_v31 = vmax.f32 %v435_v27, 0.0  ;;  %v459_v32 = vmax.f32 %v443_v28, 0.0  ;;  %v692_v33 = vpop.f32.mrb[12].mxu0  ;;  %v716_v34 = vpop.f32.mrb[12].mxu1 }
 0x10e   :  { %v693_v36 = vpop.f32.mrb[13].mxu0  ;;  %v717_v37 = vpop.f32.mrb[13].mxu1 }
 0x10f   :  { %v624_v38 = vpack.c.bf16 %v451_v31, %v450_v29  ;;  %v644_v39 = vpack.c.bf16 %v459_v32, %v458_v30  ;;  %v694_v40 = vadd.f32 %v693_v36, %v692_v33  ;;  %v718_v41 = vadd.f32 %v717_v37, %v716_v34  ;;  %v695_v42 = vpop.f32.mrb[14].mxu0  ;;  %v719_v43 = vpop.f32.mrb[14].mxu1 }
 0x110   :  { %v696_v44 = vpop.f32.mrb[15].mxu0  ;;  %v720_v45 = vpop.f32.mrb[15].mxu1 }
 0x111   :  { %652 = vst [vmem:[%s942_s3 + $0x10] sm:$0xff] %v624_v38   ;;  %656 = vst [vmem:[%s942_s3 + $0x30] sm:$0xff] %v644_v39   ;;  %v436_v46 = vadd.f32 %v694_v40, %v897_v35  ;;  %v444_v47 = vadd.f32 %v718_v41, %v897_v35  ;;  %v697_v48 = vadd.f32 %v696_v44, %v695_v42 }
 0x112   :  { %v721_v49 = vadd.f32 %v720_v45, %v719_v43 }
 0x113   :  { %v437_v50 = vadd.f32 %v697_v48, %v897_v35  ;;  %v452_v52 = vmax.f32 %v436_v46, 0.0  ;;  %v460_v53 = vmax.f32 %v444_v47, 0.0 }
 0x114   :  { %v445_v51 = vadd.f32 %v721_v49, %v897_v35 }
 0x115   :  { %v453_v54 = vmax.f32 %v437_v50, 0.0 }
 0x116   :  { %v461_v55 = vmax.f32 %v445_v51, 0.0 }
 0x117   :  { %v629_v56 = vpack.c.bf16 %v453_v54, %v452_v52 }
 0x118   :  { %v649_v57 = vpack.c.bf16 %v461_v55, %v460_v53 }
 0x119   :  { %653 = vst [vmem:[%s942_s3 + $0x18] sm:$0xff] %v629_v56  }
 0x11a   :  { %657 = vst [vmem:[%s942_s3 + $0x38] sm:$0xff] %v649_v57  }

// kernel: _lambda_.23
= control target key start
LH: loop header
LB: loop body
LE: loop exit
PB: predicated region body
PF: predicated region fallthrough
CT: control target
= control target key end

     0   :  { %s1144_s12 = smov 0   ;;  %s1146_s13 = smov 0   ;;  %s1264_s0 = inlined_call_operand.vmem [shape: bf16[32,1024], index: 0, kind: input, shape index: {}]   ;;  %s1265_s1 = inlined_call_operand.vmem [shape: bf16[1024,128], index: 1, kind: input, shape index: {}]   ;;  %s1266_s2 = inlined_call_operand.vmem [shape: f32[1,128], index: 2, kind: input, shape index: {}]   ;;  %s1267_s3 = inlined_call_operand.vmem [shape: bf16[32,128], index: 3, kind: output, shape index: {}]  }
   0x1   :  { %s1148_s14 = smov 0   ;;  %s1150_s15 = smov 0  }
   0x2   :  { %s1152_s16 = smov 0  }
   0x3 LB: > { %s25_s17 = sadd.s32 1, %s1117_s15  ;;  %p48_p1 = scmp.ne.s32.totalorder %s1109_s13, %s1105_s12  ;;  %s1121_s16 = sphi %s1152_s16, %s13_s16   ;;  %s1117_s15 = sphi %s1150_s15, %s1271_s15   ;;  %s1113_s14 = sphi %s1148_s14, %s1270_s14   ;;  %s1109_s13 = sphi %s1146_s13, %s1269_s13   ;;  %s1105_s12 = sphi %s1144_s12, %s1268_s12  }
   0x4   : > { %p26_p0 = scmp.ge.s32.totalorder %s25_s17, 2  ;;  %p49_p2 = scmp.eq.s32.totalorder %s1121_s16, 0 }
   0x5   : > { %s41_s19 = sadd.s32 1, %s1109_s13  ;;  %p867_p5 = scmp.ge.s32.totalorder %s1121_s16, 2 }
   0x6   : > { %s1273_s17 = smov (%p26_p0, %s25_s17), 0  ;;  %p50_p3 = por %p49_p2, %p48_p1 }
   0x7   : > { %s37_s18 = ssub.s32 %s1117_s15, %s1273_s17  ;;  %162 = sbr.rel (%p867_p5) target bundleno = 22 (0x16), region = 20 }
   0x8   : > { %p39_p4 = scmp.eq.s32.totalorder %s37_s18, 0 }
   0xa   : > { %s1179_s20 = scalar_select %p39_p4, %s1109_s13, %s41_s19  }
   0xe   : > { %165 = sbr.rel (!%p50_p3) target bundleno = 22 (0x16), region = 24  ;;  %s167_s21 = sand.u32 (%p50_p3), 1, %s1109_s13  }
   0xf   : > { %s926_s22 = sshll.u32 (%p50_p3), %s1117_s15, 4  ;;  %s868_s23 = sshll.u32 (%p50_p3), %s167_s21, 6 }
  0x10   : > { %s175_s26 = scalar_lea.vmem (%p50_p3), %s1264_s0, %s926_s22  ;;  %s169_s27 = scalar_lea.vmem (%p50_p3), [#allocation3], %s868_s23 }
  0x11   : > { %v188_v0 = vld [vmem:[%s175_s26] sm:$0xff] (%p50_p3)  ;;  %v190_v1 = vld [vmem:[%s175_s26 + $0x8] sm:$0xff] (%p50_p3) }
  0x12   : > { %v192_v2 = vld [vmem:[%s175_s26 + $0x20] sm:$0xff] (%p50_p3)  ;;  %189 = vst [vmem:[%s169_s27] sm:$0xff] (%p50_p3), %v188_v0  ;;  %191 = vst [vmem:[%s169_s27 + $0x8] sm:$0xff] (%p50_p3), %v190_v1  ;;  %v194_v3 = vld [vmem:[%s175_s26 + $0x28] sm:$0xff] (%p50_p3) }
  0x13   : > { %193 = vst [vmem:[%s169_s27 + $0x10] sm:$0xff] (%p50_p3), %v192_v2  ;;  %v196_v4 = vld [vmem:[%s175_s26 + $0x40] sm:$0xff] (%p50_p3)  ;;  %v198_v5 = vld [vmem:[%s175_s26 + $0x48] sm:$0xff] (%p50_p3)  ;;  %195 = vst [vmem:[%s169_s27 + $0x18] sm:$0xff] (%p50_p3), %v194_v3 }
  0x14   : > { %197 = vst [vmem:[%s169_s27 + $0x20] sm:$0xff] (%p50_p3), %v196_v4  ;;  %199 = vst [vmem:[%s169_s27 + $0x28] sm:$0xff] (%p50_p3), %v198_v5  ;;  %v200_v6 = vld [vmem:[%s175_s26 + $0x60] sm:$0xff] (%p50_p3)  ;;  %v202_v7 = vld [vmem:[%s175_s26 + $0x68] sm:$0xff] (%p50_p3) }
  0x15   : > { %201 = vst [vmem:[%s169_s27 + $0x30] sm:$0xff] %v200_v6  ;;  %203 = vst [vmem:[%s169_s27 + $0x38] sm:$0xff] %v202_v7 }
  0x16 PF: > { %p871_p6 = scmp.ge.s32.totalorder %s1121_s16, 1  ;;  %p220_p7 = scmp.lt.s32.totalorder %s1121_s16, 3 }
  0x18   : > { %p221_p8 = pnand %p871_p6, %p220_p7 }
  0x19   : > { %s227_s28 = sand.u32 (!%p221_p8), 1, %s1105_s12   ;;  %s873_s29 = sshll.u32 (!%p221_p8), %s1113_s14, 6 }
  0x1a   : > { %224 = sbr.rel (%p221_p8) target bundleno = 319 (0x13f), region = 51  ;;  %s872_s30 = sshll.u32 (!%p221_p8), %s227_s28, 6 }
  0x1b   : > { %p267_p9 = scmp.lt.s32.totalorder (!%p221_p8), %s873_s29, 127  ;;  %s1196_s8 = scalar_lea.vmem (!%p221_p8), [#allocation3], %s872_s30 }
  0x1c   : > { %p875_p10 = scmp.ne.s32.totalorder (!%p221_p8), %s1113_s14, 0 }
  0x21   : > { %s1275_s29 = smov (!%p267_p9, %s873_s29), 127  ;;  %291 = sbr.rel (%p875_p10) target bundleno = 40 (0x28), region = 59 }
  0x22   : > { %s874_s4 = sshll.u32 %s1275_s29, 2  ;;  %v1123_v8 = vmov (!%p875_p10), 0.0  }
  0x23   : > { %s1194_s7 = scalar_lea.vmem %s1265_s1, %s874_s4  ;;  %292 = vst [vmem:[#allocation2] sm:$0xff] (!%p875_p10), %v1123_v8  ;;  %293 = vst [vmem:[#allocation2 + $0x8] sm:$0xff] (!%p875_p10), %v1123_v8 }
  0x24   : > { %294 = vst [vmem:[#allocation2 + $0x10] sm:$0xff] (!%p875_p10), %v1123_v8  ;;  %295 = vst [vmem:[#allocation2 + $0x18] sm:$0xff] (!%p875_p10), %v1123_v8 }
  0x28 PF: > { %v1039_v9 = vld [vmem:[%s1194_s7 + $0x40] sm:$0xff]   ;;  %v1043_v13 = vld [vmem:[%s1194_s7 + $0x48] sm:$0xff]   ;;  %v1047_v17 = vld [vmem:[%s1194_s7 + $0x50] sm:$0xff]   ;;  %p916_p11 = scmp.ne.s32.totalorder %s1113_s14, 1 }
  0x29   : > { %v1040_v10 = vld [vmem:[%s1194_s7 + $0xc0] sm:$0xff]   ;;  %942 = vmatprep.subr.bf16.mxu0 %v1039_v9  ;;  %v1044_v14 = vld [vmem:[%s1194_s7 + $0xc8] sm:$0xff]   ;;  %v1048_v18 = vld [vmem:[%s1194_s7 + $0xd0] sm:$0xff]  }
  0x2a   : > { %v1041_v11 = vld [vmem:[%s1194_s7] sm:$0xff]   ;;  %970 = vmatprep.subr.bf16.mxu1 %v1040_v10  ;;  %v1045_v15 = vld [vmem:[%s1194_s7 + $0x8] sm:$0xff]   ;;  %v1049_v19 = vld [vmem:[%s1194_s7 + $0x10] sm:$0xff]  }
  0x2b   : > { %v1042_v12 = vld [vmem:[%s1194_s7 + $0x80] sm:$0xff]   ;;  %943 = vmatpush3.bf16.msra.mxu0 %v1041_v11  ;;  %v1046_v16 = vld [vmem:[%s1194_s7 + $0x88] sm:$0xff]   ;;  %v1050_v20 = vld [vmem:[%s1194_s7 + $0x90] sm:$0xff]  }
  0x2c   : > { %971 = vmatpush3.bf16.msra.mxu1 %v1042_v12  ;;  %944 = vmatprep.subr.bf16.mxu0 %v1043_v13  ;;  %v1051_v21 = vld [vmem:[%s1194_s7 + $0x58] sm:$0xff]   ;;  %v1055_v25 = vld [vmem:[%s1194_s7 + $0x60] sm:$0xff]   ;;  %v1059_v29 = vld [vmem:[%s1194_s7 + $0x68] sm:$0xff]  }
  0x2d   : > { %972 = vmatprep.subr.bf16.mxu1 %v1044_v14  ;;  %v1052_v22 = vld [vmem:[%s1194_s7 + $0xd8] sm:$0xff]   ;;  %v1056_v26 = vld [vmem:[%s1194_s7 + $0xe0] sm:$0xff]   ;;  %v1060_v30 = vld [vmem:[%s1194_s7 + $0xe8] sm:$0xff]  }
  0x2e   : > { %v1053_v23 = vld [vmem:[%s1194_s7 + $0x18] sm:$0xff]   ;;  %v1057_v27 = vld [vmem:[%s1194_s7 + $0x20] sm:$0xff]   ;;  %v1061_v31 = vld [vmem:[%s1194_s7 + $0x28] sm:$0xff]  }
  0x2f   : > { %945 = vmatpush3.bf16.msra.mxu0 %v1045_v15  ;;  %v1054_v24 = vld [vmem:[%s1194_s7 + $0x98] sm:$0xff]   ;;  %v1058_v28 = vld [vmem:[%s1194_s7 + $0xa0] sm:$0xff]   ;;  %v1062_v32 = vld [vmem:[%s1194_s7 + $0xa8] sm:$0xff]  }
  0x30   : > { %973 = vmatpush3.bf16.msra.mxu1 %v1046_v16  ;;  %946 = vmatprep.subr.bf16.mxu0 %v1047_v17  ;;  %v1063_v33 = vld [vmem:[%s1194_s7 + $0x70] sm:$0xff]   ;;  %v1067_v37 = vld [vmem:[%s1194_s7 + $0x78] sm:$0xff]   ;;  %v296_v58 = vld [vmem:[#allocation2] sm:$0xff] }
  0x31   : > { %974 = vmatprep.subr.bf16.mxu1 %v1048_v18  ;;  %v1064_v34 = vld [vmem:[%s1194_s7 + $0xf0] sm:$0xff]   ;;  %v1068_v38 = vld [vmem:[%s1194_s7 + $0xf8] sm:$0xff]   ;;  %v297_v63 = vld [vmem:[#allocation2 + $0x8] sm:$0xff] }
  0x32   : > { %v1065_v35 = vld [vmem:[%s1194_s7 + $0x30] sm:$0xff]   ;;  %v1069_v39 = vld [vmem:[%s1194_s7 + $0x38] sm:$0xff]  }
  0x33   : > { %947 = vmatpush3.bf16.msra.mxu0 %v1049_v19  ;;  %v1066_v36 = vld [vmem:[%s1194_s7 + $0xb0] sm:$0xff]   ;;  %v1070_v40 = vld [vmem:[%s1194_s7 + $0xb8] sm:$0xff]  }
  0x34   : > { %975 = vmatpush3.bf16.msra.mxu1 %v1050_v20  ;;  %948 = vmatprep.subr.bf16.mxu0 %v1051_v21  ;;  %v1071_v41 = vld [vmem:[%s1196_s8] ss:$16 sps:$4 sm:$0xff]   ;;  %v1073_v42 = vld [vmem:[%s1196_s8 + $0x4] ss:$16 sps:$4 sm:$0xff]   ;;  %v1074_v43 = vld [vmem:[%s1196_s8 + $0x8] ss:$16 sps:$4 sm:$0xff]  }
  0x35   : > { %976 = vmatprep.subr.bf16.mxu1 %v1052_v22  ;;  %v1076_v44 = vld [vmem:[%s1196_s8 + $0xc] ss:$16 sps:$4 sm:$0xff]   ;;  %636 = vmatprep.mubr.bf16.mxu0 %v1073_v42  ;;  %v1077_v45 = vld [vmem:[%s1196_s8 + $0x24] ss:$16 sps:$4 sm:$0xff]   ;;  %v1081_v47 = vld [vmem:[%s1196_s8 + $0x20] ss:$16 sps:$4 sm:$0xff]  }
  0x36   : > { %685 = vmatprep.mubr.bf16.mxu1 %v1076_v44  ;;  %v1079_v46 = vld [vmem:[%s1196_s8 + $0x2c] ss:$16 sps:$4 sm:$0xff]   ;;  %v1082_v48 = vld [vmem:[%s1196_s8 + $0x28] ss:$16 sps:$4 sm:$0xff]   ;;  %v298_v12 = vld [vmem:[#allocation2 + $0x10] sm:$0xff] }
  0x37   : > { %949 = vmatpush3.bf16.msra.mxu0 %v1053_v23  ;;  %v299_v17 = vld [vmem:[#allocation2 + $0x18] sm:$0xff]  ;;  %v917_v23 = vld [vmem:[%s1266_s2] ss:$0 sm:$0xff] (!%p916_p11) }
  0x38   : > { %977 = vmatpush3.bf16.msra.mxu1 %v1054_v24  ;;  %950 = vmatprep.subr.bf16.mxu0 %v1055_v25 }
  0x39   : > { %978 = vmatprep.subr.bf16.mxu1 %v1056_v26 }
  0x3b   : > { %951 = vmatpush3.bf16.msra.mxu0 %v1057_v27 }
  0x3c   : > { %979 = vmatpush3.bf16.msra.mxu1 %v1058_v28  ;;  %952 = vmatprep.subr.bf16.mxu0 %v1059_v29 }
  0x3d   : > { %980 = vmatprep.subr.bf16.mxu1 %v1060_v30 }
  0x3f   : > { %953 = vmatpush3.bf16.msra.mxu0 %v1061_v31 }
  0x40   : > { %981 = vmatpush3.bf16.msra.mxu1 %v1062_v32  ;;  %954 = vmatprep.subr.bf16.mxu0 %v1063_v33 }
  0x41   : > { %982 = vmatprep.subr.bf16.mxu1 %v1064_v34 }
  0x43   : > { %955 = vmatpush3.bf16.msra.mxu0 %v1065_v35 }
  0x44   : > { %983 = vmatpush3.bf16.msra.mxu1 %v1066_v36  ;;  %956 = vmatprep.subr.bf16.mxu0 %v1067_v37 }
  0x45   : > { %984 = vmatprep.subr.bf16.mxu1 %v1068_v38 }
  0x47   : > { %957 = vmatpush3.bf16.msra.mxu0 %v1069_v39 }
  0x48   : > { %985 = vmatpush3.bf16.msra.mxu1 %v1070_v40 }
  0x4a   : > { %637 = vmatmul.mubr.bf16.vlgmr.msra.gmra.mrb[0].mxu0 %v1071_v41 }
  0x4b   : > { %686 = vmatmul.mubr.bf16.vlgmr.msra.gmra.mrb[0].mxu1 %v1074_v43  ;;  %644 = vmatprep.mubr.bf16.mxu0 %v1077_v45 }
  0x4c   : > { %693 = vmatprep.mubr.bf16.mxu1 %v1079_v46 }
  0x52   : > { %645 = vmatmul.mubr.bf16.gmra.mrb[4].mxu0 %v1081_v47 }
  0x53   : > { %694 = vmatmul.mubr.bf16.gmra.mrb[4].mxu1 %v1082_v48 }
 0x11d   : > { %v958_v49 = vpop.f32.mrb[0].mxu0 }
 0x11e   : > { %v986_v50 = vpop.f32.mrb[0].mxu1  ;;  %v959_v51 = vpop.f32.mrb[1].mxu0 }
 0x11f   : > { %v960_v52 = vadd.f32 %v959_v51, %v958_v49  ;;  %v987_v53 = vpop.f32.mrb[1].mxu1  ;;  %v961_v54 = vpop.f32.mrb[2].mxu0 }
 0x120   : > { %v988_v55 = vadd.f32 %v987_v53, %v986_v50  ;;  %v989_v56 = vpop.f32.mrb[2].mxu1  ;;  %v962_v57 = vpop.f32.mrb[3].mxu0 }
 0x121   : > { %v963_v59 = vadd.f32 %v962_v57, %v961_v54  ;;  %v990_v60 = vpop.f32.mrb[3].mxu1 }
 0x122   : > { %v688_v61 = vadd.f32 %v988_v55, %v960_v52  ;;  %v991_v62 = vadd.f32 %v990_v60, %v989_v56 }
 0x124   : > { %v702_v0 = vadd.f32 %v688_v61, %v296_v58  ;;  %v691_v1 = vadd.f32 %v991_v62, %v963_v59 }
 0x125   : > { %v964_v2 = vpop.f32.mrb[4].mxu0 }
 0x126   : > { %706 = vst [vmem:[#allocation2] sm:$0xff] %v702_v0  ;;  %v703_v3 = vadd.f32 %v691_v1, %v297_v63  ;;  %v992_v4 = vpop.f32.mrb[4].mxu1  ;;  %v965_v5 = vpop.f32.mrb[5].mxu0 }
 0x127   : > { %v966_v6 = vadd.f32 %v965_v5, %v964_v2  ;;  %v993_v7 = vpop.f32.mrb[5].mxu1  ;;  %v967_v8 = vpop.f32.mrb[6].mxu0 }
 0x128   : > { %707 = vst [vmem:[#allocation2 + $0x8] sm:$0xff] %v703_v3  ;;  %v994_v9 = vadd.f32 %v993_v7, %v992_v4  ;;  %v995_v10 = vpop.f32.mrb[6].mxu1  ;;  %v968_v11 = vpop.f32.mrb[7].mxu0 }
 0x129   : > { %v969_v13 = vadd.f32 %v968_v11, %v967_v8  ;;  %v996_v14 = vpop.f32.mrb[7].mxu1 }
 0x12a   : > { %v696_v15 = vadd.f32 %v994_v9, %v966_v6  ;;  %v997_v16 = vadd.f32 %v996_v14, %v995_v10  ;;  %713 = sbr.rel (%p916_p11) target bundleno = 319 (0x13f), region = 63 }
 0x12c   : > { %v704_v18 = vadd.f32 %v696_v15, %v298_v12  ;;  %v699_v19 = vadd.f32 %v997_v16, %v969_v13 }
 0x12d   : > { %v714_v21 = vld [vmem:[#allocation2] sm:$0xff] (!%p916_p11) }
 0x12e   : > { %708 = vst [vmem:[#allocation2 + $0x10] sm:$0xff] %v704_v18  ;;  %v705_v20 = vadd.f32 %v699_v19, %v299_v17  ;;  %v725_v24 = vadd.f32 (!%p916_p11), %v917_v23, %v714_v21 }
 0x12f   : > { %v715_v22 = vld [vmem:[#allocation2 + $0x8] sm:$0xff] (!%p916_p11) }
 0x130   : > { %709 = vst [vmem:[#allocation2 + $0x18] sm:$0xff] %v705_v20  ;;  %v726_v25 = vadd.f32 (!%p916_p11), %v917_v23, %v715_v22  ;;  %v729_v30 = vmax.f32 (!%p916_p11), %v725_v24, 0.0 }
 0x132   : > { %v730_v31 = vmax.f32 %v726_v25, 0.0 }
 0x134   : > { %v934_v34 = vpack.c.bf16 %v730_v31, %v729_v30 }
 0x135   : > { %v716_v26 = vld [vmem:[#allocation2 + $0x10] sm:$0xff] }
 0x136   : > { %v727_v28 = vadd.f32 %v917_v23, %v716_v26  ;;  %935 = vst [vmem:[%s1267_s3] sm:$0xff] %v934_v34  }
 0x137   : > { %v717_v27 = vld [vmem:[#allocation2 + $0x18] sm:$0xff] }
 0x138   : > { %v728_v29 = vadd.f32 %v917_v23, %v717_v27  ;;  %v731_v32 = vmax.f32 %v727_v28, 0.0 }
 0x13a   : > { %v732_v33 = vmax.f32 %v728_v29, 0.0 }
 0x13c   : > { %v939_v35 = vpack.c.bf16 %v732_v33, %v731_v32 }
 0x13e   : > { %941 = vst [vmem:[%s1267_s3 + $0x8] sm:$0xff] %v939_v35  }
 0x13f PF: > { %s13_s16 = sadd.s32 1, %s1121_s16   ;;  %s1268_s12 = smov %s1109_s13 }
 0x140   : > { %p10_p12 = scmp.ge.s32.totalorder %s13_s16, 4   ;;  %s1269_s13 = smov %s1179_s20 }
 0x141   : > { %s1270_s14 = smov %s1117_s15  ;;  %s1271_s15 = smov %s1273_s17 }
 0x142   :  { %12 = sbr.rel (!%p10_p12) target bundleno = 3 (0x3), region = 104 }

// kernel: _lambda_.24
= control target key start
LH: loop header
LB: loop body
LE: loop exit
PB: predicated region body
PF: predicated region fallthrough
CT: control target
= control target key end

     0   :  { %s1249_s15 = smov 0   ;;  %s1251_s16 = smov 0   ;;  %s1375_s0 = inlined_call_operand.vmem [shape: bf16[32,1024], index: 0, kind: input, shape index: {}]   ;;  %s1376_s1 = inlined_call_operand.vmem [shape: bf16[1024,128], index: 1, kind: input, shape index: {}]   ;;  %s1377_s2 = inlined_call_operand.vmem [shape: f32[1,128], index: 2, kind: input, shape index: {}]   ;;  %s1378_s3 = inlined_call_operand.vmem [shape: bf16[32,128], index: 3, kind: input, shape index: {}]   ;;  %s1379_s4 = inlined_call_operand.vmem [shape: bf16[32,128], index: 4, kind: output, shape index: {}]  }
   0x1   :  { %s1253_s17 = smov 0   ;;  %s1255_s18 = smov 0  }
   0x2   :  { %s1257_s19 = smov 0  }
   0x3 LB: > { %s26_s20 = sadd.s32 1, %s1217_s18  ;;  %p49_p1 = scmp.ne.s32.totalorder %s1209_s16, %s1205_s15  ;;  %s1221_s19 = sphi %s1257_s19, %s14_s19   ;;  %s1217_s18 = sphi %s1255_s18, %s1383_s18   ;;  %s1213_s17 = sphi %s1253_s17, %s1382_s17   ;;  %s1209_s16 = sphi %s1251_s16, %s1381_s16   ;;  %s1205_s15 = sphi %s1249_s15, %s1380_s15  }
   0x4   : > { %p27_p0 = scmp.ge.s32.totalorder %s26_s20, 2  ;;  %p50_p2 = scmp.eq.s32.totalorder %s1221_s19, 0 }
   0x5   : > { %s42_s22 = sadd.s32 1, %s1209_s16  ;;  %p958_p5 = scmp.ge.s32.totalorder %s1221_s19, 2 }
   0x6   : > { %s1385_s20 = smov (%p27_p0, %s26_s20), 0  ;;  %p51_p3 = por %p50_p2, %p49_p1 }
   0x7   : > { %s38_s21 = ssub.s32 %s1217_s18, %s1385_s20  ;;  %203 = sbr.rel (%p958_p5) target bundleno = 22 (0x16), region = 24 }
   0x8   : > { %p40_p4 = scmp.eq.s32.totalorder %s38_s21, 0 }
   0xa   : > { %s1284_s23 = scalar_select %p40_p4, %s1209_s16, %s42_s22  }
   0xe   : > { %206 = sbr.rel (!%p51_p3) target bundleno = 22 (0x16), region = 28  ;;  %s208_s24 = sand.u32 (%p51_p3), 1, %s1209_s16  }
   0xf   : > { %s1017_s25 = sshll.u32 (%p51_p3), %s1217_s18, 4  ;;  %s959_s26 = sshll.u32 (%p51_p3), %s208_s24, 6 }
  0x10   : > { %s216_s29 = scalar_lea.vmem (%p51_p3), %s1375_s0, %s1017_s25  ;;  %s210_s30 = scalar_lea.vmem (%p51_p3), [#allocation3], %s959_s26 }
  0x11   : > { %v229_v0 = vld [vmem:[%s216_s29] sm:$0xff] (%p51_p3)  ;;  %v231_v1 = vld [vmem:[%s216_s29 + $0x8] sm:$0xff] (%p51_p3) }
  0x12   : > { %v233_v2 = vld [vmem:[%s216_s29 + $0x20] sm:$0xff] (%p51_p3)  ;;  %230 = vst [vmem:[%s210_s30] sm:$0xff] (%p51_p3), %v229_v0  ;;  %232 = vst [vmem:[%s210_s30 + $0x8] sm:$0xff] (%p51_p3), %v231_v1  ;;  %v235_v3 = vld [vmem:[%s216_s29 + $0x28] sm:$0xff] (%p51_p3) }
  0x13   : > { %234 = vst [vmem:[%s210_s30 + $0x10] sm:$0xff] (%p51_p3), %v233_v2  ;;  %v237_v4 = vld [vmem:[%s216_s29 + $0x40] sm:$0xff] (%p51_p3)  ;;  %v239_v5 = vld [vmem:[%s216_s29 + $0x48] sm:$0xff] (%p51_p3)  ;;  %236 = vst [vmem:[%s210_s30 + $0x18] sm:$0xff] (%p51_p3), %v235_v3 }
  0x14   : > { %238 = vst [vmem:[%s210_s30 + $0x20] sm:$0xff] (%p51_p3), %v237_v4  ;;  %240 = vst [vmem:[%s210_s30 + $0x28] sm:$0xff] (%p51_p3), %v239_v5  ;;  %v241_v6 = vld [vmem:[%s216_s29 + $0x60] sm:$0xff] (%p51_p3)  ;;  %v243_v7 = vld [vmem:[%s216_s29 + $0x68] sm:$0xff] (%p51_p3) }
  0x15   : > { %242 = vst [vmem:[%s210_s30 + $0x30] sm:$0xff] %v241_v6  ;;  %244 = vst [vmem:[%s210_s30 + $0x38] sm:$0xff] %v243_v7 }
  0x16 PF: > { %p962_p6 = scmp.ge.s32.totalorder %s1221_s19, 1  ;;  %p261_p7 = scmp.lt.s32.totalorder %s1221_s19, 3 }
  0x18   : > { %p262_p8 = pnand %p962_p6, %p261_p7 }
  0x19   : > { %s268_s5 = sand.u32 (!%p262_p8), 1, %s1205_s15   ;;  %s964_s6 = sshll.u32 (!%p262_p8), %s1213_s17, 6 }
  0x1a   : > { %265 = sbr.rel (%p262_p8) target bundleno = 321 (0x141), region = 55  ;;  %s963_s7 = sshll.u32 (!%p262_p8), %s268_s5, 6 }
  0x1b   : > { %p318_p9 = scmp.lt.s32.totalorder (!%p262_p8), %s964_s6, 127  ;;  %s1301_s12 = scalar_lea.vmem (!%p262_p8), [#allocation3], %s963_s7 }
  0x1c   : > { %p966_p10 = scmp.ne.s32.totalorder (!%p262_p8), %s1213_s17, 0 }
  0x21   : > { %s1387_s6 = smov (!%p318_p9, %s964_s6), 127  ;;  %351 = sbr.rel (%p966_p10) target bundleno = 40 (0x28), region = 63 }
  0x22   : > { %s965_s8 = sshll.u32 %s1387_s6, 2  ;;  %v1223_v8 = vmov (!%p966_p10), 0.0  }
  0x23   : > { %s1299_s11 = scalar_lea.vmem %s1376_s1, %s965_s8  ;;  %352 = vst [vmem:[#allocation2] sm:$0xff] (!%p966_p10), %v1223_v8  ;;  %353 = vst [vmem:[#allocation2 + $0x8] sm:$0xff] (!%p966_p10), %v1223_v8 }
  0x24   : > { %354 = vst [vmem:[#allocation2 + $0x10] sm:$0xff] (!%p966_p10), %v1223_v8  ;;  %355 = vst [vmem:[#allocation2 + $0x18] sm:$0xff] (!%p966_p10), %v1223_v8 }
  0x28 PF: > { %v1139_v9 = vld [vmem:[%s1299_s11 + $0x40] sm:$0xff]   ;;  %v1143_v13 = vld [vmem:[%s1299_s11 + $0x48] sm:$0xff]   ;;  %v1147_v17 = vld [vmem:[%s1299_s11 + $0x50] sm:$0xff]   ;;  %p1007_p11 = scmp.ne.s32.totalorder %s1213_s17, 1 }
  0x29   : > { %v1140_v10 = vld [vmem:[%s1299_s11 + $0xc0] sm:$0xff]   ;;  %1042 = vmatprep.subr.bf16.mxu0 %v1139_v9  ;;  %v1144_v14 = vld [vmem:[%s1299_s11 + $0xc8] sm:$0xff]   ;;  %v1148_v18 = vld [vmem:[%s1299_s11 + $0xd0] sm:$0xff]  }
  0x2a   : > { %v1141_v11 = vld [vmem:[%s1299_s11] sm:$0xff]   ;;  %1070 = vmatprep.subr.bf16.mxu1 %v1140_v10  ;;  %v1145_v15 = vld [vmem:[%s1299_s11 + $0x8] sm:$0xff]   ;;  %v1149_v19 = vld [vmem:[%s1299_s11 + $0x10] sm:$0xff]  }
  0x2b   : > { %v1142_v12 = vld [vmem:[%s1299_s11 + $0x80] sm:$0xff]   ;;  %1043 = vmatpush3.bf16.msra.mxu0 %v1141_v11  ;;  %v1146_v16 = vld [vmem:[%s1299_s11 + $0x88] sm:$0xff]   ;;  %v1150_v20 = vld [vmem:[%s1299_s11 + $0x90] sm:$0xff]  }
  0x2c   : > { %1071 = vmatpush3.bf16.msra.mxu1 %v1142_v12  ;;  %1044 = vmatprep.subr.bf16.mxu0 %v1143_v13  ;;  %v1151_v21 = vld [vmem:[%s1299_s11 + $0x58] sm:$0xff]   ;;  %v1155_v25 = vld [vmem:[%s1299_s11 + $0x60] sm:$0xff]   ;;  %v1159_v29 = vld [vmem:[%s1299_s11 + $0x68] sm:$0xff]  }
  0x2d   : > { %1072 = vmatprep.subr.bf16.mxu1 %v1144_v14  ;;  %v1152_v22 = vld [vmem:[%s1299_s11 + $0xd8] sm:$0xff]   ;;  %v1156_v26 = vld [vmem:[%s1299_s11 + $0xe0] sm:$0xff]   ;;  %v1160_v30 = vld [vmem:[%s1299_s11 + $0xe8] sm:$0xff]  }
  0x2e   : > { %v1153_v23 = vld [vmem:[%s1299_s11 + $0x18] sm:$0xff]   ;;  %v1157_v27 = vld [vmem:[%s1299_s11 + $0x20] sm:$0xff]   ;;  %v1161_v31 = vld [vmem:[%s1299_s11 + $0x28] sm:$0xff]  }
  0x2f   : > { %1045 = vmatpush3.bf16.msra.mxu0 %v1145_v15  ;;  %v1154_v24 = vld [vmem:[%s1299_s11 + $0x98] sm:$0xff]   ;;  %v1158_v28 = vld [vmem:[%s1299_s11 + $0xa0] sm:$0xff]   ;;  %v1162_v32 = vld [vmem:[%s1299_s11 + $0xa8] sm:$0xff]  }
  0x30   : > { %1073 = vmatpush3.bf16.msra.mxu1 %v1146_v16  ;;  %1046 = vmatprep.subr.bf16.mxu0 %v1147_v17  ;;  %v1163_v33 = vld [vmem:[%s1299_s11 + $0x70] sm:$0xff]   ;;  %v1167_v37 = vld [vmem:[%s1299_s11 + $0x78] sm:$0xff]   ;;  %v356_v58 = vld [vmem:[#allocation2] sm:$0xff] }
  0x31   : > { %1074 = vmatprep.subr.bf16.mxu1 %v1148_v18  ;;  %v1164_v34 = vld [vmem:[%s1299_s11 + $0xf0] sm:$0xff]   ;;  %v1168_v38 = vld [vmem:[%s1299_s11 + $0xf8] sm:$0xff]   ;;  %v357_v63 = vld [vmem:[#allocation2 + $0x8] sm:$0xff] }
  0x32   : > { %v1165_v35 = vld [vmem:[%s1299_s11 + $0x30] sm:$0xff]   ;;  %v1169_v39 = vld [vmem:[%s1299_s11 + $0x38] sm:$0xff]  }
  0x33   : > { %1047 = vmatpush3.bf16.msra.mxu0 %v1149_v19  ;;  %v1166_v36 = vld [vmem:[%s1299_s11 + $0xb0] sm:$0xff]   ;;  %v1170_v40 = vld [vmem:[%s1299_s11 + $0xb8] sm:$0xff]  }
  0x34   : > { %1075 = vmatpush3.bf16.msra.mxu1 %v1150_v20  ;;  %1048 = vmatprep.subr.bf16.mxu0 %v1151_v21  ;;  %v1171_v41 = vld [vmem:[%s1301_s12] ss:$16 sps:$4 sm:$0xff]   ;;  %v1173_v42 = vld [vmem:[%s1301_s12 + $0x4] ss:$16 sps:$4 sm:$0xff]   ;;  %v1174_v43 = vld [vmem:[%s1301_s12 + $0x8] ss:$16 sps:$4 sm:$0xff]  }
  0x35   : > { %1076 = vmatprep.subr.bf16.mxu1 %v1152_v22  ;;  %v1176_v44 = vld [vmem:[%s1301_s12 + $0xc] ss:$16 sps:$4 sm:$0xff]   ;;  %696 = vmatprep.mubr.bf16.mxu0 %v1173_v42  ;;  %v1177_v45 = vld [vmem:[%s1301_s12 + $0x24] ss:$16 sps:$4 sm:$0xff]   ;;  %v1181_v47 = vld [vmem:[%s1301_s12 + $0x20] ss:$16 sps:$4 sm:$0xff]  }
  0x36   : > { %745 = vmatprep.mubr.bf16.mxu1 %v1176_v44  ;;  %v1179_v46 = vld [vmem:[%s1301_s12 + $0x2c] ss:$16 sps:$4 sm:$0xff]   ;;  %v1182_v48 = vld [vmem:[%s1301_s12 + $0x28] ss:$16 sps:$4 sm:$0xff]   ;;  %v358_v12 = vld [vmem:[#allocation2 + $0x10] sm:$0xff] }
  0x37   : > { %1049 = vmatpush3.bf16.msra.mxu0 %v1153_v23  ;;  %v359_v17 = vld [vmem:[#allocation2 + $0x18] sm:$0xff]  ;;  %v1008_v23 = vld [vmem:[%s1377_s2] ss:$0 sm:$0xff] (!%p1007_p11) }
  0x38   : > { %1077 = vmatpush3.bf16.msra.mxu1 %v1154_v24  ;;  %1050 = vmatprep.subr.bf16.mxu0 %v1155_v25 }
  0x39   : > { %1078 = vmatprep.subr.bf16.mxu1 %v1156_v26  ;;  %v1023_v26 = vld [vmem:[%s1378_s3] sm:$0xff] (!%p1007_p11)  }
  0x3b   : > { %1051 = vmatpush3.bf16.msra.mxu0 %v1157_v27 }
  0x3c   : > { %1079 = vmatpush3.bf16.msra.mxu1 %v1158_v28  ;;  %1052 = vmatprep.subr.bf16.mxu0 %v1159_v29  ;;  %v1024_v29 = vunpack.c.l.bf16 (!%p1007_p11), %v1023_v26 }
  0x3d   : > { %1080 = vmatprep.subr.bf16.mxu1 %v1160_v30  ;;  %v1025_v30 = vunpack.c.h.bf16 (!%p1007_p11), %v1023_v26 }
  0x3f   : > { %1053 = vmatpush3.bf16.msra.mxu0 %v1161_v31 }
  0x40   : > { %1081 = vmatpush3.bf16.msra.mxu1 %v1162_v32  ;;  %1054 = vmatprep.subr.bf16.mxu0 %v1163_v33  ;;  %v1040_v33 = vld [vmem:[%s1378_s3 + $0x8] sm:$0xff] (!%p1007_p11)  }
  0x41   : > { %1082 = vmatprep.subr.bf16.mxu1 %v1164_v34  ;;  %v1028_v34 = vunpack.c.l.bf16 (!%p1007_p11), %v1040_v33 }
  0x43   : > { %1055 = vmatpush3.bf16.msra.mxu0 %v1165_v35  ;;  %v1029_v35 = vunpack.c.h.bf16 (!%p1007_p11), %v1040_v33 }
  0x44   : > { %1083 = vmatpush3.bf16.msra.mxu1 %v1166_v36  ;;  %1056 = vmatprep.subr.bf16.mxu0 %v1167_v37 }
  0x45   : > { %1084 = vmatprep.subr.bf16.mxu1 %v1168_v38 }
  0x47   : > { %1057 = vmatpush3.bf16.msra.mxu0 %v1169_v39 }
  0x48   : > { %1085 = vmatpush3.bf16.msra.mxu1 %v1170_v40 }
  0x4a   : > { %697 = vmatmul.mubr.bf16.vlgmr.msra.gmra.mrb[0].mxu0 %v1171_v41 }
  0x4b   : > { %746 = vmatmul.mubr.bf16.vlgmr.msra.gmra.mrb[0].mxu1 %v1174_v43  ;;  %704 = vmatprep.mubr.bf16.mxu0 %v1177_v45 }
  0x4c   : > { %753 = vmatprep.mubr.bf16.mxu1 %v1179_v46 }
  0x52   : > { %705 = vmatmul.mubr.bf16.gmra.mrb[4].mxu0 %v1181_v47 }
  0x53   : > { %754 = vmatmul.mubr.bf16.gmra.mrb[4].mxu1 %v1182_v48 }
 0x11d   : > { %v1058_v49 = vpop.f32.mrb[0].mxu0 }
 0x11e   : > { %v1086_v50 = vpop.f32.mrb[0].mxu1  ;;  %v1059_v51 = vpop.f32.mrb[1].mxu0 }
 0x11f   : > { %v1060_v52 = vadd.f32 %v1059_v51, %v1058_v49  ;;  %v1087_v53 = vpop.f32.mrb[1].mxu1  ;;  %v1061_v54 = vpop.f32.mrb[2].mxu0 }
 0x120   : > { %v1088_v55 = vadd.f32 %v1087_v53, %v1086_v50  ;;  %v1089_v56 = vpop.f32.mrb[2].mxu1  ;;  %v1062_v57 = vpop.f32.mrb[3].mxu0 }
 0x121   : > { %v1063_v59 = vadd.f32 %v1062_v57, %v1061_v54  ;;  %v1090_v60 = vpop.f32.mrb[3].mxu1 }
 0x122   : > { %v748_v61 = vadd.f32 %v1088_v55, %v1060_v52  ;;  %v1091_v62 = vadd.f32 %v1090_v60, %v1089_v56 }
 0x124   : > { %v762_v0 = vadd.f32 %v748_v61, %v356_v58  ;;  %v751_v1 = vadd.f32 %v1091_v62, %v1063_v59 }
 0x125   : > { %v1064_v2 = vpop.f32.mrb[4].mxu0 }
 0x126   : > { %766 = vst [vmem:[#allocation2] sm:$0xff] %v762_v0  ;;  %v763_v3 = vadd.f32 %v751_v1, %v357_v63  ;;  %v1092_v4 = vpop.f32.mrb[4].mxu1  ;;  %v1065_v5 = vpop.f32.mrb[5].mxu0 }
 0x127   : > { %v1066_v6 = vadd.f32 %v1065_v5, %v1064_v2  ;;  %v1093_v7 = vpop.f32.mrb[5].mxu1  ;;  %v1067_v8 = vpop.f32.mrb[6].mxu0 }
 0x128   : > { %767 = vst [vmem:[#allocation2 + $0x8] sm:$0xff] %v763_v3  ;;  %v1094_v9 = vadd.f32 %v1093_v7, %v1092_v4  ;;  %v1095_v10 = vpop.f32.mrb[6].mxu1  ;;  %v1068_v11 = vpop.f32.mrb[7].mxu0 }
 0x129   : > { %v1069_v13 = vadd.f32 %v1068_v11, %v1067_v8  ;;  %v1096_v14 = vpop.f32.mrb[7].mxu1 }
 0x12a   : > { %v756_v15 = vadd.f32 %v1094_v9, %v1066_v6  ;;  %v1097_v16 = vadd.f32 %v1096_v14, %v1095_v10  ;;  %773 = sbr.rel (%p1007_p11) target bundleno = 321 (0x141), region = 67 }
 0x12c   : > { %v764_v18 = vadd.f32 %v756_v15, %v358_v12  ;;  %v759_v19 = vadd.f32 %v1097_v16, %v1069_v13 }
 0x12d   : > { %v774_v21 = vld [vmem:[#allocation2] sm:$0xff] (!%p1007_p11) }
 0x12e   : > { %768 = vst [vmem:[#allocation2 + $0x10] sm:$0xff] %v764_v18  ;;  %v765_v20 = vadd.f32 %v759_v19, %v359_v17  ;;  %v785_v24 = vadd.f32 (!%p1007_p11), %v1008_v23, %v774_v21 }
 0x12f   : > { %v775_v22 = vld [vmem:[#allocation2 + $0x8] sm:$0xff] (!%p1007_p11) }
 0x130   : > { %769 = vst [vmem:[#allocation2 + $0x18] sm:$0xff] %v765_v20  ;;  %v786_v25 = vadd.f32 (!%p1007_p11), %v1008_v23, %v775_v22  ;;  %v797_v36 = vadd.f32 (!%p1007_p11), %v1024_v29, %v785_v24 }
 0x132   : > { %v798_v37 = vadd.f32 %v1025_v30, %v786_v25  ;;  %v801_v40 = vmax.f32 %v797_v36, 0.0 }
 0x134   : > { %v802_v41 = vmax.f32 %v798_v37, 0.0 }
 0x135   : > { %v776_v27 = vld [vmem:[#allocation2 + $0x10] sm:$0xff] }
 0x136   : > { %v787_v31 = vadd.f32 %v1008_v23, %v776_v27  ;;  %v1033_v44 = vpack.c.bf16 %v802_v41, %v801_v40 }
 0x137   : > { %v777_v28 = vld [vmem:[#allocation2 + $0x18] sm:$0xff] }
 0x138   : > { %v788_v32 = vadd.f32 %v1008_v23, %v777_v28  ;;  %v799_v38 = vadd.f32 %v1028_v34, %v787_v31  ;;  %1034 = vst [vmem:[%s1379_s4] sm:$0xff] %v1033_v44  }
 0x13a   : > { %v800_v39 = vadd.f32 %v1029_v35, %v788_v32  ;;  %v803_v42 = vmax.f32 %v799_v38, 0.0 }
 0x13c   : > { %v804_v43 = vmax.f32 %v800_v39, 0.0 }
 0x13e   : > { %v1038_v45 = vpack.c.bf16 %v804_v43, %v803_v42 }
 0x140   : > { %1041 = vst [vmem:[%s1379_s4 + $0x8] sm:$0xff] %v1038_v45  }
 0x141 PF: > { %s14_s19 = sadd.s32 1, %s1221_s19   ;;  %s1380_s15 = smov %s1209_s16 }
 0x142   : > { %p11_p12 = scmp.ge.s32.totalorder %s14_s19, 4   ;;  %s1381_s16 = smov %s1284_s23 }
 0x143   : > { %s1382_s17 = smov %s1217_s18  ;;  %s1383_s18 = smov %s1385_s20 }
 0x144   :  { %13 = sbr.rel (!%p11_p12) target bundleno = 3 (0x3), region = 111 }

// kernel: _lambda_.28
= control target key start
LH: loop header
LB: loop body
LE: loop exit
PB: predicated region body
PF: predicated region fallthrough
CT: control target
= control target key end

     0   :  { %v194_v0 = vmov 0.0   ;;  %vm195_vm0 = vmmov 0   ;;  %s249_s1 = inlined_call_operand.vmem [shape: bf16[128,128], index: 1, kind: input, shape index: {}]   ;;  %s250_s0 = inlined_call_operand.vmem [shape: bf16[8,128], index: 0, kind: input, shape index: {}]   ;;  %s251_s2 = inlined_call_operand.vmem [shape: f32[1,128], index: 2, kind: input, shape index: {}]   ;;  %s252_s3 = inlined_call_operand.vmem [shape: bf16[8,128], index: 3, kind: output, shape index: {}]  }
   0x1   :  { %164 = vmatprep.subr.bf16.mxu0 %v194_v0  ;;  %v186_v1 = vld [vmem:[%s249_s1] sm:$0xff]   ;;  %180 = vmatprep.mubr.msk.bf16.mxu0 %vm195_vm0, %v194_v0  ;;  %v187_v2 = vld [vmem:[%s249_s1 + $0x8] sm:$0xff]   ;;  %v188_v3 = vld [vmem:[%s249_s1 + $0x10] sm:$0xff]  }
   0x2   :  { %165 = vmatpush3.bf16.msra.mxu0 %v186_v1  ;;  %v189_v4 = vld [vmem:[%s249_s1 + $0x18] sm:$0xff]   ;;  %v190_v5 = vld [vmem:[%s249_s1 + $0x20] sm:$0xff]   ;;  %v191_v6 = vld [vmem:[%s249_s1 + $0x28] sm:$0xff]  }
   0x3   :  { %166 = vmatprep.subr.bf16.mxu0 %v194_v0  ;;  %v192_v7 = vld [vmem:[%s249_s1 + $0x30] sm:$0xff]   ;;  %v193_v8 = vld [vmem:[%s249_s1 + $0x38] sm:$0xff]   ;;  %v21_v9 = vld [vmem:[%s250_s0] sm:$0xf] }
   0x4   :  { %v154_v10 = vld [vmem:[%s251_s2] ss:$0 sm:$0xff] }
   0x6   :  { %167 = vmatpush3.bf16.msra.mxu0 %v187_v2 }
   0x7   :  { %168 = vmatprep.subr.bf16.mxu0 %v194_v0 }
   0xa   :  { %169 = vmatpush3.bf16.msra.mxu0 %v188_v3 }
   0xb   :  { %170 = vmatprep.subr.bf16.mxu0 %v194_v0 }
   0xe   :  { %171 = vmatpush3.bf16.msra.mxu0 %v189_v4 }
   0xf   :  { %172 = vmatprep.subr.bf16.mxu0 %v194_v0 }
  0x12   :  { %173 = vmatpush3.bf16.msra.mxu0 %v190_v5 }
  0x13   :  { %174 = vmatprep.subr.bf16.mxu0 %v194_v0 }
  0x16   :  { %175 = vmatpush3.bf16.msra.mxu0 %v191_v6 }
  0x17   :  { %176 = vmatprep.subr.bf16.mxu0 %v194_v0 }
  0x1a   :  { %177 = vmatpush3.bf16.msra.mxu0 %v192_v7 }
  0x1b   :  { %178 = vmatprep.subr.bf16.mxu0 %v194_v0 }
  0x1e   :  { %179 = vmatpush3.bf16.msra.mxu0 %v193_v8 }
  0x21   :  { %181 = vmatmul.mubr.bf16.vlgmr.msra.gmra.mrb[0].mxu0 %v21_v9 }
  0xf4   :  { %v120_v11 = vpop.f32.mrb[0].mxu0 }
  0xf5   :  { %v139_v12 = vadd.f32 %v154_v10, %v120_v11  ;;  %v182_v13 = vpop.f32.mrb[1].mxu0 }
  0xf6   :  { %v123_v14 = vpop.f32.mrb[2].mxu0 }
  0xf7   :  { %v140_v15 = vpack.c.bf16 %v139_v12, %v139_v12  ;;  %v183_v16 = vpop.f32.mrb[3].mxu0 }
  0xf9   :  { %141 = vst [vmem:[%s252_s3] sm:$0xf] %v140_v15 }

// kernel: _lambda_.27
= control target key start
LH: loop header
LB: loop body
LE: loop exit
PB: predicated region body
PF: predicated region fallthrough
CT: control target
= control target key end

     0   :  { %s942_s12 = smov 0   ;;  %s944_s13 = smov 0   ;;  %s1025_s0 = inlined_call_operand.vmem [shape: bf16[8,1024], index: 0, kind: input, shape index: {}]   ;;  %s1026_s1 = inlined_call_operand.vmem [shape: bf16[1024,128], index: 1, kind: input, shape index: {}]   ;;  %s1027_s2 = inlined_call_operand.vmem [shape: f32[1,128], index: 2, kind: input, shape index: {}]   ;;  %s1028_s3 = inlined_call_operand.vmem [shape: bf16[8,128], index: 3, kind: output, shape index: {}]  }
   0x1   :  { %s946_s14 = smov 0  }
   0x2 LB: > { %s25_s15 = sadd.s32 1, %s915_s13  ;;  %p745_p0 = scmp.ge.s32.totalorder %s919_s14, 1  ;;  %s919_s14 = sphi %s946_s14, %s13_s14   ;;  %s915_s13 = sphi %s944_s13, %s1030_s13   ;;  %s911_s12 = sphi %s942_s12, %s1029_s12  }
   0x3   : > { %p26_p1 = scmp.ge.s32.totalorder %s25_s15, 2  ;;  %p189_p2 = scmp.lt.s32.totalorder %s919_s14, 3 }
   0x5   : > { %s1032_s15 = smov (%p26_p1, %s25_s15), 0  ;;  %p190_p3 = pnand %p745_p0, %p189_p2 }
   0x6   : > { %s746_s16 = sshll.u32 (!%p190_p3), %s911_s12, 2  ;;  %s748_s17 = sshll.u32 (!%p190_p3), %s911_s12, 6 }
   0x7   : > { %193 = sbr.rel (%p190_p3) target bundleno = 293 (0x125), region = 32  ;;  %p233_p4 = scmp.lt.s32.totalorder (!%p190_p3), %s746_s16, 7 }
   0x8   : > { %p241_p5 = scmp.lt.s32.totalorder (!%p190_p3), %s748_s17, 127  ;;  %p750_p6 = scmp.ne.s32.totalorder (!%p190_p3), %s911_s12, 0 }
   0xe   : > { %s1034_s16 = smov (!%p233_p4, %s746_s16), 7  ;;  %s1036_s17 = smov (!%p241_p5, %s748_s17), 127 }
   0xf   : > { %s747_s18 = sshll.u32 %s1034_s16, 2  ;;  %s749_s22 = sshll.u32 %s1036_s17, 2  ;;  %v921_v0 = vmov (!%p750_p6), 0.0  }
  0x10   : > { %s967_s21 = scalar_lea.vmem %s1025_s0, %s747_s18  ;;  %s972_s25 = scalar_lea.vmem %s1026_s1, %s749_s22  ;;  %264 = vst [vmem:[#allocation2] sm:$0xff] (!%p750_p6), %v921_v0 }
  0x11   : > { %263 = sbr.rel (%p750_p6) target bundleno = 24 (0x18), region = 36 }
  0x18 PF: > { %v861_v1 = vld [vmem:[%s972_s25 + $0x40] sm:$0xff]   ;;  %v865_v5 = vld [vmem:[%s972_s25 + $0x48] sm:$0xff]   ;;  %v869_v9 = vld [vmem:[%s972_s25 + $0x50] sm:$0xff]   ;;  %p787_p7 = scmp.ne.s32.totalorder %s911_s12, 1 }
  0x19   : > { %v862_v2 = vld [vmem:[%s972_s25 + $0xc0] sm:$0xff]   ;;  %792 = vmatprep.subr.bf16.mxu0 %v861_v1  ;;  %v866_v6 = vld [vmem:[%s972_s25 + $0xc8] sm:$0xff]   ;;  %v870_v10 = vld [vmem:[%s972_s25 + $0xd0] sm:$0xff]  }
  0x1a   : > { %v863_v3 = vld [vmem:[%s972_s25] sm:$0xff]   ;;  %814 = vmatprep.subr.bf16.mxu1 %v862_v2  ;;  %v867_v7 = vld [vmem:[%s972_s25 + $0x8] sm:$0xff]   ;;  %v871_v11 = vld [vmem:[%s972_s25 + $0x10] sm:$0xff]  }
  0x1b   : > { %v864_v4 = vld [vmem:[%s972_s25 + $0x80] sm:$0xff]   ;;  %793 = vmatpush3.bf16.msra.mxu0 %v863_v3  ;;  %v868_v8 = vld [vmem:[%s972_s25 + $0x88] sm:$0xff]   ;;  %v872_v12 = vld [vmem:[%s972_s25 + $0x90] sm:$0xff]  }
  0x1c   : > { %815 = vmatpush3.bf16.msra.mxu1 %v864_v4  ;;  %794 = vmatprep.subr.bf16.mxu0 %v865_v5  ;;  %v873_v13 = vld [vmem:[%s972_s25 + $0x58] sm:$0xff]   ;;  %v877_v17 = vld [vmem:[%s972_s25 + $0x60] sm:$0xff]   ;;  %v881_v21 = vld [vmem:[%s972_s25 + $0x68] sm:$0xff]  }
  0x1d   : > { %816 = vmatprep.subr.bf16.mxu1 %v866_v6  ;;  %v874_v14 = vld [vmem:[%s972_s25 + $0xd8] sm:$0xff]   ;;  %v878_v18 = vld [vmem:[%s972_s25 + $0xe0] sm:$0xff]   ;;  %v882_v22 = vld [vmem:[%s972_s25 + $0xe8] sm:$0xff]  }
  0x1e   : > { %v875_v15 = vld [vmem:[%s972_s25 + $0x18] sm:$0xff]   ;;  %v879_v19 = vld [vmem:[%s972_s25 + $0x20] sm:$0xff]   ;;  %v883_v23 = vld [vmem:[%s972_s25 + $0x28] sm:$0xff]  }
  0x1f   : > { %795 = vmatpush3.bf16.msra.mxu0 %v867_v7  ;;  %v876_v16 = vld [vmem:[%s972_s25 + $0x98] sm:$0xff]   ;;  %v880_v20 = vld [vmem:[%s972_s25 + $0xa0] sm:$0xff]   ;;  %v884_v24 = vld [vmem:[%s972_s25 + $0xa8] sm:$0xff]  }
  0x20   : > { %817 = vmatpush3.bf16.msra.mxu1 %v868_v8  ;;  %796 = vmatprep.subr.bf16.mxu0 %v869_v9  ;;  %v885_v25 = vld [vmem:[%s972_s25 + $0x70] sm:$0xff]   ;;  %v889_v29 = vld [vmem:[%s972_s25 + $0x78] sm:$0xff]   ;;  %v266_v33 = vld [vmem:[%s967_s21] sm:$0xff] }
  0x21   : > { %818 = vmatprep.subr.bf16.mxu1 %v870_v10  ;;  %v886_v26 = vld [vmem:[%s972_s25 + $0xf0] sm:$0xff]   ;;  %v890_v30 = vld [vmem:[%s972_s25 + $0xf8] sm:$0xff]   ;;  %v267_v34 = vld [vmem:[%s967_s21 + $0x8] sm:$0xff]  ;;  %v751_v35 = vcombine.low %v266_v33, %v266_v33  ;;  %v752_v36 = vcombine.high %v266_v33, %v266_v33 }
  0x22   : > { %v887_v27 = vld [vmem:[%s972_s25 + $0x30] sm:$0xff]   ;;  %v891_v31 = vld [vmem:[%s972_s25 + $0x38] sm:$0xff]   ;;  %v753_v37 = vcombine.low %v267_v34, %v267_v34  ;;  %v754_v38 = vcombine.high %v267_v34, %v267_v34  ;;  %v265_v47 = vld [vmem:[#allocation2] sm:$0xff] }
  0x23   : > { %797 = vmatpush3.bf16.msra.mxu0 %v871_v11  ;;  %v888_v28 = vld [vmem:[%s972_s25 + $0xb0] sm:$0xff]   ;;  %v892_v32 = vld [vmem:[%s972_s25 + $0xb8] sm:$0xff]   ;;  %570 = vmatprep.mubr.bf16.mxu0 %v752_v36  ;;  %v788_v53 = vld [vmem:[%s1027_s2] ss:$0 sm:$0xff] (!%p787_p7) }
  0x24   : > { %819 = vmatpush3.bf16.msra.mxu1 %v872_v12  ;;  %798 = vmatprep.subr.bf16.mxu0 %v873_v13 }
  0x25   : > { %820 = vmatprep.subr.bf16.mxu1 %v874_v14  ;;  %610 = vmatprep.mubr.bf16.mxu1 %v754_v38 }
  0x27   : > { %799 = vmatpush3.bf16.msra.mxu0 %v875_v15 }
  0x28   : > { %821 = vmatpush3.bf16.msra.mxu1 %v876_v16  ;;  %800 = vmatprep.subr.bf16.mxu0 %v877_v17 }
  0x29   : > { %822 = vmatprep.subr.bf16.mxu1 %v878_v18 }
  0x2b   : > { %801 = vmatpush3.bf16.msra.mxu0 %v879_v19 }
  0x2c   : > { %823 = vmatpush3.bf16.msra.mxu1 %v880_v20  ;;  %802 = vmatprep.subr.bf16.mxu0 %v881_v21 }
  0x2d   : > { %824 = vmatprep.subr.bf16.mxu1 %v882_v22 }
  0x2f   : > { %803 = vmatpush3.bf16.msra.mxu0 %v883_v23 }
  0x30   : > { %825 = vmatpush3.bf16.msra.mxu1 %v884_v24  ;;  %804 = vmatprep.subr.bf16.mxu0 %v885_v25 }
  0x31   : > { %826 = vmatprep.subr.bf16.mxu1 %v886_v26 }
  0x33   : > { %805 = vmatpush3.bf16.msra.mxu0 %v887_v27 }
  0x34   : > { %827 = vmatpush3.bf16.msra.mxu1 %v888_v28  ;;  %806 = vmatprep.subr.bf16.mxu0 %v889_v29 }
  0x35   : > { %828 = vmatprep.subr.bf16.mxu1 %v890_v30 }
  0x37   : > { %807 = vmatpush3.bf16.msra.mxu0 %v891_v31 }
  0x38   : > { %829 = vmatpush3.bf16.msra.mxu1 %v892_v32 }
  0x3a   : > { %571 = vmatmul.mubr.bf16.vlgmr.msra.gmra.mrb[0].mxu0 %v751_v35 }
  0x3b   : > { %611 = vmatmul.mubr.bf16.vlgmr.msra.gmra.mrb[0].mxu1 %v753_v37 }
 0x10d   : > { %v808_v39 = vpop.f32.mrb[0].mxu0 }
 0x10e   : > { %v830_v40 = vpop.f32.mrb[0].mxu1  ;;  %v809_v41 = vpop.f32.mrb[1].mxu0 }
 0x10f   : > { %v831_v42 = vpop.f32.mrb[1].mxu1  ;;  %v810_v43 = vadd.f32 %v809_v41, %v808_v39  ;;  %v811_v45 = vpop.f32.mrb[2].mxu0 }
 0x110   : > { %v832_v44 = vadd.f32 %v831_v42, %v830_v40  ;;  %v833_v46 = vpop.f32.mrb[2].mxu1  ;;  %v812_v48 = vpop.f32.mrb[3].mxu0  ;;  %623 = sbr.rel (%p787_p7) target bundleno = 293 (0x125), region = 40 }
 0x111   : > { %v834_v49 = vpop.f32.mrb[3].mxu1 }
 0x112   : > { %v613_v50 = vadd.f32 %v832_v44, %v810_v43 }
 0x114   : > { %v618_v51 = vadd.f32 %v613_v50, %v265_v47 }
 0x116   : > { %619 = vst [vmem:[#allocation2] sm:$0xff] %v618_v51 }
 0x11d   : > { %v624_v52 = vld [vmem:[#allocation2] sm:$0xff] }
 0x11e   : > { %v632_v54 = vadd.f32 %v788_v53, %v624_v52 }
 0x120   : > { %v633_v55 = vmax.f32 %v632_v54, 0.0 }
 0x122   : > { %v634_v56 = vpack.c.bf16 %v633_v55, %v633_v55 }
 0x124   : > { %635 = vst [vmem:[%s1028_s3] sm:$0xf] %v634_v56 }
 0x125 PF: > { %s13_s14 = sadd.s32 1, %s919_s14   ;;  %s1029_s12 = smov %s915_s13 }
 0x126   : > { %p10_p8 = scmp.ge.s32.totalorder %s13_s14, 4   ;;  %s1030_s13 = smov %s1032_s15 }
 0x128   :  { %12 = sbr.rel (!%p10_p8) target bundleno = 2 (0x2), region = 76 }

// kernel: _lambda_.29
= control target key start
LH: loop header
LB: loop body
LE: loop exit
PB: predicated region body
PF: predicated region fallthrough
CT: control target
= control target key end

     0   :  { %s1024_s15 = smov 0   ;;  %s1026_s16 = smov 0   ;;  %s1110_s0 = inlined_call_operand.vmem [shape: bf16[8,1536], index: 0, kind: input, shape index: {}]   ;;  %s1111_s1 = inlined_call_operand.vmem [shape: bf16[1536,128], index: 1, kind: input, shape index: {}]   ;;  %s1112_s2 = inlined_call_operand.vmem [shape: f32[1,128], index: 2, kind: input, shape index: {}]   ;;  %s1113_s3 = inlined_call_operand.vmem [shape: bf16[8,128], index: 3, kind: input, shape index: {}]   ;;  %s1114_s4 = inlined_call_operand.vmem [shape: bf16[8,128], index: 4, kind: output, shape index: {}]  }
   0x1   :  { %s1028_s17 = smov 0  }
   0x2 LB: > { %s26_s18 = sadd.s32 1, %s992_s16  ;;  %p822_p0 = scmp.ge.s32.totalorder %s996_s17, 1  ;;  %s996_s17 = sphi %s1028_s17, %s14_s17   ;;  %s992_s16 = sphi %s1026_s16, %s1116_s16   ;;  %s988_s15 = sphi %s1024_s15, %s1115_s15  }
   0x3   : > { %p27_p1 = scmp.ge.s32.totalorder %s26_s18, 3  ;;  %p228_p2 = scmp.lt.s32.totalorder %s996_s17, 4 }
   0x5   : > { %s1118_s18 = smov (%p27_p1, %s26_s18), 0  ;;  %p229_p3 = pnand %p822_p0, %p228_p2 }
   0x6   : > { %s823_s19 = sshll.u32 (!%p229_p3), %s988_s15, 2  ;;  %s825_s20 = sshll.u32 (!%p229_p3), %s988_s15, 6 }
   0x7   : > { %232 = sbr.rel (%p229_p3) target bundleno = 295 (0x127), region = 36  ;;  %p281_p4 = scmp.lt.s32.totalorder (!%p229_p3), %s823_s19, 11 }
   0x8   : > { %p289_p5 = scmp.lt.s32.totalorder (!%p229_p3), %s825_s20, 191  ;;  %p827_p6 = scmp.ne.s32.totalorder (!%p229_p3), %s988_s15, 0 }
   0xe   : > { %s1120_s19 = smov (!%p281_p4, %s823_s19), 11  ;;  %s1122_s20 = smov (!%p289_p5, %s825_s20), 191 }
   0xf   : > { %s824_s21 = sshll.u32 %s1120_s19, 2  ;;  %s826_s25 = sshll.u32 %s1122_s20, 2  ;;  %v998_v0 = vmov (!%p827_p6), 0.0  }
  0x10   : > { %s1049_s24 = scalar_lea.vmem %s1110_s0, %s824_s21  ;;  %s1054_s28 = scalar_lea.vmem %s1111_s1, %s826_s25  ;;  %319 = vst [vmem:[#allocation2] sm:$0xff] (!%p827_p6), %v998_v0 }
  0x11   : > { %318 = sbr.rel (%p827_p6) target bundleno = 24 (0x18), region = 40 }
  0x18 PF: > { %v938_v1 = vld [vmem:[%s1054_s28 + $0x40] sm:$0xff]   ;;  %v942_v5 = vld [vmem:[%s1054_s28 + $0x48] sm:$0xff]   ;;  %v946_v9 = vld [vmem:[%s1054_s28 + $0x50] sm:$0xff]   ;;  %p864_p7 = scmp.ne.s32.totalorder %s988_s15, 2 }
  0x19   : > { %v939_v2 = vld [vmem:[%s1054_s28 + $0xc0] sm:$0xff]   ;;  %869 = vmatprep.subr.bf16.mxu0 %v938_v1  ;;  %v943_v6 = vld [vmem:[%s1054_s28 + $0xc8] sm:$0xff]   ;;  %v947_v10 = vld [vmem:[%s1054_s28 + $0xd0] sm:$0xff]  }
  0x1a   : > { %v940_v3 = vld [vmem:[%s1054_s28] sm:$0xff]   ;;  %891 = vmatprep.subr.bf16.mxu1 %v939_v2  ;;  %v944_v7 = vld [vmem:[%s1054_s28 + $0x8] sm:$0xff]   ;;  %v948_v11 = vld [vmem:[%s1054_s28 + $0x10] sm:$0xff]  }
  0x1b   : > { %v941_v4 = vld [vmem:[%s1054_s28 + $0x80] sm:$0xff]   ;;  %870 = vmatpush3.bf16.msra.mxu0 %v940_v3  ;;  %v945_v8 = vld [vmem:[%s1054_s28 + $0x88] sm:$0xff]   ;;  %v949_v12 = vld [vmem:[%s1054_s28 + $0x90] sm:$0xff]  }
  0x1c   : > { %892 = vmatpush3.bf16.msra.mxu1 %v941_v4  ;;  %871 = vmatprep.subr.bf16.mxu0 %v942_v5  ;;  %v950_v13 = vld [vmem:[%s1054_s28 + $0x58] sm:$0xff]   ;;  %v954_v17 = vld [vmem:[%s1054_s28 + $0x60] sm:$0xff]   ;;  %v958_v21 = vld [vmem:[%s1054_s28 + $0x68] sm:$0xff]  }
  0x1d   : > { %893 = vmatprep.subr.bf16.mxu1 %v943_v6  ;;  %v951_v14 = vld [vmem:[%s1054_s28 + $0xd8] sm:$0xff]   ;;  %v955_v18 = vld [vmem:[%s1054_s28 + $0xe0] sm:$0xff]   ;;  %v959_v22 = vld [vmem:[%s1054_s28 + $0xe8] sm:$0xff]  }
  0x1e   : > { %v952_v15 = vld [vmem:[%s1054_s28 + $0x18] sm:$0xff]   ;;  %v956_v19 = vld [vmem:[%s1054_s28 + $0x20] sm:$0xff]   ;;  %v960_v23 = vld [vmem:[%s1054_s28 + $0x28] sm:$0xff]  }
  0x1f   : > { %872 = vmatpush3.bf16.msra.mxu0 %v944_v7  ;;  %v953_v16 = vld [vmem:[%s1054_s28 + $0x98] sm:$0xff]   ;;  %v957_v20 = vld [vmem:[%s1054_s28 + $0xa0] sm:$0xff]   ;;  %v961_v24 = vld [vmem:[%s1054_s28 + $0xa8] sm:$0xff]  }
  0x20   : > { %894 = vmatpush3.bf16.msra.mxu1 %v945_v8  ;;  %873 = vmatprep.subr.bf16.mxu0 %v946_v9  ;;  %v962_v25 = vld [vmem:[%s1054_s28 + $0x70] sm:$0xff]   ;;  %v966_v29 = vld [vmem:[%s1054_s28 + $0x78] sm:$0xff]   ;;  %v321_v33 = vld [vmem:[%s1049_s24] sm:$0xff] }
  0x21   : > { %895 = vmatprep.subr.bf16.mxu1 %v947_v10  ;;  %v963_v26 = vld [vmem:[%s1054_s28 + $0xf0] sm:$0xff]   ;;  %v967_v30 = vld [vmem:[%s1054_s28 + $0xf8] sm:$0xff]   ;;  %v322_v34 = vld [vmem:[%s1049_s24 + $0x8] sm:$0xff]  ;;  %v828_v35 = vcombine.low %v321_v33, %v321_v33  ;;  %v829_v36 = vcombine.high %v321_v33, %v321_v33 }
  0x22   : > { %v964_v27 = vld [vmem:[%s1054_s28 + $0x30] sm:$0xff]   ;;  %v968_v31 = vld [vmem:[%s1054_s28 + $0x38] sm:$0xff]   ;;  %v830_v37 = vcombine.low %v322_v34, %v322_v34  ;;  %v831_v38 = vcombine.high %v322_v34, %v322_v34  ;;  %v320_v47 = vld [vmem:[#allocation2] sm:$0xff] }
  0x23   : > { %874 = vmatpush3.bf16.msra.mxu0 %v948_v11  ;;  %v965_v28 = vld [vmem:[%s1054_s28 + $0xb0] sm:$0xff]   ;;  %v969_v32 = vld [vmem:[%s1054_s28 + $0xb8] sm:$0xff]   ;;  %625 = vmatprep.mubr.bf16.mxu0 %v829_v36  ;;  %v865_v53 = vld [vmem:[%s1112_s2] ss:$0 sm:$0xff] (!%p864_p7) }
  0x24   : > { %896 = vmatpush3.bf16.msra.mxu1 %v949_v12  ;;  %875 = vmatprep.subr.bf16.mxu0 %v950_v13  ;;  %v688_v54 = vld [vmem:[%s1113_s3] sm:$0xf] (!%p864_p7) }
  0x25   : > { %897 = vmatprep.subr.bf16.mxu1 %v951_v14  ;;  %665 = vmatprep.mubr.bf16.mxu1 %v831_v38  ;;  %v689_v56 = vunpack.c.l.bf16 (!%p864_p7), %v688_v54 }
  0x27   : > { %876 = vmatpush3.bf16.msra.mxu0 %v952_v15 }
  0x28   : > { %898 = vmatpush3.bf16.msra.mxu1 %v953_v16  ;;  %877 = vmatprep.subr.bf16.mxu0 %v954_v17 }
  0x29   : > { %899 = vmatprep.subr.bf16.mxu1 %v955_v18 }
  0x2b   : > { %878 = vmatpush3.bf16.msra.mxu0 %v956_v19 }
  0x2c   : > { %900 = vmatpush3.bf16.msra.mxu1 %v957_v20  ;;  %879 = vmatprep.subr.bf16.mxu0 %v958_v21 }
  0x2d   : > { %901 = vmatprep.subr.bf16.mxu1 %v959_v22 }
  0x2f   : > { %880 = vmatpush3.bf16.msra.mxu0 %v960_v23 }
  0x30   : > { %902 = vmatpush3.bf16.msra.mxu1 %v961_v24  ;;  %881 = vmatprep.subr.bf16.mxu0 %v962_v25 }
  0x31   : > { %903 = vmatprep.subr.bf16.mxu1 %v963_v26 }
  0x33   : > { %882 = vmatpush3.bf16.msra.mxu0 %v964_v27 }
  0x34   : > { %904 = vmatpush3.bf16.msra.mxu1 %v965_v28  ;;  %883 = vmatprep.subr.bf16.mxu0 %v966_v29 }
  0x35   : > { %905 = vmatprep.subr.bf16.mxu1 %v967_v30 }
  0x37   : > { %884 = vmatpush3.bf16.msra.mxu0 %v968_v31 }
  0x38   : > { %906 = vmatpush3.bf16.msra.mxu1 %v969_v32 }
  0x3a   : > { %626 = vmatmul.mubr.bf16.vlgmr.msra.gmra.mrb[0].mxu0 %v828_v35 }
  0x3b   : > { %666 = vmatmul.mubr.bf16.vlgmr.msra.gmra.mrb[0].mxu1 %v830_v37 }
 0x10d   : > { %v885_v39 = vpop.f32.mrb[0].mxu0 }
 0x10e   : > { %v907_v40 = vpop.f32.mrb[0].mxu1  ;;  %v886_v41 = vpop.f32.mrb[1].mxu0 }
 0x10f   : > { %v908_v42 = vpop.f32.mrb[1].mxu1  ;;  %v887_v43 = vadd.f32 %v886_v41, %v885_v39  ;;  %v888_v45 = vpop.f32.mrb[2].mxu0 }
 0x110   : > { %v909_v44 = vadd.f32 %v908_v42, %v907_v40  ;;  %v910_v46 = vpop.f32.mrb[2].mxu1  ;;  %v889_v48 = vpop.f32.mrb[3].mxu0  ;;  %678 = sbr.rel (%p864_p7) target bundleno = 295 (0x127), region = 44 }
 0x111   : > { %v911_v49 = vpop.f32.mrb[3].mxu1 }
 0x112   : > { %v668_v50 = vadd.f32 %v909_v44, %v887_v43 }
 0x114   : > { %v673_v51 = vadd.f32 %v668_v50, %v320_v47 }
 0x116   : > { %674 = vst [vmem:[#allocation2] sm:$0xff] %v673_v51 }
 0x11d   : > { %v679_v52 = vld [vmem:[#allocation2] sm:$0xff] }
 0x11e   : > { %v687_v55 = vadd.f32 %v865_v53, %v679_v52 }
 0x120   : > { %v690_v57 = vadd.f32 %v689_v56, %v687_v55 }
 0x122   : > { %v691_v58 = vmax.f32 %v690_v57, 0.0 }
 0x124   : > { %v692_v59 = vpack.c.bf16 %v691_v58, %v691_v58 }
 0x126   : > { %693 = vst [vmem:[%s1114_s4] sm:$0xf] %v692_v59 }
 0x127 PF: > { %s14_s17 = sadd.s32 1, %s996_s17   ;;  %s1115_s15 = smov %s992_s16 }
 0x128   : > { %p11_p8 = scmp.ge.s32.totalorder %s14_s17, 5   ;;  %s1116_s16 = smov %s1118_s18 }
 0x12a   :  { %13 = sbr.rel (!%p11_p8) target bundleno = 2 (0x2), region = 83 }

// kernel: _lambda_.30
= control target key start
LH: loop header
LB: loop body
LE: loop exit
PB: predicated region body
PF: predicated region fallthrough
CT: control target
= control target key end

     0   :  { %s942_s12 = smov 0   ;;  %s944_s13 = smov 0   ;;  %s1025_s0 = inlined_call_operand.vmem [shape: bf16[8,1536], index: 0, kind: input, shape index: {}]   ;;  %s1026_s1 = inlined_call_operand.vmem [shape: bf16[1536,128], index: 1, kind: input, shape index: {}]   ;;  %s1027_s2 = inlined_call_operand.vmem [shape: f32[1,128], index: 2, kind: input, shape index: {}]   ;;  %s1028_s3 = inlined_call_operand.vmem [shape: bf16[8,128], index: 3, kind: output, shape index: {}]  }
   0x1   :  { %s946_s14 = smov 0  }
   0x2 LB: > { %s25_s15 = sadd.s32 1, %s915_s13  ;;  %p745_p0 = scmp.ge.s32.totalorder %s919_s14, 1  ;;  %s919_s14 = sphi %s946_s14, %s13_s14   ;;  %s915_s13 = sphi %s944_s13, %s1030_s13   ;;  %s911_s12 = sphi %s942_s12, %s1029_s12  }
   0x3   : > { %p26_p1 = scmp.ge.s32.totalorder %s25_s15, 3  ;;  %p189_p2 = scmp.lt.s32.totalorder %s919_s14, 4 }
   0x5   : > { %s1032_s15 = smov (%p26_p1, %s25_s15), 0  ;;  %p190_p3 = pnand %p745_p0, %p189_p2 }
   0x6   : > { %s746_s16 = sshll.u32 (!%p190_p3), %s911_s12, 2  ;;  %s748_s17 = sshll.u32 (!%p190_p3), %s911_s12, 6 }
   0x7   : > { %193 = sbr.rel (%p190_p3) target bundleno = 293 (0x125), region = 32  ;;  %p233_p4 = scmp.lt.s32.totalorder (!%p190_p3), %s746_s16, 11 }
   0x8   : > { %p241_p5 = scmp.lt.s32.totalorder (!%p190_p3), %s748_s17, 191  ;;  %p750_p6 = scmp.ne.s32.totalorder (!%p190_p3), %s911_s12, 0 }
   0xe   : > { %s1034_s16 = smov (!%p233_p4, %s746_s16), 11  ;;  %s1036_s17 = smov (!%p241_p5, %s748_s17), 191 }
   0xf   : > { %s747_s18 = sshll.u32 %s1034_s16, 2  ;;  %s749_s22 = sshll.u32 %s1036_s17, 2  ;;  %v921_v0 = vmov (!%p750_p6), 0.0  }
  0x10   : > { %s967_s21 = scalar_lea.vmem %s1025_s0, %s747_s18  ;;  %s972_s25 = scalar_lea.vmem %s1026_s1, %s749_s22  ;;  %264 = vst [vmem:[#allocation2] sm:$0xff] (!%p750_p6), %v921_v0 }
  0x11   : > { %263 = sbr.rel (%p750_p6) target bundleno = 24 (0x18), region = 36 }
  0x18 PF: > { %v861_v1 = vld [vmem:[%s972_s25 + $0x40] sm:$0xff]   ;;  %v865_v5 = vld [vmem:[%s972_s25 + $0x48] sm:$0xff]   ;;  %v869_v9 = vld [vmem:[%s972_s25 + $0x50] sm:$0xff]   ;;  %p787_p7 = scmp.ne.s32.totalorder %s911_s12, 2 }
  0x19   : > { %v862_v2 = vld [vmem:[%s972_s25 + $0xc0] sm:$0xff]   ;;  %792 = vmatprep.subr.bf16.mxu0 %v861_v1  ;;  %v866_v6 = vld [vmem:[%s972_s25 + $0xc8] sm:$0xff]   ;;  %v870_v10 = vld [vmem:[%s972_s25 + $0xd0] sm:$0xff]  }
  0x1a   : > { %v863_v3 = vld [vmem:[%s972_s25] sm:$0xff]   ;;  %814 = vmatprep.subr.bf16.mxu1 %v862_v2  ;;  %v867_v7 = vld [vmem:[%s972_s25 + $0x8] sm:$0xff]   ;;  %v871_v11 = vld [vmem:[%s972_s25 + $0x10] sm:$0xff]  }
  0x1b   : > { %v864_v4 = vld [vmem:[%s972_s25 + $0x80] sm:$0xff]   ;;  %793 = vmatpush3.bf16.msra.mxu0 %v863_v3  ;;  %v868_v8 = vld [vmem:[%s972_s25 + $0x88] sm:$0xff]   ;;  %v872_v12 = vld [vmem:[%s972_s25 + $0x90] sm:$0xff]  }
  0x1c   : > { %815 = vmatpush3.bf16.msra.mxu1 %v864_v4  ;;  %794 = vmatprep.subr.bf16.mxu0 %v865_v5  ;;  %v873_v13 = vld [vmem:[%s972_s25 + $0x58] sm:$0xff]   ;;  %v877_v17 = vld [vmem:[%s972_s25 + $0x60] sm:$0xff]   ;;  %v881_v21 = vld [vmem:[%s972_s25 + $0x68] sm:$0xff]  }
  0x1d   : > { %816 = vmatprep.subr.bf16.mxu1 %v866_v6  ;;  %v874_v14 = vld [vmem:[%s972_s25 + $0xd8] sm:$0xff]   ;;  %v878_v18 = vld [vmem:[%s972_s25 + $0xe0] sm:$0xff]   ;;  %v882_v22 = vld [vmem:[%s972_s25 + $0xe8] sm:$0xff]  }
  0x1e   : > { %v875_v15 = vld [vmem:[%s972_s25 + $0x18] sm:$0xff]   ;;  %v879_v19 = vld [vmem:[%s972_s25 + $0x20] sm:$0xff]   ;;  %v883_v23 = vld [vmem:[%s972_s25 + $0x28] sm:$0xff]  }
  0x1f   : > { %795 = vmatpush3.bf16.msra.mxu0 %v867_v7  ;;  %v876_v16 = vld [vmem:[%s972_s25 + $0x98] sm:$0xff]   ;;  %v880_v20 = vld [vmem:[%s972_s25 + $0xa0] sm:$0xff]   ;;  %v884_v24 = vld [vmem:[%s972_s25 + $0xa8] sm:$0xff]  }
  0x20   : > { %817 = vmatpush3.bf16.msra.mxu1 %v868_v8  ;;  %796 = vmatprep.subr.bf16.mxu0 %v869_v9  ;;  %v885_v25 = vld [vmem:[%s972_s25 + $0x70] sm:$0xff]   ;;  %v889_v29 = vld [vmem:[%s972_s25 + $0x78] sm:$0xff]   ;;  %v266_v33 = vld [vmem:[%s967_s21] sm:$0xff] }
  0x21   : > { %818 = vmatprep.subr.bf16.mxu1 %v870_v10  ;;  %v886_v26 = vld [vmem:[%s972_s25 + $0xf0] sm:$0xff]   ;;  %v890_v30 = vld [vmem:[%s972_s25 + $0xf8] sm:$0xff]   ;;  %v267_v34 = vld [vmem:[%s967_s21 + $0x8] sm:$0xff]  ;;  %v751_v35 = vcombine.low %v266_v33, %v266_v33  ;;  %v752_v36 = vcombine.high %v266_v33, %v266_v33 }
  0x22   : > { %v887_v27 = vld [vmem:[%s972_s25 + $0x30] sm:$0xff]   ;;  %v891_v31 = vld [vmem:[%s972_s25 + $0x38] sm:$0xff]   ;;  %v753_v37 = vcombine.low %v267_v34, %v267_v34  ;;  %v754_v38 = vcombine.high %v267_v34, %v267_v34  ;;  %v265_v47 = vld [vmem:[#allocation2] sm:$0xff] }
  0x23   : > { %797 = vmatpush3.bf16.msra.mxu0 %v871_v11  ;;  %v888_v28 = vld [vmem:[%s972_s25 + $0xb0] sm:$0xff]   ;;  %v892_v32 = vld [vmem:[%s972_s25 + $0xb8] sm:$0xff]   ;;  %570 = vmatprep.mubr.bf16.mxu0 %v752_v36  ;;  %v788_v53 = vld [vmem:[%s1027_s2] ss:$0 sm:$0xff] (!%p787_p7) }
  0x24   : > { %819 = vmatpush3.bf16.msra.mxu1 %v872_v12  ;;  %798 = vmatprep.subr.bf16.mxu0 %v873_v13 }
  0x25   : > { %820 = vmatprep.subr.bf16.mxu1 %v874_v14  ;;  %610 = vmatprep.mubr.bf16.mxu1 %v754_v38 }
  0x27   : > { %799 = vmatpush3.bf16.msra.mxu0 %v875_v15 }
  0x28   : > { %821 = vmatpush3.bf16.msra.mxu1 %v876_v16  ;;  %800 = vmatprep.subr.bf16.mxu0 %v877_v17 }
  0x29   : > { %822 = vmatprep.subr.bf16.mxu1 %v878_v18 }
  0x2b   : > { %801 = vmatpush3.bf16.msra.mxu0 %v879_v19 }
  0x2c   : > { %823 = vmatpush3.bf16.msra.mxu1 %v880_v20  ;;  %802 = vmatprep.subr.bf16.mxu0 %v881_v21 }
  0x2d   : > { %824 = vmatprep.subr.bf16.mxu1 %v882_v22 }
  0x2f   : > { %803 = vmatpush3.bf16.msra.mxu0 %v883_v23 }
  0x30   : > { %825 = vmatpush3.bf16.msra.mxu1 %v884_v24  ;;  %804 = vmatprep.subr.bf16.mxu0 %v885_v25 }
  0x31   : > { %826 = vmatprep.subr.bf16.mxu1 %v886_v26 }
  0x33   : > { %805 = vmatpush3.bf16.msra.mxu0 %v887_v27 }
  0x34   : > { %827 = vmatpush3.bf16.msra.mxu1 %v888_v28  ;;  %806 = vmatprep.subr.bf16.mxu0 %v889_v29 }
  0x35   : > { %828 = vmatprep.subr.bf16.mxu1 %v890_v30 }
  0x37   : > { %807 = vmatpush3.bf16.msra.mxu0 %v891_v31 }
  0x38   : > { %829 = vmatpush3.bf16.msra.mxu1 %v892_v32 }
  0x3a   : > { %571 = vmatmul.mubr.bf16.vlgmr.msra.gmra.mrb[0].mxu0 %v751_v35 }
  0x3b   : > { %611 = vmatmul.mubr.bf16.vlgmr.msra.gmra.mrb[0].mxu1 %v753_v37 }
 0x10d   : > { %v808_v39 = vpop.f32.mrb[0].mxu0 }
 0x10e   : > { %v830_v40 = vpop.f32.mrb[0].mxu1  ;;  %v809_v41 = vpop.f32.mrb[1].mxu0 }
 0x10f   : > { %v831_v42 = vpop.f32.mrb[1].mxu1  ;;  %v810_v43 = vadd.f32 %v809_v41, %v808_v39  ;;  %v811_v45 = vpop.f32.mrb[2].mxu0 }
 0x110   : > { %v832_v44 = vadd.f32 %v831_v42, %v830_v40  ;;  %v833_v46 = vpop.f32.mrb[2].mxu1  ;;  %v812_v48 = vpop.f32.mrb[3].mxu0  ;;  %623 = sbr.rel (%p787_p7) target bundleno = 293 (0x125), region = 40 }
 0x111   : > { %v834_v49 = vpop.f32.mrb[3].mxu1 }
 0x112   : > { %v613_v50 = vadd.f32 %v832_v44, %v810_v43 }
 0x114   : > { %v618_v51 = vadd.f32 %v613_v50, %v265_v47 }
 0x116   : > { %619 = vst [vmem:[#allocation2] sm:$0xff] %v618_v51 }
 0x11d   : > { %v624_v52 = vld [vmem:[#allocation2] sm:$0xff] }
 0x11e   : > { %v632_v54 = vadd.f32 %v788_v53, %v624_v52 }
 0x120   : > { %v633_v55 = vmax.f32 %v632_v54, 0.0 }
 0x122   : > { %v634_v56 = vpack.c.bf16 %v633_v55, %v633_v55 }
 0x124   : > { %635 = vst [vmem:[%s1028_s3] sm:$0xf] %v634_v56 }
 0x125 PF: > { %s13_s14 = sadd.s32 1, %s919_s14   ;;  %s1029_s12 = smov %s915_s13 }
 0x126   : > { %p10_p8 = scmp.ge.s32.totalorder %s13_s14, 5   ;;  %s1030_s13 = smov %s1032_s15 }
 0x128   :  { %12 = sbr.rel (!%p10_p8) target bundleno = 2 (0x2), region = 76 }

// kernel: _lambda_.33
= control target key start
LH: loop header
LB: loop body
LE: loop exit
PB: predicated region body
PF: predicated region fallthrough
CT: control target
= control target key end

     0   :  { %v240_v1 = vmov 0   ;;  %v172_v18 = vlaneseq  ;;  %s318_s1 = inlined_call_operand.vmem [shape: bf16[128,256], index: 1, kind: input, shape index: {}]   ;;  %s319_s0 = inlined_call_operand.vmem [shape: bf16[8,128], index: 0, kind: input, shape index: {}]   ;;  %s320_s2 = inlined_call_operand.vmem [shape: f32[1,256], index: 2, kind: input, shape index: {}]   ;;  %s321_s3 = inlined_call_operand.vmem [shape: bf16[8,256], index: 3, kind: output, shape index: {}]  }
   0x1   :  { %v216_v0 = vld [vmem:[%s318_s1 + $0x4] ss:$8 sps:$4 sm:$0xff]   ;;  %152 = vmatprep.mubr.bf16.mxu0 %v240_v1  ;;  %v218_v2 = vld [vmem:[%s318_s1] ss:$8 sps:$4 sm:$0xff]   ;;  %v219_v3 = vld [vmem:[%s318_s1 + $0x14] ss:$8 sps:$4 sm:$0xff]  }
   0x2   :  { %120 = vmatprep.subr.bf16.mxu0 %v216_v0  ;;  %v221_v4 = vld [vmem:[%s318_s1 + $0x10] ss:$8 sps:$4 sm:$0xff]   ;;  %v222_v5 = vld [vmem:[%s318_s1 + $0x24] ss:$8 sps:$4 sm:$0xff]   ;;  %v224_v6 = vld [vmem:[%s318_s1 + $0x20] ss:$8 sps:$4 sm:$0xff]  }
   0x3   :  { %121 = vmatpush1.bf16.msra.mxu0 %v218_v2  ;;  %v225_v7 = vld [vmem:[%s318_s1 + $0x34] ss:$8 sps:$4 sm:$0xff]   ;;  %v227_v8 = vld [vmem:[%s318_s1 + $0x30] ss:$8 sps:$4 sm:$0xff]   ;;  %v228_v9 = vld [vmem:[%s318_s1 + $0x44] ss:$8 sps:$4 sm:$0xff]  }
   0x4   :  { %122 = vmatprep.subr.bf16.mxu0 %v219_v3  ;;  %v230_v10 = vld [vmem:[%s318_s1 + $0x40] ss:$8 sps:$4 sm:$0xff]   ;;  %v231_v11 = vld [vmem:[%s318_s1 + $0x54] ss:$8 sps:$4 sm:$0xff]   ;;  %v233_v12 = vld [vmem:[%s318_s1 + $0x50] ss:$8 sps:$4 sm:$0xff]  }
   0x5   :  { %v234_v13 = vld [vmem:[%s318_s1 + $0x64] ss:$8 sps:$4 sm:$0xff]   ;;  %v236_v14 = vld [vmem:[%s318_s1 + $0x60] ss:$8 sps:$4 sm:$0xff]   ;;  %v237_v15 = vld [vmem:[%s318_s1 + $0x74] ss:$8 sps:$4 sm:$0xff]  }
   0x6   :  { %v239_v16 = vld [vmem:[%s318_s1 + $0x70] ss:$8 sps:$4 sm:$0xff]   ;;  %v23_v17 = vld [vmem:[%s319_s0] sm:$0xf]  ;;  %v173_v19 = vshrl.u32 %v172_v18, 7 }
   0x7   :  { %123 = vmatpush1.bf16.msra.mxu0 %v221_v4  ;;  %v170_v21 = vld [vmem:[%s320_s2] sm:$0x3] }
   0x8   :  { %124 = vmatprep.subr.bf16.mxu0 %v222_v5  ;;  %v174_v20 = vsub.s32 0, %v173_v19  ;;  %v178_v22 = vsub.s32 1, %v173_v19 }
   0xa   :  { %v175_v23 = vrot.slane %v170_v21, %v174_v20  ;;  %v179_v24 = vrot.slane %v170_v21, %v178_v22 }
   0xb   :  { %125 = vmatpush1.bf16.msra.mxu0 %v224_v6 }
   0xc   :  { %126 = vmatprep.subr.bf16.mxu0 %v225_v7 }
   0xf   :  { %127 = vmatpush1.bf16.msra.mxu0 %v227_v8 }
  0x10   :  { %128 = vmatprep.subr.bf16.mxu0 %v228_v9 }
  0x13   :  { %129 = vmatpush1.bf16.msra.mxu0 %v230_v10 }
  0x14   :  { %130 = vmatprep.subr.bf16.mxu0 %v231_v11 }
  0x17   :  { %131 = vmatpush1.bf16.msra.mxu0 %v233_v12 }
  0x18   :  { %132 = vmatprep.subr.bf16.mxu0 %v234_v13 }
  0x1b   :  { %133 = vmatpush1.bf16.msra.mxu0 %v236_v14 }
  0x1c   :  { %134 = vmatprep.subr.bf16.mxu0 %v237_v15 }
  0x1f   :  { %135 = vmatpush1.bf16.msra.mxu0 %v239_v16 }
  0x22   :  { %153 = vmatmul.mubr.bf16.vlgmr.msra.gmra.mrb[0].mxu0 %v23_v17 }
  0xf5   :  { %v154_v25 = vpop.f32.mrb[0].mxu0 }
  0xf6   :  { %v182_v26 = vadd.f32 %v175_v23, %v154_v25  ;;  %v156_v27 = vpop.f32.mrb[1].mxu0 }
  0xf7   :  { %v183_v28 = vadd.f32 %v179_v24, %v156_v27  ;;  %v158_v29 = vpop.f32.mrb[2].mxu0 }
  0xf8   :  { %v159_v30 = vpop.f32.mrb[3].mxu0 }
  0xf9   :  { %v214_v31 = vpack.c.bf16 %v183_v28, %v182_v26 }
  0xfb   :  { %192 = vst [vmem:[%s321_s3] sm:$0xff] %v214_v31 }

// kernel: _lambda_.32
= control target key start
LH: loop header
LB: loop body
LE: loop exit
PB: predicated region body
PF: predicated region fallthrough
CT: control target
= control target key end

     0   :  { %s1176_s12 = smov 0   ;;  %s1178_s13 = smov 0   ;;  %s1291_s0 = inlined_call_operand.vmem [shape: bf16[8,1536], index: 0, kind: input, shape index: {}]   ;;  %s1292_s1 = inlined_call_operand.vmem [shape: bf16[1536,256], index: 1, kind: input, shape index: {}]   ;;  %s1293_s2 = inlined_call_operand.vmem [shape: f32[1,256], index: 2, kind: input, shape index: {}]   ;;  %s1294_s3 = inlined_call_operand.vmem [shape: bf16[8,256], index: 3, kind: output, shape index: {}]  }
   0x1   :  { %s1180_s14 = smov 0  }
   0x2 LB: > { %s25_s15 = sadd.s32 1, %s1149_s13  ;;  %p923_p0 = scmp.ge.s32.totalorder %s1153_s14, 1  ;;  %s1153_s14 = sphi %s1180_s14, %s13_s14   ;;  %s1149_s13 = sphi %s1178_s13, %s1296_s13   ;;  %s1145_s12 = sphi %s1176_s12, %s1295_s12  }
   0x3   : > { %p26_p1 = scmp.ge.s32.totalorder %s25_s15, 3  ;;  %p194_p2 = scmp.lt.s32.totalorder %s1153_s14, 4 }
   0x5   : > { %s1298_s15 = smov (%p26_p1, %s25_s15), 0  ;;  %p195_p3 = pnand %p923_p0, %p194_p2 }
   0x6   : > { %s924_s16 = sshll.u32 (!%p195_p3), %s1145_s12, 2  ;;  %s926_s17 = sshll.u32 (!%p195_p3), %s1145_s12, 6 }
   0x7   : > { %198 = sbr.rel (%p195_p3) target bundleno = 322 (0x142), region = 32  ;;  %p243_p4 = scmp.lt.s32.totalorder (!%p195_p3), %s924_s16, 11 }
   0x8   : > { %p252_p5 = scmp.lt.s32.totalorder (!%p195_p3), %s926_s17, 191  ;;  %p929_p6 = scmp.ne.s32.totalorder (!%p195_p3), %s1145_s12, 0 }
   0xe   : > { %s1300_s16 = smov (!%p243_p4, %s924_s16), 11  ;;  %s1302_s17 = smov (!%p252_p5, %s926_s17), 191 }
   0xf   : > { %s925_s18 = sshll.u32 %s1300_s16, 2  ;;  %s1004_s22 = sshll.u32 %s1302_s17, 3  ;;  %v1155_v0 = vmov (!%p929_p6), 0.0  }
  0x10   : > { %s1201_s21 = scalar_lea.vmem %s1291_s0, %s925_s18  ;;  %s1206_s25 = scalar_lea.vmem %s1292_s1, %s1004_s22  ;;  %281 = vst [vmem:[#allocation2] sm:$0xff] (!%p929_p6), %v1155_v0  ;;  %282 = vst [vmem:[#allocation2 + $0x8] sm:$0xff] (!%p929_p6), %v1155_v0 }
  0x11   : > { %280 = sbr.rel (%p929_p6) target bundleno = 24 (0x18), region = 36 }
  0x18 PF: > { %v1031_v1 = vld [vmem:[%s1206_s25 + $0x4] ss:$8 sps:$4 sm:$0xff]   ;;  %v1035_v3 = vld [vmem:[%s1206_s25] ss:$8 sps:$4 sm:$0xff]   ;;  %v1037_v5 = vld [vmem:[%s1206_s25 + $0x14] ss:$8 sps:$4 sm:$0xff]  }
  0x19   : > { %v1033_v2 = vld [vmem:[%s1206_s25 + $0x104] ss:$8 sps:$4 sm:$0xff]   ;;  %685 = vmatprep.subr.bf16.mxu0 %v1031_v1  ;;  %v1036_v4 = vld [vmem:[%s1206_s25 + $0x100] ss:$8 sps:$4 sm:$0xff]   ;;  %v1039_v6 = vld [vmem:[%s1206_s25 + $0x114] ss:$8 sps:$4 sm:$0xff]  }
  0x1a   : > { %726 = vmatprep.subr.bf16.mxu1 %v1033_v2  ;;  %686 = vmatpush1.bf16.msra.mxu0 %v1035_v3  ;;  %v1041_v7 = vld [vmem:[%s1206_s25 + $0x10] ss:$8 sps:$4 sm:$0xff]   ;;  %v1043_v9 = vld [vmem:[%s1206_s25 + $0x24] ss:$8 sps:$4 sm:$0xff]   ;;  %v1047_v11 = vld [vmem:[%s1206_s25 + $0x20] ss:$8 sps:$4 sm:$0xff]  }
  0x1b   : > { %727 = vmatpush1.bf16.msra.mxu1 %v1036_v4  ;;  %687 = vmatprep.subr.bf16.mxu0 %v1037_v5  ;;  %v1042_v8 = vld [vmem:[%s1206_s25 + $0x110] ss:$8 sps:$4 sm:$0xff]   ;;  %v1045_v10 = vld [vmem:[%s1206_s25 + $0x124] ss:$8 sps:$4 sm:$0xff]   ;;  %v1048_v12 = vld [vmem:[%s1206_s25 + $0x120] ss:$8 sps:$4 sm:$0xff]  }
  0x1c   : > { %728 = vmatprep.subr.bf16.mxu1 %v1039_v6  ;;  %v1049_v13 = vld [vmem:[%s1206_s25 + $0x34] ss:$8 sps:$4 sm:$0xff]   ;;  %v1053_v15 = vld [vmem:[%s1206_s25 + $0x30] ss:$8 sps:$4 sm:$0xff]   ;;  %v1055_v17 = vld [vmem:[%s1206_s25 + $0x44] ss:$8 sps:$4 sm:$0xff]  }
  0x1d   : > { %v1051_v14 = vld [vmem:[%s1206_s25 + $0x134] ss:$8 sps:$4 sm:$0xff]   ;;  %v1054_v16 = vld [vmem:[%s1206_s25 + $0x130] ss:$8 sps:$4 sm:$0xff]   ;;  %v1057_v18 = vld [vmem:[%s1206_s25 + $0x144] ss:$8 sps:$4 sm:$0xff]  }
  0x1e   : > { %688 = vmatpush1.bf16.msra.mxu0 %v1041_v7  ;;  %v1059_v19 = vld [vmem:[%s1206_s25 + $0x40] ss:$8 sps:$4 sm:$0xff]   ;;  %v1061_v21 = vld [vmem:[%s1206_s25 + $0x54] ss:$8 sps:$4 sm:$0xff]   ;;  %v1065_v23 = vld [vmem:[%s1206_s25 + $0x50] ss:$8 sps:$4 sm:$0xff]  }
  0x1f   : > { %729 = vmatpush1.bf16.msra.mxu1 %v1042_v8  ;;  %689 = vmatprep.subr.bf16.mxu0 %v1043_v9  ;;  %v1060_v20 = vld [vmem:[%s1206_s25 + $0x140] ss:$8 sps:$4 sm:$0xff]   ;;  %v1063_v22 = vld [vmem:[%s1206_s25 + $0x154] ss:$8 sps:$4 sm:$0xff]   ;;  %v1066_v24 = vld [vmem:[%s1206_s25 + $0x150] ss:$8 sps:$4 sm:$0xff]  }
  0x20   : > { %730 = vmatprep.subr.bf16.mxu1 %v1045_v10  ;;  %v1067_v25 = vld [vmem:[%s1206_s25 + $0x64] ss:$8 sps:$4 sm:$0xff]   ;;  %v1071_v27 = vld [vmem:[%s1206_s25 + $0x60] ss:$8 sps:$4 sm:$0xff]   ;;  %v1073_v29 = vld [vmem:[%s1206_s25 + $0x74] ss:$8 sps:$4 sm:$0xff]  }
  0x21   : > { %v1069_v26 = vld [vmem:[%s1206_s25 + $0x164] ss:$8 sps:$4 sm:$0xff]   ;;  %v1072_v28 = vld [vmem:[%s1206_s25 + $0x160] ss:$8 sps:$4 sm:$0xff]   ;;  %v1075_v30 = vld [vmem:[%s1206_s25 + $0x174] ss:$8 sps:$4 sm:$0xff]  }
  0x22   : > { %690 = vmatpush1.bf16.msra.mxu0 %v1047_v11  ;;  %v1077_v31 = vld [vmem:[%s1206_s25 + $0x70] ss:$8 sps:$4 sm:$0xff]   ;;  %v1079_v33 = vld [vmem:[%s1206_s25 + $0x84] ss:$8 sps:$4 sm:$0xff]   ;;  %v1083_v35 = vld [vmem:[%s1206_s25 + $0x80] ss:$8 sps:$4 sm:$0xff]  }
  0x23   : > { %731 = vmatpush1.bf16.msra.mxu1 %v1048_v12  ;;  %691 = vmatprep.subr.bf16.mxu0 %v1049_v13  ;;  %v1078_v32 = vld [vmem:[%s1206_s25 + $0x170] ss:$8 sps:$4 sm:$0xff]   ;;  %v1081_v34 = vld [vmem:[%s1206_s25 + $0x184] ss:$8 sps:$4 sm:$0xff]   ;;  %v1084_v36 = vld [vmem:[%s1206_s25 + $0x180] ss:$8 sps:$4 sm:$0xff]  }
  0x24   : > { %732 = vmatprep.subr.bf16.mxu1 %v1051_v14  ;;  %v1085_v37 = vld [vmem:[%s1206_s25 + $0x94] ss:$8 sps:$4 sm:$0xff]   ;;  %v1089_v39 = vld [vmem:[%s1206_s25 + $0x90] ss:$8 sps:$4 sm:$0xff]   ;;  %v1091_v41 = vld [vmem:[%s1206_s25 + $0xa4] ss:$8 sps:$4 sm:$0xff]  }
  0x25   : > { %v1087_v38 = vld [vmem:[%s1206_s25 + $0x194] ss:$8 sps:$4 sm:$0xff]   ;;  %v1090_v40 = vld [vmem:[%s1206_s25 + $0x190] ss:$8 sps:$4 sm:$0xff]   ;;  %v1093_v42 = vld [vmem:[%s1206_s25 + $0x1a4] ss:$8 sps:$4 sm:$0xff]  }
  0x26   : > { %692 = vmatpush1.bf16.msra.mxu0 %v1053_v15  ;;  %v1095_v43 = vld [vmem:[%s1206_s25 + $0xa0] ss:$8 sps:$4 sm:$0xff]   ;;  %v1097_v45 = vld [vmem:[%s1206_s25 + $0xb4] ss:$8 sps:$4 sm:$0xff]   ;;  %v1101_v50 = vld [vmem:[%s1206_s25 + $0xb0] ss:$8 sps:$4 sm:$0xff]  }
  0x27   : > { %733 = vmatpush1.bf16.msra.mxu1 %v1054_v16  ;;  %693 = vmatprep.subr.bf16.mxu0 %v1055_v17  ;;  %v1096_v44 = vld [vmem:[%s1206_s25 + $0x1a0] ss:$8 sps:$4 sm:$0xff]   ;;  %v1099_v46 = vld [vmem:[%s1206_s25 + $0x1b4] ss:$8 sps:$4 sm:$0xff]   ;;  %v1102_v51 = vld [vmem:[%s1206_s25 + $0x1b0] ss:$8 sps:$4 sm:$0xff]  }
  0x28   : > { %734 = vmatprep.subr.bf16.mxu1 %v1057_v18  ;;  %v285_v47 = vld [vmem:[%s1201_s21] sm:$0xff]  ;;  %v286_v49 = vld [vmem:[%s1201_s21 + $0x8] sm:$0xff]  ;;  %v1109_v57 = vld [vmem:[%s1206_s25 + $0xd4] ss:$8 sps:$4 sm:$0xff]   ;;  %p998_p7 = scmp.ne.s32.totalorder %s1145_s12, 2 }
  0x29   : > { %v931_v48 = vcombine.high %v285_v47, %v285_v47  ;;  %v933_v52 = vcombine.high %v286_v49, %v286_v49  ;;  %v1103_v53 = vld [vmem:[%s1206_s25 + $0xc4] ss:$8 sps:$4 sm:$0xff]   ;;  %v1107_v55 = vld [vmem:[%s1206_s25 + $0xc0] ss:$8 sps:$4 sm:$0xff]   ;;  %v1111_v58 = vld [vmem:[%s1206_s25 + $0x1d4] ss:$8 sps:$4 sm:$0xff]   ;;  %v930_v5 = vcombine.low %v285_v47, %v285_v47  ;;  %v932_v6 = vcombine.low %v286_v49, %v286_v49 }
  0x2a   : > { %694 = vmatpush1.bf16.msra.mxu0 %v1059_v19  ;;  %v1105_v54 = vld [vmem:[%s1206_s25 + $0x1c4] ss:$8 sps:$4 sm:$0xff]   ;;  %v1108_v56 = vld [vmem:[%s1206_s25 + $0x1c0] ss:$8 sps:$4 sm:$0xff]   ;;  %v1113_v59 = vld [vmem:[%s1206_s25 + $0xd0] ss:$8 sps:$4 sm:$0xff]  }
  0x2b   : > { %735 = vmatpush1.bf16.msra.mxu1 %v1060_v20  ;;  %695 = vmatprep.subr.bf16.mxu0 %v1061_v21  ;;  %v1114_v60 = vld [vmem:[%s1206_s25 + $0x1d0] ss:$8 sps:$4 sm:$0xff]   ;;  %v1115_v61 = vld [vmem:[%s1206_s25 + $0xe4] ss:$8 sps:$4 sm:$0xff]   ;;  %v1119_v63 = vld [vmem:[%s1206_s25 + $0xe0] ss:$8 sps:$4 sm:$0xff]   ;;  %v779_v21 = vlaneseq (!%p998_p7) }
  0x2c   : > { %736 = vmatprep.subr.bf16.mxu1 %v1063_v22  ;;  %717 = vmatprep.mubr.bf16.mxu0 %v931_v48  ;;  %v1117_v62 = vld [vmem:[%s1206_s25 + $0x1e4] ss:$8 sps:$4 sm:$0xff]   ;;  %v1120_v0 = vld [vmem:[%s1206_s25 + $0x1e0] ss:$8 sps:$4 sm:$0xff]   ;;  %v1121_v1 = vld [vmem:[%s1206_s25 + $0xf4] ss:$8 sps:$4 sm:$0xff]  }
  0x2d   : > { %758 = vmatprep.mubr.bf16.mxu1 %v933_v52  ;;  %v1123_v2 = vld [vmem:[%s1206_s25 + $0x1f4] ss:$8 sps:$4 sm:$0xff]   ;;  %v1125_v3 = vld [vmem:[%s1206_s25 + $0xf0] ss:$8 sps:$4 sm:$0xff]   ;;  %v283_v8 = vld [vmem:[#allocation2] sm:$0xff]  ;;  %v780_v22 = vshrl.u32 (!%p998_p7), %v779_v21, 7 }
  0x2e   : > { %696 = vmatpush1.bf16.msra.mxu0 %v1065_v23  ;;  %v1126_v4 = vld [vmem:[%s1206_s25 + $0x1f0] ss:$8 sps:$4 sm:$0xff]   ;;  %v284_v12 = vld [vmem:[#allocation2 + $0x8] sm:$0xff]  ;;  %v777_v23 = vld [vmem:[%s1293_s2] sm:$0x3] (!%p998_p7) }
  0x2f   : > { %737 = vmatpush1.bf16.msra.mxu1 %v1066_v24  ;;  %697 = vmatprep.subr.bf16.mxu0 %v1067_v25  ;;  %v781_v24 = vsub.s32 (!%p998_p7), 0, %v780_v22  ;;  %v785_v25 = vsub.s32 (!%p998_p7), 1, %v780_v22 }
  0x30   : > { %738 = vmatprep.subr.bf16.mxu1 %v1069_v26 }
  0x32   : > { %698 = vmatpush1.bf16.msra.mxu0 %v1071_v27 }
  0x33   : > { %739 = vmatpush1.bf16.msra.mxu1 %v1072_v28  ;;  %699 = vmatprep.subr.bf16.mxu0 %v1073_v29  ;;  %v782_v28 = vrot.slane (!%p998_p7), %v777_v23, %v781_v24  ;;  %v786_v29 = vrot.slane (!%p998_p7), %v777_v23, %v785_v25 }
  0x34   : > { %740 = vmatprep.subr.bf16.mxu1 %v1075_v30 }
  0x36   : > { %700 = vmatpush1.bf16.msra.mxu0 %v1077_v31 }
  0x37   : > { %741 = vmatpush1.bf16.msra.mxu1 %v1078_v32  ;;  %701 = vmatprep.subr.bf16.mxu0 %v1079_v33 }
  0x38   : > { %742 = vmatprep.subr.bf16.mxu1 %v1081_v34 }
  0x3a   : > { %702 = vmatpush1.bf16.msra.mxu0 %v1083_v35 }
  0x3b   : > { %743 = vmatpush1.bf16.msra.mxu1 %v1084_v36  ;;  %703 = vmatprep.subr.bf16.mxu0 %v1085_v37 }
  0x3c   : > { %744 = vmatprep.subr.bf16.mxu1 %v1087_v38 }
  0x3e   : > { %704 = vmatpush1.bf16.msra.mxu0 %v1089_v39 }
  0x3f   : > { %745 = vmatpush1.bf16.msra.mxu1 %v1090_v40  ;;  %705 = vmatprep.subr.bf16.mxu0 %v1091_v41 }
  0x40   : > { %746 = vmatprep.subr.bf16.mxu1 %v1093_v42 }
  0x42   : > { %706 = vmatpush1.bf16.msra.mxu0 %v1095_v43 }
  0x43   : > { %747 = vmatpush1.bf16.msra.mxu1 %v1096_v44  ;;  %707 = vmatprep.subr.bf16.mxu0 %v1097_v45 }
  0x44   : > { %748 = vmatprep.subr.bf16.mxu1 %v1099_v46 }
  0x46   : > { %708 = vmatpush1.bf16.msra.mxu0 %v1101_v50 }
  0x47   : > { %749 = vmatpush1.bf16.msra.mxu1 %v1102_v51  ;;  %709 = vmatprep.subr.bf16.mxu0 %v1103_v53 }
  0x48   : > { %750 = vmatprep.subr.bf16.mxu1 %v1105_v54 }
  0x4a   : > { %710 = vmatpush1.bf16.msra.mxu0 %v1107_v55 }
  0x4b   : > { %751 = vmatpush1.bf16.msra.mxu1 %v1108_v56  ;;  %711 = vmatprep.subr.bf16.mxu0 %v1109_v57 }
  0x4c   : > { %752 = vmatprep.subr.bf16.mxu1 %v1111_v58 }
  0x4e   : > { %712 = vmatpush1.bf16.msra.mxu0 %v1113_v59 }
  0x4f   : > { %753 = vmatpush1.bf16.msra.mxu1 %v1114_v60  ;;  %713 = vmatprep.subr.bf16.mxu0 %v1115_v61 }
  0x50   : > { %754 = vmatprep.subr.bf16.mxu1 %v1117_v62 }
  0x52   : > { %714 = vmatpush1.bf16.msra.mxu0 %v1119_v63 }
  0x53   : > { %755 = vmatpush1.bf16.msra.mxu1 %v1120_v0  ;;  %715 = vmatprep.subr.bf16.mxu0 %v1121_v1 }
  0x54   : > { %756 = vmatprep.subr.bf16.mxu1 %v1123_v2 }
  0x56   : > { %716 = vmatpush1.bf16.msra.mxu0 %v1125_v3 }
  0x57   : > { %757 = vmatpush1.bf16.msra.mxu1 %v1126_v4 }
  0x59   : > { %718 = vmatmul.mubr.bf16.vlgmr.msra.gmra.mrb[0].mxu0 %v930_v5 }
  0x5a   : > { %759 = vmatmul.mubr.bf16.vlgmr.msra.gmra.mrb[0].mxu1 %v932_v6 }
 0x12c   : > { %v719_v7 = vpop.f32.mrb[0].mxu0 }
 0x12d   : > { %v760_v9 = vpop.f32.mrb[0].mxu1  ;;  %v721_v11 = vpop.f32.mrb[1].mxu0  ;;  %774 = sbr.rel (%p998_p7) target bundleno = 322 (0x142), region = 40 }
 0x12e   : > { %v761_v10 = vadd.f32 %v760_v9, %v719_v7  ;;  %v762_v13 = vpop.f32.mrb[1].mxu1  ;;  %v723_v15 = vpop.f32.mrb[2].mxu0 }
 0x12f   : > { %v763_v14 = vadd.f32 %v762_v13, %v721_v11  ;;  %v764_v16 = vpop.f32.mrb[2].mxu1  ;;  %v724_v18 = vpop.f32.mrb[3].mxu0 }
 0x130   : > { %v767_v17 = vadd.f32 %v761_v10, %v283_v8  ;;  %v765_v19 = vpop.f32.mrb[3].mxu1 }
 0x131   : > { %v768_v20 = vadd.f32 %v763_v14, %v284_v12 }
 0x132   : > { %769 = vst [vmem:[#allocation2] sm:$0xff] %v767_v17 }
 0x133   : > { %770 = vst [vmem:[#allocation2 + $0x8] sm:$0xff] %v768_v20 }
 0x139   : > { %v775_v26 = vld [vmem:[#allocation2] sm:$0xff] }
 0x13a   : > { %v776_v27 = vld [vmem:[#allocation2 + $0x8] sm:$0xff]  ;;  %v789_v30 = vadd.f32 %v782_v28, %v775_v26 }
 0x13b   : > { %v790_v31 = vadd.f32 %v786_v29, %v776_v27 }
 0x13c   : > { %v791_v32 = vmax.f32 %v789_v30, 0.0 }
 0x13d   : > { %v792_v33 = vmax.f32 %v790_v31, 0.0 }
 0x13f   : > { %v1005_v34 = vpack.c.bf16 %v792_v33, %v791_v32 }
 0x141   : > { %801 = vst [vmem:[%s1294_s3] sm:$0xff] %v1005_v34 }
 0x142 PF: > { %s13_s14 = sadd.s32 1, %s1153_s14   ;;  %s1295_s12 = smov %s1149_s13 }
 0x143   : > { %p10_p8 = scmp.ge.s32.totalorder %s13_s14, 5   ;;  %s1296_s13 = smov %s1298_s15 }
 0x145   :  { %12 = sbr.rel (!%p10_p8) target bundleno = 2 (0x2), region = 76 }

// kernel: _lambda_.34
= control target key start
LH: loop header
LB: loop body
LE: loop exit
PB: predicated region body
PF: predicated region fallthrough
CT: control target
= control target key end

     0   :  { %s1271_s15 = smov 0   ;;  %s1273_s16 = smov 0   ;;  %s1389_s0 = inlined_call_operand.vmem [shape: bf16[8,2560], index: 0, kind: input, shape index: {}]   ;;  %s1390_s1 = inlined_call_operand.vmem [shape: bf16[2560,256], index: 1, kind: input, shape index: {}]   ;;  %s1391_s2 = inlined_call_operand.vmem [shape: f32[1,256], index: 2, kind: input, shape index: {}]   ;;  %s1392_s3 = inlined_call_operand.vmem [shape: bf16[8,256], index: 3, kind: input, shape index: {}]   ;;  %s1393_s4 = inlined_call_operand.vmem [shape: bf16[8,256], index: 4, kind: output, shape index: {}]  }
   0x1   :  { %s1275_s17 = smov 0  }
   0x2 LB: > { %s26_s18 = sadd.s32 1, %s1239_s16  ;;  %p1013_p0 = scmp.ge.s32.totalorder %s1243_s17, 1  ;;  %s1243_s17 = sphi %s1275_s17, %s14_s17   ;;  %s1239_s16 = sphi %s1273_s16, %s1395_s16   ;;  %s1235_s15 = sphi %s1271_s15, %s1394_s15  }
   0x3   : > { %p27_p1 = scmp.ge.s32.totalorder %s26_s18, 5  ;;  %p236_p2 = scmp.lt.s32.totalorder %s1243_s17, 6 }
   0x5   : > { %s1397_s18 = smov (%p27_p1, %s26_s18), 0  ;;  %p237_p3 = pnand %p1013_p0, %p236_p2 }
   0x6   : > { %s1014_s19 = sshll.u32 (!%p237_p3), %s1235_s15, 2  ;;  %s1016_s20 = sshll.u32 (!%p237_p3), %s1235_s15, 6 }
   0x7   : > { %240 = sbr.rel (%p237_p3) target bundleno = 324 (0x144), region = 36  ;;  %p296_p4 = scmp.lt.s32.totalorder (!%p237_p3), %s1014_s19, 19 }
   0x8   : > { %p305_p5 = scmp.lt.s32.totalorder (!%p237_p3), %s1016_s20, 319  ;;  %p1019_p6 = scmp.ne.s32.totalorder (!%p237_p3), %s1235_s15, 0 }
   0xe   : > { %s1399_s19 = smov (!%p296_p4, %s1014_s19), 19  ;;  %s1401_s20 = smov (!%p305_p5, %s1016_s20), 319 }
   0xf   : > { %s1015_s21 = sshll.u32 %s1399_s19, 2  ;;  %s1094_s25 = sshll.u32 %s1401_s20, 3  ;;  %v1245_v0 = vmov (!%p1019_p6), 0.0  }
  0x10   : > { %s1296_s24 = scalar_lea.vmem %s1389_s0, %s1015_s21  ;;  %s1301_s28 = scalar_lea.vmem %s1390_s1, %s1094_s25  ;;  %344 = vst [vmem:[#allocation2] sm:$0xff] (!%p1019_p6), %v1245_v0  ;;  %345 = vst [vmem:[#allocation2 + $0x8] sm:$0xff] (!%p1019_p6), %v1245_v0 }
  0x11   : > { %343 = sbr.rel (%p1019_p6) target bundleno = 24 (0x18), region = 40 }
  0x18 PF: > { %v1121_v1 = vld [vmem:[%s1301_s28 + $0x4] ss:$8 sps:$4 sm:$0xff]   ;;  %v1125_v3 = vld [vmem:[%s1301_s28] ss:$8 sps:$4 sm:$0xff]   ;;  %v1127_v5 = vld [vmem:[%s1301_s28 + $0x14] ss:$8 sps:$4 sm:$0xff]  }
  0x19   : > { %v1123_v2 = vld [vmem:[%s1301_s28 + $0x104] ss:$8 sps:$4 sm:$0xff]   ;;  %748 = vmatprep.subr.bf16.mxu0 %v1121_v1  ;;  %v1126_v4 = vld [vmem:[%s1301_s28 + $0x100] ss:$8 sps:$4 sm:$0xff]   ;;  %v1129_v6 = vld [vmem:[%s1301_s28 + $0x114] ss:$8 sps:$4 sm:$0xff]  }
  0x1a   : > { %789 = vmatprep.subr.bf16.mxu1 %v1123_v2  ;;  %749 = vmatpush1.bf16.msra.mxu0 %v1125_v3  ;;  %v1131_v7 = vld [vmem:[%s1301_s28 + $0x10] ss:$8 sps:$4 sm:$0xff]   ;;  %v1133_v9 = vld [vmem:[%s1301_s28 + $0x24] ss:$8 sps:$4 sm:$0xff]   ;;  %v1137_v11 = vld [vmem:[%s1301_s28 + $0x20] ss:$8 sps:$4 sm:$0xff]  }
  0x1b   : > { %790 = vmatpush1.bf16.msra.mxu1 %v1126_v4  ;;  %750 = vmatprep.subr.bf16.mxu0 %v1127_v5  ;;  %v1132_v8 = vld [vmem:[%s1301_s28 + $0x110] ss:$8 sps:$4 sm:$0xff]   ;;  %v1135_v10 = vld [vmem:[%s1301_s28 + $0x124] ss:$8 sps:$4 sm:$0xff]   ;;  %v1138_v12 = vld [vmem:[%s1301_s28 + $0x120] ss:$8 sps:$4 sm:$0xff]  }
  0x1c   : > { %791 = vmatprep.subr.bf16.mxu1 %v1129_v6  ;;  %v1139_v13 = vld [vmem:[%s1301_s28 + $0x34] ss:$8 sps:$4 sm:$0xff]   ;;  %v1143_v15 = vld [vmem:[%s1301_s28 + $0x30] ss:$8 sps:$4 sm:$0xff]   ;;  %v1145_v17 = vld [vmem:[%s1301_s28 + $0x44] ss:$8 sps:$4 sm:$0xff]  }
  0x1d   : > { %v1141_v14 = vld [vmem:[%s1301_s28 + $0x134] ss:$8 sps:$4 sm:$0xff]   ;;  %v1144_v16 = vld [vmem:[%s1301_s28 + $0x130] ss:$8 sps:$4 sm:$0xff]   ;;  %v1147_v18 = vld [vmem:[%s1301_s28 + $0x144] ss:$8 sps:$4 sm:$0xff]  }
  0x1e   : > { %751 = vmatpush1.bf16.msra.mxu0 %v1131_v7  ;;  %v1149_v19 = vld [vmem:[%s1301_s28 + $0x40] ss:$8 sps:$4 sm:$0xff]   ;;  %v1151_v21 = vld [vmem:[%s1301_s28 + $0x54] ss:$8 sps:$4 sm:$0xff]   ;;  %v1155_v23 = vld [vmem:[%s1301_s28 + $0x50] ss:$8 sps:$4 sm:$0xff]  }
  0x1f   : > { %792 = vmatpush1.bf16.msra.mxu1 %v1132_v8  ;;  %752 = vmatprep.subr.bf16.mxu0 %v1133_v9  ;;  %v1150_v20 = vld [vmem:[%s1301_s28 + $0x140] ss:$8 sps:$4 sm:$0xff]   ;;  %v1153_v22 = vld [vmem:[%s1301_s28 + $0x154] ss:$8 sps:$4 sm:$0xff]   ;;  %v1156_v24 = vld [vmem:[%s1301_s28 + $0x150] ss:$8 sps:$4 sm:$0xff]  }
  0x20   : > { %793 = vmatprep.subr.bf16.mxu1 %v1135_v10  ;;  %v1157_v25 = vld [vmem:[%s1301_s28 + $0x64] ss:$8 sps:$4 sm:$0xff]   ;;  %v1161_v27 = vld [vmem:[%s1301_s28 + $0x60] ss:$8 sps:$4 sm:$0xff]   ;;  %v1163_v29 = vld [vmem:[%s1301_s28 + $0x74] ss:$8 sps:$4 sm:$0xff]  }
  0x21   : > { %v1159_v26 = vld [vmem:[%s1301_s28 + $0x164] ss:$8 sps:$4 sm:$0xff]   ;;  %v1162_v28 = vld [vmem:[%s1301_s28 + $0x160] ss:$8 sps:$4 sm:$0xff]   ;;  %v1165_v30 = vld [vmem:[%s1301_s28 + $0x174] ss:$8 sps:$4 sm:$0xff]  }
  0x22   : > { %753 = vmatpush1.bf16.msra.mxu0 %v1137_v11  ;;  %v1167_v31 = vld [vmem:[%s1301_s28 + $0x70] ss:$8 sps:$4 sm:$0xff]   ;;  %v1169_v33 = vld [vmem:[%s1301_s28 + $0x84] ss:$8 sps:$4 sm:$0xff]   ;;  %v1173_v35 = vld [vmem:[%s1301_s28 + $0x80] ss:$8 sps:$4 sm:$0xff]  }
  0x23   : > { %794 = vmatpush1.bf16.msra.mxu1 %v1138_v12  ;;  %754 = vmatprep.subr.bf16.mxu0 %v1139_v13  ;;  %v1168_v32 = vld [vmem:[%s1301_s28 + $0x170] ss:$8 sps:$4 sm:$0xff]   ;;  %v1171_v34 = vld [vmem:[%s1301_s28 + $0x184] ss:$8 sps:$4 sm:$0xff]   ;;  %v1174_v36 = vld [vmem:[%s1301_s28 + $0x180] ss:$8 sps:$4 sm:$0xff]  }
  0x24   : > { %795 = vmatprep.subr.bf16.mxu1 %v1141_v14  ;;  %v1175_v37 = vld [vmem:[%s1301_s28 + $0x94] ss:$8 sps:$4 sm:$0xff]   ;;  %v1179_v39 = vld [vmem:[%s1301_s28 + $0x90] ss:$8 sps:$4 sm:$0xff]   ;;  %v1181_v41 = vld [vmem:[%s1301_s28 + $0xa4] ss:$8 sps:$4 sm:$0xff]  }
  0x25   : > { %v1177_v38 = vld [vmem:[%s1301_s28 + $0x194] ss:$8 sps:$4 sm:$0xff]   ;;  %v1180_v40 = vld [vmem:[%s1301_s28 + $0x190] ss:$8 sps:$4 sm:$0xff]   ;;  %v1183_v42 = vld [vmem:[%s1301_s28 + $0x1a4] ss:$8 sps:$4 sm:$0xff]  }
  0x26   : > { %755 = vmatpush1.bf16.msra.mxu0 %v1143_v15  ;;  %v1185_v43 = vld [vmem:[%s1301_s28 + $0xa0] ss:$8 sps:$4 sm:$0xff]   ;;  %v1187_v45 = vld [vmem:[%s1301_s28 + $0xb4] ss:$8 sps:$4 sm:$0xff]   ;;  %v1191_v50 = vld [vmem:[%s1301_s28 + $0xb0] ss:$8 sps:$4 sm:$0xff]  }
  0x27   : > { %796 = vmatpush1.bf16.msra.mxu1 %v1144_v16  ;;  %756 = vmatprep.subr.bf16.mxu0 %v1145_v17  ;;  %v1186_v44 = vld [vmem:[%s1301_s28 + $0x1a0] ss:$8 sps:$4 sm:$0xff]   ;;  %v1189_v46 = vld [vmem:[%s1301_s28 + $0x1b4] ss:$8 sps:$4 sm:$0xff]   ;;  %v1192_v51 = vld [vmem:[%s1301_s28 + $0x1b0] ss:$8 sps:$4 sm:$0xff]  }
  0x28   : > { %797 = vmatprep.subr.bf16.mxu1 %v1147_v18  ;;  %v348_v47 = vld [vmem:[%s1296_s24] sm:$0xff]  ;;  %v349_v49 = vld [vmem:[%s1296_s24 + $0x8] sm:$0xff]  ;;  %v1199_v57 = vld [vmem:[%s1301_s28 + $0xd4] ss:$8 sps:$4 sm:$0xff]   ;;  %p1088_p7 = scmp.ne.s32.totalorder %s1235_s15, 4 }
  0x29   : > { %v1021_v48 = vcombine.high %v348_v47, %v348_v47  ;;  %v1023_v52 = vcombine.high %v349_v49, %v349_v49  ;;  %v1193_v53 = vld [vmem:[%s1301_s28 + $0xc4] ss:$8 sps:$4 sm:$0xff]   ;;  %v1197_v55 = vld [vmem:[%s1301_s28 + $0xc0] ss:$8 sps:$4 sm:$0xff]   ;;  %v1201_v58 = vld [vmem:[%s1301_s28 + $0x1d4] ss:$8 sps:$4 sm:$0xff]   ;;  %v1020_v5 = vcombine.low %v348_v47, %v348_v47  ;;  %v1022_v6 = vcombine.low %v349_v49, %v349_v49 }
  0x2a   : > { %757 = vmatpush1.bf16.msra.mxu0 %v1149_v19  ;;  %v1195_v54 = vld [vmem:[%s1301_s28 + $0x1c4] ss:$8 sps:$4 sm:$0xff]   ;;  %v1198_v56 = vld [vmem:[%s1301_s28 + $0x1c0] ss:$8 sps:$4 sm:$0xff]   ;;  %v1203_v59 = vld [vmem:[%s1301_s28 + $0xd0] ss:$8 sps:$4 sm:$0xff]  }
  0x2b   : > { %798 = vmatpush1.bf16.msra.mxu1 %v1150_v20  ;;  %758 = vmatprep.subr.bf16.mxu0 %v1151_v21  ;;  %v1204_v60 = vld [vmem:[%s1301_s28 + $0x1d0] ss:$8 sps:$4 sm:$0xff]   ;;  %v1205_v61 = vld [vmem:[%s1301_s28 + $0xe4] ss:$8 sps:$4 sm:$0xff]   ;;  %v1209_v63 = vld [vmem:[%s1301_s28 + $0xe0] ss:$8 sps:$4 sm:$0xff]   ;;  %v842_v21 = vlaneseq (!%p1088_p7) }
  0x2c   : > { %799 = vmatprep.subr.bf16.mxu1 %v1153_v22  ;;  %780 = vmatprep.mubr.bf16.mxu0 %v1021_v48  ;;  %v1207_v62 = vld [vmem:[%s1301_s28 + $0x1e4] ss:$8 sps:$4 sm:$0xff]   ;;  %v1210_v0 = vld [vmem:[%s1301_s28 + $0x1e0] ss:$8 sps:$4 sm:$0xff]   ;;  %v1211_v1 = vld [vmem:[%s1301_s28 + $0xf4] ss:$8 sps:$4 sm:$0xff]  }
  0x2d   : > { %821 = vmatprep.mubr.bf16.mxu1 %v1023_v52  ;;  %v1213_v2 = vld [vmem:[%s1301_s28 + $0x1f4] ss:$8 sps:$4 sm:$0xff]   ;;  %v1215_v3 = vld [vmem:[%s1301_s28 + $0xf0] ss:$8 sps:$4 sm:$0xff]   ;;  %v346_v8 = vld [vmem:[#allocation2] sm:$0xff]  ;;  %v843_v22 = vshrl.u32 (!%p1088_p7), %v842_v21, 7 }
  0x2e   : > { %759 = vmatpush1.bf16.msra.mxu0 %v1155_v23  ;;  %v1216_v4 = vld [vmem:[%s1301_s28 + $0x1f0] ss:$8 sps:$4 sm:$0xff]   ;;  %v347_v12 = vld [vmem:[#allocation2 + $0x8] sm:$0xff]  ;;  %v840_v23 = vld [vmem:[%s1391_s2] sm:$0x3] (!%p1088_p7) }
  0x2f   : > { %800 = vmatpush1.bf16.msra.mxu1 %v1156_v24  ;;  %760 = vmatprep.subr.bf16.mxu0 %v1157_v25  ;;  %v854_v24 = vld [vmem:[%s1392_s3] sm:$0xff] (!%p1088_p7)  ;;  %v844_v25 = vsub.s32 (!%p1088_p7), 0, %v843_v22 }
  0x30   : > { %801 = vmatprep.subr.bf16.mxu1 %v1159_v26  ;;  %v848_v26 = vsub.s32 (!%p1088_p7), 1, %v843_v22 }
  0x32   : > { %761 = vmatpush1.bf16.msra.mxu0 %v1161_v27 }
  0x33   : > { %802 = vmatpush1.bf16.msra.mxu1 %v1162_v28  ;;  %762 = vmatprep.subr.bf16.mxu0 %v1163_v29  ;;  %v845_v29 = vrot.slane (!%p1088_p7), %v840_v23, %v844_v25 }
  0x34   : > { %803 = vmatprep.subr.bf16.mxu1 %v1165_v30  ;;  %v849_v30 = vrot.slane (!%p1088_p7), %v840_v23, %v848_v26 }
  0x36   : > { %763 = vmatpush1.bf16.msra.mxu0 %v1167_v31  ;;  %v855_v31 = vunpack.c.l.bf16 (!%p1088_p7), %v854_v24 }
  0x37   : > { %804 = vmatpush1.bf16.msra.mxu1 %v1168_v32  ;;  %764 = vmatprep.subr.bf16.mxu0 %v1169_v33  ;;  %v856_v32 = vunpack.c.h.bf16 (!%p1088_p7), %v854_v24 }
  0x38   : > { %805 = vmatprep.subr.bf16.mxu1 %v1171_v34 }
  0x3a   : > { %765 = vmatpush1.bf16.msra.mxu0 %v1173_v35 }
  0x3b   : > { %806 = vmatpush1.bf16.msra.mxu1 %v1174_v36  ;;  %766 = vmatprep.subr.bf16.mxu0 %v1175_v37 }
  0x3c   : > { %807 = vmatprep.subr.bf16.mxu1 %v1177_v38 }
  0x3e   : > { %767 = vmatpush1.bf16.msra.mxu0 %v1179_v39 }
  0x3f   : > { %808 = vmatpush1.bf16.msra.mxu1 %v1180_v40  ;;  %768 = vmatprep.subr.bf16.mxu0 %v1181_v41 }
  0x40   : > { %809 = vmatprep.subr.bf16.mxu1 %v1183_v42 }
  0x42   : > { %769 = vmatpush1.bf16.msra.mxu0 %v1185_v43 }
  0x43   : > { %810 = vmatpush1.bf16.msra.mxu1 %v1186_v44  ;;  %770 = vmatprep.subr.bf16.mxu0 %v1187_v45 }
  0x44   : > { %811 = vmatprep.subr.bf16.mxu1 %v1189_v46 }
  0x46   : > { %771 = vmatpush1.bf16.msra.mxu0 %v1191_v50 }
  0x47   : > { %812 = vmatpush1.bf16.msra.mxu1 %v1192_v51  ;;  %772 = vmatprep.subr.bf16.mxu0 %v1193_v53 }
  0x48   : > { %813 = vmatprep.subr.bf16.mxu1 %v1195_v54 }
  0x4a   : > { %773 = vmatpush1.bf16.msra.mxu0 %v1197_v55 }
  0x4b   : > { %814 = vmatpush1.bf16.msra.mxu1 %v1198_v56  ;;  %774 = vmatprep.subr.bf16.mxu0 %v1199_v57 }
  0x4c   : > { %815 = vmatprep.subr.bf16.mxu1 %v1201_v58 }
  0x4e   : > { %775 = vmatpush1.bf16.msra.mxu0 %v1203_v59 }
  0x4f   : > { %816 = vmatpush1.bf16.msra.mxu1 %v1204_v60  ;;  %776 = vmatprep.subr.bf16.mxu0 %v1205_v61 }
  0x50   : > { %817 = vmatprep.subr.bf16.mxu1 %v1207_v62 }
  0x52   : > { %777 = vmatpush1.bf16.msra.mxu0 %v1209_v63 }
  0x53   : > { %818 = vmatpush1.bf16.msra.mxu1 %v1210_v0  ;;  %778 = vmatprep.subr.bf16.mxu0 %v1211_v1 }
  0x54   : > { %819 = vmatprep.subr.bf16.mxu1 %v1213_v2 }
  0x56   : > { %779 = vmatpush1.bf16.msra.mxu0 %v1215_v3 }
  0x57   : > { %820 = vmatpush1.bf16.msra.mxu1 %v1216_v4 }
  0x59   : > { %781 = vmatmul.mubr.bf16.vlgmr.msra.gmra.mrb[0].mxu0 %v1020_v5 }
  0x5a   : > { %822 = vmatmul.mubr.bf16.vlgmr.msra.gmra.mrb[0].mxu1 %v1022_v6 }
 0x12c   : > { %v782_v7 = vpop.f32.mrb[0].mxu0 }
 0x12d   : > { %v823_v9 = vpop.f32.mrb[0].mxu1  ;;  %v784_v11 = vpop.f32.mrb[1].mxu0  ;;  %837 = sbr.rel (%p1088_p7) target bundleno = 324 (0x144), region = 44 }
 0x12e   : > { %v824_v10 = vadd.f32 %v823_v9, %v782_v7  ;;  %v825_v13 = vpop.f32.mrb[1].mxu1  ;;  %v786_v15 = vpop.f32.mrb[2].mxu0 }
 0x12f   : > { %v826_v14 = vadd.f32 %v825_v13, %v784_v11  ;;  %v827_v16 = vpop.f32.mrb[2].mxu1  ;;  %v787_v18 = vpop.f32.mrb[3].mxu0 }
 0x130   : > { %v830_v17 = vadd.f32 %v824_v10, %v346_v8  ;;  %v828_v19 = vpop.f32.mrb[3].mxu1 }
 0x131   : > { %v831_v20 = vadd.f32 %v826_v14, %v347_v12 }
 0x132   : > { %832 = vst [vmem:[#allocation2] sm:$0xff] %v830_v17 }
 0x133   : > { %833 = vst [vmem:[#allocation2 + $0x8] sm:$0xff] %v831_v20 }
 0x139   : > { %v838_v27 = vld [vmem:[#allocation2] sm:$0xff] }
 0x13a   : > { %v839_v28 = vld [vmem:[#allocation2 + $0x8] sm:$0xff]  ;;  %v852_v33 = vadd.f32 %v845_v29, %v838_v27 }
 0x13b   : > { %v853_v34 = vadd.f32 %v849_v30, %v839_v28 }
 0x13c   : > { %v857_v35 = vadd.f32 %v855_v31, %v852_v33 }
 0x13d   : > { %v858_v36 = vadd.f32 %v856_v32, %v853_v34 }
 0x13e   : > { %v859_v37 = vmax.f32 %v857_v35, 0.0 }
 0x13f   : > { %v860_v38 = vmax.f32 %v858_v36, 0.0 }
 0x141   : > { %v1095_v39 = vpack.c.bf16 %v860_v38, %v859_v37 }
 0x143   : > { %869 = vst [vmem:[%s1393_s4] sm:$0xff] %v1095_v39 }
 0x144 PF: > { %s14_s17 = sadd.s32 1, %s1243_s17   ;;  %s1394_s15 = smov %s1239_s16 }
 0x145   : > { %p11_p8 = scmp.ge.s32.totalorder %s14_s17, 7   ;;  %s1395_s16 = smov %s1397_s18 }
 0x147   :  { %13 = sbr.rel (!%p11_p8) target bundleno = 2 (0x2), region = 83 }

// kernel: _lambda_.35
= control target key start
LH: loop header
LB: loop body
LE: loop exit
PB: predicated region body
PF: predicated region fallthrough
CT: control target
= control target key end

     0   :  { %s1176_s12 = smov 0   ;;  %s1178_s13 = smov 0   ;;  %s1291_s0 = inlined_call_operand.vmem [shape: bf16[8,2560], index: 0, kind: input, shape index: {}]   ;;  %s1292_s1 = inlined_call_operand.vmem [shape: bf16[2560,256], index: 1, kind: input, shape index: {}]   ;;  %s1293_s2 = inlined_call_operand.vmem [shape: f32[1,256], index: 2, kind: input, shape index: {}]   ;;  %s1294_s3 = inlined_call_operand.vmem [shape: bf16[8,256], index: 3, kind: output, shape index: {}]  }
   0x1   :  { %s1180_s14 = smov 0  }
   0x2 LB: > { %s25_s15 = sadd.s32 1, %s1149_s13  ;;  %p923_p0 = scmp.ge.s32.totalorder %s1153_s14, 1  ;;  %s1153_s14 = sphi %s1180_s14, %s13_s14   ;;  %s1149_s13 = sphi %s1178_s13, %s1296_s13   ;;  %s1145_s12 = sphi %s1176_s12, %s1295_s12  }
   0x3   : > { %p26_p1 = scmp.ge.s32.totalorder %s25_s15, 5  ;;  %p194_p2 = scmp.lt.s32.totalorder %s1153_s14, 6 }
   0x5   : > { %s1298_s15 = smov (%p26_p1, %s25_s15), 0  ;;  %p195_p3 = pnand %p923_p0, %p194_p2 }
   0x6   : > { %s924_s16 = sshll.u32 (!%p195_p3), %s1145_s12, 2  ;;  %s926_s17 = sshll.u32 (!%p195_p3), %s1145_s12, 6 }
   0x7   : > { %198 = sbr.rel (%p195_p3) target bundleno = 322 (0x142), region = 32  ;;  %p243_p4 = scmp.lt.s32.totalorder (!%p195_p3), %s924_s16, 19 }
   0x8   : > { %p252_p5 = scmp.lt.s32.totalorder (!%p195_p3), %s926_s17, 319  ;;  %p929_p6 = scmp.ne.s32.totalorder (!%p195_p3), %s1145_s12, 0 }
   0xe   : > { %s1300_s16 = smov (!%p243_p4, %s924_s16), 19  ;;  %s1302_s17 = smov (!%p252_p5, %s926_s17), 319 }
   0xf   : > { %s925_s18 = sshll.u32 %s1300_s16, 2  ;;  %s1004_s22 = sshll.u32 %s1302_s17, 3  ;;  %v1155_v0 = vmov (!%p929_p6), 0.0  }
  0x10   : > { %s1201_s21 = scalar_lea.vmem %s1291_s0, %s925_s18  ;;  %s1206_s25 = scalar_lea.vmem %s1292_s1, %s1004_s22  ;;  %281 = vst [vmem:[#allocation2] sm:$0xff] (!%p929_p6), %v1155_v0  ;;  %282 = vst [vmem:[#allocation2 + $0x8] sm:$0xff] (!%p929_p6), %v1155_v0 }
  0x11   : > { %280 = sbr.rel (%p929_p6) target bundleno = 24 (0x18), region = 36 }
  0x18 PF: > { %v1031_v1 = vld [vmem:[%s1206_s25 + $0x4] ss:$8 sps:$4 sm:$0xff]   ;;  %v1035_v3 = vld [vmem:[%s1206_s25] ss:$8 sps:$4 sm:$0xff]   ;;  %v1037_v5 = vld [vmem:[%s1206_s25 + $0x14] ss:$8 sps:$4 sm:$0xff]  }
  0x19   : > { %v1033_v2 = vld [vmem:[%s1206_s25 + $0x104] ss:$8 sps:$4 sm:$0xff]   ;;  %685 = vmatprep.subr.bf16.mxu0 %v1031_v1  ;;  %v1036_v4 = vld [vmem:[%s1206_s25 + $0x100] ss:$8 sps:$4 sm:$0xff]   ;;  %v1039_v6 = vld [vmem:[%s1206_s25 + $0x114] ss:$8 sps:$4 sm:$0xff]  }
  0x1a   : > { %726 = vmatprep.subr.bf16.mxu1 %v1033_v2  ;;  %686 = vmatpush1.bf16.msra.mxu0 %v1035_v3  ;;  %v1041_v7 = vld [vmem:[%s1206_s25 + $0x10] ss:$8 sps:$4 sm:$0xff]   ;;  %v1043_v9 = vld [vmem:[%s1206_s25 + $0x24] ss:$8 sps:$4 sm:$0xff]   ;;  %v1047_v11 = vld [vmem:[%s1206_s25 + $0x20] ss:$8 sps:$4 sm:$0xff]  }
  0x1b   : > { %727 = vmatpush1.bf16.msra.mxu1 %v1036_v4  ;;  %687 = vmatprep.subr.bf16.mxu0 %v1037_v5  ;;  %v1042_v8 = vld [vmem:[%s1206_s25 + $0x110] ss:$8 sps:$4 sm:$0xff]   ;;  %v1045_v10 = vld [vmem:[%s1206_s25 + $0x124] ss:$8 sps:$4 sm:$0xff]   ;;  %v1048_v12 = vld [vmem:[%s1206_s25 + $0x120] ss:$8 sps:$4 sm:$0xff]  }
  0x1c   : > { %728 = vmatprep.subr.bf16.mxu1 %v1039_v6  ;;  %v1049_v13 = vld [vmem:[%s1206_s25 + $0x34] ss:$8 sps:$4 sm:$0xff]   ;;  %v1053_v15 = vld [vmem:[%s1206_s25 + $0x30] ss:$8 sps:$4 sm:$0xff]   ;;  %v1055_v17 = vld [vmem:[%s1206_s25 + $0x44] ss:$8 sps:$4 sm:$0xff]  }
  0x1d   : > { %v1051_v14 = vld [vmem:[%s1206_s25 + $0x134] ss:$8 sps:$4 sm:$0xff]   ;;  %v1054_v16 = vld [vmem:[%s1206_s25 + $0x130] ss:$8 sps:$4 sm:$0xff]   ;;  %v1057_v18 = vld [vmem:[%s1206_s25 + $0x144] ss:$8 sps:$4 sm:$0xff]  }
  0x1e   : > { %688 = vmatpush1.bf16.msra.mxu0 %v1041_v7  ;;  %v1059_v19 = vld [vmem:[%s1206_s25 + $0x40] ss:$8 sps:$4 sm:$0xff]   ;;  %v1061_v21 = vld [vmem:[%s1206_s25 + $0x54] ss:$8 sps:$4 sm:$0xff]   ;;  %v1065_v23 = vld [vmem:[%s1206_s25 + $0x50] ss:$8 sps:$4 sm:$0xff]  }
  0x1f   : > { %729 = vmatpush1.bf16.msra.mxu1 %v1042_v8  ;;  %689 = vmatprep.subr.bf16.mxu0 %v1043_v9  ;;  %v1060_v20 = vld [vmem:[%s1206_s25 + $0x140] ss:$8 sps:$4 sm:$0xff]   ;;  %v1063_v22 = vld [vmem:[%s1206_s25 + $0x154] ss:$8 sps:$4 sm:$0xff]   ;;  %v1066_v24 = vld [vmem:[%s1206_s25 + $0x150] ss:$8 sps:$4 sm:$0xff]  }
  0x20   : > { %730 = vmatprep.subr.bf16.mxu1 %v1045_v10  ;;  %v1067_v25 = vld [vmem:[%s1206_s25 + $0x64] ss:$8 sps:$4 sm:$0xff]   ;;  %v1071_v27 = vld [vmem:[%s1206_s25 + $0x60] ss:$8 sps:$4 sm:$0xff]   ;;  %v1073_v29 = vld [vmem:[%s1206_s25 + $0x74] ss:$8 sps:$4 sm:$0xff]  }
  0x21   : > { %v1069_v26 = vld [vmem:[%s1206_s25 + $0x164] ss:$8 sps:$4 sm:$0xff]   ;;  %v1072_v28 = vld [vmem:[%s1206_s25 + $0x160] ss:$8 sps:$4 sm:$0xff]   ;;  %v1075_v30 = vld [vmem:[%s1206_s25 + $0x174] ss:$8 sps:$4 sm:$0xff]  }
  0x22   : > { %690 = vmatpush1.bf16.msra.mxu0 %v1047_v11  ;;  %v1077_v31 = vld [vmem:[%s1206_s25 + $0x70] ss:$8 sps:$4 sm:$0xff]   ;;  %v1079_v33 = vld [vmem:[%s1206_s25 + $0x84] ss:$8 sps:$4 sm:$0xff]   ;;  %v1083_v35 = vld [vmem:[%s1206_s25 + $0x80] ss:$8 sps:$4 sm:$0xff]  }
  0x23   : > { %731 = vmatpush1.bf16.msra.mxu1 %v1048_v12  ;;  %691 = vmatprep.subr.bf16.mxu0 %v1049_v13  ;;  %v1078_v32 = vld [vmem:[%s1206_s25 + $0x170] ss:$8 sps:$4 sm:$0xff]   ;;  %v1081_v34 = vld [vmem:[%s1206_s25 + $0x184] ss:$8 sps:$4 sm:$0xff]   ;;  %v1084_v36 = vld [vmem:[%s1206_s25 + $0x180] ss:$8 sps:$4 sm:$0xff]  }
  0x24   : > { %732 = vmatprep.subr.bf16.mxu1 %v1051_v14  ;;  %v1085_v37 = vld [vmem:[%s1206_s25 + $0x94] ss:$8 sps:$4 sm:$0xff]   ;;  %v1089_v39 = vld [vmem:[%s1206_s25 + $0x90] ss:$8 sps:$4 sm:$0xff]   ;;  %v1091_v41 = vld [vmem:[%s1206_s25 + $0xa4] ss:$8 sps:$4 sm:$0xff]  }
  0x25   : > { %v1087_v38 = vld [vmem:[%s1206_s25 + $0x194] ss:$8 sps:$4 sm:$0xff]   ;;  %v1090_v40 = vld [vmem:[%s1206_s25 + $0x190] ss:$8 sps:$4 sm:$0xff]   ;;  %v1093_v42 = vld [vmem:[%s1206_s25 + $0x1a4] ss:$8 sps:$4 sm:$0xff]  }
  0x26   : > { %692 = vmatpush1.bf16.msra.mxu0 %v1053_v15  ;;  %v1095_v43 = vld [vmem:[%s1206_s25 + $0xa0] ss:$8 sps:$4 sm:$0xff]   ;;  %v1097_v45 = vld [vmem:[%s1206_s25 + $0xb4] ss:$8 sps:$4 sm:$0xff]   ;;  %v1101_v50 = vld [vmem:[%s1206_s25 + $0xb0] ss:$8 sps:$4 sm:$0xff]  }
  0x27   : > { %733 = vmatpush1.bf16.msra.mxu1 %v1054_v16  ;;  %693 = vmatprep.subr.bf16.mxu0 %v1055_v17  ;;  %v1096_v44 = vld [vmem:[%s1206_s25 + $0x1a0] ss:$8 sps:$4 sm:$0xff]   ;;  %v1099_v46 = vld [vmem:[%s1206_s25 + $0x1b4] ss:$8 sps:$4 sm:$0xff]   ;;  %v1102_v51 = vld [vmem:[%s1206_s25 + $0x1b0] ss:$8 sps:$4 sm:$0xff]  }
  0x28   : > { %734 = vmatprep.subr.bf16.mxu1 %v1057_v18  ;;  %v285_v47 = vld [vmem:[%s1201_s21] sm:$0xff]  ;;  %v286_v49 = vld [vmem:[%s1201_s21 + $0x8] sm:$0xff]  ;;  %v1109_v57 = vld [vmem:[%s1206_s25 + $0xd4] ss:$8 sps:$4 sm:$0xff]   ;;  %p998_p7 = scmp.ne.s32.totalorder %s1145_s12, 4 }
  0x29   : > { %v931_v48 = vcombine.high %v285_v47, %v285_v47  ;;  %v933_v52 = vcombine.high %v286_v49, %v286_v49  ;;  %v1103_v53 = vld [vmem:[%s1206_s25 + $0xc4] ss:$8 sps:$4 sm:$0xff]   ;;  %v1107_v55 = vld [vmem:[%s1206_s25 + $0xc0] ss:$8 sps:$4 sm:$0xff]   ;;  %v1111_v58 = vld [vmem:[%s1206_s25 + $0x1d4] ss:$8 sps:$4 sm:$0xff]   ;;  %v930_v5 = vcombine.low %v285_v47, %v285_v47  ;;  %v932_v6 = vcombine.low %v286_v49, %v286_v49 }
  0x2a   : > { %694 = vmatpush1.bf16.msra.mxu0 %v1059_v19  ;;  %v1105_v54 = vld [vmem:[%s1206_s25 + $0x1c4] ss:$8 sps:$4 sm:$0xff]   ;;  %v1108_v56 = vld [vmem:[%s1206_s25 + $0x1c0] ss:$8 sps:$4 sm:$0xff]   ;;  %v1113_v59 = vld [vmem:[%s1206_s25 + $0xd0] ss:$8 sps:$4 sm:$0xff]  }
  0x2b   : > { %735 = vmatpush1.bf16.msra.mxu1 %v1060_v20  ;;  %695 = vmatprep.subr.bf16.mxu0 %v1061_v21  ;;  %v1114_v60 = vld [vmem:[%s1206_s25 + $0x1d0] ss:$8 sps:$4 sm:$0xff]   ;;  %v1115_v61 = vld [vmem:[%s1206_s25 + $0xe4] ss:$8 sps:$4 sm:$0xff]   ;;  %v1119_v63 = vld [vmem:[%s1206_s25 + $0xe0] ss:$8 sps:$4 sm:$0xff]   ;;  %v779_v21 = vlaneseq (!%p998_p7) }
  0x2c   : > { %736 = vmatprep.subr.bf16.mxu1 %v1063_v22  ;;  %717 = vmatprep.mubr.bf16.mxu0 %v931_v48  ;;  %v1117_v62 = vld [vmem:[%s1206_s25 + $0x1e4] ss:$8 sps:$4 sm:$0xff]   ;;  %v1120_v0 = vld [vmem:[%s1206_s25 + $0x1e0] ss:$8 sps:$4 sm:$0xff]   ;;  %v1121_v1 = vld [vmem:[%s1206_s25 + $0xf4] ss:$8 sps:$4 sm:$0xff]  }
  0x2d   : > { %758 = vmatprep.mubr.bf16.mxu1 %v933_v52  ;;  %v1123_v2 = vld [vmem:[%s1206_s25 + $0x1f4] ss:$8 sps:$4 sm:$0xff]   ;;  %v1125_v3 = vld [vmem:[%s1206_s25 + $0xf0] ss:$8 sps:$4 sm:$0xff]   ;;  %v283_v8 = vld [vmem:[#allocation2] sm:$0xff]  ;;  %v780_v22 = vshrl.u32 (!%p998_p7), %v779_v21, 7 }
  0x2e   : > { %696 = vmatpush1.bf16.msra.mxu0 %v1065_v23  ;;  %v1126_v4 = vld [vmem:[%s1206_s25 + $0x1f0] ss:$8 sps:$4 sm:$0xff]   ;;  %v284_v12 = vld [vmem:[#allocation2 + $0x8] sm:$0xff]  ;;  %v777_v23 = vld [vmem:[%s1293_s2] sm:$0x3] (!%p998_p7) }
  0x2f   : > { %737 = vmatpush1.bf16.msra.mxu1 %v1066_v24  ;;  %697 = vmatprep.subr.bf16.mxu0 %v1067_v25  ;;  %v781_v24 = vsub.s32 (!%p998_p7), 0, %v780_v22  ;;  %v785_v25 = vsub.s32 (!%p998_p7), 1, %v780_v22 }
  0x30   : > { %738 = vmatprep.subr.bf16.mxu1 %v1069_v26 }
  0x32   : > { %698 = vmatpush1.bf16.msra.mxu0 %v1071_v27 }
  0x33   : > { %739 = vmatpush1.bf16.msra.mxu1 %v1072_v28  ;;  %699 = vmatprep.subr.bf16.mxu0 %v1073_v29  ;;  %v782_v28 = vrot.slane (!%p998_p7), %v777_v23, %v781_v24  ;;  %v786_v29 = vrot.slane (!%p998_p7), %v777_v23, %v785_v25 }
  0x34   : > { %740 = vmatprep.subr.bf16.mxu1 %v1075_v30 }
  0x36   : > { %700 = vmatpush1.bf16.msra.mxu0 %v1077_v31 }
  0x37   : > { %741 = vmatpush1.bf16.msra.mxu1 %v1078_v32  ;;  %701 = vmatprep.subr.bf16.mxu0 %v1079_v33 }
  0x38   : > { %742 = vmatprep.subr.bf16.mxu1 %v1081_v34 }
  0x3a   : > { %702 = vmatpush1.bf16.msra.mxu0 %v1083_v35 }
  0x3b   : > { %743 = vmatpush1.bf16.msra.mxu1 %v1084_v36  ;;  %703 = vmatprep.subr.bf16.mxu0 %v1085_v37 }
  0x3c   : > { %744 = vmatprep.subr.bf16.mxu1 %v1087_v38 }
  0x3e   : > { %704 = vmatpush1.bf16.msra.mxu0 %v1089_v39 }
  0x3f   : > { %745 = vmatpush1.bf16.msra.mxu1 %v1090_v40  ;;  %705 = vmatprep.subr.bf16.mxu0 %v1091_v41 }
  0x40   : > { %746 = vmatprep.subr.bf16.mxu1 %v1093_v42 }
  0x42   : > { %706 = vmatpush1.bf16.msra.mxu0 %v1095_v43 }
  0x43   : > { %747 = vmatpush1.bf16.msra.mxu1 %v1096_v44  ;;  %707 = vmatprep.subr.bf16.mxu0 %v1097_v45 }
  0x44   : > { %748 = vmatprep.subr.bf16.mxu1 %v1099_v46 }
  0x46   : > { %708 = vmatpush1.bf16.msra.mxu0 %v1101_v50 }
  0x47   : > { %749 = vmatpush1.bf16.msra.mxu1 %v1102_v51  ;;  %709 = vmatprep.subr.bf16.mxu0 %v1103_v53 }
  0x48   : > { %750 = vmatprep.subr.bf16.mxu1 %v1105_v54 }
  0x4a   : > { %710 = vmatpush1.bf16.msra.mxu0 %v1107_v55 }
  0x4b   : > { %751 = vmatpush1.bf16.msra.mxu1 %v1108_v56  ;;  %711 = vmatprep.subr.bf16.mxu0 %v1109_v57 }
  0x4c   : > { %752 = vmatprep.subr.bf16.mxu1 %v1111_v58 }
  0x4e   : > { %712 = vmatpush1.bf16.msra.mxu0 %v1113_v59 }
  0x4f   : > { %753 = vmatpush1.bf16.msra.mxu1 %v1114_v60  ;;  %713 = vmatprep.subr.bf16.mxu0 %v1115_v61 }
  0x50   : > { %754 = vmatprep.subr.bf16.mxu1 %v1117_v62 }
  0x52   : > { %714 = vmatpush1.bf16.msra.mxu0 %v1119_v63 }
  0x53   : > { %755 = vmatpush1.bf16.msra.mxu1 %v1120_v0  ;;  %715 = vmatprep.subr.bf16.mxu0 %v1121_v1 }
  0x54   : > { %756 = vmatprep.subr.bf16.mxu1 %v1123_v2 }
  0x56   : > { %716 = vmatpush1.bf16.msra.mxu0 %v1125_v3 }
  0x57   : > { %757 = vmatpush1.bf16.msra.mxu1 %v1126_v4 }
  0x59   : > { %718 = vmatmul.mubr.bf16.vlgmr.msra.gmra.mrb[0].mxu0 %v930_v5 }
  0x5a   : > { %759 = vmatmul.mubr.bf16.vlgmr.msra.gmra.mrb[0].mxu1 %v932_v6 }
 0x12c   : > { %v719_v7 = vpop.f32.mrb[0].mxu0 }
 0x12d   : > { %v760_v9 = vpop.f32.mrb[0].mxu1  ;;  %v721_v11 = vpop.f32.mrb[1].mxu0  ;;  %774 = sbr.rel (%p998_p7) target bundleno = 322 (0x142), region = 40 }
 0x12e   : > { %v761_v10 = vadd.f32 %v760_v9, %v719_v7  ;;  %v762_v13 = vpop.f32.mrb[1].mxu1  ;;  %v723_v15 = vpop.f32.mrb[2].mxu0 }
 0x12f   : > { %v763_v14 = vadd.f32 %v762_v13, %v721_v11  ;;  %v764_v16 = vpop.f32.mrb[2].mxu1  ;;  %v724_v18 = vpop.f32.mrb[3].mxu0 }
 0x130   : > { %v767_v17 = vadd.f32 %v761_v10, %v283_v8  ;;  %v765_v19 = vpop.f32.mrb[3].mxu1 }
 0x131   : > { %v768_v20 = vadd.f32 %v763_v14, %v284_v12 }
 0x132   : > { %769 = vst [vmem:[#allocation2] sm:$0xff] %v767_v17 }
 0x133   : > { %770 = vst [vmem:[#allocation2 + $0x8] sm:$0xff] %v768_v20 }
 0x139   : > { %v775_v26 = vld [vmem:[#allocation2] sm:$0xff] }
 0x13a   : > { %v776_v27 = vld [vmem:[#allocation2 + $0x8] sm:$0xff]  ;;  %v789_v30 = vadd.f32 %v782_v28, %v775_v26 }
 0x13b   : > { %v790_v31 = vadd.f32 %v786_v29, %v776_v27 }
 0x13c   : > { %v791_v32 = vmax.f32 %v789_v30, 0.0 }
 0x13d   : > { %v792_v33 = vmax.f32 %v790_v31, 0.0 }
 0x13f   : > { %v1005_v34 = vpack.c.bf16 %v792_v33, %v791_v32 }
 0x141   : > { %801 = vst [vmem:[%s1294_s3] sm:$0xff] %v1005_v34 }
 0x142 PF: > { %s13_s14 = sadd.s32 1, %s1153_s14   ;;  %s1295_s12 = smov %s1149_s13 }
 0x143   : > { %p10_p8 = scmp.ge.s32.totalorder %s13_s14, 7   ;;  %s1296_s13 = smov %s1298_s15 }
 0x145   :  { %12 = sbr.rel (!%p10_p8) target bundleno = 2 (0x2), region = 76 }

// kernel: _lambda_.38
= control target key start
LH: loop header
LB: loop body
LE: loop exit
PB: predicated region body
PF: predicated region fallthrough
CT: control target
= control target key end

     0   :  { %s955_s1 = inlined_call_operand.vmem [shape: bf16[256,512], index: 1, kind: input, shape index: {}]   ;;  %s956_s0 = inlined_call_operand.vmem [shape: bf16[8,256], index: 0, kind: input, shape index: {}]   ;;  %s957_s2 = inlined_call_operand.vmem [shape: f32[1,512], index: 2, kind: input, shape index: {}]   ;;  %s958_s3 = inlined_call_operand.vmem [shape: bf16[8,512], index: 3, kind: output, shape index: {}]  }
   0x1   :  { %v633_v0 = vld [vmem:[%s955_s1 + $0x4] ss:$16 sps:$4 sm:$0xff]   ;;  %v635_v1 = vld [vmem:[%s955_s1 + $0xc] ss:$16 sps:$4 sm:$0xff]   ;;  %v637_v2 = vld [vmem:[%s955_s1] ss:$16 sps:$4 sm:$0xff]  }
   0x2   :  { %418 = vmatprep.subr.bf16.mxu0 %v633_v0  ;;  %v638_v3 = vld [vmem:[%s955_s1 + $0x8] ss:$16 sps:$4 sm:$0xff]   ;;  %459 = vmatprep.subr.bf16.mxu1 %v635_v1  ;;  %v639_v4 = vld [vmem:[%s955_s1 + $0x24] ss:$16 sps:$4 sm:$0xff]   ;;  %v641_v5 = vld [vmem:[%s955_s1 + $0x2c] ss:$16 sps:$4 sm:$0xff]  }
   0x3   :  { %419 = vmatpush1.bf16.msra.mxu0 %v637_v2  ;;  %460 = vmatpush1.bf16.msra.mxu1 %v638_v3  ;;  %v643_v6 = vld [vmem:[%s955_s1 + $0x20] ss:$16 sps:$4 sm:$0xff]   ;;  %v644_v7 = vld [vmem:[%s955_s1 + $0x28] ss:$16 sps:$4 sm:$0xff]   ;;  %v645_v8 = vld [vmem:[%s955_s1 + $0x44] ss:$16 sps:$4 sm:$0xff]   ;;  %v517_v3 = vlaneseq }
   0x4   :  { %420 = vmatprep.subr.bf16.mxu0 %v639_v4  ;;  %461 = vmatprep.subr.bf16.mxu1 %v641_v5  ;;  %v647_v9 = vld [vmem:[%s955_s1 + $0x4c] ss:$16 sps:$4 sm:$0xff]   ;;  %v649_v10 = vld [vmem:[%s955_s1 + $0x40] ss:$16 sps:$4 sm:$0xff]   ;;  %v650_v11 = vld [vmem:[%s955_s1 + $0x48] ss:$16 sps:$4 sm:$0xff]  }
   0x5   :  { %v651_v12 = vld [vmem:[%s955_s1 + $0x64] ss:$16 sps:$4 sm:$0xff]   ;;  %v653_v13 = vld [vmem:[%s955_s1 + $0x6c] ss:$16 sps:$4 sm:$0xff]   ;;  %v655_v14 = vld [vmem:[%s955_s1 + $0x60] ss:$16 sps:$4 sm:$0xff]  }
   0x6   :  { %v656_v15 = vld [vmem:[%s955_s1 + $0x68] ss:$16 sps:$4 sm:$0xff]   ;;  %v657_v16 = vld [vmem:[%s955_s1 + $0x84] ss:$16 sps:$4 sm:$0xff]   ;;  %v659_v17 = vld [vmem:[%s955_s1 + $0x8c] ss:$16 sps:$4 sm:$0xff]  }
   0x7   :  { %421 = vmatpush1.bf16.msra.mxu0 %v643_v6  ;;  %462 = vmatpush1.bf16.msra.mxu1 %v644_v7  ;;  %v661_v18 = vld [vmem:[%s955_s1 + $0x80] ss:$16 sps:$4 sm:$0xff]   ;;  %v662_v19 = vld [vmem:[%s955_s1 + $0x88] ss:$16 sps:$4 sm:$0xff]   ;;  %v663_v20 = vld [vmem:[%s955_s1 + $0xa4] ss:$16 sps:$4 sm:$0xff]  }
   0x8   :  { %422 = vmatprep.subr.bf16.mxu0 %v645_v8  ;;  %463 = vmatprep.subr.bf16.mxu1 %v647_v9  ;;  %v665_v21 = vld [vmem:[%s955_s1 + $0xac] ss:$16 sps:$4 sm:$0xff]   ;;  %v667_v22 = vld [vmem:[%s955_s1 + $0xa0] ss:$16 sps:$4 sm:$0xff]   ;;  %v668_v23 = vld [vmem:[%s955_s1 + $0xa8] ss:$16 sps:$4 sm:$0xff]  }
   0x9   :  { %v669_v24 = vld [vmem:[%s955_s1 + $0xc4] ss:$16 sps:$4 sm:$0xff]   ;;  %v671_v25 = vld [vmem:[%s955_s1 + $0xcc] ss:$16 sps:$4 sm:$0xff]   ;;  %v673_v26 = vld [vmem:[%s955_s1 + $0xc0] ss:$16 sps:$4 sm:$0xff]  }
   0xa   :  { %v674_v27 = vld [vmem:[%s955_s1 + $0xc8] ss:$16 sps:$4 sm:$0xff]   ;;  %v675_v28 = vld [vmem:[%s955_s1 + $0xe4] ss:$16 sps:$4 sm:$0xff]   ;;  %v677_v29 = vld [vmem:[%s955_s1 + $0xec] ss:$16 sps:$4 sm:$0xff]  }
   0xb   :  { %423 = vmatpush1.bf16.msra.mxu0 %v649_v10  ;;  %464 = vmatpush1.bf16.msra.mxu1 %v650_v11  ;;  %v679_v30 = vld [vmem:[%s955_s1 + $0xe0] ss:$16 sps:$4 sm:$0xff]   ;;  %v680_v31 = vld [vmem:[%s955_s1 + $0xe8] ss:$16 sps:$4 sm:$0xff]   ;;  %v681_v32 = vld [vmem:[%s955_s1 + $0x104] ss:$16 sps:$4 sm:$0xff]  }
   0xc   :  { %424 = vmatprep.subr.bf16.mxu0 %v651_v12  ;;  %465 = vmatprep.subr.bf16.mxu1 %v653_v13  ;;  %v683_v33 = vld [vmem:[%s955_s1 + $0x10c] ss:$16 sps:$4 sm:$0xff]   ;;  %v685_v34 = vld [vmem:[%s955_s1 + $0x100] ss:$16 sps:$4 sm:$0xff]   ;;  %v686_v35 = vld [vmem:[%s955_s1 + $0x108] ss:$16 sps:$4 sm:$0xff]  }
   0xd   :  { %v687_v36 = vld [vmem:[%s955_s1 + $0x124] ss:$16 sps:$4 sm:$0xff]   ;;  %v689_v37 = vld [vmem:[%s955_s1 + $0x12c] ss:$16 sps:$4 sm:$0xff]   ;;  %v691_v38 = vld [vmem:[%s955_s1 + $0x120] ss:$16 sps:$4 sm:$0xff]  }
   0xe   :  { %v692_v39 = vld [vmem:[%s955_s1 + $0x128] ss:$16 sps:$4 sm:$0xff]   ;;  %v693_v40 = vld [vmem:[%s955_s1 + $0x144] ss:$16 sps:$4 sm:$0xff]   ;;  %v695_v41 = vld [vmem:[%s955_s1 + $0x14c] ss:$16 sps:$4 sm:$0xff]  }
   0xf   :  { %425 = vmatpush1.bf16.msra.mxu0 %v655_v14  ;;  %466 = vmatpush1.bf16.msra.mxu1 %v656_v15  ;;  %v697_v42 = vld [vmem:[%s955_s1 + $0x140] ss:$16 sps:$4 sm:$0xff]   ;;  %v698_v43 = vld [vmem:[%s955_s1 + $0x148] ss:$16 sps:$4 sm:$0xff]   ;;  %v699_v44 = vld [vmem:[%s955_s1 + $0x164] ss:$16 sps:$4 sm:$0xff]  }
  0x10   :  { %426 = vmatprep.subr.bf16.mxu0 %v657_v16  ;;  %467 = vmatprep.subr.bf16.mxu1 %v659_v17  ;;  %v701_v45 = vld [vmem:[%s955_s1 + $0x16c] ss:$16 sps:$4 sm:$0xff]   ;;  %v26_v46 = vld [vmem:[%s956_s0] sm:$0xff]  ;;  %v704_v49 = vld [vmem:[%s955_s1 + $0x168] ss:$16 sps:$4 sm:$0xff]   ;;  %v518_v4 = vshrl.u32 %v517_v3, 7 }
  0x11   :  { %v564_v47 = vcombine.high %v26_v46, %v26_v46  ;;  %v703_v48 = vld [vmem:[%s955_s1 + $0x160] ss:$16 sps:$4 sm:$0xff]   ;;  %v705_v50 = vld [vmem:[%s955_s1 + $0x184] ss:$16 sps:$4 sm:$0xff]   ;;  %v707_v51 = vld [vmem:[%s955_s1 + $0x18c] ss:$16 sps:$4 sm:$0xff]   ;;  %v563_v2 = vcombine.low %v26_v46, %v26_v46 }
  0x12   :  { %v709_v52 = vld [vmem:[%s955_s1 + $0x180] ss:$16 sps:$4 sm:$0xff]   ;;  %v710_v53 = vld [vmem:[%s955_s1 + $0x188] ss:$16 sps:$4 sm:$0xff]   ;;  %v711_v54 = vld [vmem:[%s955_s1 + $0x1a4] ss:$16 sps:$4 sm:$0xff]  }
  0x13   :  { %427 = vmatpush1.bf16.msra.mxu0 %v661_v18  ;;  %468 = vmatpush1.bf16.msra.mxu1 %v662_v19  ;;  %v713_v55 = vld [vmem:[%s955_s1 + $0x1ac] ss:$16 sps:$4 sm:$0xff]   ;;  %v715_v56 = vld [vmem:[%s955_s1 + $0x1a0] ss:$16 sps:$4 sm:$0xff]   ;;  %v716_v57 = vld [vmem:[%s955_s1 + $0x1a8] ss:$16 sps:$4 sm:$0xff]  }
  0x14   :  { %428 = vmatprep.subr.bf16.mxu0 %v663_v20  ;;  %469 = vmatprep.subr.bf16.mxu1 %v665_v21  ;;  %v717_v58 = vld [vmem:[%s955_s1 + $0x1c4] ss:$16 sps:$4 sm:$0xff]   ;;  %v719_v59 = vld [vmem:[%s955_s1 + $0x1cc] ss:$16 sps:$4 sm:$0xff]   ;;  %v721_v60 = vld [vmem:[%s955_s1 + $0x1c0] ss:$16 sps:$4 sm:$0xff]  }
  0x15   :  { %450 = vmatprep.mubr.bf16.mxu0 %v564_v47  ;;  %491 = vmatprep.mubr.bf16.mxu1 %v564_v47  ;;  %v722_v61 = vld [vmem:[%s955_s1 + $0x1c8] ss:$16 sps:$4 sm:$0xff]   ;;  %v723_v62 = vld [vmem:[%s955_s1 + $0x1e4] ss:$16 sps:$4 sm:$0xff]   ;;  %v725_v63 = vld [vmem:[%s955_s1 + $0x1ec] ss:$16 sps:$4 sm:$0xff]  }
  0x16   :  { %v727_v0 = vld [vmem:[%s955_s1 + $0x1e0] ss:$16 sps:$4 sm:$0xff]   ;;  %v728_v1 = vld [vmem:[%s955_s1 + $0x1e8] ss:$16 sps:$4 sm:$0xff]   ;;  %v519_v5 = vsub.s32 0, %v518_v4  ;;  %v527_v6 = vsub.s32 2, %v518_v4 }
  0x17   :  { %429 = vmatpush1.bf16.msra.mxu0 %v667_v22  ;;  %470 = vmatpush1.bf16.msra.mxu1 %v668_v23  ;;  %v515_v7 = vld [vmem:[%s957_s2] sm:$0xf]  ;;  %v523_v8 = vsub.s32 1, %v518_v4  ;;  %v531_v9 = vsub.s32 3, %v518_v4 }
  0x18   :  { %430 = vmatprep.subr.bf16.mxu0 %v669_v24  ;;  %471 = vmatprep.subr.bf16.mxu1 %v671_v25  ;;  %v520_v10 = vrot.slane %v515_v7, %v519_v5  ;;  %v528_v11 = vrot.slane %v515_v7, %v527_v6 }
  0x19   :  { %v524_v12 = vrot.slane %v515_v7, %v523_v8  ;;  %v532_v13 = vrot.slane %v515_v7, %v531_v9 }
  0x1b   :  { %431 = vmatpush1.bf16.msra.mxu0 %v673_v26  ;;  %472 = vmatpush1.bf16.msra.mxu1 %v674_v27 }
  0x1c   :  { %432 = vmatprep.subr.bf16.mxu0 %v675_v28  ;;  %473 = vmatprep.subr.bf16.mxu1 %v677_v29 }
  0x1f   :  { %433 = vmatpush1.bf16.msra.mxu0 %v679_v30  ;;  %474 = vmatpush1.bf16.msra.mxu1 %v680_v31 }
  0x20   :  { %434 = vmatprep.subr.bf16.mxu0 %v681_v32  ;;  %475 = vmatprep.subr.bf16.mxu1 %v683_v33 }
  0x23   :  { %435 = vmatpush1.bf16.msra.mxu0 %v685_v34  ;;  %476 = vmatpush1.bf16.msra.mxu1 %v686_v35 }
  0x24   :  { %436 = vmatprep.subr.bf16.mxu0 %v687_v36  ;;  %477 = vmatprep.subr.bf16.mxu1 %v689_v37 }
  0x27   :  { %437 = vmatpush1.bf16.msra.mxu0 %v691_v38  ;;  %478 = vmatpush1.bf16.msra.mxu1 %v692_v39 }
  0x28   :  { %438 = vmatprep.subr.bf16.mxu0 %v693_v40  ;;  %479 = vmatprep.subr.bf16.mxu1 %v695_v41 }
  0x2b   :  { %439 = vmatpush1.bf16.msra.mxu0 %v697_v42  ;;  %480 = vmatpush1.bf16.msra.mxu1 %v698_v43 }
  0x2c   :  { %440 = vmatprep.subr.bf16.mxu0 %v699_v44  ;;  %481 = vmatprep.subr.bf16.mxu1 %v701_v45 }
  0x2f   :  { %441 = vmatpush1.bf16.msra.mxu0 %v703_v48  ;;  %482 = vmatpush1.bf16.msra.mxu1 %v704_v49 }
  0x30   :  { %442 = vmatprep.subr.bf16.mxu0 %v705_v50  ;;  %483 = vmatprep.subr.bf16.mxu1 %v707_v51 }
  0x33   :  { %443 = vmatpush1.bf16.msra.mxu0 %v709_v52  ;;  %484 = vmatpush1.bf16.msra.mxu1 %v710_v53 }
  0x34   :  { %444 = vmatprep.subr.bf16.mxu0 %v711_v54  ;;  %485 = vmatprep.subr.bf16.mxu1 %v713_v55 }
  0x37   :  { %445 = vmatpush1.bf16.msra.mxu0 %v715_v56  ;;  %486 = vmatpush1.bf16.msra.mxu1 %v716_v57 }
  0x38   :  { %446 = vmatprep.subr.bf16.mxu0 %v717_v58  ;;  %487 = vmatprep.subr.bf16.mxu1 %v719_v59 }
  0x3b   :  { %447 = vmatpush1.bf16.msra.mxu0 %v721_v60  ;;  %488 = vmatpush1.bf16.msra.mxu1 %v722_v61 }
  0x3c   :  { %448 = vmatprep.subr.bf16.mxu0 %v723_v62  ;;  %489 = vmatprep.subr.bf16.mxu1 %v725_v63 }
  0x3f   :  { %449 = vmatpush1.bf16.msra.mxu0 %v727_v0  ;;  %490 = vmatpush1.bf16.msra.mxu1 %v728_v1 }
  0x42   :  { %451 = vmatmul.mubr.bf16.vlgmr.msra.gmra.mrb[0].mxu0 %v563_v2  ;;  %492 = vmatmul.mubr.bf16.vlgmr.msra.gmra.mrb[0].mxu1 %v563_v2 }
 0x115   :  { %v452_v14 = vpop.f32.mrb[0].mxu0  ;;  %v493_v15 = vpop.f32.mrb[0].mxu1 }
 0x116   :  { %v537_v16 = vadd.f32 %v520_v10, %v452_v14  ;;  %v539_v17 = vadd.f32 %v528_v11, %v493_v15  ;;  %v454_v18 = vpop.f32.mrb[1].mxu0  ;;  %v495_v19 = vpop.f32.mrb[1].mxu1 }
 0x117   :  { %v538_v20 = vadd.f32 %v524_v12, %v454_v18  ;;  %v540_v21 = vadd.f32 %v532_v13, %v495_v19  ;;  %v456_v22 = vpop.f32.mrb[2].mxu0  ;;  %v497_v23 = vpop.f32.mrb[2].mxu1 }
 0x118   :  { %v457_v24 = vpop.f32.mrb[3].mxu0  ;;  %v498_v25 = vpop.f32.mrb[3].mxu1 }
 0x119   :  { %v631_v26 = vpack.c.bf16 %v538_v20, %v537_v16  ;;  %v632_v27 = vpack.c.bf16 %v540_v21, %v539_v17 }
 0x11b   :  { %557 = vst [vmem:[%s958_s3] sm:$0xff] %v631_v26  ;;  %558 = vst [vmem:[%s958_s3 + $0x8] sm:$0xff] %v632_v27 }

// kernel: _lambda_.37
= control target key start
LH: loop header
LB: loop body
LE: loop exit
PB: predicated region body
PF: predicated region fallthrough
CT: control target
= control target key end

     0   :  { %s1837_s12 = smov 0   ;;  %s1839_s13 = smov 0   ;;  %s2031_s0 = inlined_call_operand.vmem [shape: bf16[8,2560], index: 0, kind: input, shape index: {}]   ;;  %s2032_s1 = inlined_call_operand.vmem [shape: bf16[2560,512], index: 1, kind: input, shape index: {}]   ;;  %s2033_s2 = inlined_call_operand.vmem [shape: f32[1,512], index: 2, kind: input, shape index: {}]   ;;  %s2034_s3 = inlined_call_operand.vmem [shape: bf16[8,512], index: 3, kind: output, shape index: {}]  }
   0x1   :  { %s1841_s14 = smov 0  }
   0x2 LB: > { %s25_s15 = sadd.s32 1, %s1810_s13  ;;  %p1422_p0 = scmp.ge.s32.totalorder %s1814_s14, 1  ;;  %s1814_s14 = sphi %s1841_s14, %s13_s14   ;;  %s1810_s13 = sphi %s1839_s13, %s2036_s13   ;;  %s1806_s12 = sphi %s1837_s12, %s2035_s12  }
   0x3   : > { %p26_p1 = scmp.ge.s32.totalorder %s25_s15, 5  ;;  %p194_p2 = scmp.lt.s32.totalorder %s1814_s14, 6 }
   0x5   : > { %s2038_s15 = smov (%p26_p1, %s25_s15), 0  ;;  %p195_p3 = pnand %p1422_p0, %p194_p2 }
   0x6   : > { %s1423_s16 = sshll.u32 (!%p195_p3), %s1806_s12, 2  ;;  %s1425_s17 = sshll.u32 (!%p195_p3), %s1806_s12, 6 }
   0x7   : > { %198 = sbr.rel (%p195_p3) target bundleno = 386 (0x182), region = 32  ;;  %p243_p4 = scmp.lt.s32.totalorder (!%p195_p3), %s1423_s16, 19 }
   0x8   : > { %p252_p5 = scmp.lt.s32.totalorder (!%p195_p3), %s1425_s17, 319  ;;  %p1428_p6 = scmp.ne.s32.totalorder (!%p195_p3), %s1806_s12, 0 }
   0xe   : > { %s2040_s16 = smov (!%p243_p4, %s1423_s16), 19  ;;  %s2042_s17 = smov (!%p252_p5, %s1425_s17), 319 }
   0xf   : > { %s1424_s18 = sshll.u32 %s2040_s16, 2  ;;  %s1568_s22 = sshll.u32 %s2042_s17, 4  ;;  %v1816_v0 = vmov (!%p1428_p6), 0.0  }
  0x10   : > { %s1862_s21 = scalar_lea.vmem %s2031_s0, %s1424_s18  ;;  %s1867_s25 = scalar_lea.vmem %s2032_s1, %s1568_s22  ;;  %281 = vst [vmem:[#allocation2] sm:$0xff] (!%p1428_p6), %v1816_v0  ;;  %282 = vst [vmem:[#allocation2 + $0x8] sm:$0xff] (!%p1428_p6), %v1816_v0 }
  0x11   : > { %280 = sbr.rel (%p1428_p6) target bundleno = 24 (0x18), region = 36  ;;  %283 = vst [vmem:[#allocation2 + $0x10] sm:$0xff] (!%p1428_p6), %v1816_v0  ;;  %284 = vst [vmem:[#allocation2 + $0x18] sm:$0xff] (!%p1428_p6), %v1816_v0 }
  0x18 PF: > { %v1596_v1 = vld [vmem:[%s1867_s25 + $0x4] ss:$16 sps:$4 sm:$0xff]   ;;  %v1600_v3 = vld [vmem:[%s1867_s25] ss:$16 sps:$4 sm:$0xff]   ;;  %v290_v49 = vld [vmem:[%s1862_s21 + $0x8] sm:$0xff]  ;;  %p1561_p7 = scmp.ne.s32.totalorder %s1806_s12, 4 }
  0x19   : > { %v1598_v2 = vld [vmem:[%s1867_s25 + $0x204] ss:$16 sps:$4 sm:$0xff]   ;;  %1073 = vmatprep.subr.bf16.mxu0 %v1596_v1  ;;  %v1601_v4 = vld [vmem:[%s1867_s25 + $0x200] ss:$16 sps:$4 sm:$0xff]   ;;  %v1432_v52 = vcombine.high %v290_v49, %v290_v49 }
  0x1a   : > { %1114 = vmatprep.subr.bf16.mxu1 %v1598_v2  ;;  %v1602_v5 = vld [vmem:[%s1867_s25 + $0x24] ss:$16 sps:$4 sm:$0xff]   ;;  %1074 = vmatpush1.bf16.msra.mxu0 %v1600_v3  ;;  %v1606_v7 = vld [vmem:[%s1867_s25 + $0x20] ss:$16 sps:$4 sm:$0xff]  }
  0x1b   : > { %1115 = vmatpush1.bf16.msra.mxu1 %v1601_v4  ;;  %v1604_v6 = vld [vmem:[%s1867_s25 + $0x224] ss:$16 sps:$4 sm:$0xff]   ;;  %1075 = vmatprep.subr.bf16.mxu0 %v1602_v5  ;;  %v1607_v8 = vld [vmem:[%s1867_s25 + $0x220] ss:$16 sps:$4 sm:$0xff]   ;;  %v1698_v5 = vld [vmem:[%s1867_s25 + $0xc] ss:$16 sps:$4 sm:$0xff]  }
  0x1c   : > { %1116 = vmatprep.subr.bf16.mxu1 %v1604_v6  ;;  %v1608_v9 = vld [vmem:[%s1867_s25 + $0x44] ss:$16 sps:$4 sm:$0xff]   ;;  %v1612_v11 = vld [vmem:[%s1867_s25 + $0x40] ss:$16 sps:$4 sm:$0xff]   ;;  %1146 = vmatprep.mubr.bf16.mxu1 %v1432_v52  ;;  %v1701_v6 = vld [vmem:[%s1867_s25 + $0x20c] ss:$16 sps:$4 sm:$0xff]  }
  0x1d   : > { %v1610_v10 = vld [vmem:[%s1867_s25 + $0x244] ss:$16 sps:$4 sm:$0xff]   ;;  %v1613_v12 = vld [vmem:[%s1867_s25 + $0x240] ss:$16 sps:$4 sm:$0xff]  }
  0x1e   : > { %1076 = vmatpush1.bf16.msra.mxu0 %v1606_v7  ;;  %v1614_v13 = vld [vmem:[%s1867_s25 + $0x64] ss:$16 sps:$4 sm:$0xff]   ;;  %v1618_v15 = vld [vmem:[%s1867_s25 + $0x60] ss:$16 sps:$4 sm:$0xff]  }
  0x1f   : > { %1117 = vmatpush1.bf16.msra.mxu1 %v1607_v8  ;;  %1077 = vmatprep.subr.bf16.mxu0 %v1608_v9  ;;  %v1616_v14 = vld [vmem:[%s1867_s25 + $0x264] ss:$16 sps:$4 sm:$0xff]   ;;  %v1619_v16 = vld [vmem:[%s1867_s25 + $0x260] ss:$16 sps:$4 sm:$0xff]   ;;  %v1943_v8 = vcombine.low %v290_v49, %v290_v49  ;;  %v1696_v9 = vld [vmem:[%s1867_s25 + $0x8] ss:$16 sps:$4 sm:$0xff]  }
  0x20   : > { %1118 = vmatprep.subr.bf16.mxu1 %v1610_v10  ;;  %v1620_v17 = vld [vmem:[%s1867_s25 + $0x84] ss:$16 sps:$4 sm:$0xff]   ;;  %v1624_v19 = vld [vmem:[%s1867_s25 + $0x80] ss:$16 sps:$4 sm:$0xff]   ;;  %v1699_v10 = vld [vmem:[%s1867_s25 + $0x208] ss:$16 sps:$4 sm:$0xff]  }
  0x21   : > { %v1622_v18 = vld [vmem:[%s1867_s25 + $0x284] ss:$16 sps:$4 sm:$0xff]   ;;  %v1625_v20 = vld [vmem:[%s1867_s25 + $0x280] ss:$16 sps:$4 sm:$0xff]   ;;  %v1756_v49 = vld [vmem:[%s1867_s25 + $0x148] ss:$16 sps:$4 sm:$0xff]  }
  0x22   : > { %1078 = vmatpush1.bf16.msra.mxu0 %v1612_v11  ;;  %v1626_v21 = vld [vmem:[%s1867_s25 + $0xa4] ss:$16 sps:$4 sm:$0xff]   ;;  %v1630_v23 = vld [vmem:[%s1867_s25 + $0xa0] ss:$16 sps:$4 sm:$0xff]   ;;  %v1704_v11 = vld [vmem:[%s1867_s25 + $0x2c] ss:$16 sps:$4 sm:$0xff]  }
  0x23   : > { %1119 = vmatpush1.bf16.msra.mxu1 %v1613_v12  ;;  %1079 = vmatprep.subr.bf16.mxu0 %v1614_v13  ;;  %v1628_v22 = vld [vmem:[%s1867_s25 + $0x2a4] ss:$16 sps:$4 sm:$0xff]   ;;  %v1631_v24 = vld [vmem:[%s1867_s25 + $0x2a0] ss:$16 sps:$4 sm:$0xff]   ;;  %v1707_v12 = vld [vmem:[%s1867_s25 + $0x22c] ss:$16 sps:$4 sm:$0xff]  }
  0x24   : > { %1120 = vmatprep.subr.bf16.mxu1 %v1616_v14  ;;  %v1632_v25 = vld [vmem:[%s1867_s25 + $0xc4] ss:$16 sps:$4 sm:$0xff]   ;;  %v1636_v27 = vld [vmem:[%s1867_s25 + $0xc0] ss:$16 sps:$4 sm:$0xff]   ;;  %v1702_v13 = vld [vmem:[%s1867_s25 + $0x28] ss:$16 sps:$4 sm:$0xff]  }
  0x25   : > { %v1634_v26 = vld [vmem:[%s1867_s25 + $0x2c4] ss:$16 sps:$4 sm:$0xff]   ;;  %v1637_v28 = vld [vmem:[%s1867_s25 + $0x2c0] ss:$16 sps:$4 sm:$0xff]   ;;  %v1705_v14 = vld [vmem:[%s1867_s25 + $0x228] ss:$16 sps:$4 sm:$0xff]  }
  0x26   : > { %1080 = vmatpush1.bf16.msra.mxu0 %v1618_v15  ;;  %v1638_v29 = vld [vmem:[%s1867_s25 + $0xe4] ss:$16 sps:$4 sm:$0xff]   ;;  %v1642_v31 = vld [vmem:[%s1867_s25 + $0xe0] ss:$16 sps:$4 sm:$0xff]   ;;  %v1710_v15 = vld [vmem:[%s1867_s25 + $0x4c] ss:$16 sps:$4 sm:$0xff]  }
  0x27   : > { %1121 = vmatpush1.bf16.msra.mxu1 %v1619_v16  ;;  %1081 = vmatprep.subr.bf16.mxu0 %v1620_v17  ;;  %v1640_v30 = vld [vmem:[%s1867_s25 + $0x2e4] ss:$16 sps:$4 sm:$0xff]   ;;  %v1643_v32 = vld [vmem:[%s1867_s25 + $0x2e0] ss:$16 sps:$4 sm:$0xff]   ;;  %v1713_v16 = vld [vmem:[%s1867_s25 + $0x24c] ss:$16 sps:$4 sm:$0xff]  }
  0x28   : > { %1122 = vmatprep.subr.bf16.mxu1 %v1622_v18  ;;  %v1644_v33 = vld [vmem:[%s1867_s25 + $0x104] ss:$16 sps:$4 sm:$0xff]   ;;  %v1648_v35 = vld [vmem:[%s1867_s25 + $0x100] ss:$16 sps:$4 sm:$0xff]   ;;  %v1708_v17 = vld [vmem:[%s1867_s25 + $0x48] ss:$16 sps:$4 sm:$0xff]  }
  0x29   : > { %v1646_v34 = vld [vmem:[%s1867_s25 + $0x304] ss:$16 sps:$4 sm:$0xff]   ;;  %v1649_v36 = vld [vmem:[%s1867_s25 + $0x300] ss:$16 sps:$4 sm:$0xff]   ;;  %v1711_v18 = vld [vmem:[%s1867_s25 + $0x248] ss:$16 sps:$4 sm:$0xff]  }
  0x2a   : > { %1082 = vmatpush1.bf16.msra.mxu0 %v1624_v19  ;;  %v1650_v37 = vld [vmem:[%s1867_s25 + $0x124] ss:$16 sps:$4 sm:$0xff]   ;;  %v1654_v39 = vld [vmem:[%s1867_s25 + $0x120] ss:$16 sps:$4 sm:$0xff]   ;;  %v1716_v19 = vld [vmem:[%s1867_s25 + $0x6c] ss:$16 sps:$4 sm:$0xff]  }
  0x2b   : > { %1123 = vmatpush1.bf16.msra.mxu1 %v1625_v20  ;;  %1083 = vmatprep.subr.bf16.mxu0 %v1626_v21  ;;  %v1652_v38 = vld [vmem:[%s1867_s25 + $0x324] ss:$16 sps:$4 sm:$0xff]   ;;  %v1655_v40 = vld [vmem:[%s1867_s25 + $0x320] ss:$16 sps:$4 sm:$0xff]   ;;  %v1719_v20 = vld [vmem:[%s1867_s25 + $0x26c] ss:$16 sps:$4 sm:$0xff]  }
  0x2c   : > { %1124 = vmatprep.subr.bf16.mxu1 %v1628_v22  ;;  %v1656_v41 = vld [vmem:[%s1867_s25 + $0x144] ss:$16 sps:$4 sm:$0xff]   ;;  %v1660_v43 = vld [vmem:[%s1867_s25 + $0x140] ss:$16 sps:$4 sm:$0xff]   ;;  %v1714_v21 = vld [vmem:[%s1867_s25 + $0x68] ss:$16 sps:$4 sm:$0xff]  }
  0x2d   : > { %v1658_v42 = vld [vmem:[%s1867_s25 + $0x344] ss:$16 sps:$4 sm:$0xff]   ;;  %v1661_v44 = vld [vmem:[%s1867_s25 + $0x340] ss:$16 sps:$4 sm:$0xff]   ;;  %v1717_v22 = vld [vmem:[%s1867_s25 + $0x268] ss:$16 sps:$4 sm:$0xff]  }
  0x2e   : > { %1084 = vmatpush1.bf16.msra.mxu0 %v1630_v23  ;;  %v1662_v45 = vld [vmem:[%s1867_s25 + $0x164] ss:$16 sps:$4 sm:$0xff]   ;;  %v1666_v50 = vld [vmem:[%s1867_s25 + $0x160] ss:$16 sps:$4 sm:$0xff]   ;;  %v1722_v23 = vld [vmem:[%s1867_s25 + $0x8c] ss:$16 sps:$4 sm:$0xff]  }
  0x2f   : > { %1125 = vmatpush1.bf16.msra.mxu1 %v1631_v24  ;;  %1085 = vmatprep.subr.bf16.mxu0 %v1632_v25  ;;  %v1664_v46 = vld [vmem:[%s1867_s25 + $0x364] ss:$16 sps:$4 sm:$0xff]   ;;  %v1667_v51 = vld [vmem:[%s1867_s25 + $0x360] ss:$16 sps:$4 sm:$0xff]   ;;  %v1725_v24 = vld [vmem:[%s1867_s25 + $0x28c] ss:$16 sps:$4 sm:$0xff]  }
  0x30   : > { %1126 = vmatprep.subr.bf16.mxu1 %v1634_v26  ;;  %v289_v47 = vld [vmem:[%s1862_s21] sm:$0xff]  ;;  %v1720_v25 = vld [vmem:[%s1867_s25 + $0x88] ss:$16 sps:$4 sm:$0xff]  }
  0x31   : > { %v1917_v48 = vcombine.high %v289_v47, %v289_v47  ;;  %v1668_v53 = vld [vmem:[%s1867_s25 + $0x184] ss:$16 sps:$4 sm:$0xff]   ;;  %v1672_v55 = vld [vmem:[%s1867_s25 + $0x180] ss:$16 sps:$4 sm:$0xff]   ;;  %v1941_v7 = vcombine.low %v289_v47, %v289_v47  ;;  %v1723_v26 = vld [vmem:[%s1867_s25 + $0x288] ss:$16 sps:$4 sm:$0xff]  }
  0x32   : > { %1086 = vmatpush1.bf16.msra.mxu0 %v1636_v27  ;;  %v1670_v54 = vld [vmem:[%s1867_s25 + $0x384] ss:$16 sps:$4 sm:$0xff]   ;;  %v1673_v56 = vld [vmem:[%s1867_s25 + $0x380] ss:$16 sps:$4 sm:$0xff]   ;;  %v1728_v27 = vld [vmem:[%s1867_s25 + $0xac] ss:$16 sps:$4 sm:$0xff]  }
  0x33   : > { %1127 = vmatpush1.bf16.msra.mxu1 %v1637_v28  ;;  %1087 = vmatprep.subr.bf16.mxu0 %v1638_v29  ;;  %v1674_v57 = vld [vmem:[%s1867_s25 + $0x1a4] ss:$16 sps:$4 sm:$0xff]   ;;  %v1678_v59 = vld [vmem:[%s1867_s25 + $0x1a0] ss:$16 sps:$4 sm:$0xff]   ;;  %v1731_v28 = vld [vmem:[%s1867_s25 + $0x2ac] ss:$16 sps:$4 sm:$0xff]  }
  0x34   : > { %1128 = vmatprep.subr.bf16.mxu1 %v1640_v30  ;;  %1105 = vmatprep.mubr.bf16.mxu0 %v1917_v48  ;;  %v1676_v58 = vld [vmem:[%s1867_s25 + $0x3a4] ss:$16 sps:$4 sm:$0xff]   ;;  %v1679_v60 = vld [vmem:[%s1867_s25 + $0x3a0] ss:$16 sps:$4 sm:$0xff]   ;;  %v1726_v29 = vld [vmem:[%s1867_s25 + $0xa8] ss:$16 sps:$4 sm:$0xff]  }
  0x35   : > { %v1680_v61 = vld [vmem:[%s1867_s25 + $0x1c4] ss:$16 sps:$4 sm:$0xff]   ;;  %v1684_v63 = vld [vmem:[%s1867_s25 + $0x1c0] ss:$16 sps:$4 sm:$0xff]   ;;  %v1729_v30 = vld [vmem:[%s1867_s25 + $0x2a8] ss:$16 sps:$4 sm:$0xff]  }
  0x36   : > { %1088 = vmatpush1.bf16.msra.mxu0 %v1642_v31  ;;  %v1682_v62 = vld [vmem:[%s1867_s25 + $0x3c4] ss:$16 sps:$4 sm:$0xff]   ;;  %v1685_v0 = vld [vmem:[%s1867_s25 + $0x3c0] ss:$16 sps:$4 sm:$0xff]   ;;  %v1734_v31 = vld [vmem:[%s1867_s25 + $0xcc] ss:$16 sps:$4 sm:$0xff]  }
  0x37   : > { %1129 = vmatpush1.bf16.msra.mxu1 %v1643_v32  ;;  %1089 = vmatprep.subr.bf16.mxu0 %v1644_v33  ;;  %v1686_v1 = vld [vmem:[%s1867_s25 + $0x1e4] ss:$16 sps:$4 sm:$0xff]   ;;  %v1690_v3 = vld [vmem:[%s1867_s25 + $0x1e0] ss:$16 sps:$4 sm:$0xff]   ;;  %v1737_v32 = vld [vmem:[%s1867_s25 + $0x2cc] ss:$16 sps:$4 sm:$0xff]  }
  0x38   : > { %1130 = vmatprep.subr.bf16.mxu1 %v1646_v34  ;;  %v1688_v2 = vld [vmem:[%s1867_s25 + $0x3e4] ss:$16 sps:$4 sm:$0xff]   ;;  %v1691_v4 = vld [vmem:[%s1867_s25 + $0x3e0] ss:$16 sps:$4 sm:$0xff]   ;;  %v1732_v33 = vld [vmem:[%s1867_s25 + $0xc8] ss:$16 sps:$4 sm:$0xff]  }
  0x39   : > { %v1735_v34 = vld [vmem:[%s1867_s25 + $0x2c8] ss:$16 sps:$4 sm:$0xff]   ;;  %v1758_v47 = vld [vmem:[%s1867_s25 + $0x14c] ss:$16 sps:$4 sm:$0xff]  }
  0x3a   : > { %1090 = vmatpush1.bf16.msra.mxu0 %v1648_v35  ;;  %v1740_v35 = vld [vmem:[%s1867_s25 + $0xec] ss:$16 sps:$4 sm:$0xff]  }
  0x3b   : > { %1131 = vmatpush1.bf16.msra.mxu1 %v1649_v36  ;;  %1091 = vmatprep.subr.bf16.mxu0 %v1650_v37  ;;  %v1743_v36 = vld [vmem:[%s1867_s25 + $0x2ec] ss:$16 sps:$4 sm:$0xff]   ;;  %v1738_v37 = vld [vmem:[%s1867_s25 + $0xe8] ss:$16 sps:$4 sm:$0xff]  }
  0x3c   : > { %1132 = vmatprep.subr.bf16.mxu1 %v1652_v38  ;;  %v1741_v38 = vld [vmem:[%s1867_s25 + $0x2e8] ss:$16 sps:$4 sm:$0xff]  }
  0x3e   : > { %1092 = vmatpush1.bf16.msra.mxu0 %v1654_v39  ;;  %v1746_v39 = vld [vmem:[%s1867_s25 + $0x10c] ss:$16 sps:$4 sm:$0xff]  }
  0x3f   : > { %1133 = vmatpush1.bf16.msra.mxu1 %v1655_v40  ;;  %1093 = vmatprep.subr.bf16.mxu0 %v1656_v41  ;;  %v1749_v40 = vld [vmem:[%s1867_s25 + $0x30c] ss:$16 sps:$4 sm:$0xff]   ;;  %v1744_v41 = vld [vmem:[%s1867_s25 + $0x108] ss:$16 sps:$4 sm:$0xff]  }
  0x40   : > { %1134 = vmatprep.subr.bf16.mxu1 %v1658_v42  ;;  %v1747_v42 = vld [vmem:[%s1867_s25 + $0x308] ss:$16 sps:$4 sm:$0xff]  }
  0x42   : > { %1094 = vmatpush1.bf16.msra.mxu0 %v1660_v43  ;;  %v1752_v43 = vld [vmem:[%s1867_s25 + $0x12c] ss:$16 sps:$4 sm:$0xff]  }
  0x43   : > { %1135 = vmatpush1.bf16.msra.mxu1 %v1661_v44  ;;  %1095 = vmatprep.subr.bf16.mxu0 %v1662_v45  ;;  %v1755_v44 = vld [vmem:[%s1867_s25 + $0x32c] ss:$16 sps:$4 sm:$0xff]   ;;  %v1750_v45 = vld [vmem:[%s1867_s25 + $0x128] ss:$16 sps:$4 sm:$0xff]  }
  0x44   : > { %1136 = vmatprep.subr.bf16.mxu1 %v1664_v46  ;;  %v1753_v46 = vld [vmem:[%s1867_s25 + $0x328] ss:$16 sps:$4 sm:$0xff]  }
  0x46   : > { %1096 = vmatpush1.bf16.msra.mxu0 %v1666_v50  ;;  %v1759_v50 = vld [vmem:[%s1867_s25 + $0x348] ss:$16 sps:$4 sm:$0xff]  }
  0x47   : > { %1137 = vmatpush1.bf16.msra.mxu1 %v1667_v51  ;;  %1097 = vmatprep.subr.bf16.mxu0 %v1668_v53  ;;  %v1764_v51 = vld [vmem:[%s1867_s25 + $0x16c] ss:$16 sps:$4 sm:$0xff]   ;;  %v1762_v53 = vld [vmem:[%s1867_s25 + $0x168] ss:$16 sps:$4 sm:$0xff]  }
  0x48   : > { %1138 = vmatprep.subr.bf16.mxu1 %v1670_v54  ;;  %v1765_v54 = vld [vmem:[%s1867_s25 + $0x368] ss:$16 sps:$4 sm:$0xff]  }
  0x4a   : > { %1098 = vmatpush1.bf16.msra.mxu0 %v1672_v55  ;;  %v1770_v55 = vld [vmem:[%s1867_s25 + $0x18c] ss:$16 sps:$4 sm:$0xff]  }
  0x4b   : > { %1139 = vmatpush1.bf16.msra.mxu1 %v1673_v56  ;;  %1099 = vmatprep.subr.bf16.mxu0 %v1674_v57  ;;  %v1773_v56 = vld [vmem:[%s1867_s25 + $0x38c] ss:$16 sps:$4 sm:$0xff]   ;;  %v1768_v57 = vld [vmem:[%s1867_s25 + $0x188] ss:$16 sps:$4 sm:$0xff]  }
  0x4c   : > { %1140 = vmatprep.subr.bf16.mxu1 %v1676_v58  ;;  %v1771_v58 = vld [vmem:[%s1867_s25 + $0x388] ss:$16 sps:$4 sm:$0xff]  }
  0x4e   : > { %1100 = vmatpush1.bf16.msra.mxu0 %v1678_v59  ;;  %v1776_v59 = vld [vmem:[%s1867_s25 + $0x1ac] ss:$16 sps:$4 sm:$0xff]  }
  0x4f   : > { %1141 = vmatpush1.bf16.msra.mxu1 %v1679_v60  ;;  %1101 = vmatprep.subr.bf16.mxu0 %v1680_v61  ;;  %v1779_v60 = vld [vmem:[%s1867_s25 + $0x3ac] ss:$16 sps:$4 sm:$0xff]   ;;  %v1774_v61 = vld [vmem:[%s1867_s25 + $0x1a8] ss:$16 sps:$4 sm:$0xff]  }
  0x50   : > { %1142 = vmatprep.subr.bf16.mxu1 %v1682_v62  ;;  %v1777_v62 = vld [vmem:[%s1867_s25 + $0x3a8] ss:$16 sps:$4 sm:$0xff]  }
  0x52   : > { %1102 = vmatpush1.bf16.msra.mxu0 %v1684_v63  ;;  %v1782_v63 = vld [vmem:[%s1867_s25 + $0x1cc] ss:$16 sps:$4 sm:$0xff]  }
  0x53   : > { %1143 = vmatpush1.bf16.msra.mxu1 %v1685_v0  ;;  %1103 = vmatprep.subr.bf16.mxu0 %v1686_v1  ;;  %v1785_v0 = vld [vmem:[%s1867_s25 + $0x3cc] ss:$16 sps:$4 sm:$0xff]   ;;  %v1780_v1 = vld [vmem:[%s1867_s25 + $0x1c8] ss:$16 sps:$4 sm:$0xff]  }
  0x54   : > { %1144 = vmatprep.subr.bf16.mxu1 %v1688_v2  ;;  %v1783_v2 = vld [vmem:[%s1867_s25 + $0x3c8] ss:$16 sps:$4 sm:$0xff]  }
  0x56   : > { %1104 = vmatpush1.bf16.msra.mxu0 %v1690_v3  ;;  %v1788_v3 = vld [vmem:[%s1867_s25 + $0x1ec] ss:$16 sps:$4 sm:$0xff]  }
  0x57   : > { %1145 = vmatpush1.bf16.msra.mxu1 %v1691_v4  ;;  %1155 = vmatprep.subr.bf16.mxu0 %v1698_v5  ;;  %v1791_v4 = vld [vmem:[%s1867_s25 + $0x3ec] ss:$16 sps:$4 sm:$0xff]   ;;  %v1786_v5 = vld [vmem:[%s1867_s25 + $0x1e8] ss:$16 sps:$4 sm:$0xff]  }
  0x58   : > { %1196 = vmatprep.subr.bf16.mxu1 %v1701_v6  ;;  %v1789_v6 = vld [vmem:[%s1867_s25 + $0x3e8] ss:$16 sps:$4 sm:$0xff]  }
  0x59   : > { %1106 = vmatmul.mubr.bf16.vlgmr.msra.gmra.mrb[0].mxu0 %v1941_v7 }
  0x5a   : > { %1147 = vmatmul.mubr.bf16.vlgmr.msra.gmra.mrb[0].mxu1 %v1943_v8  ;;  %1156 = vmatpush1.bf16.msra.mxu0 %v1696_v9 }
  0x5b   : > { %1197 = vmatpush1.bf16.msra.mxu1 %v1699_v10  ;;  %1157 = vmatprep.subr.bf16.mxu0 %v1704_v11  ;;  %v285_v10 = vld [vmem:[#allocation2] sm:$0xff] }
  0x5c   : > { %1198 = vmatprep.subr.bf16.mxu1 %v1707_v12  ;;  %1187 = vmatprep.mubr.bf16.mxu0 %v1917_v48  ;;  %v1761_v48 = vld [vmem:[%s1867_s25 + $0x34c] ss:$16 sps:$4 sm:$0xff]  }
  0x5d   : > { %1228 = vmatprep.mubr.bf16.mxu1 %v1432_v52  ;;  %v1767_v52 = vld [vmem:[%s1867_s25 + $0x36c] ss:$16 sps:$4 sm:$0xff]  }
  0x5e   : > { %1158 = vmatpush1.bf16.msra.mxu0 %v1702_v13 }
  0x5f   : > { %1199 = vmatpush1.bf16.msra.mxu1 %v1705_v14  ;;  %1159 = vmatprep.subr.bf16.mxu0 %v1710_v15  ;;  %v286_v14 = vld [vmem:[#allocation2 + $0x8] sm:$0xff] }
  0x60   : > { %1200 = vmatprep.subr.bf16.mxu1 %v1713_v16 }
  0x62   : > { %1160 = vmatpush1.bf16.msra.mxu0 %v1708_v17 }
  0x63   : > { %1201 = vmatpush1.bf16.msra.mxu1 %v1711_v18  ;;  %1161 = vmatprep.subr.bf16.mxu0 %v1716_v19 }
  0x64   : > { %1202 = vmatprep.subr.bf16.mxu1 %v1719_v20 }
  0x66   : > { %1162 = vmatpush1.bf16.msra.mxu0 %v1714_v21 }
  0x67   : > { %1203 = vmatpush1.bf16.msra.mxu1 %v1717_v22  ;;  %1163 = vmatprep.subr.bf16.mxu0 %v1722_v23 }
  0x68   : > { %1204 = vmatprep.subr.bf16.mxu1 %v1725_v24 }
  0x6a   : > { %1164 = vmatpush1.bf16.msra.mxu0 %v1720_v25 }
  0x6b   : > { %1205 = vmatpush1.bf16.msra.mxu1 %v1723_v26  ;;  %1165 = vmatprep.subr.bf16.mxu0 %v1728_v27  ;;  %v288_v26 = vld [vmem:[#allocation2 + $0x18] sm:$0xff] }
  0x6c   : > { %1206 = vmatprep.subr.bf16.mxu1 %v1731_v28 }
  0x6e   : > { %1166 = vmatpush1.bf16.msra.mxu0 %v1726_v29 }
  0x6f   : > { %1207 = vmatpush1.bf16.msra.mxu1 %v1729_v30  ;;  %1167 = vmatprep.subr.bf16.mxu0 %v1734_v31 }
  0x70   : > { %1208 = vmatprep.subr.bf16.mxu1 %v1737_v32 }
  0x72   : > { %1168 = vmatpush1.bf16.msra.mxu0 %v1732_v33 }
  0x73   : > { %1209 = vmatpush1.bf16.msra.mxu1 %v1735_v34  ;;  %1169 = vmatprep.subr.bf16.mxu0 %v1740_v35  ;;  %v1255_v35 = vlaneseq (!%p1561_p7) }
  0x74   : > { %1210 = vmatprep.subr.bf16.mxu1 %v1743_v36 }
  0x75   : > { %v1256_v36 = vshrl.u32 (!%p1561_p7), %v1255_v35, 7 }
  0x76   : > { %1170 = vmatpush1.bf16.msra.mxu0 %v1738_v37  ;;  %v1253_v37 = vld [vmem:[%s2033_s2] sm:$0xf] (!%p1561_p7) }
  0x77   : > { %1211 = vmatpush1.bf16.msra.mxu1 %v1741_v38  ;;  %1171 = vmatprep.subr.bf16.mxu0 %v1746_v39  ;;  %v1257_v39 = vsub.s32 (!%p1561_p7), 0, %v1256_v36 }
  0x78   : > { %1212 = vmatprep.subr.bf16.mxu1 %v1749_v40  ;;  %v1261_v40 = vsub.s32 (!%p1561_p7), 1, %v1256_v36 }
  0x7a   : > { %1172 = vmatpush1.bf16.msra.mxu0 %v1744_v41  ;;  %v1265_v41 = vsub.s32 (!%p1561_p7), 2, %v1256_v36 }
  0x7b   : > { %1213 = vmatpush1.bf16.msra.mxu1 %v1747_v42  ;;  %1173 = vmatprep.subr.bf16.mxu0 %v1752_v43  ;;  %v1269_v42 = vsub.s32 (!%p1561_p7), 3, %v1256_v36 }
  0x7c   : > { %1214 = vmatprep.subr.bf16.mxu1 %v1755_v44 }
  0x7e   : > { %1174 = vmatpush1.bf16.msra.mxu0 %v1750_v45 }
  0x7f   : > { %1215 = vmatpush1.bf16.msra.mxu1 %v1753_v46  ;;  %1175 = vmatprep.subr.bf16.mxu0 %v1758_v47  ;;  %v1258_v46 = vrot.slane (!%p1561_p7), %v1253_v37, %v1257_v39  ;;  %v1262_v47 = vrot.slane (!%p1561_p7), %v1253_v37, %v1261_v40 }
  0x80   : > { %1216 = vmatprep.subr.bf16.mxu1 %v1761_v48  ;;  %v1266_v48 = vrot.slane (!%p1561_p7), %v1253_v37, %v1265_v41 }
  0x82   : > { %1176 = vmatpush1.bf16.msra.mxu0 %v1756_v49  ;;  %v1270_v49 = vrot.slane (!%p1561_p7), %v1253_v37, %v1269_v42 }
  0x83   : > { %1217 = vmatpush1.bf16.msra.mxu1 %v1759_v50  ;;  %1177 = vmatprep.subr.bf16.mxu0 %v1764_v51 }
  0x84   : > { %1218 = vmatprep.subr.bf16.mxu1 %v1767_v52 }
  0x86   : > { %1178 = vmatpush1.bf16.msra.mxu0 %v1762_v53 }
  0x87   : > { %1219 = vmatpush1.bf16.msra.mxu1 %v1765_v54  ;;  %1179 = vmatprep.subr.bf16.mxu0 %v1770_v55 }
  0x88   : > { %1220 = vmatprep.subr.bf16.mxu1 %v1773_v56 }
  0x8a   : > { %1180 = vmatpush1.bf16.msra.mxu0 %v1768_v57 }
  0x8b   : > { %1221 = vmatpush1.bf16.msra.mxu1 %v1771_v58  ;;  %1181 = vmatprep.subr.bf16.mxu0 %v1776_v59 }
  0x8c   : > { %1222 = vmatprep.subr.bf16.mxu1 %v1779_v60 }
  0x8e   : > { %1182 = vmatpush1.bf16.msra.mxu0 %v1774_v61 }
  0x8f   : > { %1223 = vmatpush1.bf16.msra.mxu1 %v1777_v62  ;;  %1183 = vmatprep.subr.bf16.mxu0 %v1782_v63 }
  0x90   : > { %1224 = vmatprep.subr.bf16.mxu1 %v1785_v0 }
  0x92   : > { %1184 = vmatpush1.bf16.msra.mxu0 %v1780_v1 }
  0x93   : > { %1225 = vmatpush1.bf16.msra.mxu1 %v1783_v2  ;;  %1185 = vmatprep.subr.bf16.mxu0 %v1788_v3 }
  0x94   : > { %1226 = vmatprep.subr.bf16.mxu1 %v1791_v4 }
  0x96   : > { %1186 = vmatpush1.bf16.msra.mxu0 %v1786_v5 }
  0x97   : > { %1227 = vmatpush1.bf16.msra.mxu1 %v1789_v6 }
  0x99   : > { %1188 = vmatmul.mubr.bf16.vlgmr.msra.gmra.mrb[4].mxu0 %v1941_v7  ;;  %v287_v7 = vld [vmem:[#allocation2 + $0x10] sm:$0xff] }
  0x9a   : > { %1229 = vmatmul.mubr.bf16.vlgmr.msra.gmra.mrb[4].mxu1 %v1943_v8 }
 0x12c   : > { %v1107_v9 = vpop.f32.mrb[0].mxu0 }
 0x12d   : > { %v1148_v11 = vpop.f32.mrb[0].mxu1  ;;  %v1109_v13 = vpop.f32.mrb[1].mxu0 }
 0x12e   : > { %v1149_v12 = vadd.f32 %v1148_v11, %v1107_v9  ;;  %v1150_v15 = vpop.f32.mrb[1].mxu1  ;;  %v1111_v17 = vpop.f32.mrb[2].mxu0 }
 0x12f   : > { %v1151_v16 = vadd.f32 %v1150_v15, %v1109_v13  ;;  %v1152_v18 = vpop.f32.mrb[2].mxu1  ;;  %v1112_v20 = vpop.f32.mrb[3].mxu0 }
 0x130   : > { %v1237_v19 = vadd.f32 %v1149_v12, %v285_v10  ;;  %v1153_v21 = vpop.f32.mrb[3].mxu1 }
 0x131   : > { %v1238_v22 = vadd.f32 %v1151_v16, %v286_v14 }
 0x132   : > { %1241 = vst [vmem:[#allocation2] sm:$0xff] %v1237_v19 }
 0x133   : > { %1242 = vst [vmem:[#allocation2 + $0x8] sm:$0xff] %v1238_v22 }
 0x139   : > { %v1249_v38 = vld [vmem:[#allocation2] sm:$0xff] (!%p1561_p7) }
 0x13a   : > { %v1250_v43 = vld [vmem:[#allocation2 + $0x8] sm:$0xff] (!%p1561_p7)  ;;  %v1275_v50 = vadd.f32 (!%p1561_p7), %v1258_v46, %v1249_v38 }
 0x13b   : > { %v1276_v51 = vadd.f32 (!%p1561_p7), %v1262_v47, %v1250_v43 }
 0x13c   : > { %v1279_v54 = vmax.f32 (!%p1561_p7), %v1275_v50, 0.0 }
 0x13d   : > { %v1280_v55 = vmax.f32 (!%p1561_p7), %v1276_v51, 0.0 }
 0x13f   : > { %v1569_v58 = vpack.c.bf16 (!%p1561_p7), %v1280_v55, %v1279_v54 }
 0x141   : > { %1299 = vst [vmem:[%s2034_s3] sm:$0xff] (!%p1561_p7), %v1569_v58 }
 0x16c   : > { %v1189_v23 = vpop.f32.mrb[4].mxu0 }
 0x16d   : > { %v1230_v24 = vpop.f32.mrb[4].mxu1  ;;  %v1191_v25 = vpop.f32.mrb[5].mxu0  ;;  %1248 = sbr.rel (%p1561_p7) target bundleno = 386 (0x182), region = 40 }
 0x16e   : > { %v1231_v8 = vadd.f32 %v1230_v24, %v1189_v23  ;;  %v1232_v27 = vpop.f32.mrb[5].mxu1  ;;  %v1193_v29 = vpop.f32.mrb[6].mxu0 }
 0x16f   : > { %v1233_v28 = vadd.f32 %v1232_v27, %v1191_v25  ;;  %v1234_v30 = vpop.f32.mrb[6].mxu1  ;;  %v1194_v32 = vpop.f32.mrb[7].mxu0 }
 0x170   : > { %v1239_v31 = vadd.f32 %v1231_v8, %v287_v7  ;;  %v1235_v33 = vpop.f32.mrb[7].mxu1 }
 0x171   : > { %v1240_v34 = vadd.f32 %v1233_v28, %v288_v26 }
 0x172   : > { %1243 = vst [vmem:[#allocation2 + $0x10] sm:$0xff] %v1239_v31 }
 0x173   : > { %1244 = vst [vmem:[#allocation2 + $0x18] sm:$0xff] %v1240_v34 }
 0x179   : > { %v1251_v44 = vld [vmem:[#allocation2 + $0x10] sm:$0xff] }
 0x17a   : > { %v1252_v45 = vld [vmem:[#allocation2 + $0x18] sm:$0xff]  ;;  %v1277_v52 = vadd.f32 %v1266_v48, %v1251_v44 }
 0x17b   : > { %v1278_v53 = vadd.f32 %v1270_v49, %v1252_v45 }
 0x17c   : > { %v1281_v56 = vmax.f32 %v1277_v52, 0.0 }
 0x17d   : > { %v1282_v57 = vmax.f32 %v1278_v53, 0.0 }
 0x17f   : > { %v1570_v59 = vpack.c.bf16 %v1282_v57, %v1281_v56 }
 0x181   : > { %1300 = vst [vmem:[%s2034_s3 + $0x8] sm:$0xff] %v1570_v59 }
 0x182 PF: > { %s13_s14 = sadd.s32 1, %s1814_s14   ;;  %s2035_s12 = smov %s1810_s13 }
 0x183   : > { %p10_p8 = scmp.ge.s32.totalorder %s13_s14, 7   ;;  %s2036_s13 = smov %s2038_s15 }
 0x185   :  { %12 = sbr.rel (!%p10_p8) target bundleno = 2 (0x2), region = 76 }

// kernel: _lambda_.39
= control target key start
LH: loop header
LB: loop body
LE: loop exit
PB: predicated region body
PF: predicated region fallthrough
CT: control target
= control target key end

     0   :  { %s1937_s15 = smov 0   ;;  %s1939_s16 = smov 0   ;;  %s2137_s0 = inlined_call_operand.vmem [shape: bf16[8,4608], index: 0, kind: input, shape index: {}]   ;;  %s2138_s1 = inlined_call_operand.vmem [shape: bf16[4608,512], index: 1, kind: input, shape index: {}]   ;;  %s2139_s2 = inlined_call_operand.vmem [shape: f32[1,512], index: 2, kind: input, shape index: {}]   ;;  %s2140_s3 = inlined_call_operand.vmem [shape: bf16[8,512], index: 3, kind: input, shape index: {}]   ;;  %s2141_s4 = inlined_call_operand.vmem [shape: bf16[8,512], index: 4, kind: output, shape index: {}]  }
   0x1   :  { %s1941_s17 = smov 0  }
   0x2 LB: > { %s26_s18 = sadd.s32 1, %s1905_s16  ;;  %p1517_p0 = scmp.ge.s32.totalorder %s1909_s17, 1  ;;  %s1909_s17 = sphi %s1941_s17, %s14_s17   ;;  %s1905_s16 = sphi %s1939_s16, %s2143_s16   ;;  %s1901_s15 = sphi %s1937_s15, %s2142_s15  }
   0x3   : > { %p27_p1 = scmp.ge.s32.totalorder %s26_s18, 9  ;;  %p236_p2 = scmp.lt.s32.totalorder %s1909_s17, 10 }
   0x5   : > { %s2145_s18 = smov (%p27_p1, %s26_s18), 0  ;;  %p237_p3 = pnand %p1517_p0, %p236_p2 }
   0x6   : > { %s1518_s19 = sshll.u32 (!%p237_p3), %s1901_s15, 2  ;;  %s1520_s20 = sshll.u32 (!%p237_p3), %s1901_s15, 6 }
   0x7   : > { %240 = sbr.rel (%p237_p3) target bundleno = 388 (0x184), region = 36  ;;  %p296_p4 = scmp.lt.s32.totalorder (!%p237_p3), %s1518_s19, 35 }
   0x8   : > { %p305_p5 = scmp.lt.s32.totalorder (!%p237_p3), %s1520_s20, 575  ;;  %p1523_p6 = scmp.ne.s32.totalorder (!%p237_p3), %s1901_s15, 0 }
   0xe   : > { %s2147_s19 = smov (!%p296_p4, %s1518_s19), 35  ;;  %s2149_s20 = smov (!%p305_p5, %s1520_s20), 575 }
   0xf   : > { %s1519_s21 = sshll.u32 %s2147_s19, 2  ;;  %s1663_s25 = sshll.u32 %s2149_s20, 4  ;;  %v1911_v0 = vmov (!%p1523_p6), 0.0  }
  0x10   : > { %s1962_s24 = scalar_lea.vmem %s2137_s0, %s1519_s21  ;;  %s1967_s28 = scalar_lea.vmem %s2138_s1, %s1663_s25  ;;  %344 = vst [vmem:[#allocation2] sm:$0xff] (!%p1523_p6), %v1911_v0  ;;  %345 = vst [vmem:[#allocation2 + $0x8] sm:$0xff] (!%p1523_p6), %v1911_v0 }
  0x11   : > { %343 = sbr.rel (%p1523_p6) target bundleno = 24 (0x18), region = 40  ;;  %346 = vst [vmem:[#allocation2 + $0x10] sm:$0xff] (!%p1523_p6), %v1911_v0  ;;  %347 = vst [vmem:[#allocation2 + $0x18] sm:$0xff] (!%p1523_p6), %v1911_v0 }
  0x18 PF: > { %v1691_v1 = vld [vmem:[%s1967_s28 + $0x4] ss:$16 sps:$4 sm:$0xff]   ;;  %v1695_v3 = vld [vmem:[%s1967_s28] ss:$16 sps:$4 sm:$0xff]   ;;  %v353_v49 = vld [vmem:[%s1962_s24 + $0x8] sm:$0xff]  ;;  %p1656_p7 = scmp.ne.s32.totalorder %s1901_s15, 8 }
  0x19   : > { %v1693_v2 = vld [vmem:[%s1967_s28 + $0x204] ss:$16 sps:$4 sm:$0xff]   ;;  %1136 = vmatprep.subr.bf16.mxu0 %v1691_v1  ;;  %v1696_v4 = vld [vmem:[%s1967_s28 + $0x200] ss:$16 sps:$4 sm:$0xff]   ;;  %v1527_v52 = vcombine.high %v353_v49, %v353_v49 }
  0x1a   : > { %1177 = vmatprep.subr.bf16.mxu1 %v1693_v2  ;;  %v1697_v5 = vld [vmem:[%s1967_s28 + $0x24] ss:$16 sps:$4 sm:$0xff]   ;;  %1137 = vmatpush1.bf16.msra.mxu0 %v1695_v3  ;;  %v1701_v7 = vld [vmem:[%s1967_s28 + $0x20] ss:$16 sps:$4 sm:$0xff]  }
  0x1b   : > { %1178 = vmatpush1.bf16.msra.mxu1 %v1696_v4  ;;  %v1699_v6 = vld [vmem:[%s1967_s28 + $0x224] ss:$16 sps:$4 sm:$0xff]   ;;  %1138 = vmatprep.subr.bf16.mxu0 %v1697_v5  ;;  %v1702_v8 = vld [vmem:[%s1967_s28 + $0x220] ss:$16 sps:$4 sm:$0xff]   ;;  %v1793_v5 = vld [vmem:[%s1967_s28 + $0xc] ss:$16 sps:$4 sm:$0xff]  }
  0x1c   : > { %1179 = vmatprep.subr.bf16.mxu1 %v1699_v6  ;;  %v1703_v9 = vld [vmem:[%s1967_s28 + $0x44] ss:$16 sps:$4 sm:$0xff]   ;;  %v1707_v11 = vld [vmem:[%s1967_s28 + $0x40] ss:$16 sps:$4 sm:$0xff]   ;;  %1209 = vmatprep.mubr.bf16.mxu1 %v1527_v52  ;;  %v1796_v6 = vld [vmem:[%s1967_s28 + $0x20c] ss:$16 sps:$4 sm:$0xff]  }
  0x1d   : > { %v1705_v10 = vld [vmem:[%s1967_s28 + $0x244] ss:$16 sps:$4 sm:$0xff]   ;;  %v1708_v12 = vld [vmem:[%s1967_s28 + $0x240] ss:$16 sps:$4 sm:$0xff]  }
  0x1e   : > { %1139 = vmatpush1.bf16.msra.mxu0 %v1701_v7  ;;  %v1709_v13 = vld [vmem:[%s1967_s28 + $0x64] ss:$16 sps:$4 sm:$0xff]   ;;  %v1713_v15 = vld [vmem:[%s1967_s28 + $0x60] ss:$16 sps:$4 sm:$0xff]  }
  0x1f   : > { %1180 = vmatpush1.bf16.msra.mxu1 %v1702_v8  ;;  %1140 = vmatprep.subr.bf16.mxu0 %v1703_v9  ;;  %v1711_v14 = vld [vmem:[%s1967_s28 + $0x264] ss:$16 sps:$4 sm:$0xff]   ;;  %v1714_v16 = vld [vmem:[%s1967_s28 + $0x260] ss:$16 sps:$4 sm:$0xff]   ;;  %v2043_v8 = vcombine.low %v353_v49, %v353_v49  ;;  %v1791_v9 = vld [vmem:[%s1967_s28 + $0x8] ss:$16 sps:$4 sm:$0xff]  }
  0x20   : > { %1181 = vmatprep.subr.bf16.mxu1 %v1705_v10  ;;  %v1715_v17 = vld [vmem:[%s1967_s28 + $0x84] ss:$16 sps:$4 sm:$0xff]   ;;  %v1719_v19 = vld [vmem:[%s1967_s28 + $0x80] ss:$16 sps:$4 sm:$0xff]   ;;  %v1794_v10 = vld [vmem:[%s1967_s28 + $0x208] ss:$16 sps:$4 sm:$0xff]  }
  0x21   : > { %v1717_v18 = vld [vmem:[%s1967_s28 + $0x284] ss:$16 sps:$4 sm:$0xff]   ;;  %v1720_v20 = vld [vmem:[%s1967_s28 + $0x280] ss:$16 sps:$4 sm:$0xff]   ;;  %v1851_v49 = vld [vmem:[%s1967_s28 + $0x148] ss:$16 sps:$4 sm:$0xff]  }
  0x22   : > { %1141 = vmatpush1.bf16.msra.mxu0 %v1707_v11  ;;  %v1721_v21 = vld [vmem:[%s1967_s28 + $0xa4] ss:$16 sps:$4 sm:$0xff]   ;;  %v1725_v23 = vld [vmem:[%s1967_s28 + $0xa0] ss:$16 sps:$4 sm:$0xff]   ;;  %v1799_v11 = vld [vmem:[%s1967_s28 + $0x2c] ss:$16 sps:$4 sm:$0xff]  }
  0x23   : > { %1182 = vmatpush1.bf16.msra.mxu1 %v1708_v12  ;;  %1142 = vmatprep.subr.bf16.mxu0 %v1709_v13  ;;  %v1723_v22 = vld [vmem:[%s1967_s28 + $0x2a4] ss:$16 sps:$4 sm:$0xff]   ;;  %v1726_v24 = vld [vmem:[%s1967_s28 + $0x2a0] ss:$16 sps:$4 sm:$0xff]   ;;  %v1802_v12 = vld [vmem:[%s1967_s28 + $0x22c] ss:$16 sps:$4 sm:$0xff]  }
  0x24   : > { %1183 = vmatprep.subr.bf16.mxu1 %v1711_v14  ;;  %v1727_v25 = vld [vmem:[%s1967_s28 + $0xc4] ss:$16 sps:$4 sm:$0xff]   ;;  %v1731_v27 = vld [vmem:[%s1967_s28 + $0xc0] ss:$16 sps:$4 sm:$0xff]   ;;  %v1797_v13 = vld [vmem:[%s1967_s28 + $0x28] ss:$16 sps:$4 sm:$0xff]  }
  0x25   : > { %v1729_v26 = vld [vmem:[%s1967_s28 + $0x2c4] ss:$16 sps:$4 sm:$0xff]   ;;  %v1732_v28 = vld [vmem:[%s1967_s28 + $0x2c0] ss:$16 sps:$4 sm:$0xff]   ;;  %v1800_v14 = vld [vmem:[%s1967_s28 + $0x228] ss:$16 sps:$4 sm:$0xff]  }
  0x26   : > { %1143 = vmatpush1.bf16.msra.mxu0 %v1713_v15  ;;  %v1733_v29 = vld [vmem:[%s1967_s28 + $0xe4] ss:$16 sps:$4 sm:$0xff]   ;;  %v1737_v31 = vld [vmem:[%s1967_s28 + $0xe0] ss:$16 sps:$4 sm:$0xff]   ;;  %v1805_v15 = vld [vmem:[%s1967_s28 + $0x4c] ss:$16 sps:$4 sm:$0xff]  }
  0x27   : > { %1184 = vmatpush1.bf16.msra.mxu1 %v1714_v16  ;;  %1144 = vmatprep.subr.bf16.mxu0 %v1715_v17  ;;  %v1735_v30 = vld [vmem:[%s1967_s28 + $0x2e4] ss:$16 sps:$4 sm:$0xff]   ;;  %v1738_v32 = vld [vmem:[%s1967_s28 + $0x2e0] ss:$16 sps:$4 sm:$0xff]   ;;  %v1808_v16 = vld [vmem:[%s1967_s28 + $0x24c] ss:$16 sps:$4 sm:$0xff]  }
  0x28   : > { %1185 = vmatprep.subr.bf16.mxu1 %v1717_v18  ;;  %v1739_v33 = vld [vmem:[%s1967_s28 + $0x104] ss:$16 sps:$4 sm:$0xff]   ;;  %v1743_v35 = vld [vmem:[%s1967_s28 + $0x100] ss:$16 sps:$4 sm:$0xff]   ;;  %v1803_v17 = vld [vmem:[%s1967_s28 + $0x48] ss:$16 sps:$4 sm:$0xff]  }
  0x29   : > { %v1741_v34 = vld [vmem:[%s1967_s28 + $0x304] ss:$16 sps:$4 sm:$0xff]   ;;  %v1744_v36 = vld [vmem:[%s1967_s28 + $0x300] ss:$16 sps:$4 sm:$0xff]   ;;  %v1806_v18 = vld [vmem:[%s1967_s28 + $0x248] ss:$16 sps:$4 sm:$0xff]  }
  0x2a   : > { %1145 = vmatpush1.bf16.msra.mxu0 %v1719_v19  ;;  %v1745_v37 = vld [vmem:[%s1967_s28 + $0x124] ss:$16 sps:$4 sm:$0xff]   ;;  %v1749_v39 = vld [vmem:[%s1967_s28 + $0x120] ss:$16 sps:$4 sm:$0xff]   ;;  %v1811_v19 = vld [vmem:[%s1967_s28 + $0x6c] ss:$16 sps:$4 sm:$0xff]  }
  0x2b   : > { %1186 = vmatpush1.bf16.msra.mxu1 %v1720_v20  ;;  %1146 = vmatprep.subr.bf16.mxu0 %v1721_v21  ;;  %v1747_v38 = vld [vmem:[%s1967_s28 + $0x324] ss:$16 sps:$4 sm:$0xff]   ;;  %v1750_v40 = vld [vmem:[%s1967_s28 + $0x320] ss:$16 sps:$4 sm:$0xff]   ;;  %v1814_v20 = vld [vmem:[%s1967_s28 + $0x26c] ss:$16 sps:$4 sm:$0xff]  }
  0x2c   : > { %1187 = vmatprep.subr.bf16.mxu1 %v1723_v22  ;;  %v1751_v41 = vld [vmem:[%s1967_s28 + $0x144] ss:$16 sps:$4 sm:$0xff]   ;;  %v1755_v43 = vld [vmem:[%s1967_s28 + $0x140] ss:$16 sps:$4 sm:$0xff]   ;;  %v1809_v21 = vld [vmem:[%s1967_s28 + $0x68] ss:$16 sps:$4 sm:$0xff]  }
  0x2d   : > { %v1753_v42 = vld [vmem:[%s1967_s28 + $0x344] ss:$16 sps:$4 sm:$0xff]   ;;  %v1756_v44 = vld [vmem:[%s1967_s28 + $0x340] ss:$16 sps:$4 sm:$0xff]   ;;  %v1812_v22 = vld [vmem:[%s1967_s28 + $0x268] ss:$16 sps:$4 sm:$0xff]  }
  0x2e   : > { %1147 = vmatpush1.bf16.msra.mxu0 %v1725_v23  ;;  %v1757_v45 = vld [vmem:[%s1967_s28 + $0x164] ss:$16 sps:$4 sm:$0xff]   ;;  %v1761_v50 = vld [vmem:[%s1967_s28 + $0x160] ss:$16 sps:$4 sm:$0xff]   ;;  %v1817_v23 = vld [vmem:[%s1967_s28 + $0x8c] ss:$16 sps:$4 sm:$0xff]  }
  0x2f   : > { %1188 = vmatpush1.bf16.msra.mxu1 %v1726_v24  ;;  %1148 = vmatprep.subr.bf16.mxu0 %v1727_v25  ;;  %v1759_v46 = vld [vmem:[%s1967_s28 + $0x364] ss:$16 sps:$4 sm:$0xff]   ;;  %v1762_v51 = vld [vmem:[%s1967_s28 + $0x360] ss:$16 sps:$4 sm:$0xff]   ;;  %v1820_v24 = vld [vmem:[%s1967_s28 + $0x28c] ss:$16 sps:$4 sm:$0xff]  }
  0x30   : > { %1189 = vmatprep.subr.bf16.mxu1 %v1729_v26  ;;  %v352_v47 = vld [vmem:[%s1962_s24] sm:$0xff]  ;;  %v1815_v25 = vld [vmem:[%s1967_s28 + $0x88] ss:$16 sps:$4 sm:$0xff]  }
  0x31   : > { %v2017_v48 = vcombine.high %v352_v47, %v352_v47  ;;  %v1763_v53 = vld [vmem:[%s1967_s28 + $0x184] ss:$16 sps:$4 sm:$0xff]   ;;  %v1767_v55 = vld [vmem:[%s1967_s28 + $0x180] ss:$16 sps:$4 sm:$0xff]   ;;  %v2041_v7 = vcombine.low %v352_v47, %v352_v47  ;;  %v1818_v26 = vld [vmem:[%s1967_s28 + $0x288] ss:$16 sps:$4 sm:$0xff]  }
  0x32   : > { %1149 = vmatpush1.bf16.msra.mxu0 %v1731_v27  ;;  %v1765_v54 = vld [vmem:[%s1967_s28 + $0x384] ss:$16 sps:$4 sm:$0xff]   ;;  %v1768_v56 = vld [vmem:[%s1967_s28 + $0x380] ss:$16 sps:$4 sm:$0xff]   ;;  %v1823_v27 = vld [vmem:[%s1967_s28 + $0xac] ss:$16 sps:$4 sm:$0xff]  }
  0x33   : > { %1190 = vmatpush1.bf16.msra.mxu1 %v1732_v28  ;;  %1150 = vmatprep.subr.bf16.mxu0 %v1733_v29  ;;  %v1769_v57 = vld [vmem:[%s1967_s28 + $0x1a4] ss:$16 sps:$4 sm:$0xff]   ;;  %v1773_v59 = vld [vmem:[%s1967_s28 + $0x1a0] ss:$16 sps:$4 sm:$0xff]   ;;  %v1826_v28 = vld [vmem:[%s1967_s28 + $0x2ac] ss:$16 sps:$4 sm:$0xff]  }
  0x34   : > { %1191 = vmatprep.subr.bf16.mxu1 %v1735_v30  ;;  %1168 = vmatprep.mubr.bf16.mxu0 %v2017_v48  ;;  %v1771_v58 = vld [vmem:[%s1967_s28 + $0x3a4] ss:$16 sps:$4 sm:$0xff]   ;;  %v1774_v60 = vld [vmem:[%s1967_s28 + $0x3a0] ss:$16 sps:$4 sm:$0xff]   ;;  %v1821_v29 = vld [vmem:[%s1967_s28 + $0xa8] ss:$16 sps:$4 sm:$0xff]  }
  0x35   : > { %v1775_v61 = vld [vmem:[%s1967_s28 + $0x1c4] ss:$16 sps:$4 sm:$0xff]   ;;  %v1779_v63 = vld [vmem:[%s1967_s28 + $0x1c0] ss:$16 sps:$4 sm:$0xff]   ;;  %v1824_v30 = vld [vmem:[%s1967_s28 + $0x2a8] ss:$16 sps:$4 sm:$0xff]  }
  0x36   : > { %1151 = vmatpush1.bf16.msra.mxu0 %v1737_v31  ;;  %v1777_v62 = vld [vmem:[%s1967_s28 + $0x3c4] ss:$16 sps:$4 sm:$0xff]   ;;  %v1780_v0 = vld [vmem:[%s1967_s28 + $0x3c0] ss:$16 sps:$4 sm:$0xff]   ;;  %v1829_v31 = vld [vmem:[%s1967_s28 + $0xcc] ss:$16 sps:$4 sm:$0xff]  }
  0x37   : > { %1192 = vmatpush1.bf16.msra.mxu1 %v1738_v32  ;;  %1152 = vmatprep.subr.bf16.mxu0 %v1739_v33  ;;  %v1781_v1 = vld [vmem:[%s1967_s28 + $0x1e4] ss:$16 sps:$4 sm:$0xff]   ;;  %v1785_v3 = vld [vmem:[%s1967_s28 + $0x1e0] ss:$16 sps:$4 sm:$0xff]   ;;  %v1832_v32 = vld [vmem:[%s1967_s28 + $0x2cc] ss:$16 sps:$4 sm:$0xff]  }
  0x38   : > { %1193 = vmatprep.subr.bf16.mxu1 %v1741_v34  ;;  %v1783_v2 = vld [vmem:[%s1967_s28 + $0x3e4] ss:$16 sps:$4 sm:$0xff]   ;;  %v1786_v4 = vld [vmem:[%s1967_s28 + $0x3e0] ss:$16 sps:$4 sm:$0xff]   ;;  %v1827_v33 = vld [vmem:[%s1967_s28 + $0xc8] ss:$16 sps:$4 sm:$0xff]  }
  0x39   : > { %v1830_v34 = vld [vmem:[%s1967_s28 + $0x2c8] ss:$16 sps:$4 sm:$0xff]   ;;  %v1853_v47 = vld [vmem:[%s1967_s28 + $0x14c] ss:$16 sps:$4 sm:$0xff]  }
  0x3a   : > { %1153 = vmatpush1.bf16.msra.mxu0 %v1743_v35  ;;  %v1835_v35 = vld [vmem:[%s1967_s28 + $0xec] ss:$16 sps:$4 sm:$0xff]  }
  0x3b   : > { %1194 = vmatpush1.bf16.msra.mxu1 %v1744_v36  ;;  %1154 = vmatprep.subr.bf16.mxu0 %v1745_v37  ;;  %v1838_v36 = vld [vmem:[%s1967_s28 + $0x2ec] ss:$16 sps:$4 sm:$0xff]   ;;  %v1833_v37 = vld [vmem:[%s1967_s28 + $0xe8] ss:$16 sps:$4 sm:$0xff]  }
  0x3c   : > { %1195 = vmatprep.subr.bf16.mxu1 %v1747_v38  ;;  %v1836_v38 = vld [vmem:[%s1967_s28 + $0x2e8] ss:$16 sps:$4 sm:$0xff]  }
  0x3e   : > { %1155 = vmatpush1.bf16.msra.mxu0 %v1749_v39  ;;  %v1841_v39 = vld [vmem:[%s1967_s28 + $0x10c] ss:$16 sps:$4 sm:$0xff]  }
  0x3f   : > { %1196 = vmatpush1.bf16.msra.mxu1 %v1750_v40  ;;  %1156 = vmatprep.subr.bf16.mxu0 %v1751_v41  ;;  %v1844_v40 = vld [vmem:[%s1967_s28 + $0x30c] ss:$16 sps:$4 sm:$0xff]   ;;  %v1839_v41 = vld [vmem:[%s1967_s28 + $0x108] ss:$16 sps:$4 sm:$0xff]  }
  0x40   : > { %1197 = vmatprep.subr.bf16.mxu1 %v1753_v42  ;;  %v1842_v42 = vld [vmem:[%s1967_s28 + $0x308] ss:$16 sps:$4 sm:$0xff]  }
  0x42   : > { %1157 = vmatpush1.bf16.msra.mxu0 %v1755_v43  ;;  %v1847_v43 = vld [vmem:[%s1967_s28 + $0x12c] ss:$16 sps:$4 sm:$0xff]  }
  0x43   : > { %1198 = vmatpush1.bf16.msra.mxu1 %v1756_v44  ;;  %1158 = vmatprep.subr.bf16.mxu0 %v1757_v45  ;;  %v1850_v44 = vld [vmem:[%s1967_s28 + $0x32c] ss:$16 sps:$4 sm:$0xff]   ;;  %v1845_v45 = vld [vmem:[%s1967_s28 + $0x128] ss:$16 sps:$4 sm:$0xff]  }
  0x44   : > { %1199 = vmatprep.subr.bf16.mxu1 %v1759_v46  ;;  %v1848_v46 = vld [vmem:[%s1967_s28 + $0x328] ss:$16 sps:$4 sm:$0xff]  }
  0x46   : > { %1159 = vmatpush1.bf16.msra.mxu0 %v1761_v50  ;;  %v1854_v50 = vld [vmem:[%s1967_s28 + $0x348] ss:$16 sps:$4 sm:$0xff]  }
  0x47   : > { %1200 = vmatpush1.bf16.msra.mxu1 %v1762_v51  ;;  %1160 = vmatprep.subr.bf16.mxu0 %v1763_v53  ;;  %v1859_v51 = vld [vmem:[%s1967_s28 + $0x16c] ss:$16 sps:$4 sm:$0xff]   ;;  %v1857_v53 = vld [vmem:[%s1967_s28 + $0x168] ss:$16 sps:$4 sm:$0xff]  }
  0x48   : > { %1201 = vmatprep.subr.bf16.mxu1 %v1765_v54  ;;  %v1860_v54 = vld [vmem:[%s1967_s28 + $0x368] ss:$16 sps:$4 sm:$0xff]  }
  0x4a   : > { %1161 = vmatpush1.bf16.msra.mxu0 %v1767_v55  ;;  %v1865_v55 = vld [vmem:[%s1967_s28 + $0x18c] ss:$16 sps:$4 sm:$0xff]  }
  0x4b   : > { %1202 = vmatpush1.bf16.msra.mxu1 %v1768_v56  ;;  %1162 = vmatprep.subr.bf16.mxu0 %v1769_v57  ;;  %v1868_v56 = vld [vmem:[%s1967_s28 + $0x38c] ss:$16 sps:$4 sm:$0xff]   ;;  %v1863_v57 = vld [vmem:[%s1967_s28 + $0x188] ss:$16 sps:$4 sm:$0xff]  }
  0x4c   : > { %1203 = vmatprep.subr.bf16.mxu1 %v1771_v58  ;;  %v1866_v58 = vld [vmem:[%s1967_s28 + $0x388] ss:$16 sps:$4 sm:$0xff]  }
  0x4e   : > { %1163 = vmatpush1.bf16.msra.mxu0 %v1773_v59  ;;  %v1871_v59 = vld [vmem:[%s1967_s28 + $0x1ac] ss:$16 sps:$4 sm:$0xff]  }
  0x4f   : > { %1204 = vmatpush1.bf16.msra.mxu1 %v1774_v60  ;;  %1164 = vmatprep.subr.bf16.mxu0 %v1775_v61  ;;  %v1874_v60 = vld [vmem:[%s1967_s28 + $0x3ac] ss:$16 sps:$4 sm:$0xff]   ;;  %v1869_v61 = vld [vmem:[%s1967_s28 + $0x1a8] ss:$16 sps:$4 sm:$0xff]  }
  0x50   : > { %1205 = vmatprep.subr.bf16.mxu1 %v1777_v62  ;;  %v1872_v62 = vld [vmem:[%s1967_s28 + $0x3a8] ss:$16 sps:$4 sm:$0xff]  }
  0x52   : > { %1165 = vmatpush1.bf16.msra.mxu0 %v1779_v63  ;;  %v1877_v63 = vld [vmem:[%s1967_s28 + $0x1cc] ss:$16 sps:$4 sm:$0xff]  }
  0x53   : > { %1206 = vmatpush1.bf16.msra.mxu1 %v1780_v0  ;;  %1166 = vmatprep.subr.bf16.mxu0 %v1781_v1  ;;  %v1880_v0 = vld [vmem:[%s1967_s28 + $0x3cc] ss:$16 sps:$4 sm:$0xff]   ;;  %v1875_v1 = vld [vmem:[%s1967_s28 + $0x1c8] ss:$16 sps:$4 sm:$0xff]  }
  0x54   : > { %1207 = vmatprep.subr.bf16.mxu1 %v1783_v2  ;;  %v1878_v2 = vld [vmem:[%s1967_s28 + $0x3c8] ss:$16 sps:$4 sm:$0xff]  }
  0x56   : > { %1167 = vmatpush1.bf16.msra.mxu0 %v1785_v3  ;;  %v1883_v3 = vld [vmem:[%s1967_s28 + $0x1ec] ss:$16 sps:$4 sm:$0xff]  }
  0x57   : > { %1208 = vmatpush1.bf16.msra.mxu1 %v1786_v4  ;;  %1218 = vmatprep.subr.bf16.mxu0 %v1793_v5  ;;  %v1886_v4 = vld [vmem:[%s1967_s28 + $0x3ec] ss:$16 sps:$4 sm:$0xff]   ;;  %v1881_v5 = vld [vmem:[%s1967_s28 + $0x1e8] ss:$16 sps:$4 sm:$0xff]  }
  0x58   : > { %1259 = vmatprep.subr.bf16.mxu1 %v1796_v6  ;;  %v1884_v6 = vld [vmem:[%s1967_s28 + $0x3e8] ss:$16 sps:$4 sm:$0xff]  }
  0x59   : > { %1169 = vmatmul.mubr.bf16.vlgmr.msra.gmra.mrb[0].mxu0 %v2041_v7 }
  0x5a   : > { %1210 = vmatmul.mubr.bf16.vlgmr.msra.gmra.mrb[0].mxu1 %v2043_v8  ;;  %1219 = vmatpush1.bf16.msra.mxu0 %v1791_v9 }
  0x5b   : > { %1260 = vmatpush1.bf16.msra.mxu1 %v1794_v10  ;;  %1220 = vmatprep.subr.bf16.mxu0 %v1799_v11  ;;  %v348_v10 = vld [vmem:[#allocation2] sm:$0xff] }
  0x5c   : > { %1261 = vmatprep.subr.bf16.mxu1 %v1802_v12  ;;  %1250 = vmatprep.mubr.bf16.mxu0 %v2017_v48  ;;  %v1856_v48 = vld [vmem:[%s1967_s28 + $0x34c] ss:$16 sps:$4 sm:$0xff]  }
  0x5d   : > { %1291 = vmatprep.mubr.bf16.mxu1 %v1527_v52  ;;  %v1862_v52 = vld [vmem:[%s1967_s28 + $0x36c] ss:$16 sps:$4 sm:$0xff]  }
  0x5e   : > { %1221 = vmatpush1.bf16.msra.mxu0 %v1797_v13 }
  0x5f   : > { %1262 = vmatpush1.bf16.msra.mxu1 %v1800_v14  ;;  %1222 = vmatprep.subr.bf16.mxu0 %v1805_v15  ;;  %v349_v14 = vld [vmem:[#allocation2 + $0x8] sm:$0xff] }
  0x60   : > { %1263 = vmatprep.subr.bf16.mxu1 %v1808_v16 }
  0x62   : > { %1223 = vmatpush1.bf16.msra.mxu0 %v1803_v17 }
  0x63   : > { %1264 = vmatpush1.bf16.msra.mxu1 %v1806_v18  ;;  %1224 = vmatprep.subr.bf16.mxu0 %v1811_v19 }
  0x64   : > { %1265 = vmatprep.subr.bf16.mxu1 %v1814_v20 }
  0x66   : > { %1225 = vmatpush1.bf16.msra.mxu0 %v1809_v21 }
  0x67   : > { %1266 = vmatpush1.bf16.msra.mxu1 %v1812_v22  ;;  %1226 = vmatprep.subr.bf16.mxu0 %v1817_v23 }
  0x68   : > { %1267 = vmatprep.subr.bf16.mxu1 %v1820_v24 }
  0x6a   : > { %1227 = vmatpush1.bf16.msra.mxu0 %v1815_v25 }
  0x6b   : > { %1268 = vmatpush1.bf16.msra.mxu1 %v1818_v26  ;;  %1228 = vmatprep.subr.bf16.mxu0 %v1823_v27  ;;  %v351_v26 = vld [vmem:[#allocation2 + $0x18] sm:$0xff] }
  0x6c   : > { %1269 = vmatprep.subr.bf16.mxu1 %v1826_v28 }
  0x6e   : > { %1229 = vmatpush1.bf16.msra.mxu0 %v1821_v29 }
  0x6f   : > { %1270 = vmatpush1.bf16.msra.mxu1 %v1824_v30  ;;  %1230 = vmatprep.subr.bf16.mxu0 %v1829_v31 }
  0x70   : > { %1271 = vmatprep.subr.bf16.mxu1 %v1832_v32 }
  0x72   : > { %1231 = vmatpush1.bf16.msra.mxu0 %v1827_v33 }
  0x73   : > { %1272 = vmatpush1.bf16.msra.mxu1 %v1830_v34  ;;  %1232 = vmatprep.subr.bf16.mxu0 %v1835_v35  ;;  %v1318_v35 = vlaneseq (!%p1656_p7) }
  0x74   : > { %1273 = vmatprep.subr.bf16.mxu1 %v1838_v36 }
  0x75   : > { %v1319_v36 = vshrl.u32 (!%p1656_p7), %v1318_v35, 7 }
  0x76   : > { %1233 = vmatpush1.bf16.msra.mxu0 %v1833_v37  ;;  %v1342_v37 = vld [vmem:[%s2140_s3] sm:$0xff] (!%p1656_p7) }
  0x77   : > { %1274 = vmatpush1.bf16.msra.mxu1 %v1836_v38  ;;  %1234 = vmatprep.subr.bf16.mxu0 %v1841_v39  ;;  %v1343_v38 = vld [vmem:[%s2140_s3 + $0x8] sm:$0xff] (!%p1656_p7)  ;;  %v1316_v39 = vld [vmem:[%s2139_s2] sm:$0xf] (!%p1656_p7) }
  0x78   : > { %1275 = vmatprep.subr.bf16.mxu1 %v1844_v40 }
  0x7a   : > { %1235 = vmatpush1.bf16.msra.mxu0 %v1839_v41  ;;  %v1320_v41 = vsub.s32 (!%p1656_p7), 0, %v1319_v36 }
  0x7b   : > { %1276 = vmatpush1.bf16.msra.mxu1 %v1842_v42  ;;  %1236 = vmatprep.subr.bf16.mxu0 %v1847_v43  ;;  %v1324_v42 = vsub.s32 (!%p1656_p7), 1, %v1319_v36  ;;  %v1328_v43 = vsub.s32 (!%p1656_p7), 2, %v1319_v36 }
  0x7c   : > { %1277 = vmatprep.subr.bf16.mxu1 %v1850_v44  ;;  %v1332_v44 = vsub.s32 (!%p1656_p7), 3, %v1319_v36 }
  0x7e   : > { %1237 = vmatpush1.bf16.msra.mxu0 %v1845_v45 }
  0x7f   : > { %1278 = vmatpush1.bf16.msra.mxu1 %v1848_v46  ;;  %1238 = vmatprep.subr.bf16.mxu0 %v1853_v47  ;;  %v1344_v46 = vunpack.c.l.bf16 (!%p1656_p7), %v1342_v37  ;;  %v1345_v47 = vunpack.c.h.bf16 (!%p1656_p7), %v1342_v37 }
  0x80   : > { %1279 = vmatprep.subr.bf16.mxu1 %v1856_v48 }
  0x82   : > { %1239 = vmatpush1.bf16.msra.mxu0 %v1851_v49 }
  0x83   : > { %1280 = vmatpush1.bf16.msra.mxu1 %v1854_v50  ;;  %1240 = vmatprep.subr.bf16.mxu0 %v1859_v51  ;;  %v1346_v50 = vunpack.c.l.bf16 (!%p1656_p7), %v1343_v38  ;;  %v1347_v51 = vunpack.c.h.bf16 (!%p1656_p7), %v1343_v38 }
  0x84   : > { %1281 = vmatprep.subr.bf16.mxu1 %v1862_v52  ;;  %v1321_v52 = vrot.slane (!%p1656_p7), %v1316_v39, %v1320_v41 }
  0x86   : > { %1241 = vmatpush1.bf16.msra.mxu0 %v1857_v53  ;;  %v1325_v53 = vrot.slane (!%p1656_p7), %v1316_v39, %v1324_v42 }
  0x87   : > { %1282 = vmatpush1.bf16.msra.mxu1 %v1860_v54  ;;  %1242 = vmatprep.subr.bf16.mxu0 %v1865_v55  ;;  %v1329_v54 = vrot.slane (!%p1656_p7), %v1316_v39, %v1328_v43  ;;  %v1333_v55 = vrot.slane (!%p1656_p7), %v1316_v39, %v1332_v44 }
  0x88   : > { %1283 = vmatprep.subr.bf16.mxu1 %v1868_v56 }
  0x8a   : > { %1243 = vmatpush1.bf16.msra.mxu0 %v1863_v57 }
  0x8b   : > { %1284 = vmatpush1.bf16.msra.mxu1 %v1866_v58  ;;  %1244 = vmatprep.subr.bf16.mxu0 %v1871_v59 }
  0x8c   : > { %1285 = vmatprep.subr.bf16.mxu1 %v1874_v60 }
  0x8e   : > { %1245 = vmatpush1.bf16.msra.mxu0 %v1869_v61 }
  0x8f   : > { %1286 = vmatpush1.bf16.msra.mxu1 %v1872_v62  ;;  %1246 = vmatprep.subr.bf16.mxu0 %v1877_v63 }
  0x90   : > { %1287 = vmatprep.subr.bf16.mxu1 %v1880_v0 }
  0x92   : > { %1247 = vmatpush1.bf16.msra.mxu0 %v1875_v1 }
  0x93   : > { %1288 = vmatpush1.bf16.msra.mxu1 %v1878_v2  ;;  %1248 = vmatprep.subr.bf16.mxu0 %v1883_v3 }
  0x94   : > { %1289 = vmatprep.subr.bf16.mxu1 %v1886_v4 }
  0x96   : > { %1249 = vmatpush1.bf16.msra.mxu0 %v1881_v5 }
  0x97   : > { %1290 = vmatpush1.bf16.msra.mxu1 %v1884_v6 }
  0x99   : > { %1251 = vmatmul.mubr.bf16.vlgmr.msra.gmra.mrb[4].mxu0 %v2041_v7  ;;  %v350_v7 = vld [vmem:[#allocation2 + $0x10] sm:$0xff] }
  0x9a   : > { %1292 = vmatmul.mubr.bf16.vlgmr.msra.gmra.mrb[4].mxu1 %v2043_v8 }
 0x12c   : > { %v1170_v9 = vpop.f32.mrb[0].mxu0 }
 0x12d   : > { %v1211_v11 = vpop.f32.mrb[0].mxu1  ;;  %v1172_v13 = vpop.f32.mrb[1].mxu0 }
 0x12e   : > { %v1212_v12 = vadd.f32 %v1211_v11, %v1170_v9  ;;  %v1213_v15 = vpop.f32.mrb[1].mxu1  ;;  %v1174_v17 = vpop.f32.mrb[2].mxu0 }
 0x12f   : > { %v1214_v16 = vadd.f32 %v1213_v15, %v1172_v13  ;;  %v1215_v18 = vpop.f32.mrb[2].mxu1  ;;  %v1175_v20 = vpop.f32.mrb[3].mxu0 }
 0x130   : > { %v1300_v19 = vadd.f32 %v1212_v12, %v348_v10  ;;  %v1216_v21 = vpop.f32.mrb[3].mxu1 }
 0x131   : > { %v1301_v22 = vadd.f32 %v1214_v16, %v349_v14 }
 0x132   : > { %1304 = vst [vmem:[#allocation2] sm:$0xff] %v1300_v19 }
 0x133   : > { %1305 = vst [vmem:[#allocation2 + $0x8] sm:$0xff] %v1301_v22 }
 0x139   : > { %v1312_v40 = vld [vmem:[#allocation2] sm:$0xff] (!%p1656_p7) }
 0x13a   : > { %v1313_v45 = vld [vmem:[#allocation2 + $0x8] sm:$0xff] (!%p1656_p7)  ;;  %v1338_v56 = vadd.f32 (!%p1656_p7), %v1321_v52, %v1312_v40 }
 0x13b   : > { %v1339_v57 = vadd.f32 (!%p1656_p7), %v1325_v53, %v1313_v45 }
 0x13c   : > { %v1348_v60 = vadd.f32 (!%p1656_p7), %v1344_v46, %v1338_v56 }
 0x13d   : > { %v1349_v61 = vadd.f32 (!%p1656_p7), %v1345_v47, %v1339_v57 }
 0x13e   : > { %v1352_v0 = vmax.f32 (!%p1656_p7), %v1348_v60, 0.0 }
 0x13f   : > { %v1353_v1 = vmax.f32 (!%p1656_p7), %v1349_v61, 0.0 }
 0x141   : > { %v1664_v4 = vpack.c.bf16 (!%p1656_p7), %v1353_v1, %v1352_v0 }
 0x143   : > { %1372 = vst [vmem:[%s2141_s4] sm:$0xff] (!%p1656_p7), %v1664_v4 }
 0x16c   : > { %v1252_v23 = vpop.f32.mrb[4].mxu0 }
 0x16d   : > { %v1293_v24 = vpop.f32.mrb[4].mxu1  ;;  %v1254_v25 = vpop.f32.mrb[5].mxu0  ;;  %1311 = sbr.rel (%p1656_p7) target bundleno = 388 (0x184), region = 44 }
 0x16e   : > { %v1294_v8 = vadd.f32 %v1293_v24, %v1252_v23  ;;  %v1295_v27 = vpop.f32.mrb[5].mxu1  ;;  %v1256_v29 = vpop.f32.mrb[6].mxu0 }
 0x16f   : > { %v1296_v28 = vadd.f32 %v1295_v27, %v1254_v25  ;;  %v1297_v30 = vpop.f32.mrb[6].mxu1  ;;  %v1257_v32 = vpop.f32.mrb[7].mxu0 }
 0x170   : > { %v1302_v31 = vadd.f32 %v1294_v8, %v350_v7  ;;  %v1298_v33 = vpop.f32.mrb[7].mxu1 }
 0x171   : > { %v1303_v34 = vadd.f32 %v1296_v28, %v351_v26 }
 0x172   : > { %1306 = vst [vmem:[#allocation2 + $0x10] sm:$0xff] %v1302_v31 }
 0x173   : > { %1307 = vst [vmem:[#allocation2 + $0x18] sm:$0xff] %v1303_v34 }
 0x179   : > { %v1314_v48 = vld [vmem:[#allocation2 + $0x10] sm:$0xff] }
 0x17a   : > { %v1315_v49 = vld [vmem:[#allocation2 + $0x18] sm:$0xff]  ;;  %v1340_v58 = vadd.f32 %v1329_v54, %v1314_v48 }
 0x17b   : > { %v1341_v59 = vadd.f32 %v1333_v55, %v1315_v49 }
 0x17c   : > { %v1350_v62 = vadd.f32 %v1346_v50, %v1340_v58 }
 0x17d   : > { %v1351_v63 = vadd.f32 %v1347_v51, %v1341_v59 }
 0x17e   : > { %v1354_v2 = vmax.f32 %v1350_v62, 0.0 }
 0x17f   : > { %v1355_v3 = vmax.f32 %v1351_v63, 0.0 }
 0x181   : > { %v1665_v5 = vpack.c.bf16 %v1355_v3, %v1354_v2 }
 0x183   : > { %1373 = vst [vmem:[%s2141_s4 + $0x8] sm:$0xff] %v1665_v5 }
 0x184 PF: > { %s14_s17 = sadd.s32 1, %s1909_s17   ;;  %s2142_s15 = smov %s1905_s16 }
 0x185   : > { %p11_p8 = scmp.ge.s32.totalorder %s14_s17, 11   ;;  %s2143_s16 = smov %s2145_s18 }
 0x187   :  { %13 = sbr.rel (!%p11_p8) target bundleno = 2 (0x2), region = 83 }

// kernel: _lambda_.40
= control target key start
LH: loop header
LB: loop body
LE: loop exit
PB: predicated region body
PF: predicated region fallthrough
CT: control target
= control target key end

     0   :  { %s1837_s12 = smov 0   ;;  %s1839_s13 = smov 0   ;;  %s2031_s0 = inlined_call_operand.vmem [shape: bf16[8,4608], index: 0, kind: input, shape index: {}]   ;;  %s2032_s1 = inlined_call_operand.vmem [shape: bf16[4608,512], index: 1, kind: input, shape index: {}]   ;;  %s2033_s2 = inlined_call_operand.vmem [shape: f32[1,512], index: 2, kind: input, shape index: {}]   ;;  %s2034_s3 = inlined_call_operand.vmem [shape: bf16[8,512], index: 3, kind: output, shape index: {}]  }
   0x1   :  { %s1841_s14 = smov 0  }
   0x2 LB: > { %s25_s15 = sadd.s32 1, %s1810_s13  ;;  %p1422_p0 = scmp.ge.s32.totalorder %s1814_s14, 1  ;;  %s1814_s14 = sphi %s1841_s14, %s13_s14   ;;  %s1810_s13 = sphi %s1839_s13, %s2036_s13   ;;  %s1806_s12 = sphi %s1837_s12, %s2035_s12  }
   0x3   : > { %p26_p1 = scmp.ge.s32.totalorder %s25_s15, 9  ;;  %p194_p2 = scmp.lt.s32.totalorder %s1814_s14, 10 }
   0x5   : > { %s2038_s15 = smov (%p26_p1, %s25_s15), 0  ;;  %p195_p3 = pnand %p1422_p0, %p194_p2 }
   0x6   : > { %s1423_s16 = sshll.u32 (!%p195_p3), %s1806_s12, 2  ;;  %s1425_s17 = sshll.u32 (!%p195_p3), %s1806_s12, 6 }
   0x7   : > { %198 = sbr.rel (%p195_p3) target bundleno = 386 (0x182), region = 32  ;;  %p243_p4 = scmp.lt.s32.totalorder (!%p195_p3), %s1423_s16, 35 }
   0x8   : > { %p252_p5 = scmp.lt.s32.totalorder (!%p195_p3), %s1425_s17, 575  ;;  %p1428_p6 = scmp.ne.s32.totalorder (!%p195_p3), %s1806_s12, 0 }
   0xe   : > { %s2040_s16 = smov (!%p243_p4, %s1423_s16), 35  ;;  %s2042_s17 = smov (!%p252_p5, %s1425_s17), 575 }
   0xf   : > { %s1424_s18 = sshll.u32 %s2040_s16, 2  ;;  %s1568_s22 = sshll.u32 %s2042_s17, 4  ;;  %v1816_v0 = vmov (!%p1428_p6), 0.0  }
  0x10   : > { %s1862_s21 = scalar_lea.vmem %s2031_s0, %s1424_s18  ;;  %s1867_s25 = scalar_lea.vmem %s2032_s1, %s1568_s22  ;;  %281 = vst [vmem:[#allocation2] sm:$0xff] (!%p1428_p6), %v1816_v0  ;;  %282 = vst [vmem:[#allocation2 + $0x8] sm:$0xff] (!%p1428_p6), %v1816_v0 }
  0x11   : > { %280 = sbr.rel (%p1428_p6) target bundleno = 24 (0x18), region = 36  ;;  %283 = vst [vmem:[#allocation2 + $0x10] sm:$0xff] (!%p1428_p6), %v1816_v0  ;;  %284 = vst [vmem:[#allocation2 + $0x18] sm:$0xff] (!%p1428_p6), %v1816_v0 }
  0x18 PF: > { %v1596_v1 = vld [vmem:[%s1867_s25 + $0x4] ss:$16 sps:$4 sm:$0xff]   ;;  %v1600_v3 = vld [vmem:[%s1867_s25] ss:$16 sps:$4 sm:$0xff]   ;;  %v290_v49 = vld [vmem:[%s1862_s21 + $0x8] sm:$0xff]  ;;  %p1561_p7 = scmp.ne.s32.totalorder %s1806_s12, 8 }
  0x19   : > { %v1598_v2 = vld [vmem:[%s1867_s25 + $0x204] ss:$16 sps:$4 sm:$0xff]   ;;  %1073 = vmatprep.subr.bf16.mxu0 %v1596_v1  ;;  %v1601_v4 = vld [vmem:[%s1867_s25 + $0x200] ss:$16 sps:$4 sm:$0xff]   ;;  %v1432_v52 = vcombine.high %v290_v49, %v290_v49 }
  0x1a   : > { %1114 = vmatprep.subr.bf16.mxu1 %v1598_v2  ;;  %v1602_v5 = vld [vmem:[%s1867_s25 + $0x24] ss:$16 sps:$4 sm:$0xff]   ;;  %1074 = vmatpush1.bf16.msra.mxu0 %v1600_v3  ;;  %v1606_v7 = vld [vmem:[%s1867_s25 + $0x20] ss:$16 sps:$4 sm:$0xff]  }
  0x1b   : > { %1115 = vmatpush1.bf16.msra.mxu1 %v1601_v4  ;;  %v1604_v6 = vld [vmem:[%s1867_s25 + $0x224] ss:$16 sps:$4 sm:$0xff]   ;;  %1075 = vmatprep.subr.bf16.mxu0 %v1602_v5  ;;  %v1607_v8 = vld [vmem:[%s1867_s25 + $0x220] ss:$16 sps:$4 sm:$0xff]   ;;  %v1698_v5 = vld [vmem:[%s1867_s25 + $0xc] ss:$16 sps:$4 sm:$0xff]  }
  0x1c   : > { %1116 = vmatprep.subr.bf16.mxu1 %v1604_v6  ;;  %v1608_v9 = vld [vmem:[%s1867_s25 + $0x44] ss:$16 sps:$4 sm:$0xff]   ;;  %v1612_v11 = vld [vmem:[%s1867_s25 + $0x40] ss:$16 sps:$4 sm:$0xff]   ;;  %1146 = vmatprep.mubr.bf16.mxu1 %v1432_v52  ;;  %v1701_v6 = vld [vmem:[%s1867_s25 + $0x20c] ss:$16 sps:$4 sm:$0xff]  }
  0x1d   : > { %v1610_v10 = vld [vmem:[%s1867_s25 + $0x244] ss:$16 sps:$4 sm:$0xff]   ;;  %v1613_v12 = vld [vmem:[%s1867_s25 + $0x240] ss:$16 sps:$4 sm:$0xff]  }
  0x1e   : > { %1076 = vmatpush1.bf16.msra.mxu0 %v1606_v7  ;;  %v1614_v13 = vld [vmem:[%s1867_s25 + $0x64] ss:$16 sps:$4 sm:$0xff]   ;;  %v1618_v15 = vld [vmem:[%s1867_s25 + $0x60] ss:$16 sps:$4 sm:$0xff]  }
  0x1f   : > { %1117 = vmatpush1.bf16.msra.mxu1 %v1607_v8  ;;  %1077 = vmatprep.subr.bf16.mxu0 %v1608_v9  ;;  %v1616_v14 = vld [vmem:[%s1867_s25 + $0x264] ss:$16 sps:$4 sm:$0xff]   ;;  %v1619_v16 = vld [vmem:[%s1867_s25 + $0x260] ss:$16 sps:$4 sm:$0xff]   ;;  %v1943_v8 = vcombine.low %v290_v49, %v290_v49  ;;  %v1696_v9 = vld [vmem:[%s1867_s25 + $0x8] ss:$16 sps:$4 sm:$0xff]  }
  0x20   : > { %1118 = vmatprep.subr.bf16.mxu1 %v1610_v10  ;;  %v1620_v17 = vld [vmem:[%s1867_s25 + $0x84] ss:$16 sps:$4 sm:$0xff]   ;;  %v1624_v19 = vld [vmem:[%s1867_s25 + $0x80] ss:$16 sps:$4 sm:$0xff]   ;;  %v1699_v10 = vld [vmem:[%s1867_s25 + $0x208] ss:$16 sps:$4 sm:$0xff]  }
  0x21   : > { %v1622_v18 = vld [vmem:[%s1867_s25 + $0x284] ss:$16 sps:$4 sm:$0xff]   ;;  %v1625_v20 = vld [vmem:[%s1867_s25 + $0x280] ss:$16 sps:$4 sm:$0xff]   ;;  %v1756_v49 = vld [vmem:[%s1867_s25 + $0x148] ss:$16 sps:$4 sm:$0xff]  }
  0x22   : > { %1078 = vmatpush1.bf16.msra.mxu0 %v1612_v11  ;;  %v1626_v21 = vld [vmem:[%s1867_s25 + $0xa4] ss:$16 sps:$4 sm:$0xff]   ;;  %v1630_v23 = vld [vmem:[%s1867_s25 + $0xa0] ss:$16 sps:$4 sm:$0xff]   ;;  %v1704_v11 = vld [vmem:[%s1867_s25 + $0x2c] ss:$16 sps:$4 sm:$0xff]  }
  0x23   : > { %1119 = vmatpush1.bf16.msra.mxu1 %v1613_v12  ;;  %1079 = vmatprep.subr.bf16.mxu0 %v1614_v13  ;;  %v1628_v22 = vld [vmem:[%s1867_s25 + $0x2a4] ss:$16 sps:$4 sm:$0xff]   ;;  %v1631_v24 = vld [vmem:[%s1867_s25 + $0x2a0] ss:$16 sps:$4 sm:$0xff]   ;;  %v1707_v12 = vld [vmem:[%s1867_s25 + $0x22c] ss:$16 sps:$4 sm:$0xff]  }
  0x24   : > { %1120 = vmatprep.subr.bf16.mxu1 %v1616_v14  ;;  %v1632_v25 = vld [vmem:[%s1867_s25 + $0xc4] ss:$16 sps:$4 sm:$0xff]   ;;  %v1636_v27 = vld [vmem:[%s1867_s25 + $0xc0] ss:$16 sps:$4 sm:$0xff]   ;;  %v1702_v13 = vld [vmem:[%s1867_s25 + $0x28] ss:$16 sps:$4 sm:$0xff]  }
  0x25   : > { %v1634_v26 = vld [vmem:[%s1867_s25 + $0x2c4] ss:$16 sps:$4 sm:$0xff]   ;;  %v1637_v28 = vld [vmem:[%s1867_s25 + $0x2c0] ss:$16 sps:$4 sm:$0xff]   ;;  %v1705_v14 = vld [vmem:[%s1867_s25 + $0x228] ss:$16 sps:$4 sm:$0xff]  }
  0x26   : > { %1080 = vmatpush1.bf16.msra.mxu0 %v1618_v15  ;;  %v1638_v29 = vld [vmem:[%s1867_s25 + $0xe4] ss:$16 sps:$4 sm:$0xff]   ;;  %v1642_v31 = vld [vmem:[%s1867_s25 + $0xe0] ss:$16 sps:$4 sm:$0xff]   ;;  %v1710_v15 = vld [vmem:[%s1867_s25 + $0x4c] ss:$16 sps:$4 sm:$0xff]  }
  0x27   : > { %1121 = vmatpush1.bf16.msra.mxu1 %v1619_v16  ;;  %1081 = vmatprep.subr.bf16.mxu0 %v1620_v17  ;;  %v1640_v30 = vld [vmem:[%s1867_s25 + $0x2e4] ss:$16 sps:$4 sm:$0xff]   ;;  %v1643_v32 = vld [vmem:[%s1867_s25 + $0x2e0] ss:$16 sps:$4 sm:$0xff]   ;;  %v1713_v16 = vld [vmem:[%s1867_s25 + $0x24c] ss:$16 sps:$4 sm:$0xff]  }
  0x28   : > { %1122 = vmatprep.subr.bf16.mxu1 %v1622_v18  ;;  %v1644_v33 = vld [vmem:[%s1867_s25 + $0x104] ss:$16 sps:$4 sm:$0xff]   ;;  %v1648_v35 = vld [vmem:[%s1867_s25 + $0x100] ss:$16 sps:$4 sm:$0xff]   ;;  %v1708_v17 = vld [vmem:[%s1867_s25 + $0x48] ss:$16 sps:$4 sm:$0xff]  }
  0x29   : > { %v1646_v34 = vld [vmem:[%s1867_s25 + $0x304] ss:$16 sps:$4 sm:$0xff]   ;;  %v1649_v36 = vld [vmem:[%s1867_s25 + $0x300] ss:$16 sps:$4 sm:$0xff]   ;;  %v1711_v18 = vld [vmem:[%s1867_s25 + $0x248] ss:$16 sps:$4 sm:$0xff]  }
  0x2a   : > { %1082 = vmatpush1.bf16.msra.mxu0 %v1624_v19  ;;  %v1650_v37 = vld [vmem:[%s1867_s25 + $0x124] ss:$16 sps:$4 sm:$0xff]   ;;  %v1654_v39 = vld [vmem:[%s1867_s25 + $0x120] ss:$16 sps:$4 sm:$0xff]   ;;  %v1716_v19 = vld [vmem:[%s1867_s25 + $0x6c] ss:$16 sps:$4 sm:$0xff]  }
  0x2b   : > { %1123 = vmatpush1.bf16.msra.mxu1 %v1625_v20  ;;  %1083 = vmatprep.subr.bf16.mxu0 %v1626_v21  ;;  %v1652_v38 = vld [vmem:[%s1867_s25 + $0x324] ss:$16 sps:$4 sm:$0xff]   ;;  %v1655_v40 = vld [vmem:[%s1867_s25 + $0x320] ss:$16 sps:$4 sm:$0xff]   ;;  %v1719_v20 = vld [vmem:[%s1867_s25 + $0x26c] ss:$16 sps:$4 sm:$0xff]  }
  0x2c   : > { %1124 = vmatprep.subr.bf16.mxu1 %v1628_v22  ;;  %v1656_v41 = vld [vmem:[%s1867_s25 + $0x144] ss:$16 sps:$4 sm:$0xff]   ;;  %v1660_v43 = vld [vmem:[%s1867_s25 + $0x140] ss:$16 sps:$4 sm:$0xff]   ;;  %v1714_v21 = vld [vmem:[%s1867_s25 + $0x68] ss:$16 sps:$4 sm:$0xff]  }
  0x2d   : > { %v1658_v42 = vld [vmem:[%s1867_s25 + $0x344] ss:$16 sps:$4 sm:$0xff]   ;;  %v1661_v44 = vld [vmem:[%s1867_s25 + $0x340] ss:$16 sps:$4 sm:$0xff]   ;;  %v1717_v22 = vld [vmem:[%s1867_s25 + $0x268] ss:$16 sps:$4 sm:$0xff]  }
  0x2e   : > { %1084 = vmatpush1.bf16.msra.mxu0 %v1630_v23  ;;  %v1662_v45 = vld [vmem:[%s1867_s25 + $0x164] ss:$16 sps:$4 sm:$0xff]   ;;  %v1666_v50 = vld [vmem:[%s1867_s25 + $0x160] ss:$16 sps:$4 sm:$0xff]   ;;  %v1722_v23 = vld [vmem:[%s1867_s25 + $0x8c] ss:$16 sps:$4 sm:$0xff]  }
  0x2f   : > { %1125 = vmatpush1.bf16.msra.mxu1 %v1631_v24  ;;  %1085 = vmatprep.subr.bf16.mxu0 %v1632_v25  ;;  %v1664_v46 = vld [vmem:[%s1867_s25 + $0x364] ss:$16 sps:$4 sm:$0xff]   ;;  %v1667_v51 = vld [vmem:[%s1867_s25 + $0x360] ss:$16 sps:$4 sm:$0xff]   ;;  %v1725_v24 = vld [vmem:[%s1867_s25 + $0x28c] ss:$16 sps:$4 sm:$0xff]  }
  0x30   : > { %1126 = vmatprep.subr.bf16.mxu1 %v1634_v26  ;;  %v289_v47 = vld [vmem:[%s1862_s21] sm:$0xff]  ;;  %v1720_v25 = vld [vmem:[%s1867_s25 + $0x88] ss:$16 sps:$4 sm:$0xff]  }
  0x31   : > { %v1917_v48 = vcombine.high %v289_v47, %v289_v47  ;;  %v1668_v53 = vld [vmem:[%s1867_s25 + $0x184] ss:$16 sps:$4 sm:$0xff]   ;;  %v1672_v55 = vld [vmem:[%s1867_s25 + $0x180] ss:$16 sps:$4 sm:$0xff]   ;;  %v1941_v7 = vcombine.low %v289_v47, %v289_v47  ;;  %v1723_v26 = vld [vmem:[%s1867_s25 + $0x288] ss:$16 sps:$4 sm:$0xff]  }
  0x32   : > { %1086 = vmatpush1.bf16.msra.mxu0 %v1636_v27  ;;  %v1670_v54 = vld [vmem:[%s1867_s25 + $0x384] ss:$16 sps:$4 sm:$0xff]   ;;  %v1673_v56 = vld [vmem:[%s1867_s25 + $0x380] ss:$16 sps:$4 sm:$0xff]   ;;  %v1728_v27 = vld [vmem:[%s1867_s25 + $0xac] ss:$16 sps:$4 sm:$0xff]  }
  0x33   : > { %1127 = vmatpush1.bf16.msra.mxu1 %v1637_v28  ;;  %1087 = vmatprep.subr.bf16.mxu0 %v1638_v29  ;;  %v1674_v57 = vld [vmem:[%s1867_s25 + $0x1a4] ss:$16 sps:$4 sm:$0xff]   ;;  %v1678_v59 = vld [vmem:[%s1867_s25 + $0x1a0] ss:$16 sps:$4 sm:$0xff]   ;;  %v1731_v28 = vld [vmem:[%s1867_s25 + $0x2ac] ss:$16 sps:$4 sm:$0xff]  }
  0x34   : > { %1128 = vmatprep.subr.bf16.mxu1 %v1640_v30  ;;  %1105 = vmatprep.mubr.bf16.mxu0 %v1917_v48  ;;  %v1676_v58 = vld [vmem:[%s1867_s25 + $0x3a4] ss:$16 sps:$4 sm:$0xff]   ;;  %v1679_v60 = vld [vmem:[%s1867_s25 + $0x3a0] ss:$16 sps:$4 sm:$0xff]   ;;  %v1726_v29 = vld [vmem:[%s1867_s25 + $0xa8] ss:$16 sps:$4 sm:$0xff]  }
  0x35   : > { %v1680_v61 = vld [vmem:[%s1867_s25 + $0x1c4] ss:$16 sps:$4 sm:$0xff]   ;;  %v1684_v63 = vld [vmem:[%s1867_s25 + $0x1c0] ss:$16 sps:$4 sm:$0xff]   ;;  %v1729_v30 = vld [vmem:[%s1867_s25 + $0x2a8] ss:$16 sps:$4 sm:$0xff]  }
  0x36   : > { %1088 = vmatpush1.bf16.msra.mxu0 %v1642_v31  ;;  %v1682_v62 = vld [vmem:[%s1867_s25 + $0x3c4] ss:$16 sps:$4 sm:$0xff]   ;;  %v1685_v0 = vld [vmem:[%s1867_s25 + $0x3c0] ss:$16 sps:$4 sm:$0xff]   ;;  %v1734_v31 = vld [vmem:[%s1867_s25 + $0xcc] ss:$16 sps:$4 sm:$0xff]  }
  0x37   : > { %1129 = vmatpush1.bf16.msra.mxu1 %v1643_v32  ;;  %1089 = vmatprep.subr.bf16.mxu0 %v1644_v33  ;;  %v1686_v1 = vld [vmem:[%s1867_s25 + $0x1e4] ss:$16 sps:$4 sm:$0xff]   ;;  %v1690_v3 = vld [vmem:[%s1867_s25 + $0x1e0] ss:$16 sps:$4 sm:$0xff]   ;;  %v1737_v32 = vld [vmem:[%s1867_s25 + $0x2cc] ss:$16 sps:$4 sm:$0xff]  }
  0x38   : > { %1130 = vmatprep.subr.bf16.mxu1 %v1646_v34  ;;  %v1688_v2 = vld [vmem:[%s1867_s25 + $0x3e4] ss:$16 sps:$4 sm:$0xff]   ;;  %v1691_v4 = vld [vmem:[%s1867_s25 + $0x3e0] ss:$16 sps:$4 sm:$0xff]   ;;  %v1732_v33 = vld [vmem:[%s1867_s25 + $0xc8] ss:$16 sps:$4 sm:$0xff]  }
  0x39   : > { %v1735_v34 = vld [vmem:[%s1867_s25 + $0x2c8] ss:$16 sps:$4 sm:$0xff]   ;;  %v1758_v47 = vld [vmem:[%s1867_s25 + $0x14c] ss:$16 sps:$4 sm:$0xff]  }
  0x3a   : > { %1090 = vmatpush1.bf16.msra.mxu0 %v1648_v35  ;;  %v1740_v35 = vld [vmem:[%s1867_s25 + $0xec] ss:$16 sps:$4 sm:$0xff]  }
  0x3b   : > { %1131 = vmatpush1.bf16.msra.mxu1 %v1649_v36  ;;  %1091 = vmatprep.subr.bf16.mxu0 %v1650_v37  ;;  %v1743_v36 = vld [vmem:[%s1867_s25 + $0x2ec] ss:$16 sps:$4 sm:$0xff]   ;;  %v1738_v37 = vld [vmem:[%s1867_s25 + $0xe8] ss:$16 sps:$4 sm:$0xff]  }
  0x3c   : > { %1132 = vmatprep.subr.bf16.mxu1 %v1652_v38  ;;  %v1741_v38 = vld [vmem:[%s1867_s25 + $0x2e8] ss:$16 sps:$4 sm:$0xff]  }
  0x3e   : > { %1092 = vmatpush1.bf16.msra.mxu0 %v1654_v39  ;;  %v1746_v39 = vld [vmem:[%s1867_s25 + $0x10c] ss:$16 sps:$4 sm:$0xff]  }
  0x3f   : > { %1133 = vmatpush1.bf16.msra.mxu1 %v1655_v40  ;;  %1093 = vmatprep.subr.bf16.mxu0 %v1656_v41  ;;  %v1749_v40 = vld [vmem:[%s1867_s25 + $0x30c] ss:$16 sps:$4 sm:$0xff]   ;;  %v1744_v41 = vld [vmem:[%s1867_s25 + $0x108] ss:$16 sps:$4 sm:$0xff]  }
  0x40   : > { %1134 = vmatprep.subr.bf16.mxu1 %v1658_v42  ;;  %v1747_v42 = vld [vmem:[%s1867_s25 + $0x308] ss:$16 sps:$4 sm:$0xff]  }
  0x42   : > { %1094 = vmatpush1.bf16.msra.mxu0 %v1660_v43  ;;  %v1752_v43 = vld [vmem:[%s1867_s25 + $0x12c] ss:$16 sps:$4 sm:$0xff]  }
  0x43   : > { %1135 = vmatpush1.bf16.msra.mxu1 %v1661_v44  ;;  %1095 = vmatprep.subr.bf16.mxu0 %v1662_v45  ;;  %v1755_v44 = vld [vmem:[%s1867_s25 + $0x32c] ss:$16 sps:$4 sm:$0xff]   ;;  %v1750_v45 = vld [vmem:[%s1867_s25 + $0x128] ss:$16 sps:$4 sm:$0xff]  }
  0x44   : > { %1136 = vmatprep.subr.bf16.mxu1 %v1664_v46  ;;  %v1753_v46 = vld [vmem:[%s1867_s25 + $0x328] ss:$16 sps:$4 sm:$0xff]  }
  0x46   : > { %1096 = vmatpush1.bf16.msra.mxu0 %v1666_v50  ;;  %v1759_v50 = vld [vmem:[%s1867_s25 + $0x348] ss:$16 sps:$4 sm:$0xff]  }
  0x47   : > { %1137 = vmatpush1.bf16.msra.mxu1 %v1667_v51  ;;  %1097 = vmatprep.subr.bf16.mxu0 %v1668_v53  ;;  %v1764_v51 = vld [vmem:[%s1867_s25 + $0x16c] ss:$16 sps:$4 sm:$0xff]   ;;  %v1762_v53 = vld [vmem:[%s1867_s25 + $0x168] ss:$16 sps:$4 sm:$0xff]  }
  0x48   : > { %1138 = vmatprep.subr.bf16.mxu1 %v1670_v54  ;;  %v1765_v54 = vld [vmem:[%s1867_s25 + $0x368] ss:$16 sps:$4 sm:$0xff]  }
  0x4a   : > { %1098 = vmatpush1.bf16.msra.mxu0 %v1672_v55  ;;  %v1770_v55 = vld [vmem:[%s1867_s25 + $0x18c] ss:$16 sps:$4 sm:$0xff]  }
  0x4b   : > { %1139 = vmatpush1.bf16.msra.mxu1 %v1673_v56  ;;  %1099 = vmatprep.subr.bf16.mxu0 %v1674_v57  ;;  %v1773_v56 = vld [vmem:[%s1867_s25 + $0x38c] ss:$16 sps:$4 sm:$0xff]   ;;  %v1768_v57 = vld [vmem:[%s1867_s25 + $0x188] ss:$16 sps:$4 sm:$0xff]  }
  0x4c   : > { %1140 = vmatprep.subr.bf16.mxu1 %v1676_v58  ;;  %v1771_v58 = vld [vmem:[%s1867_s25 + $0x388] ss:$16 sps:$4 sm:$0xff]  }
  0x4e   : > { %1100 = vmatpush1.bf16.msra.mxu0 %v1678_v59  ;;  %v1776_v59 = vld [vmem:[%s1867_s25 + $0x1ac] ss:$16 sps:$4 sm:$0xff]  }
  0x4f   : > { %1141 = vmatpush1.bf16.msra.mxu1 %v1679_v60  ;;  %1101 = vmatprep.subr.bf16.mxu0 %v1680_v61  ;;  %v1779_v60 = vld [vmem:[%s1867_s25 + $0x3ac] ss:$16 sps:$4 sm:$0xff]   ;;  %v1774_v61 = vld [vmem:[%s1867_s25 + $0x1a8] ss:$16 sps:$4 sm:$0xff]  }
  0x50   : > { %1142 = vmatprep.subr.bf16.mxu1 %v1682_v62  ;;  %v1777_v62 = vld [vmem:[%s1867_s25 + $0x3a8] ss:$16 sps:$4 sm:$0xff]  }
  0x52   : > { %1102 = vmatpush1.bf16.msra.mxu0 %v1684_v63  ;;  %v1782_v63 = vld [vmem:[%s1867_s25 + $0x1cc] ss:$16 sps:$4 sm:$0xff]  }
  0x53   : > { %1143 = vmatpush1.bf16.msra.mxu1 %v1685_v0  ;;  %1103 = vmatprep.subr.bf16.mxu0 %v1686_v1  ;;  %v1785_v0 = vld [vmem:[%s1867_s25 + $0x3cc] ss:$16 sps:$4 sm:$0xff]   ;;  %v1780_v1 = vld [vmem:[%s1867_s25 + $0x1c8] ss:$16 sps:$4 sm:$0xff]  }
  0x54   : > { %1144 = vmatprep.subr.bf16.mxu1 %v1688_v2  ;;  %v1783_v2 = vld [vmem:[%s1867_s25 + $0x3c8] ss:$16 sps:$4 sm:$0xff]  }
  0x56   : > { %1104 = vmatpush1.bf16.msra.mxu0 %v1690_v3  ;;  %v1788_v3 = vld [vmem:[%s1867_s25 + $0x1ec] ss:$16 sps:$4 sm:$0xff]  }
  0x57   : > { %1145 = vmatpush1.bf16.msra.mxu1 %v1691_v4  ;;  %1155 = vmatprep.subr.bf16.mxu0 %v1698_v5  ;;  %v1791_v4 = vld [vmem:[%s1867_s25 + $0x3ec] ss:$16 sps:$4 sm:$0xff]   ;;  %v1786_v5 = vld [vmem:[%s1867_s25 + $0x1e8] ss:$16 sps:$4 sm:$0xff]  }
  0x58   : > { %1196 = vmatprep.subr.bf16.mxu1 %v1701_v6  ;;  %v1789_v6 = vld [vmem:[%s1867_s25 + $0x3e8] ss:$16 sps:$4 sm:$0xff]  }
  0x59   : > { %1106 = vmatmul.mubr.bf16.vlgmr.msra.gmra.mrb[0].mxu0 %v1941_v7 }
  0x5a   : > { %1147 = vmatmul.mubr.bf16.vlgmr.msra.gmra.mrb[0].mxu1 %v1943_v8  ;;  %1156 = vmatpush1.bf16.msra.mxu0 %v1696_v9 }
  0x5b   : > { %1197 = vmatpush1.bf16.msra.mxu1 %v1699_v10  ;;  %1157 = vmatprep.subr.bf16.mxu0 %v1704_v11  ;;  %v285_v10 = vld [vmem:[#allocation2] sm:$0xff] }
  0x5c   : > { %1198 = vmatprep.subr.bf16.mxu1 %v1707_v12  ;;  %1187 = vmatprep.mubr.bf16.mxu0 %v1917_v48  ;;  %v1761_v48 = vld [vmem:[%s1867_s25 + $0x34c] ss:$16 sps:$4 sm:$0xff]  }
  0x5d   : > { %1228 = vmatprep.mubr.bf16.mxu1 %v1432_v52  ;;  %v1767_v52 = vld [vmem:[%s1867_s25 + $0x36c] ss:$16 sps:$4 sm:$0xff]  }
  0x5e   : > { %1158 = vmatpush1.bf16.msra.mxu0 %v1702_v13 }
  0x5f   : > { %1199 = vmatpush1.bf16.msra.mxu1 %v1705_v14  ;;  %1159 = vmatprep.subr.bf16.mxu0 %v1710_v15  ;;  %v286_v14 = vld [vmem:[#allocation2 + $0x8] sm:$0xff] }
  0x60   : > { %1200 = vmatprep.subr.bf16.mxu1 %v1713_v16 }
  0x62   : > { %1160 = vmatpush1.bf16.msra.mxu0 %v1708_v17 }
  0x63   : > { %1201 = vmatpush1.bf16.msra.mxu1 %v1711_v18  ;;  %1161 = vmatprep.subr.bf16.mxu0 %v1716_v19 }
  0x64   : > { %1202 = vmatprep.subr.bf16.mxu1 %v1719_v20 }
  0x66   : > { %1162 = vmatpush1.bf16.msra.mxu0 %v1714_v21 }
  0x67   : > { %1203 = vmatpush1.bf16.msra.mxu1 %v1717_v22  ;;  %1163 = vmatprep.subr.bf16.mxu0 %v1722_v23 }
  0x68   : > { %1204 = vmatprep.subr.bf16.mxu1 %v1725_v24 }
  0x6a   : > { %1164 = vmatpush1.bf16.msra.mxu0 %v1720_v25 }
  0x6b   : > { %1205 = vmatpush1.bf16.msra.mxu1 %v1723_v26  ;;  %1165 = vmatprep.subr.bf16.mxu0 %v1728_v27  ;;  %v288_v26 = vld [vmem:[#allocation2 + $0x18] sm:$0xff] }
  0x6c   : > { %1206 = vmatprep.subr.bf16.mxu1 %v1731_v28 }
  0x6e   : > { %1166 = vmatpush1.bf16.msra.mxu0 %v1726_v29 }
  0x6f   : > { %1207 = vmatpush1.bf16.msra.mxu1 %v1729_v30  ;;  %1167 = vmatprep.subr.bf16.mxu0 %v1734_v31 }
  0x70   : > { %1208 = vmatprep.subr.bf16.mxu1 %v1737_v32 }
  0x72   : > { %1168 = vmatpush1.bf16.msra.mxu0 %v1732_v33 }
  0x73   : > { %1209 = vmatpush1.bf16.msra.mxu1 %v1735_v34  ;;  %1169 = vmatprep.subr.bf16.mxu0 %v1740_v35  ;;  %v1255_v35 = vlaneseq (!%p1561_p7) }
  0x74   : > { %1210 = vmatprep.subr.bf16.mxu1 %v1743_v36 }
  0x75   : > { %v1256_v36 = vshrl.u32 (!%p1561_p7), %v1255_v35, 7 }
  0x76   : > { %1170 = vmatpush1.bf16.msra.mxu0 %v1738_v37  ;;  %v1253_v37 = vld [vmem:[%s2033_s2] sm:$0xf] (!%p1561_p7) }
  0x77   : > { %1211 = vmatpush1.bf16.msra.mxu1 %v1741_v38  ;;  %1171 = vmatprep.subr.bf16.mxu0 %v1746_v39  ;;  %v1257_v39 = vsub.s32 (!%p1561_p7), 0, %v1256_v36 }
  0x78   : > { %1212 = vmatprep.subr.bf16.mxu1 %v1749_v40  ;;  %v1261_v40 = vsub.s32 (!%p1561_p7), 1, %v1256_v36 }
  0x7a   : > { %1172 = vmatpush1.bf16.msra.mxu0 %v1744_v41  ;;  %v1265_v41 = vsub.s32 (!%p1561_p7), 2, %v1256_v36 }
  0x7b   : > { %1213 = vmatpush1.bf16.msra.mxu1 %v1747_v42  ;;  %1173 = vmatprep.subr.bf16.mxu0 %v1752_v43  ;;  %v1269_v42 = vsub.s32 (!%p1561_p7), 3, %v1256_v36 }
  0x7c   : > { %1214 = vmatprep.subr.bf16.mxu1 %v1755_v44 }
  0x7e   : > { %1174 = vmatpush1.bf16.msra.mxu0 %v1750_v45 }
  0x7f   : > { %1215 = vmatpush1.bf16.msra.mxu1 %v1753_v46  ;;  %1175 = vmatprep.subr.bf16.mxu0 %v1758_v47  ;;  %v1258_v46 = vrot.slane (!%p1561_p7), %v1253_v37, %v1257_v39  ;;  %v1262_v47 = vrot.slane (!%p1561_p7), %v1253_v37, %v1261_v40 }
  0x80   : > { %1216 = vmatprep.subr.bf16.mxu1 %v1761_v48  ;;  %v1266_v48 = vrot.slane (!%p1561_p7), %v1253_v37, %v1265_v41 }
  0x82   : > { %1176 = vmatpush1.bf16.msra.mxu0 %v1756_v49  ;;  %v1270_v49 = vrot.slane (!%p1561_p7), %v1253_v37, %v1269_v42 }
  0x83   : > { %1217 = vmatpush1.bf16.msra.mxu1 %v1759_v50  ;;  %1177 = vmatprep.subr.bf16.mxu0 %v1764_v51 }
  0x84   : > { %1218 = vmatprep.subr.bf16.mxu1 %v1767_v52 }
  0x86   : > { %1178 = vmatpush1.bf16.msra.mxu0 %v1762_v53 }
  0x87   : > { %1219 = vmatpush1.bf16.msra.mxu1 %v1765_v54  ;;  %1179 = vmatprep.subr.bf16.mxu0 %v1770_v55 }
  0x88   : > { %1220 = vmatprep.subr.bf16.mxu1 %v1773_v56 }
  0x8a   : > { %1180 = vmatpush1.bf16.msra.mxu0 %v1768_v57 }
  0x8b   : > { %1221 = vmatpush1.bf16.msra.mxu1 %v1771_v58  ;;  %1181 = vmatprep.subr.bf16.mxu0 %v1776_v59 }
  0x8c   : > { %1222 = vmatprep.subr.bf16.mxu1 %v1779_v60 }
  0x8e   : > { %1182 = vmatpush1.bf16.msra.mxu0 %v1774_v61 }
  0x8f   : > { %1223 = vmatpush1.bf16.msra.mxu1 %v1777_v62  ;;  %1183 = vmatprep.subr.bf16.mxu0 %v1782_v63 }
  0x90   : > { %1224 = vmatprep.subr.bf16.mxu1 %v1785_v0 }
  0x92   : > { %1184 = vmatpush1.bf16.msra.mxu0 %v1780_v1 }
  0x93   : > { %1225 = vmatpush1.bf16.msra.mxu1 %v1783_v2  ;;  %1185 = vmatprep.subr.bf16.mxu0 %v1788_v3 }
  0x94   : > { %1226 = vmatprep.subr.bf16.mxu1 %v1791_v4 }
  0x96   : > { %1186 = vmatpush1.bf16.msra.mxu0 %v1786_v5 }
  0x97   : > { %1227 = vmatpush1.bf16.msra.mxu1 %v1789_v6 }
  0x99   : > { %1188 = vmatmul.mubr.bf16.vlgmr.msra.gmra.mrb[4].mxu0 %v1941_v7  ;;  %v287_v7 = vld [vmem:[#allocation2 + $0x10] sm:$0xff] }
  0x9a   : > { %1229 = vmatmul.mubr.bf16.vlgmr.msra.gmra.mrb[4].mxu1 %v1943_v8 }
 0x12c   : > { %v1107_v9 = vpop.f32.mrb[0].mxu0 }
 0x12d   : > { %v1148_v11 = vpop.f32.mrb[0].mxu1  ;;  %v1109_v13 = vpop.f32.mrb[1].mxu0 }
 0x12e   : > { %v1149_v12 = vadd.f32 %v1148_v11, %v1107_v9  ;;  %v1150_v15 = vpop.f32.mrb[1].mxu1  ;;  %v1111_v17 = vpop.f32.mrb[2].mxu0 }
 0x12f   : > { %v1151_v16 = vadd.f32 %v1150_v15, %v1109_v13  ;;  %v1152_v18 = vpop.f32.mrb[2].mxu1  ;;  %v1112_v20 = vpop.f32.mrb[3].mxu0 }
 0x130   : > { %v1237_v19 = vadd.f32 %v1149_v12, %v285_v10  ;;  %v1153_v21 = vpop.f32.mrb[3].mxu1 }
 0x131   : > { %v1238_v22 = vadd.f32 %v1151_v16, %v286_v14 }
 0x132   : > { %1241 = vst [vmem:[#allocation2] sm:$0xff] %v1237_v19 }
 0x133   : > { %1242 = vst [vmem:[#allocation2 + $0x8] sm:$0xff] %v1238_v22 }
 0x139   : > { %v1249_v38 = vld [vmem:[#allocation2] sm:$0xff] (!%p1561_p7) }
 0x13a   : > { %v1250_v43 = vld [vmem:[#allocation2 + $0x8] sm:$0xff] (!%p1561_p7)  ;;  %v1275_v50 = vadd.f32 (!%p1561_p7), %v1258_v46, %v1249_v38 }
 0x13b   : > { %v1276_v51 = vadd.f32 (!%p1561_p7), %v1262_v47, %v1250_v43 }
 0x13c   : > { %v1279_v54 = vmax.f32 (!%p1561_p7), %v1275_v50, 0.0 }
 0x13d   : > { %v1280_v55 = vmax.f32 (!%p1561_p7), %v1276_v51, 0.0 }
 0x13f   : > { %v1569_v58 = vpack.c.bf16 (!%p1561_p7), %v1280_v55, %v1279_v54 }
 0x141   : > { %1299 = vst [vmem:[%s2034_s3] sm:$0xff] (!%p1561_p7), %v1569_v58 }
 0x16c   : > { %v1189_v23 = vpop.f32.mrb[4].mxu0 }
 0x16d   : > { %v1230_v24 = vpop.f32.mrb[4].mxu1  ;;  %v1191_v25 = vpop.f32.mrb[5].mxu0  ;;  %1248 = sbr.rel (%p1561_p7) target bundleno = 386 (0x182), region = 40 }
 0x16e   : > { %v1231_v8 = vadd.f32 %v1230_v24, %v1189_v23  ;;  %v1232_v27 = vpop.f32.mrb[5].mxu1  ;;  %v1193_v29 = vpop.f32.mrb[6].mxu0 }
 0x16f   : > { %v1233_v28 = vadd.f32 %v1232_v27, %v1191_v25  ;;  %v1234_v30 = vpop.f32.mrb[6].mxu1  ;;  %v1194_v32 = vpop.f32.mrb[7].mxu0 }
 0x170   : > { %v1239_v31 = vadd.f32 %v1231_v8, %v287_v7  ;;  %v1235_v33 = vpop.f32.mrb[7].mxu1 }
 0x171   : > { %v1240_v34 = vadd.f32 %v1233_v28, %v288_v26 }
 0x172   : > { %1243 = vst [vmem:[#allocation2 + $0x10] sm:$0xff] %v1239_v31 }
 0x173   : > { %1244 = vst [vmem:[#allocation2 + $0x18] sm:$0xff] %v1240_v34 }
 0x179   : > { %v1251_v44 = vld [vmem:[#allocation2 + $0x10] sm:$0xff] }
 0x17a   : > { %v1252_v45 = vld [vmem:[#allocation2 + $0x18] sm:$0xff]  ;;  %v1277_v52 = vadd.f32 %v1266_v48, %v1251_v44 }
 0x17b   : > { %v1278_v53 = vadd.f32 %v1270_v49, %v1252_v45 }
 0x17c   : > { %v1281_v56 = vmax.f32 %v1277_v52, 0.0 }
 0x17d   : > { %v1282_v57 = vmax.f32 %v1278_v53, 0.0 }
 0x17f   : > { %v1570_v59 = vpack.c.bf16 %v1282_v57, %v1281_v56 }
 0x181   : > { %1300 = vst [vmem:[%s2034_s3 + $0x8] sm:$0xff] %v1570_v59 }
 0x182 PF: > { %s13_s14 = sadd.s32 1, %s1814_s14   ;;  %s2035_s12 = smov %s1810_s13 }
 0x183   : > { %p10_p8 = scmp.ge.s32.totalorder %s13_s14, 11   ;;  %s2036_s13 = smov %s2038_s15 }
 0x185   :  { %12 = sbr.rel (!%p10_p8) target bundleno = 2 (0x2), region = 76 }

// kernel: _lambda_.42
= control target key start
LH: loop header
LB: loop body
LE: loop exit
PB: predicated region body
PF: predicated region fallthrough
CT: control target
= control target key end

     0   :  { %s1844_s0 = inlined_call_operand.vmem [shape: f32[2,512], index: 0, kind: input, shape index: {}]   ;;  %s1845_s1 = inlined_call_operand.vmem [shape: f32[512,512], index: 1, kind: input, shape index: {}]   ;;  %s1846_s2 = inlined_call_operand.vmem [shape: f32[1,512], index: 2, kind: input, shape index: {}]   ;;  %s1847_s3 = inlined_call_operand.vmem [shape: f32[2,512], index: 3, kind: output, shape index: {0}]   ;;  %s1848_s4 = inlined_call_operand.hbm [shape: f32[2,512], index: 4, kind: output, shape index: {1}]  }
   0x1   :  { %v19_v0 = vld [vmem:[%s1845_s1 + $0x8] sm:$0xff]  ;;  %v21_v2 = vld [vmem:[%s1845_s1 + $0x18] sm:$0xff]  ;;  %v18_v5 = vld [vmem:[%s1845_s1] sm:$0xff] }
   0x2   :  { %v23_v1 = vld [vmem:[%s1845_s1 + $0x28] sm:$0xff]  ;;  %v25_v4 = vld [vmem:[%s1845_s1 + $0x38] sm:$0xff]  ;;  %v22_v6 = vld [vmem:[%s1845_s1 + $0x20] sm:$0xff] }
   0x3   :  { %v697_v3 = vpack.c.bf16 %v23_v1, %v19_v0  ;;  %v825_v7 = vpack.c.bf16 %v25_v4, %v21_v2  ;;  %v699_v8 = vpack.c.bf16 %v22_v6, %v18_v5  ;;  %v20_v9 = vld [vmem:[%s1845_s1 + $0x10] sm:$0xff]  ;;  %v27_v11 = vld [vmem:[%s1845_s1 + $0x48] sm:$0xff]  ;;  %v29_v14 = vld [vmem:[%s1845_s1 + $0x58] sm:$0xff] }
   0x4   :  { %v24_v10 = vld [vmem:[%s1845_s1 + $0x30] sm:$0xff]  ;;  %v31_v13 = vld [vmem:[%s1845_s1 + $0x68] sm:$0xff]  ;;  %v33_v15 = vld [vmem:[%s1845_s1 + $0x78] sm:$0xff] }
   0x5   :  { %698 = vmatprep.subr.bf16.mxu0 %v697_v3  ;;  %v827_v12 = vpack.c.bf16 %v24_v10, %v20_v9  ;;  %826 = vmatprep.subr.bf16.mxu1 %v825_v7  ;;  %v701_v16 = vpack.c.bf16 %v31_v13, %v27_v11  ;;  %v829_v17 = vpack.c.bf16 %v33_v15, %v29_v14  ;;  %v26_v18 = vld [vmem:[%s1845_s1 + $0x40] sm:$0xff]  ;;  %v28_v20 = vld [vmem:[%s1845_s1 + $0x50] sm:$0xff]  ;;  %v35_v23 = vld [vmem:[%s1845_s1 + $0x88] sm:$0xff] }
   0x6   :  { %700 = vmatpush1.bf16.msra.mxu0 %v699_v8  ;;  %v30_v19 = vld [vmem:[%s1845_s1 + $0x60] sm:$0xff]  ;;  %v32_v22 = vld [vmem:[%s1845_s1 + $0x70] sm:$0xff]  ;;  %v39_v24 = vld [vmem:[%s1845_s1 + $0xa8] sm:$0xff] }
   0x7   :  { %828 = vmatpush1.bf16.msra.mxu1 %v827_v12  ;;  %v703_v21 = vpack.c.bf16 %v30_v19, %v26_v18  ;;  %702 = vmatprep.subr.bf16.mxu0 %v701_v16  ;;  %v831_v25 = vpack.c.bf16 %v32_v22, %v28_v20  ;;  %v705_v26 = vpack.c.bf16 %v39_v24, %v35_v23  ;;  %v37_v27 = vld [vmem:[%s1845_s1 + $0x98] sm:$0xff]  ;;  %v34_v29 = vld [vmem:[%s1845_s1 + $0x80] sm:$0xff]  ;;  %v36_v32 = vld [vmem:[%s1845_s1 + $0x90] sm:$0xff] }
   0x8   :  { %830 = vmatprep.subr.bf16.mxu1 %v829_v17  ;;  %v41_v28 = vld [vmem:[%s1845_s1 + $0xb8] sm:$0xff]  ;;  %v38_v31 = vld [vmem:[%s1845_s1 + $0xa0] sm:$0xff]  ;;  %v40_v33 = vld [vmem:[%s1845_s1 + $0xb0] sm:$0xff] }
   0x9   :  { %v833_v30 = vpack.c.bf16 %v41_v28, %v37_v27  ;;  %v707_v34 = vpack.c.bf16 %v38_v31, %v34_v29  ;;  %v43_v35 = vld [vmem:[%s1845_s1 + $0xc8] sm:$0xff]  ;;  %v45_v37 = vld [vmem:[%s1845_s1 + $0xd8] sm:$0xff]  ;;  %v835_v38 = vpack.c.bf16 %v40_v33, %v36_v32  ;;  %v42_v41 = vld [vmem:[%s1845_s1 + $0xc0] sm:$0xff] }
   0xa   :  { %704 = vmatpush1.bf16.msra.mxu0 %v703_v21  ;;  %v47_v36 = vld [vmem:[%s1845_s1 + $0xe8] sm:$0xff]  ;;  %v49_v40 = vld [vmem:[%s1845_s1 + $0xf8] sm:$0xff]  ;;  %v46_v42 = vld [vmem:[%s1845_s1 + $0xe0] sm:$0xff] }
   0xb   :  { %832 = vmatpush1.bf16.msra.mxu1 %v831_v25  ;;  %706 = vmatprep.subr.bf16.mxu0 %v705_v26  ;;  %v709_v39 = vpack.c.bf16 %v47_v36, %v43_v35  ;;  %v837_v43 = vpack.c.bf16 %v49_v40, %v45_v37  ;;  %v44_v44 = vld [vmem:[%s1845_s1 + $0xd0] sm:$0xff]  ;;  %v51_v46 = vld [vmem:[%s1845_s1 + $0x108] sm:$0xff]  ;;  %v53_v48 = vld [vmem:[%s1845_s1 + $0x118] sm:$0xff]  ;;  %v711_v50 = vpack.c.bf16 %v46_v42, %v42_v41 }
   0xc   :  { %834 = vmatprep.subr.bf16.mxu1 %v833_v30  ;;  %v48_v45 = vld [vmem:[%s1845_s1 + $0xf0] sm:$0xff]  ;;  %v55_v47 = vld [vmem:[%s1845_s1 + $0x128] sm:$0xff]  ;;  %v57_v49 = vld [vmem:[%s1845_s1 + $0x138] sm:$0xff] }
   0xd   :  { %v839_v51 = vpack.c.bf16 %v48_v45, %v44_v44  ;;  %v713_v52 = vpack.c.bf16 %v55_v47, %v51_v46  ;;  %v50_v53 = vld [vmem:[%s1845_s1 + $0x100] sm:$0xff]  ;;  %v52_v55 = vld [vmem:[%s1845_s1 + $0x110] sm:$0xff]  ;;  %v841_v56 = vpack.c.bf16 %v57_v49, %v53_v48  ;;  %v59_v58 = vld [vmem:[%s1845_s1 + $0x148] sm:$0xff]  ;;  %v276_v46 = vlaneseq }
   0xe   :  { %708 = vmatpush1.bf16.msra.mxu0 %v707_v34  ;;  %v54_v54 = vld [vmem:[%s1845_s1 + $0x120] sm:$0xff]  ;;  %v56_v57 = vld [vmem:[%s1845_s1 + $0x130] sm:$0xff]  ;;  %v63_v59 = vld [vmem:[%s1845_s1 + $0x168] sm:$0xff]  ;;  %v992_v47 = vmov 1983009808  }
   0xf   :  { %836 = vmatpush1.bf16.msra.mxu1 %v835_v38  ;;  %710 = vmatprep.subr.bf16.mxu0 %v709_v39  ;;  %v61_v60 = vld [vmem:[%s1845_s1 + $0x158] sm:$0xff]  ;;  %v715_v62 = vpack.c.bf16 %v54_v54, %v50_v53  ;;  %v843_v63 = vpack.c.bf16 %v56_v57, %v52_v55  ;;  %v717_v0 = vpack.c.bf16 %v63_v59, %v59_v58  ;;  %v58_v1 = vld [vmem:[%s1845_s1 + $0x140] sm:$0xff]  ;;  %v60_v3 = vld [vmem:[%s1845_s1 + $0x150] sm:$0xff]  ;;  %v299_v48 = vunpack.c.l.s4 %v992_v47 }
  0x10   :  { %838 = vmatprep.subr.bf16.mxu1 %v837_v43  ;;  %v65_v61 = vld [vmem:[%s1845_s1 + $0x178] sm:$0xff]  ;;  %v62_v2 = vld [vmem:[%s1845_s1 + $0x160] sm:$0xff]  ;;  %v64_v5 = vld [vmem:[%s1845_s1 + $0x170] sm:$0xff] }
  0x11   :  { %v845_v4 = vpack.c.bf16 %v65_v61, %v61_v60  ;;  %v67_v6 = vld [vmem:[%s1845_s1 + $0x188] sm:$0xff]  ;;  %v69_v8 = vld [vmem:[%s1845_s1 + $0x198] sm:$0xff]  ;;  %v719_v10 = vpack.c.bf16 %v62_v2, %v58_v1  ;;  %v847_v11 = vpack.c.bf16 %v64_v5, %v60_v3  ;;  %v66_v13 = vld [vmem:[%s1845_s1 + $0x180] sm:$0xff]  ;;  %v1271_v61 = vshrl.u32 %v276_v46, 7 }
  0x12   :  { %712 = vmatpush1.bf16.msra.mxu0 %v711_v50  ;;  %v71_v7 = vld [vmem:[%s1845_s1 + $0x1a8] sm:$0xff]  ;;  %v73_v9 = vld [vmem:[%s1845_s1 + $0x1b8] sm:$0xff]  ;;  %v70_v14 = vld [vmem:[%s1845_s1 + $0x1a0] sm:$0xff] }
  0x13   :  { %840 = vmatpush1.bf16.msra.mxu1 %v839_v51  ;;  %714 = vmatprep.subr.bf16.mxu0 %v713_v52  ;;  %v721_v12 = vpack.c.bf16 %v71_v7, %v67_v6  ;;  %v68_v15 = vld [vmem:[%s1845_s1 + $0x190] sm:$0xff]  ;;  %v849_v16 = vpack.c.bf16 %v73_v9, %v69_v8  ;;  %v75_v18 = vld [vmem:[%s1845_s1 + $0x1c8] sm:$0xff]  ;;  %v77_v20 = vld [vmem:[%s1845_s1 + $0x1d8] sm:$0xff]  ;;  %v723_v22 = vpack.c.bf16 %v70_v14, %v66_v13 }
  0x14   :  { %842 = vmatprep.subr.bf16.mxu1 %v841_v56  ;;  %v72_v17 = vld [vmem:[%s1845_s1 + $0x1b0] sm:$0xff]  ;;  %v79_v19 = vld [vmem:[%s1845_s1 + $0x1e8] sm:$0xff]  ;;  %v81_v21 = vld [vmem:[%s1845_s1 + $0x1f8] sm:$0xff] }
  0x15   :  { %v851_v23 = vpack.c.bf16 %v72_v17, %v68_v15  ;;  %v725_v24 = vpack.c.bf16 %v79_v19, %v75_v18  ;;  %v74_v25 = vld [vmem:[%s1845_s1 + $0x1c0] sm:$0xff]  ;;  %v76_v27 = vld [vmem:[%s1845_s1 + $0x1d0] sm:$0xff]  ;;  %v853_v28 = vpack.c.bf16 %v81_v21, %v77_v20  ;;  %v83_v30 = vld [vmem:[%s1845_s1 + $0x208] sm:$0xff] }
  0x16   :  { %716 = vmatpush1.bf16.msra.mxu0 %v715_v62  ;;  %v78_v26 = vld [vmem:[%s1845_s1 + $0x1e0] sm:$0xff]  ;;  %v80_v29 = vld [vmem:[%s1845_s1 + $0x1f0] sm:$0xff]  ;;  %v87_v31 = vld [vmem:[%s1845_s1 + $0x228] sm:$0xff]  ;;  %v300_v62 = vunpack.c.0.s8 %v299_v48 }
  0x17   :  { %844 = vmatpush1.bf16.msra.mxu1 %v843_v63  ;;  %718 = vmatprep.subr.bf16.mxu0 %v717_v0  ;;  %v85_v32 = vld [vmem:[%s1845_s1 + $0x218] sm:$0xff]  ;;  %v727_v34 = vpack.c.bf16 %v78_v26, %v74_v25  ;;  %v855_v35 = vpack.c.bf16 %v80_v29, %v76_v27  ;;  %v729_v36 = vpack.c.bf16 %v87_v31, %v83_v30  ;;  %v82_v37 = vld [vmem:[%s1845_s1 + $0x200] sm:$0xff]  ;;  %v84_v39 = vld [vmem:[%s1845_s1 + $0x210] sm:$0xff] }
  0x18   :  { %846 = vmatprep.subr.bf16.mxu1 %v845_v4  ;;  %v89_v33 = vld [vmem:[%s1845_s1 + $0x238] sm:$0xff]  ;;  %v86_v38 = vld [vmem:[%s1845_s1 + $0x220] sm:$0xff]  ;;  %v88_v41 = vld [vmem:[%s1845_s1 + $0x230] sm:$0xff] }
  0x19   :  { %v857_v40 = vpack.c.bf16 %v89_v33, %v85_v32  ;;  %v91_v42 = vld [vmem:[%s1845_s1 + $0x248] sm:$0xff]  ;;  %v93_v44 = vld [vmem:[%s1845_s1 + $0x258] sm:$0xff]  ;;  %v731_v49 = vpack.c.bf16 %v86_v38, %v82_v37  ;;  %v859_v50 = vpack.c.bf16 %v88_v41, %v84_v39  ;;  %v90_v52 = vld [vmem:[%s1845_s1 + $0x240] sm:$0xff] }
  0x1a   :  { %720 = vmatpush1.bf16.msra.mxu0 %v719_v10  ;;  %v95_v43 = vld [vmem:[%s1845_s1 + $0x268] sm:$0xff]  ;;  %v97_v45 = vld [vmem:[%s1845_s1 + $0x278] sm:$0xff]  ;;  %v94_v53 = vld [vmem:[%s1845_s1 + $0x260] sm:$0xff] }
  0x1b   :  { %848 = vmatpush1.bf16.msra.mxu1 %v847_v11  ;;  %722 = vmatprep.subr.bf16.mxu0 %v721_v12  ;;  %v733_v51 = vpack.c.bf16 %v95_v43, %v91_v42  ;;  %v92_v54 = vld [vmem:[%s1845_s1 + $0x250] sm:$0xff]  ;;  %v861_v55 = vpack.c.bf16 %v97_v45, %v93_v44  ;;  %v99_v57 = vld [vmem:[%s1845_s1 + $0x288] sm:$0xff]  ;;  %v101_v59 = vld [vmem:[%s1845_s1 + $0x298] sm:$0xff]  ;;  %v735_v63 = vpack.c.bf16 %v94_v53, %v90_v52 }
  0x1c   :  { %850 = vmatprep.subr.bf16.mxu1 %v849_v16  ;;  %v96_v56 = vld [vmem:[%s1845_s1 + $0x270] sm:$0xff]  ;;  %v103_v58 = vld [vmem:[%s1845_s1 + $0x2a8] sm:$0xff]  ;;  %v105_v60 = vld [vmem:[%s1845_s1 + $0x2b8] sm:$0xff]  ;;  %v1298_v11 = vsub.s32 %v300_v62, %v1271_v61 }
  0x1d   :  { %v863_v0 = vpack.c.bf16 %v96_v56, %v92_v54  ;;  %v737_v1 = vpack.c.bf16 %v103_v58, %v99_v57  ;;  %v98_v2 = vld [vmem:[%s1845_s1 + $0x280] sm:$0xff]  ;;  %v100_v4 = vld [vmem:[%s1845_s1 + $0x290] sm:$0xff]  ;;  %v865_v5 = vpack.c.bf16 %v105_v60, %v101_v59  ;;  %v107_v7 = vld [vmem:[%s1845_s1 + $0x2c8] sm:$0xff] }
  0x1e   :  { %724 = vmatpush1.bf16.msra.mxu0 %v723_v22  ;;  %v102_v3 = vld [vmem:[%s1845_s1 + $0x2a0] sm:$0xff]  ;;  %v104_v6 = vld [vmem:[%s1845_s1 + $0x2b0] sm:$0xff]  ;;  %v111_v8 = vld [vmem:[%s1845_s1 + $0x2e8] sm:$0xff] }
  0x1f   :  { %852 = vmatpush1.bf16.msra.mxu1 %v851_v23  ;;  %726 = vmatprep.subr.bf16.mxu0 %v725_v24  ;;  %v109_v9 = vld [vmem:[%s1845_s1 + $0x2d8] sm:$0xff]  ;;  %v739_v12 = vpack.c.bf16 %v102_v3, %v98_v2  ;;  %v106_v13 = vld [vmem:[%s1845_s1 + $0x2c0] sm:$0xff]  ;;  %v867_v14 = vpack.c.bf16 %v104_v6, %v100_v4  ;;  %v741_v15 = vpack.c.bf16 %v111_v8, %v107_v7  ;;  %v108_v17 = vld [vmem:[%s1845_s1 + $0x2d0] sm:$0xff] }
  0x20   :  { %854 = vmatprep.subr.bf16.mxu1 %v853_v28  ;;  %v113_v10 = vld [vmem:[%s1845_s1 + $0x2f8] sm:$0xff]  ;;  %v110_v16 = vld [vmem:[%s1845_s1 + $0x2e0] sm:$0xff]  ;;  %v112_v18 = vld [vmem:[%s1845_s1 + $0x2f0] sm:$0xff] }
  0x21   :  { %v869_v19 = vpack.c.bf16 %v113_v10, %v109_v9  ;;  %v115_v20 = vld [vmem:[%s1845_s1 + $0x308] sm:$0xff]  ;;  %v1321_v22 = vld [vmem:[%s1844_s0] sm:$0xff]  ;;  %v117_v23 = vld [vmem:[%s1845_s1 + $0x318] sm:$0xff]  ;;  %v743_v26 = vpack.c.bf16 %v110_v16, %v106_v13  ;;  %v871_v27 = vpack.c.bf16 %v112_v18, %v108_v17 }
  0x22   :  { %728 = vmatpush1.bf16.msra.mxu0 %v727_v34  ;;  %v119_v21 = vld [vmem:[%s1845_s1 + $0x328] sm:$0xff]  ;;  %v121_v24 = vld [vmem:[%s1845_s1 + $0x338] sm:$0xff]  ;;  %v1331_v25 = vrot.slane %v1321_v22, %v1298_v11  ;;  %v114_v29 = vld [vmem:[%s1845_s1 + $0x300] sm:$0xff]  ;;  %v297_v8 = vcombine.high %v1321_v22, %v1321_v22 }
  0x23   :  { %856 = vmatpush1.bf16.msra.mxu1 %v855_v35  ;;  %730 = vmatprep.subr.bf16.mxu0 %v729_v36  ;;  %v745_v28 = vpack.c.bf16 %v119_v21, %v115_v20  ;;  %v118_v30 = vld [vmem:[%s1845_s1 + $0x320] sm:$0xff]  ;;  %v116_v31 = vld [vmem:[%s1845_s1 + $0x310] sm:$0xff]  ;;  %v873_v33 = vpack.c.bf16 %v121_v24, %v117_v23  ;;  %v123_v35 = vld [vmem:[%s1845_s1 + $0x348] sm:$0xff] }
  0x24   :  { %858 = vmatprep.subr.bf16.mxu1 %v857_v40  ;;  %v312_v32 = vcombine.high %v1331_v25, %v1331_v25  ;;  %v120_v34 = vld [vmem:[%s1845_s1 + $0x330] sm:$0xff]  ;;  %v127_v36 = vld [vmem:[%s1845_s1 + $0x368] sm:$0xff]  ;;  %v125_v37 = vld [vmem:[%s1845_s1 + $0x358] sm:$0xff]  ;;  %v747_v39 = vpack.c.bf16 %v118_v30, %v114_v29  ;;  %v1452_v24 = vrot.slane %v297_v8, %v1298_v11 }
  0x25   :  { %v129_v38 = vld [vmem:[%s1845_s1 + $0x378] sm:$0xff]  ;;  %v875_v40 = vpack.c.bf16 %v120_v34, %v116_v31  ;;  %v749_v41 = vpack.c.bf16 %v127_v36, %v123_v35  ;;  %v122_v42 = vld [vmem:[%s1845_s1 + $0x340] sm:$0xff]  ;;  %v124_v44 = vld [vmem:[%s1845_s1 + $0x350] sm:$0xff] }
  0x26   :  { %732 = vmatpush1.bf16.msra.mxu0 %v731_v49  ;;  %382 = vmatprep.mubr.f32.mxu0 %v312_v32  ;;  %v126_v43 = vld [vmem:[%s1845_s1 + $0x360] sm:$0xff]  ;;  %v877_v45 = vpack.c.bf16 %v129_v38, %v125_v37  ;;  %v128_v46 = vld [vmem:[%s1845_s1 + $0x370] sm:$0xff]  ;;  %v131_v47 = vld [vmem:[%s1845_s1 + $0x388] sm:$0xff]  ;;  %v313_v38 = vcombine.high %v1452_v24, %v1452_v24 }
  0x27   :  { %860 = vmatpush1.bf16.msra.mxu1 %v859_v50  ;;  %734 = vmatprep.subr.bf16.mxu0 %v733_v51  ;;  %v135_v48 = vld [vmem:[%s1845_s1 + $0x3a8] sm:$0xff]  ;;  %v133_v49 = vld [vmem:[%s1845_s1 + $0x398] sm:$0xff]  ;;  %v751_v51 = vpack.c.bf16 %v126_v43, %v122_v42  ;;  %v879_v52 = vpack.c.bf16 %v128_v46, %v124_v44  ;;  %v130_v54 = vld [vmem:[%s1845_s1 + $0x380] sm:$0xff] }
  0x28   :  { %862 = vmatprep.subr.bf16.mxu1 %v861_v55  ;;  %524 = vmatprep.mubr.f32.mxu1 %v312_v32  ;;  %v137_v50 = vld [vmem:[%s1845_s1 + $0x3b8] sm:$0xff]  ;;  %v753_v53 = vpack.c.bf16 %v135_v48, %v131_v47  ;;  %v134_v55 = vld [vmem:[%s1845_s1 + $0x3a0] sm:$0xff]  ;;  %v132_v56 = vld [vmem:[%s1845_s1 + $0x390] sm:$0xff] }
  0x29   :  { %v881_v57 = vpack.c.bf16 %v137_v50, %v133_v49  ;;  %v136_v58 = vld [vmem:[%s1845_s1 + $0x3b0] sm:$0xff]  ;;  %v139_v59 = vld [vmem:[%s1845_s1 + $0x3c8] sm:$0xff]  ;;  %v141_v62 = vld [vmem:[%s1845_s1 + $0x3d8] sm:$0xff] }
  0x2a   :  { %736 = vmatpush1.bf16.msra.mxu0 %v735_v63  ;;  %v143_v60 = vld [vmem:[%s1845_s1 + $0x3e8] sm:$0xff]  ;;  %v145_v63 = vld [vmem:[%s1845_s1 + $0x3f8] sm:$0xff]  ;;  %v138_v3 = vld [vmem:[%s1845_s1 + $0x3c0] sm:$0xff] }
  0x2b   :  { %864 = vmatpush1.bf16.msra.mxu1 %v863_v0  ;;  %738 = vmatprep.subr.bf16.mxu0 %v737_v1  ;;  %v755_v0 = vpack.c.bf16 %v134_v55, %v130_v54  ;;  %v883_v1 = vpack.c.bf16 %v136_v58, %v132_v56  ;;  %v757_v2 = vpack.c.bf16 %v143_v60, %v139_v59  ;;  %v142_v4 = vld [vmem:[%s1845_s1 + $0x3e0] sm:$0xff]  ;;  %v144_v7 = vld [vmem:[%s1845_s1 + $0x3f0] sm:$0xff]  ;;  %v147_v9 = vld [vmem:[%s1845_s1 + $0x408] sm:$0xff] }
  0x2c   :  { %866 = vmatprep.subr.bf16.mxu1 %v865_v5  ;;  %v140_v5 = vld [vmem:[%s1845_s1 + $0x3d0] sm:$0xff]  ;;  %v885_v6 = vpack.c.bf16 %v145_v63, %v141_v62  ;;  %v151_v10 = vld [vmem:[%s1845_s1 + $0x428] sm:$0xff]  ;;  %v153_v13 = vld [vmem:[%s1845_s1 + $0x438] sm:$0xff] }
  0x2d   :  { %v761_v16 = vpack.c.bf16 %v151_v10, %v147_v9  ;;  %v146_v17 = vld [vmem:[%s1845_s1 + $0x400] sm:$0xff]  ;;  %v152_v21 = vld [vmem:[%s1845_s1 + $0x430] sm:$0xff]  ;;  %v155_v22 = vld [vmem:[%s1845_s1 + $0x448] sm:$0xff] }
  0x2e   :  { %740 = vmatpush1.bf16.msra.mxu0 %v739_v12  ;;  %v149_v12 = vld [vmem:[%s1845_s1 + $0x418] sm:$0xff]  ;;  %v150_v18 = vld [vmem:[%s1845_s1 + $0x420] sm:$0xff]  ;;  %v159_v23 = vld [vmem:[%s1845_s1 + $0x468] sm:$0xff] }
  0x2f   :  { %868 = vmatpush1.bf16.msra.mxu1 %v867_v14  ;;  %742 = vmatprep.subr.bf16.mxu0 %v741_v15  ;;  %v759_v14 = vpack.c.bf16 %v142_v4, %v138_v3  ;;  %v887_v15 = vpack.c.bf16 %v144_v7, %v140_v5  ;;  %v889_v20 = vpack.c.bf16 %v153_v13, %v149_v12  ;;  %v154_v31 = vld [vmem:[%s1845_s1 + $0x440] sm:$0xff]  ;;  %v160_v35 = vld [vmem:[%s1845_s1 + $0x470] sm:$0xff]  ;;  %v163_v36 = vld [vmem:[%s1845_s1 + $0x488] sm:$0xff] }
  0x30   :  { %870 = vmatprep.subr.bf16.mxu1 %v869_v19  ;;  %v148_v19 = vld [vmem:[%s1845_s1 + $0x410] sm:$0xff]  ;;  %v765_v30 = vpack.c.bf16 %v159_v23, %v155_v22  ;;  %v158_v32 = vld [vmem:[%s1845_s1 + $0x460] sm:$0xff]  ;;  %v167_v37 = vld [vmem:[%s1845_s1 + $0x4a8] sm:$0xff] }
  0x31   :  { %v891_v29 = vpack.c.bf16 %v152_v21, %v148_v19  ;;  %v769_v43 = vpack.c.bf16 %v167_v37, %v163_v36  ;;  %v162_v44 = vld [vmem:[%s1845_s1 + $0x480] sm:$0xff]  ;;  %v164_v46 = vld [vmem:[%s1845_s1 + $0x490] sm:$0xff]  ;;  %v171_v48 = vld [vmem:[%s1845_s1 + $0x4c8] sm:$0xff] }
  0x32   :  { %744 = vmatpush1.bf16.msra.mxu0 %v743_v26  ;;  %v157_v26 = vld [vmem:[%s1845_s1 + $0x458] sm:$0xff]  ;;  %v175_v49 = vld [vmem:[%s1845_s1 + $0x4e8] sm:$0xff]  ;;  %v170_v55 = vld [vmem:[%s1845_s1 + $0x4c0] sm:$0xff] }
  0x33   :  { %872 = vmatpush1.bf16.msra.mxu1 %v871_v27  ;;  %746 = vmatprep.subr.bf16.mxu0 %v745_v28  ;;  %v161_v27 = vld [vmem:[%s1845_s1 + $0x478] sm:$0xff]  ;;  %v763_v28 = vpack.c.bf16 %v150_v18, %v146_v17  ;;  %v773_v54 = vpack.c.bf16 %v175_v49, %v171_v48  ;;  %v174_v56 = vld [vmem:[%s1845_s1 + $0x4e0] sm:$0xff]  ;;  %v176_v59 = vld [vmem:[%s1845_s1 + $0x4f0] sm:$0xff] }
  0x34   :  { %874 = vmatprep.subr.bf16.mxu1 %v873_v33  ;;  %v156_v33 = vld [vmem:[%s1845_s1 + $0x450] sm:$0xff]  ;;  %v893_v34 = vpack.c.bf16 %v161_v27, %v157_v26  ;;  %v173_v50 = vld [vmem:[%s1845_s1 + $0x4d8] sm:$0xff]  ;;  %v179_v60 = vld [vmem:[%s1845_s1 + $0x508] sm:$0xff] }
  0x35   :  { %v895_v42 = vpack.c.bf16 %v160_v35, %v156_v33  ;;  %v183_v62 = vld [vmem:[%s1845_s1 + $0x528] sm:$0xff]  ;;  %v181_v63 = vld [vmem:[%s1845_s1 + $0x518] sm:$0xff]  ;;  %v178_v4 = vld [vmem:[%s1845_s1 + $0x500] sm:$0xff] }
  0x36   :  { %748 = vmatpush1.bf16.msra.mxu0 %v747_v39  ;;  %v165_v39 = vld [vmem:[%s1845_s1 + $0x498] sm:$0xff]  ;;  %v777_v3 = vpack.c.bf16 %v183_v62, %v179_v60  ;;  %v182_v5 = vld [vmem:[%s1845_s1 + $0x520] sm:$0xff]  ;;  %v184_v8 = vld [vmem:[%s1845_s1 + $0x530] sm:$0xff] }
  0x37   :  { %876 = vmatpush1.bf16.msra.mxu1 %v875_v40  ;;  %750 = vmatprep.subr.bf16.mxu0 %v749_v41  ;;  %v169_v40 = vld [vmem:[%s1845_s1 + $0x4b8] sm:$0xff]  ;;  %v767_v41 = vpack.c.bf16 %v158_v32, %v154_v31  ;;  %v187_v9 = vld [vmem:[%s1845_s1 + $0x548] sm:$0xff]  ;;  %v186_v17 = vld [vmem:[%s1845_s1 + $0x540] sm:$0xff] }
  0x38   :  { %878 = vmatprep.subr.bf16.mxu1 %v877_v45  ;;  %v166_v45 = vld [vmem:[%s1845_s1 + $0x4a0] sm:$0xff]  ;;  %v897_v47 = vpack.c.bf16 %v169_v40, %v165_v39  ;;  %v191_v10 = vld [vmem:[%s1845_s1 + $0x568] sm:$0xff]  ;;  %v189_v12 = vld [vmem:[%s1845_s1 + $0x558] sm:$0xff] }
  0x39   :  { %v193_v13 = vld [vmem:[%s1845_s1 + $0x578] sm:$0xff]  ;;  %v190_v18 = vld [vmem:[%s1845_s1 + $0x560] sm:$0xff]  ;;  %v188_v19 = vld [vmem:[%s1845_s1 + $0x550] sm:$0xff] }
  0x3a   :  { %752 = vmatpush1.bf16.msra.mxu0 %v751_v51  ;;  %v177_v51 = vld [vmem:[%s1845_s1 + $0x4f8] sm:$0xff]  ;;  %v192_v21 = vld [vmem:[%s1845_s1 + $0x570] sm:$0xff]  ;;  %v195_v22 = vld [vmem:[%s1845_s1 + $0x588] sm:$0xff] }
  0x3b   :  { %880 = vmatpush1.bf16.msra.mxu1 %v879_v52  ;;  %754 = vmatprep.subr.bf16.mxu0 %v753_v53  ;;  %v771_v52 = vpack.c.bf16 %v166_v45, %v162_v44  ;;  %v901_v58 = vpack.c.bf16 %v177_v51, %v173_v50  ;;  %v199_v23 = vld [vmem:[%s1845_s1 + $0x5a8] sm:$0xff]  ;;  %v197_v26 = vld [vmem:[%s1845_s1 + $0x598] sm:$0xff]  ;;  %v198_v32 = vld [vmem:[%s1845_s1 + $0x5a0] sm:$0xff] }
  0x3c   :  { %882 = vmatprep.subr.bf16.mxu1 %v881_v57  ;;  %v172_v57 = vld [vmem:[%s1845_s1 + $0x4d0] sm:$0xff]  ;;  %v201_v27 = vld [vmem:[%s1845_s1 + $0x5b8] sm:$0xff]  ;;  %v785_v31 = vpack.c.bf16 %v199_v23, %v195_v22  ;;  %v203_v36 = vld [vmem:[%s1845_s1 + $0x5c8] sm:$0xff] }
  0x3d   :  { %v196_v33 = vld [vmem:[%s1845_s1 + $0x590] sm:$0xff]  ;;  %v913_v35 = vpack.c.bf16 %v201_v27, %v197_v26  ;;  %v207_v37 = vld [vmem:[%s1845_s1 + $0x5e8] sm:$0xff] }
  0x3e   :  { %756 = vmatpush1.bf16.msra.mxu0 %v755_v0  ;;  %v185_v0 = vld [vmem:[%s1845_s1 + $0x538] sm:$0xff] }
  0x3f   :  { %884 = vmatpush1.bf16.msra.mxu1 %v883_v1  ;;  %758 = vmatprep.subr.bf16.mxu0 %v757_v2  ;;  %v775_v1 = vpack.c.bf16 %v174_v56, %v170_v55  ;;  %v903_v2 = vpack.c.bf16 %v176_v59, %v172_v57  ;;  %v905_v7 = vpack.c.bf16 %v185_v0, %v181_v63 }
  0x40   :  { %886 = vmatprep.subr.bf16.mxu1 %v885_v6  ;;  %v180_v6 = vld [vmem:[%s1845_s1 + $0x510] sm:$0xff] }
  0x42   :  { %760 = vmatpush1.bf16.msra.mxu0 %v759_v14  ;;  %v779_v14 = vpack.c.bf16 %v182_v5, %v178_v4 }
  0x43   :  { %888 = vmatpush1.bf16.msra.mxu1 %v887_v15  ;;  %762 = vmatprep.subr.bf16.mxu0 %v761_v16  ;;  %v907_v15 = vpack.c.bf16 %v184_v8, %v180_v6  ;;  %v781_v16 = vpack.c.bf16 %v191_v10, %v187_v9 }
  0x44   :  { %890 = vmatprep.subr.bf16.mxu1 %v889_v20  ;;  %v909_v20 = vpack.c.bf16 %v193_v13, %v189_v12 }
  0x45   :  { %383 = vmatmul.mubr.f32.vlgmr.msra.gmra.mrb[0].mxu0 %v1331_v25 }
  0x46   :  { %764 = vmatpush1.bf16.msra.mxu0 %v763_v28  ;;  %525 = vmatmul.mubr.f32.vlgmr.msra.gmra.mrb[0].mxu1 %v1331_v25  ;;  %v168_v25 = vld [vmem:[%s1845_s1 + $0x4b0] sm:$0xff]  ;;  %v783_v28 = vpack.c.bf16 %v190_v18, %v186_v17 }
  0x47   :  { %892 = vmatpush1.bf16.msra.mxu1 %v891_v29  ;;  %766 = vmatprep.subr.bf16.mxu0 %v765_v30  ;;  %v899_v53 = vpack.c.bf16 %v168_v25, %v164_v46  ;;  %v194_v29 = vld [vmem:[%s1845_s1 + $0x580] sm:$0xff]  ;;  %v911_v30 = vpack.c.bf16 %v192_v21, %v188_v19 }
  0x48   :  { %894 = vmatprep.subr.bf16.mxu1 %v893_v34  ;;  %453 = vmatprep.mubr.f32.mxu0 %v313_v38  ;;  %v200_v34 = vld [vmem:[%s1845_s1 + $0x5b0] sm:$0xff] }
  0x49   :  { %595 = vmatprep.mubr.f32.mxu1 %v313_v38 }
  0x4a   :  { %768 = vmatpush1.bf16.msra.mxu0 %v767_v41 }
  0x4b   :  { %896 = vmatpush1.bf16.msra.mxu1 %v895_v42  ;;  %770 = vmatprep.subr.bf16.mxu0 %v769_v43 }
  0x4c   :  { %898 = vmatprep.subr.bf16.mxu1 %v897_v47 }
  0x4e   :  { %772 = vmatpush1.bf16.msra.mxu0 %v771_v52 }
  0x4f   :  { %900 = vmatpush1.bf16.msra.mxu1 %v899_v53  ;;  %774 = vmatprep.subr.bf16.mxu0 %v773_v54 }
  0x50   :  { %902 = vmatprep.subr.bf16.mxu1 %v901_v58 }
  0x52   :  { %776 = vmatpush1.bf16.msra.mxu0 %v775_v1 }
  0x53   :  { %904 = vmatpush1.bf16.msra.mxu1 %v903_v2  ;;  %778 = vmatprep.subr.bf16.mxu0 %v777_v3 }
  0x54   :  { %906 = vmatprep.subr.bf16.mxu1 %v905_v7 }
  0x56   :  { %780 = vmatpush1.bf16.msra.mxu0 %v779_v14 }
  0x57   :  { %908 = vmatpush1.bf16.msra.mxu1 %v907_v15  ;;  %782 = vmatprep.subr.bf16.mxu0 %v781_v16 }
  0x58   :  { %910 = vmatprep.subr.bf16.mxu1 %v909_v20 }
  0x59   :  { %10 = vsyncpa [#allocation3], 0  ;;  %v205_v38 = vld [vmem:[%s1845_s1 + $0x5d8] sm:$0xff]  ;;  %v787_v40 = vpack.c.bf16 %v198_v32, %v194_v29  ;;  %v915_v41 = vpack.c.bf16 %v200_v34, %v196_v33  ;;  %v789_v42 = vpack.c.bf16 %v207_v37, %v203_v36  ;;  %v202_v43 = vld [vmem:[%s1845_s1 + $0x5c0] sm:$0xff]  ;;  %vm633_vm0 = vcmask 1041408  }
  0x5a   :  { %v209_v39 = vld [vmem:[%s1845_s1 + $0x5f8] sm:$0xff]  ;;  %784 = vmatpush1.bf16.msra.mxu0 %v783_v28  ;;  %v206_v44 = vld [vmem:[%s1845_s1 + $0x5e0] sm:$0xff]  ;;  %v204_v45 = vld [vmem:[%s1845_s1 + $0x5d0] sm:$0xff] }
  0x5b   :  { %912 = vmatpush1.bf16.msra.mxu1 %v911_v30  ;;  %786 = vmatprep.subr.bf16.mxu0 %v785_v31  ;;  %v917_v46 = vpack.c.bf16 %v209_v39, %v205_v38  ;;  %v208_v47 = vld [vmem:[%s1845_s1 + $0x5f0] sm:$0xff]  ;;  %v211_v25 = vld [vmem:[%s1845_s1 + $0x608] sm:$0xff]  ;;  %v213_v49 = vld [vmem:[%s1845_s1 + $0x618] sm:$0xff]  ;;  %v791_v51 = vpack.c.bf16 %v206_v44, %v202_v43 }
  0x5c   :  { %914 = vmatprep.subr.bf16.mxu1 %v913_v35  ;;  %v215_v48 = vld [vmem:[%s1845_s1 + $0x628] sm:$0xff]  ;;  %v217_v50 = vld [vmem:[%s1845_s1 + $0x638] sm:$0xff]  ;;  %v919_v52 = vpack.c.bf16 %v208_v47, %v204_v45  ;;  %v210_v54 = vld [vmem:[%s1845_s1 + $0x600] sm:$0xff] }
  0x5d   :  { %v793_v53 = vpack.c.bf16 %v215_v48, %v211_v25  ;;  %v214_v55 = vld [vmem:[%s1845_s1 + $0x620] sm:$0xff]  ;;  %v212_v56 = vld [vmem:[%s1845_s1 + $0x610] sm:$0xff]  ;;  %v921_v57 = vpack.c.bf16 %v217_v50, %v213_v49  ;;  %v219_v59 = vld [vmem:[%s1845_s1 + $0x648] sm:$0xff] }
  0x5e   :  { %788 = vmatpush1.bf16.msra.mxu0 %v787_v40  ;;  %v216_v58 = vld [vmem:[%s1845_s1 + $0x630] sm:$0xff]  ;;  %v223_v60 = vld [vmem:[%s1845_s1 + $0x668] sm:$0xff]  ;;  %v221_v62 = vld [vmem:[%s1845_s1 + $0x658] sm:$0xff]  ;;  %v795_v0 = vpack.c.bf16 %v214_v55, %v210_v54 }
  0x5f   :  { %916 = vmatpush1.bf16.msra.mxu1 %v915_v41  ;;  %790 = vmatprep.subr.bf16.mxu0 %v789_v42  ;;  %v225_v63 = vld [vmem:[%s1845_s1 + $0x678] sm:$0xff]  ;;  %v923_v1 = vpack.c.bf16 %v216_v58, %v212_v56  ;;  %v797_v2 = vpack.c.bf16 %v223_v60, %v219_v59  ;;  %v218_v3 = vld [vmem:[%s1845_s1 + $0x640] sm:$0xff]  ;;  %v220_v5 = vld [vmem:[%s1845_s1 + $0x650] sm:$0xff] }
  0x60   :  { %918 = vmatprep.subr.bf16.mxu1 %v917_v46  ;;  %v222_v4 = vld [vmem:[%s1845_s1 + $0x660] sm:$0xff]  ;;  %v925_v6 = vpack.c.bf16 %v225_v63, %v221_v62  ;;  %v224_v7 = vld [vmem:[%s1845_s1 + $0x670] sm:$0xff]  ;;  %v227_v8 = vld [vmem:[%s1845_s1 + $0x688] sm:$0xff] }
  0x61   :  { %v231_v9 = vld [vmem:[%s1845_s1 + $0x6a8] sm:$0xff]  ;;  %v229_v10 = vld [vmem:[%s1845_s1 + $0x698] sm:$0xff]  ;;  %v799_v13 = vpack.c.bf16 %v222_v4, %v218_v3  ;;  %v927_v14 = vpack.c.bf16 %v224_v7, %v220_v5  ;;  %v226_v16 = vld [vmem:[%s1845_s1 + $0x680] sm:$0xff] }
  0x62   :  { %792 = vmatpush1.bf16.msra.mxu0 %v791_v51  ;;  %v233_v12 = vld [vmem:[%s1845_s1 + $0x6b8] sm:$0xff]  ;;  %v801_v15 = vpack.c.bf16 %v231_v9, %v227_v8  ;;  %v230_v17 = vld [vmem:[%s1845_s1 + $0x6a0] sm:$0xff]  ;;  %v228_v18 = vld [vmem:[%s1845_s1 + $0x690] sm:$0xff] }
  0x63   :  { %920 = vmatpush1.bf16.msra.mxu1 %v919_v52  ;;  %794 = vmatprep.subr.bf16.mxu0 %v793_v53  ;;  %v929_v19 = vpack.c.bf16 %v233_v12, %v229_v10  ;;  %v232_v20 = vld [vmem:[%s1845_s1 + $0x6b0] sm:$0xff]  ;;  %v235_v21 = vld [vmem:[%s1845_s1 + $0x6c8] sm:$0xff]  ;;  %v237_v23 = vld [vmem:[%s1845_s1 + $0x6d8] sm:$0xff]  ;;  %v803_v27 = vpack.c.bf16 %v230_v17, %v226_v16 }
  0x64   :  { %922 = vmatprep.subr.bf16.mxu1 %v921_v57  ;;  %v239_v22 = vld [vmem:[%s1845_s1 + $0x6e8] sm:$0xff]  ;;  %v241_v26 = vld [vmem:[%s1845_s1 + $0x6f8] sm:$0xff]  ;;  %v931_v28 = vpack.c.bf16 %v232_v20, %v228_v18  ;;  %v234_v30 = vld [vmem:[%s1845_s1 + $0x6c0] sm:$0xff] }
  0x65   :  { %v805_v29 = vpack.c.bf16 %v239_v22, %v235_v21  ;;  %v238_v31 = vld [vmem:[%s1845_s1 + $0x6e0] sm:$0xff]  ;;  %v236_v32 = vld [vmem:[%s1845_s1 + $0x6d0] sm:$0xff]  ;;  %v933_v33 = vpack.c.bf16 %v241_v26, %v237_v23  ;;  %v243_v35 = vld [vmem:[%s1845_s1 + $0x708] sm:$0xff]  ;;  %v278_v22 = vsub.s32 0, %v1271_v61  ;;  %v286_v26 = vsub.s32 2, %v1271_v61 }
  0x66   :  { %796 = vmatpush1.bf16.msra.mxu0 %v795_v0  ;;  %v240_v34 = vld [vmem:[%s1845_s1 + $0x6f0] sm:$0xff]  ;;  %v247_v36 = vld [vmem:[%s1845_s1 + $0x728] sm:$0xff]  ;;  %v245_v37 = vld [vmem:[%s1845_s1 + $0x718] sm:$0xff]  ;;  %v807_v39 = vpack.c.bf16 %v238_v31, %v234_v30 }
  0x67   :  { %924 = vmatpush1.bf16.msra.mxu1 %v923_v1  ;;  %798 = vmatprep.subr.bf16.mxu0 %v797_v2  ;;  %v249_v38 = vld [vmem:[%s1845_s1 + $0x738] sm:$0xff]  ;;  %v935_v40 = vpack.c.bf16 %v240_v34, %v236_v32  ;;  %v809_v41 = vpack.c.bf16 %v247_v36, %v243_v35  ;;  %v242_v42 = vld [vmem:[%s1845_s1 + $0x700] sm:$0xff]  ;;  %v244_v44 = vld [vmem:[%s1845_s1 + $0x710] sm:$0xff] }
  0x68   :  { %926 = vmatprep.subr.bf16.mxu1 %v925_v6  ;;  %v246_v43 = vld [vmem:[%s1845_s1 + $0x720] sm:$0xff]  ;;  %v937_v45 = vpack.c.bf16 %v249_v38, %v245_v37  ;;  %v248_v46 = vld [vmem:[%s1845_s1 + $0x730] sm:$0xff]  ;;  %v251_v47 = vld [vmem:[%s1845_s1 + $0x748] sm:$0xff] }
  0x69   :  { %v255_v25 = vld [vmem:[%s1845_s1 + $0x768] sm:$0xff]  ;;  %v253_v48 = vld [vmem:[%s1845_s1 + $0x758] sm:$0xff]  ;;  %v811_v50 = vpack.c.bf16 %v246_v43, %v242_v42  ;;  %v939_v51 = vpack.c.bf16 %v248_v46, %v244_v44  ;;  %v250_v53 = vld [vmem:[%s1845_s1 + $0x740] sm:$0xff] }
  0x6a   :  { %800 = vmatpush1.bf16.msra.mxu0 %v799_v13  ;;  %v257_v49 = vld [vmem:[%s1845_s1 + $0x778] sm:$0xff]  ;;  %v813_v52 = vpack.c.bf16 %v255_v25, %v251_v47  ;;  %v254_v54 = vld [vmem:[%s1845_s1 + $0x760] sm:$0xff]  ;;  %v252_v55 = vld [vmem:[%s1845_s1 + $0x750] sm:$0xff] }
  0x6b   :  { %928 = vmatpush1.bf16.msra.mxu1 %v927_v14  ;;  %802 = vmatprep.subr.bf16.mxu0 %v801_v15  ;;  %v941_v56 = vpack.c.bf16 %v257_v49, %v253_v48  ;;  %v256_v57 = vld [vmem:[%s1845_s1 + $0x770] sm:$0xff]  ;;  %v259_v58 = vld [vmem:[%s1845_s1 + $0x788] sm:$0xff]  ;;  %v261_v60 = vld [vmem:[%s1845_s1 + $0x798] sm:$0xff]  ;;  %v815_v63 = vpack.c.bf16 %v254_v54, %v250_v53 }
  0x6c   :  { %930 = vmatprep.subr.bf16.mxu1 %v929_v19  ;;  %v263_v59 = vld [vmem:[%s1845_s1 + $0x7a8] sm:$0xff]  ;;  %v265_v62 = vld [vmem:[%s1845_s1 + $0x7b8] sm:$0xff]  ;;  %v943_v0 = vpack.c.bf16 %v256_v57, %v252_v55  ;;  %v258_v2 = vld [vmem:[%s1845_s1 + $0x780] sm:$0xff] }
  0x6d   :  { %v817_v1 = vpack.c.bf16 %v263_v59, %v259_v58  ;;  %v262_v3 = vld [vmem:[%s1845_s1 + $0x7a0] sm:$0xff]  ;;  %v260_v4 = vld [vmem:[%s1845_s1 + $0x790] sm:$0xff]  ;;  %v945_v5 = vpack.c.bf16 %v265_v62, %v261_v60  ;;  %v267_v7 = vld [vmem:[%s1845_s1 + $0x7c8] sm:$0xff] }
  0x6e   :  { %804 = vmatpush1.bf16.msra.mxu0 %v803_v27  ;;  %v264_v6 = vld [vmem:[%s1845_s1 + $0x7b0] sm:$0xff]  ;;  %v271_v8 = vld [vmem:[%s1845_s1 + $0x7e8] sm:$0xff]  ;;  %v269_v9 = vld [vmem:[%s1845_s1 + $0x7d8] sm:$0xff]  ;;  %v819_v12 = vpack.c.bf16 %v262_v3, %v258_v2  ;;  %v282_v27 = vsub.s32 1, %v1271_v61 }
  0x6f   :  { %932 = vmatpush1.bf16.msra.mxu1 %v931_v28  ;;  %806 = vmatprep.subr.bf16.mxu0 %v805_v29  ;;  %v273_v10 = vld [vmem:[%s1845_s1 + $0x7f8] sm:$0xff]  ;;  %v947_v13 = vpack.c.bf16 %v264_v6, %v260_v4  ;;  %v821_v14 = vpack.c.bf16 %v271_v8, %v267_v7  ;;  %v266_v15 = vld [vmem:[%s1845_s1 + $0x7c0] sm:$0xff]  ;;  %v268_v18 = vld [vmem:[%s1845_s1 + $0x7d0] sm:$0xff]  ;;  %v290_v28 = vsub.s32 3, %v1271_v61 }
  0x70   :  { %934 = vmatprep.subr.bf16.mxu1 %v933_v33  ;;  %v270_v16 = vld [vmem:[%s1845_s1 + $0x7e0] sm:$0xff]  ;;  %v949_v17 = vpack.c.bf16 %v273_v10, %v269_v9  ;;  %v272_v19 = vld [vmem:[%s1845_s1 + $0x7f0] sm:$0xff] }
  0x71   :  { %v823_v20 = vpack.c.bf16 %v270_v16, %v266_v15  ;;  %v951_v21 = vpack.c.bf16 %v272_v19, %v268_v18  ;;  %v274_v23 = vld [vmem:[%s1846_s2] sm:$0xf] }
  0x72   :  { %808 = vmatpush1.bf16.msra.mxu0 %v807_v39  ;;  %v279_v29 = vrot.slane %v274_v23, %v278_v22  ;;  %v287_v30 = vrot.slane %v274_v23, %v286_v26  ;;  %v283_v31 = vrot.slane %v274_v23, %v282_v27  ;;  %v291_v32 = vrot.slane %v274_v23, %v290_v28 }
  0x73   :  { %936 = vmatpush1.bf16.msra.mxu1 %v935_v40  ;;  %810 = vmatprep.subr.bf16.mxu0 %v809_v41 }
  0x74   :  { %938 = vmatprep.subr.bf16.mxu1 %v937_v45 }
  0x76   :  { %812 = vmatpush1.bf16.msra.mxu0 %v811_v50 }
  0x77   :  { %940 = vmatpush1.bf16.msra.mxu1 %v939_v51  ;;  %814 = vmatprep.subr.bf16.mxu0 %v813_v52 }
  0x78   :  { %942 = vmatprep.subr.bf16.mxu1 %v941_v56 }
  0x7a   :  { %816 = vmatpush1.bf16.msra.mxu0 %v815_v63 }
  0x7b   :  { %944 = vmatpush1.bf16.msra.mxu1 %v943_v0  ;;  %818 = vmatprep.subr.bf16.mxu0 %v817_v1 }
  0x7c   :  { %946 = vmatprep.subr.bf16.mxu1 %v945_v5 }
  0x7e   :  { %820 = vmatpush1.bf16.msra.mxu0 %v819_v12 }
  0x7f   :  { %948 = vmatpush1.bf16.msra.mxu1 %v947_v13  ;;  %822 = vmatprep.subr.bf16.mxu0 %v821_v14 }
  0x80   :  { %950 = vmatprep.subr.bf16.mxu1 %v949_v17 }
  0x82   :  { %824 = vmatpush1.bf16.msra.mxu0 %v823_v20 }
  0x83   :  { %952 = vmatpush1.bf16.msra.mxu1 %v951_v21 }
  0x85   :  { %454 = vmatmul.mubr.f32.vlgmr.msra.gmra.mrb[0].mxu0 %v1452_v24 }
  0x86   :  { %596 = vmatmul.mubr.f32.vlgmr.msra.gmra.mrb[0].mxu1 %v1452_v24 }
 0x158   :  { %v455_v33 = vpop.f32.mrb[0].mxu0 }
 0x159   :  { %v953_v34 = vadd.f32 %v455_v33, %v279_v29  ;;  %v597_v35 = vpop.f32.mrb[0].mxu1  ;;  %v457_v24 = vpop.f32.mrb[1].mxu0 }
 0x15a   :  { %v955_v36 = vadd.f32 %v597_v35, %v287_v30  ;;  %v954_v37 = vadd.f32 %v457_v24, %v283_v31  ;;  %v599_v38 = vpop.f32.mrb[1].mxu1 }
 0x15b   :  { %v602_v39 = vmax.f32 %v953_v34, 0.0  ;;  %v956_v40 = vadd.f32 %v599_v38, %v291_v32 }
 0x15c   :  { %v604_v41 = vmax.f32 %v955_v36, 0.0  ;;  %v603_v42 = vmax.f32 %v954_v37, 0.0 }
 0x15d   :  { %v629_v43 = vmul.f32 %v602_v39, %v602_v39  ;;  %v605_v44 = vmax.f32 %v956_v40, 0.0 }
 0x15e   :  { %v610_v45 = vcombine.low %v602_v39, %v603_v42  ;;  %v630_v61 = vmul.f32 %v603_v42, %v603_v42  ;;  %v631_v46 = vmul.f32 %v604_v41, %v604_v41 }
 0x15f   :  { %v611_v47 = vcombine.low %v604_v41, %v605_v44  ;;  %v634_v25 = vsel %vm633_vm0, %v629_v43, 0.0  ;;  %v632_v49 = vmul.f32 %v605_v44, %v605_v44 }
 0x160   :  { %v618_v48 = vrot.slane %v610_v45, %v1298_v11  ;;  %v635_v50 = vsel %vm633_vm0, %v630_v61, 0.0  ;;  %v637_v53 = vsel %vm633_vm0, %v631_v46, 0.0 }
 0x161   :  { %v625_v51 = vrot.slane %v611_v47, %v1298_v11  ;;  %v636_v52 = vadd.f32 %v635_v50, %v634_v25  ;;  %v639_v56 = vsel %vm633_vm0, %v632_v49, 0.0 }
 0x163   :  { %v626_v54 = vcombine.low %v618_v48, %v625_v51  ;;  %v638_v55 = vadd.f32 %v637_v53, %v636_v52 }
 0x165   :  { %628 = vst [vmem:[%s1847_s3] sm:$0xff] %v626_v54  ;;  %v640_v57 = vadd.f32 %v639_v56, %v638_v55  ;;  %s993_s3 = smov [#allocation2]  }
 0x166   :  { %s687_s25 = sshll.u32 %s993_s3, 4  ;;  %s688_s25 = int_to_ptr.vmem [resolvable:$true] %s687_s25 }
 0x167   :  { %641 = vadd.xlane.f32.xlu0 %v640_v57  ;;  %s968_s26 = scalar_lea.vmem %s688_s25, 128  ;;  %p973_p1 = scmp.lt.s32.totalorder %s688_s25, %s688_s25 }
 0x168   :  { %p969_p0 = scmp.ne.s32.totalorder %s688_s25, %s968_s26  ;;  %p974_p2 = scmp.lt.s32.totalorder %s968_s26, %s968_s26 }
 0x16a   :  { %p975_p3 = por %p974_p2, %p973_p1 }
 0x16c   :  { %p976_p4 = pnand %p975_p3, %p969_p0 }
 0x1f4   :  { %v642_v58 = vpop.xlane.xlu0 %641 }
 0x1f5   :  { %964 = vrsqrt.f32 %v642_v58  ;;  %vm645_vm1 = vcmp.eq.f32.partialorder %v642_v58, inf  ;;  %v648_v62 = vand.u32 2147483648, %v642_v58  ;;  %vm647_vm2 = vcmp.eq.f32.partialorder %v642_v58, 0.0 }
 0x1ff   :  { %v965_v59 = vpop.eup %964 }
 0x200   :  { %v644_v60 = vmul.f32 %v965_v59, %v642_v58 }
 0x202   :  { %v646_v63 = vsel %vm645_vm1, %v642_v58, %v644_v60 }
 0x203   :  { %v649_v0 = vsel %vm647_vm2, %v648_v62, %v646_v63 }
 0x204   :  { %v650_v1 = vmax.f32 %v649_v0, 1e-12 }
 0x206   :  { %966 = vrcp.f32 %v650_v1 }
 0x210   :  { %v967_v2 = vpop.eup %966 }
 0x211   :  { %v652_v3 = vmul.f32 %v967_v2, %v602_v39  ;;  %v653_v4 = vmul.f32 %v967_v2, %v603_v42  ;;  %v654_v5 = vmul.f32 %v967_v2, %v604_v41  ;;  %v655_v6 = vmul.f32 %v967_v2, %v605_v44 }
 0x213   :  { %v660_v7 = vcombine.low %v652_v3, %v653_v4  ;;  %v661_v8 = vcombine.low %v654_v5, %v655_v6 }
 0x215   :  { %v668_v9 = vrot.slane %v660_v7, %v1298_v11  ;;  %v675_v10 = vrot.slane %v661_v8, %v1298_v11 }
 0x217   :  { %v676_v12 = vcombine.low %v668_v9, %v675_v10 }
 0x219   :  { %678 = vst [vmem:[#allocation2] sm:$0xff] %v676_v12 }
 0x21a   :  { %979 = shalt.err (!%p976_p4)
}
 0x21b   :  { %s980_s29 = scalar_lea.hbm %s1848_s4, 128 }
 0x21c   :  { %p981_p5 = scmp.ne.s32.totalorder %s1848_s4, %s980_s29  ;;  %p984_p6 = scmp.lt.u32.totalorder %s980_s29, %s1848_s4 }
 0x21e   :  { %p986_p7 = pnand %p984_p6, %p981_p5 }
 0x220   :  { %989 = shalt.err (!%p986_p7)
}
 0x221   :  { %690 = dma.vmem_to_hbm [thread:$0]  %s688_s25, 128, %s1848_s4, [#allocation3]  }
 0x222   :  { %990 = dma.done.wait [#allocation3], 128  }
 0x223   :  { %991 = vsyncadd [#allocation3], 4294967168 }
 0x224   :  { %696 = vsyncpa [#allocation3], 1 }

// kernel: _lambda_.43
= control target key start
LH: loop header
LB: loop body
LE: loop exit
PB: predicated region body
PF: predicated region fallthrough
CT: control target
= control target key end

     0   :  { %s637_s1 = inlined_call_operand.vmem [shape: bf16[512,128], index: 1, kind: input, shape index: {}]   ;;  %s638_s0 = inlined_call_operand.vmem [shape: bf16[8,512], index: 0, kind: input, shape index: {}]   ;;  %s639_s2 = inlined_call_operand.vmem [shape: f32[1,128], index: 2, kind: input, shape index: {}]   ;;  %s640_s3 = inlined_call_operand.vmem [shape: f32[8,128], index: 3, kind: output, shape index: {}]  }
   0x1   :  { %v473_v0 = vld [vmem:[%s637_s1 + $0x40] sm:$0xff]   ;;  %v477_v4 = vld [vmem:[%s637_s1 + $0x48] sm:$0xff]   ;;  %v481_v8 = vld [vmem:[%s637_s1 + $0x50] sm:$0xff]  }
   0x2   :  { %v474_v1 = vld [vmem:[%s637_s1 + $0xc0] sm:$0xff]   ;;  %429 = vmatprep.subr.bf16.mxu0 %v473_v0  ;;  %v478_v5 = vld [vmem:[%s637_s1 + $0xc8] sm:$0xff]   ;;  %v482_v9 = vld [vmem:[%s637_s1 + $0xd0] sm:$0xff]  }
   0x3   :  { %v475_v2 = vld [vmem:[%s637_s1] sm:$0xff]   ;;  %451 = vmatprep.subr.bf16.mxu1 %v474_v1  ;;  %v479_v6 = vld [vmem:[%s637_s1 + $0x8] sm:$0xff]   ;;  %v483_v10 = vld [vmem:[%s637_s1 + $0x10] sm:$0xff]  }
   0x4   :  { %v476_v3 = vld [vmem:[%s637_s1 + $0x80] sm:$0xff]   ;;  %430 = vmatpush3.bf16.msra.mxu0 %v475_v2  ;;  %v480_v7 = vld [vmem:[%s637_s1 + $0x88] sm:$0xff]   ;;  %v484_v11 = vld [vmem:[%s637_s1 + $0x90] sm:$0xff]  }
   0x5   :  { %452 = vmatpush3.bf16.msra.mxu1 %v476_v3  ;;  %431 = vmatprep.subr.bf16.mxu0 %v477_v4  ;;  %v485_v12 = vld [vmem:[%s637_s1 + $0x58] sm:$0xff]   ;;  %v489_v16 = vld [vmem:[%s637_s1 + $0x60] sm:$0xff]   ;;  %v493_v20 = vld [vmem:[%s637_s1 + $0x68] sm:$0xff]  }
   0x6   :  { %453 = vmatprep.subr.bf16.mxu1 %v478_v5  ;;  %v486_v13 = vld [vmem:[%s637_s1 + $0xd8] sm:$0xff]   ;;  %v490_v17 = vld [vmem:[%s637_s1 + $0xe0] sm:$0xff]   ;;  %v494_v21 = vld [vmem:[%s637_s1 + $0xe8] sm:$0xff]  }
   0x7   :  { %v487_v14 = vld [vmem:[%s637_s1 + $0x18] sm:$0xff]   ;;  %v491_v18 = vld [vmem:[%s637_s1 + $0x20] sm:$0xff]   ;;  %v495_v22 = vld [vmem:[%s637_s1 + $0x28] sm:$0xff]  }
   0x8   :  { %432 = vmatpush3.bf16.msra.mxu0 %v479_v6  ;;  %v488_v15 = vld [vmem:[%s637_s1 + $0x98] sm:$0xff]   ;;  %v492_v19 = vld [vmem:[%s637_s1 + $0xa0] sm:$0xff]   ;;  %v496_v23 = vld [vmem:[%s637_s1 + $0xa8] sm:$0xff]  }
   0x9   :  { %454 = vmatpush3.bf16.msra.mxu1 %v480_v7  ;;  %433 = vmatprep.subr.bf16.mxu0 %v481_v8  ;;  %v497_v24 = vld [vmem:[%s637_s1 + $0x70] sm:$0xff]   ;;  %v501_v28 = vld [vmem:[%s637_s1 + $0x78] sm:$0xff]   ;;  %v21_v32 = vld [vmem:[%s638_s0] sm:$0xff] }
   0xa   :  { %455 = vmatprep.subr.bf16.mxu1 %v482_v9  ;;  %v498_v25 = vld [vmem:[%s637_s1 + $0xf0] sm:$0xff]   ;;  %v502_v29 = vld [vmem:[%s637_s1 + $0xf8] sm:$0xff]   ;;  %v22_v33 = vld [vmem:[%s638_s0 + $0x8] sm:$0xff]  ;;  %v392_v34 = vcombine.low %v21_v32, %v21_v32  ;;  %v393_v35 = vcombine.high %v21_v32, %v21_v32 }
   0xb   :  { %v499_v26 = vld [vmem:[%s637_s1 + $0x30] sm:$0xff]   ;;  %v503_v30 = vld [vmem:[%s637_s1 + $0x38] sm:$0xff]   ;;  %v394_v36 = vcombine.low %v22_v33, %v22_v33  ;;  %v395_v37 = vcombine.high %v22_v33, %v22_v33  ;;  %v428_v46 = vld [vmem:[%s639_s2] ss:$0 sm:$0xff] }
   0xc   :  { %434 = vmatpush3.bf16.msra.mxu0 %v483_v10  ;;  %v500_v27 = vld [vmem:[%s637_s1 + $0xb0] sm:$0xff]   ;;  %v504_v31 = vld [vmem:[%s637_s1 + $0xb8] sm:$0xff]   ;;  %325 = vmatprep.mubr.bf16.mxu0 %v393_v35 }
   0xd   :  { %456 = vmatpush3.bf16.msra.mxu1 %v484_v11  ;;  %435 = vmatprep.subr.bf16.mxu0 %v485_v12 }
   0xe   :  { %457 = vmatprep.subr.bf16.mxu1 %v486_v13  ;;  %365 = vmatprep.mubr.bf16.mxu1 %v395_v37 }
  0x10   :  { %436 = vmatpush3.bf16.msra.mxu0 %v487_v14 }
  0x11   :  { %458 = vmatpush3.bf16.msra.mxu1 %v488_v15  ;;  %437 = vmatprep.subr.bf16.mxu0 %v489_v16 }
  0x12   :  { %459 = vmatprep.subr.bf16.mxu1 %v490_v17 }
  0x14   :  { %438 = vmatpush3.bf16.msra.mxu0 %v491_v18 }
  0x15   :  { %460 = vmatpush3.bf16.msra.mxu1 %v492_v19  ;;  %439 = vmatprep.subr.bf16.mxu0 %v493_v20 }
  0x16   :  { %461 = vmatprep.subr.bf16.mxu1 %v494_v21 }
  0x18   :  { %440 = vmatpush3.bf16.msra.mxu0 %v495_v22 }
  0x19   :  { %462 = vmatpush3.bf16.msra.mxu1 %v496_v23  ;;  %441 = vmatprep.subr.bf16.mxu0 %v497_v24 }
  0x1a   :  { %463 = vmatprep.subr.bf16.mxu1 %v498_v25 }
  0x1c   :  { %442 = vmatpush3.bf16.msra.mxu0 %v499_v26 }
  0x1d   :  { %464 = vmatpush3.bf16.msra.mxu1 %v500_v27  ;;  %443 = vmatprep.subr.bf16.mxu0 %v501_v28 }
  0x1e   :  { %465 = vmatprep.subr.bf16.mxu1 %v502_v29 }
  0x20   :  { %444 = vmatpush3.bf16.msra.mxu0 %v503_v30 }
  0x21   :  { %466 = vmatpush3.bf16.msra.mxu1 %v504_v31 }
  0x23   :  { %326 = vmatmul.mubr.bf16.vlgmr.msra.gmra.mrb[0].mxu0 %v392_v34 }
  0x24   :  { %366 = vmatmul.mubr.bf16.vlgmr.msra.gmra.mrb[0].mxu1 %v394_v36 }
  0xf6   :  { %v445_v38 = vpop.f32.mrb[0].mxu0 }
  0xf7   :  { %v467_v39 = vpop.f32.mrb[0].mxu1  ;;  %v446_v40 = vpop.f32.mrb[1].mxu0 }
  0xf8   :  { %v468_v41 = vpop.f32.mrb[1].mxu1  ;;  %v447_v42 = vadd.f32 %v446_v40, %v445_v38  ;;  %v448_v44 = vpop.f32.mrb[2].mxu0 }
  0xf9   :  { %v469_v43 = vadd.f32 %v468_v41, %v467_v39  ;;  %v470_v45 = vpop.f32.mrb[2].mxu1  ;;  %v449_v47 = vpop.f32.mrb[3].mxu0 }
  0xfa   :  { %v471_v48 = vpop.f32.mrb[3].mxu1 }
  0xfb   :  { %v368_v49 = vadd.f32 %v469_v43, %v447_v42 }
  0xfd   :  { %v386_v50 = vadd.f32 %v428_v46, %v368_v49 }
  0xff   :  { %387 = vst [vmem:[%s640_s3] sm:$0xff] %v386_v50 }

</bundles_post_ra>
